<compile_context>
chip_gen: v5e
topology: v5e:2x2
jax: 0.10.0
libtpu: 0.0.40
codegen_flags: <defaults>
</compile_context>

<pallas_src>
import functools

import jax
import jax.numpy as jnp
from jax import lax
from jax.experimental import pallas as pl
from jax.experimental.pallas import tpu as pltpu


# ------------------------------ kernel ------------------------------

def scaling_ae_kernel(x_ref, len_ref,
                      wih_e_ref, b_e_ref, whh_e_ref,
                      w_zd_ref, b_zd_ref,
                      whh_d_ref, wfc2_ref, bfc2_ref,
                      z_ref, y_ref,
                      hd_ref):
    L, BB, _ = x_ref.shape
    Hp = whh_e_ref.shape[0]                 # padded hidden dim (multiple of 128)
    Op = wfc2_ref.shape[1]                  # padded output dim (multiple of 128)

    lengths = len_ref[...]                  # (BB, 1) int32

    # ---------------- hoisted, non-recurrent work (off the serial chain) ----------------
    whh_e = whh_e_ref[...]                  # (Hp, 4Hp)
    whh_d = whh_d_ref[...]                  # (Hp, 4Hp)
    w_zd = w_zd_ref[...]                    # (Hp, Hp + 4Hp)   [ wfc1 | wfc1 @ wih_d ]
    wdt = whh_e.dtype                       # matmul weight dtype (f32 here, bf16 optional)
    # Encoder input projection for every step at once (input_dim == 1 -> broadcast multiply).
    gates_x = x_ref[...] * wih_e_ref[...] + b_e_ref[...]          # (L, BB, 4Hp) f32
    # Bias pre-broadcast once (JAX does not CSE broadcast_in_dim inside loops).
    b_zd = jnp.broadcast_to(b_zd_ref[...], (BB, w_zd.shape[1]))   # (BB, Hp + 4Hp)

    def sigmoid(g):
        # single-EUP lowering: one tanh push per gate instead of exp + reciprocal
        return 0.5 * jnp.tanh(0.5 * g) + 0.5

    def gate_act(g):                        # gate slices land on 128-lane boundaries
        i = sigmoid(g[:, 0 * Hp:1 * Hp])
        f = sigmoid(g[:, 1 * Hp:2 * Hp])
        gg = jnp.tanh(g[:, 2 * Hp:3 * Hp])
        o = sigmoid(g[:, 3 * Hp:4 * Hp])
        return i, f, gg, o

    zero = jnp.zeros((BB, Hp), jnp.float32)

    def fused_step(t, gx, h_e, c_e, h_d, c_d):
        # encoder LSTM step
        g_e = gx + jnp.dot(h_e.astype(wdt), whh_e, preferred_element_type=jnp.float32)
        i, f, g, o = gate_act(g_e)
        c_e = f * c_e + i * g
        h_e = o * jnp.tanh(c_e)
        # pad_packed_sequence: encoder outputs past the true length are zero (before fc1).
        h_m = jnp.where(t < lengths, h_e, 0.0)                    # (BB, Hp)
        # fc1 (-> z) and the decoder input projection fused into ONE matmul.
        zd = jnp.dot(h_m.astype(wdt), w_zd, preferred_element_type=jnp.float32) + b_zd
        z_ref[t] = zd[:, :Hp]                                     # dense (BB, 128) store
        # decoder LSTM step (z_t consumed from registers, no VMEM round-trip)
        g_d = zd[:, Hp:] + jnp.dot(h_d.astype(wdt), whh_d, preferred_element_type=jnp.float32)
        i, f, g, o = gate_act(g_d)
        c_d = f * c_d + i * g
        h_d = o * jnp.tanh(c_d)
        hd_ref[t] = h_d                                           # fc2 applied after the loop
        return h_e, c_e, h_d, c_d

    if L <= 32:
        # small L: full unroll, LLO sees two independent MXU/EUP chains per step
        h_e, c_e, h_d, c_d = zero, zero, zero, zero
        for t in range(L):
            h_e, c_e, h_d, c_d = fused_step(t, gates_x[t], h_e, c_e, h_d, c_d)
    else:
        # large L: visible loop with modest unroll (bounds live ranges / program size)
        def body(t, carry):
            gx = lax.dynamic_index_in_dim(gates_x, t, axis=0, keepdims=False)
            return fused_step(t, gx, *carry)
        _ = lax.fori_loop(0, L, body, (zero, zero, zero, zero), unroll=2)

    # fc2 hoisted off the serial chain: ONE throughput-friendly (L*BB, Hp) @ (Hp, Op) matmul.
    h_all = hd_ref[...].reshape(L * BB, Hp)
    y = jnp.dot(h_all.astype(wdt), wfc2_ref[...], preferred_element_type=jnp.float32)
    y_ref[...] = (y + bfc2_ref[...]).reshape(L, BB, Op)


# ------------------------------ parameters ------------------------------

def init_params(key, input_dim, hidden_dim, output_dim):
    """Deterministic synthetic parameters; PyTorch layouts, pre-transposed for matmul."""
    H = hidden_dim
    ks = jax.random.split(key, 12)
    s = 1.0 / float(jnp.sqrt(H))
    u = lambda k, shape: jax.random.uniform(k, shape, jnp.float32, -s, s)

    w_ih_e = u(ks[0], (4 * H, input_dim))     # nn.LSTM(input_dim, H).weight_ih_l0
    w_hh_e = u(ks[1], (4 * H, H))
    b_ih_e = u(ks[2], (4 * H,))
    b_hh_e = u(ks[3], (4 * H,))
    w_fc1 = u(ks[4], (H, H))                  # encoder.fc
    b_fc1 = u(ks[5], (H,))
    w_ih_d = u(ks[6], (4 * H, H))             # nn.LSTM(H, H).weight_ih_l0
    w_hh_d = u(ks[7], (4 * H, H))
    b_ih_d = u(ks[8], (4 * H,))
    b_hh_d = u(ks[9], (4 * H,))
    w_fc2 = u(ks[10], (output_dim, H))        # decoder.fc
    b_fc2 = u(ks[11], (output_dim,))

    return dict(
        wih_e=w_ih_e.T,                       # (input_dim, 4H)
        whh_e=w_hh_e.T,                       # (H, 4H)
        b_e=(b_ih_e + b_hh_e)[None, :],       # (1, 4H)
        wfc1=w_fc1.T, bfc1=b_fc1[None, :],    # (H, H), (1, H)
        wih_d=w_ih_d.T, whh_d=w_hh_d.T,       # (H, 4H), (H, 4H)
        b_d=(b_ih_d + b_hh_d)[None, :],       # (1, 4H)
        wfc2=w_fc2.T, bfc2=b_fc2[None, :],    # (H, O), (1, O)
    )


def _pad_to(a, shape):
    out = jnp.zeros(shape, a.dtype)
    return out.at[tuple(slice(0, s) for s in a.shape)].set(a)


def _pad_gate_cols(w, H, Hp):
    """(D, 4H) -> (D, 4Hp), keeping PyTorch's (i, f, g, o) gate-block order."""
    out = jnp.zeros((w.shape[0], 4 * Hp), w.dtype)
    for k in range(4):
        out = out.at[:, k * Hp:k * Hp + H].set(w[:, k * H:(k + 1) * H])
    return out


def prepare_kernel_params(params, hidden_pad=128, output_pad=128, matmul_dtype=jnp.float32):
    """One-time weight prep: lane-pad, fold fc1 into the decoder input path, optionally bf16."""
    H = params["whh_e"].shape[0]
    Hp, Op = hidden_pad, output_pad

    wih_e = _pad_gate_cols(params["wih_e"], H, Hp)                       # (1, 4Hp)
    b_e = _pad_gate_cols(params["b_e"], H, Hp)                           # (1, 4Hp)
    whh_e = _pad_to(_pad_gate_cols(params["whh_e"], H, Hp), (Hp, 4 * Hp))
    wfc1 = _pad_to(params["wfc1"], (Hp, Hp))
    bfc1 = _pad_to(params["bfc1"], (1, Hp))
    wih_d = _pad_to(_pad_gate_cols(params["wih_d"], H, Hp), (Hp, 4 * Hp))
    whh_d = _pad_to(_pad_gate_cols(params["whh_d"], H, Hp), (Hp, 4 * Hp))
    b_d = _pad_gate_cols(params["b_d"], H, Hp)                           # (1, 4Hp)
    wfc2 = _pad_to(params["wfc2"], (Hp, Op))
    bfc2 = _pad_to(params["bfc2"], (1, Op))

    # Fold fc1 into the decoder's input projection: z @ wih_d == h_m @ (wfc1 @ wih_d) + bfc1 @ wih_d
    w_fused = wfc1 @ wih_d                                               # (Hp, 4Hp)
    b_fused = bfc1 @ wih_d + b_d                                         # (1, 4Hp)

    md = matmul_dtype                                                    # bf16 for v6e/v7x prod H
    return dict(
        wih_e=wih_e, b_e=b_e,
        whh_e=whh_e.astype(md),
        w_zd=jnp.concatenate([wfc1, w_fused], axis=1).astype(md),        # (Hp, Hp + 4Hp)
        b_zd=jnp.concatenate([bfc1, b_fused], axis=1),                   # (1, Hp + 4Hp), f32
        whh_d=whh_d.astype(md),
        wfc2=wfc2.astype(md),
        bfc2=bfc2,
    )


# ------------------------------ block / VMEM sizing ------------------------------

def _round_up(n, m):
    return ((n + m - 1) // m) * m


def _vmem_estimate(L, BB, Hp, Op, w_bytes):
    f4 = 4
    io = 2 * (L * BB * 1 * f4) + 2 * (L * BB * Hp * f4) + 2 * (L * BB * Op * f4)  # x, z, y (x2 buf)
    scratch = L * BB * Hp * f4                                                     # hd scratch
    temps = L * BB * 4 * Hp * f4 + 2 * L * BB * Op * f4                            # gates_x + fc2 tmp
    return io + scratch + temps + 2 * w_bytes


def _choose_batch_block(B, L, Hp, Op, w_bytes, budget=40 << 20, max_bb=128):
    """Largest batch block (mult of 8, <=128) that fits VMEM and still leaves >=2 grid blocks
    (v7x megacore) when the batch is big enough."""
    b8 = _round_up(max(B, 1), 8)
    for bb in (256, 128, 64, 32, 16):
        if bb > max_bb or bb > b8:
            continue
        if b8 < 2 * bb:                       # keep >= 2 blocks so both v7x cores get work
            continue
        if _vmem_estimate(L, bb, Hp, Op, w_bytes) > budget:
            continue
        return bb
    return 8


# ------------------------------ forward wrappers ------------------------------

@functools.partial(jax.jit, static_argnames=("custom_pad_length", "hidden_dim", "output_dim"))
def scaling_ae_forward(x, lengths, kparams, custom_pad_length, hidden_dim, output_dim):
    """x: (B, T) float32, lengths: (B,) int32. Returns (z (B,L,H), x_hat (B,L,O))."""
    B, T = x.shape
    L = custom_pad_length
    Hp = kparams["whh_e"].shape[0]
    G4 = 4 * Hp
    Op = kparams["wfc2"].shape[1]

    w_bytes = sum(int(v.size) * v.dtype.itemsize for v in kparams.values())
    BB = _choose_batch_block(B, L, Hp, Op, w_bytes)
    B_pad = _round_up(_round_up(B, 8), BB)
    vmem_limit = int(min(max(_vmem_estimate(L, BB, Hp, Op, w_bytes) * 5 // 4, 32 << 20), 60 << 20))

    # Pad batch to a block multiple and time to L (masked past lengths anyway), go time-major.
    x_pad = jnp.zeros((B_pad, L), jnp.float32).at[:B, :T].set(x.astype(jnp.float32))
    x_tm = jnp.transpose(x_pad)[:, :, None]                               # (L, B_pad, 1)
    len_pad = jnp.zeros((B_pad, 1), jnp.int32).at[:B, 0].set(lengths.astype(jnp.int32))

    def rep(shape):                           # weight replicated across the batch grid
        return pl.BlockSpec(shape, lambda b, _s=shape: tuple(0 for _ in _s))

    z_tm, y_tm = pl.pallas_call(
        scaling_ae_kernel,
        out_shape=(jax.ShapeDtypeStruct((L, B_pad, Hp), jnp.float32),
                   jax.ShapeDtypeStruct((L, B_pad, Op), jnp.float32)),
        grid=(B_pad // BB,),
        in_specs=[
            pl.BlockSpec((L, BB, 1), lambda b: (0, b, 0)),                # x (time-major)
            pl.BlockSpec((BB, 1), lambda b: (b, 0)),                      # lengths
            rep((1, G4)),                                                 # wih_e
            rep((1, G4)),                                                 # b_e
            rep((Hp, G4)),                                                # whh_e
            rep((Hp, Hp + G4)),                                           # w_zd
            rep((1, Hp + G4)),                                            # b_zd
            rep((Hp, G4)),                                                # whh_d
            rep((Hp, Op)),                                                # wfc2
            rep((1, Op)),                                                 # bfc2
        ],
        out_specs=(pl.BlockSpec((L, BB, Hp), lambda b: (0, b, 0)),
                   pl.BlockSpec((L, BB, Op), lambda b: (0, b, 0))),
        scratch_shapes=[pltpu.VMEM((L, BB, Hp), jnp.float32)],            # h_d stash for fc2
        compiler_params=pltpu.CompilerParams(
            dimension_semantics=("parallel",),
            vmem_limit_bytes=vmem_limit),
    )(x_tm, len_pad,
      kparams["wih_e"], kparams["b_e"], kparams["whh_e"],
      kparams["w_zd"], kparams["b_zd"], kparams["whh_d"],
      kparams["wfc2"], kparams["bfc2"])

    # Slice BEFORE transposing: never move padded lanes through an extra HBM pass.
    z = jnp.transpose(z_tm[:, :B, :hidden_dim], (1, 0, 2))                # (B, L, H)
    x_hat = jnp.transpose(y_tm[:, :B, :output_dim], (1, 0, 2))            # (B, L, O)
    return z, x_hat


def reference_forward(x, lengths, params, custom_pad_length):
    """Pure-JAX reference with identical semantics (unpadded, unfused weights)."""
    B, T = x.shape
    L = custom_pad_length
    H = params["whh_e"].shape[0]
    x_pad = jnp.zeros((B, L), jnp.float32).at[:, :T].set(x.astype(jnp.float32))

    def lstm(inputs, wih, whh, b):            # inputs: (L, B, D), wih: (D, 4H)
        def step(carry, x_t):
            h, c = carry
            gates = x_t @ wih + h @ whh + b
            i, f, g, o = jnp.split(gates, 4, axis=-1)
            i = jax.nn.sigmoid(i); f = jax.nn.sigmoid(f)
            g = jnp.tanh(g); o = jax.nn.sigmoid(o)
            c = f * c + i * g
            h = o * jnp.tanh(c)
            return (h, c), h
        zero = jnp.zeros((B, H), jnp.float32)
        _, hs = lax.scan(step, (zero, zero), inputs)
        return hs                              # (L, B, H)

    x_tm = jnp.transpose(x_pad)[:, :, None]
    h_enc = lstm(x_tm, params["wih_e"], params["whh_e"], params["b_e"])
    mask = jnp.arange(L)[:, None, None] < lengths[None, :, None]
    h_enc = jnp.where(mask, h_enc, 0.0)
    z = h_enc @ params["wfc1"] + params["bfc1"]
    h_dec = lstm(z, params["wih_d"], params["whh_d"], params["b_d"])
    y = h_dec @ params["wfc2"] + params["bfc2"]
    return jnp.transpose(z, (1, 0, 2)), jnp.transpose(y, (1, 0, 2))


if __name__ == "__main__":
    H, O = 32, 1                       # hidden_dim, output_dim (univariate)
    key = jax.random.PRNGKey(0)
    kx, kp, kx2, kl2 = jax.random.split(key, 4)

    params = init_params(kp, 1, H, O)
    kparams = prepare_kernel_params(params, hidden_pad=128, output_pad=128)  # one-time prep

    # --- small case matching the module spec: B=2, seq=8, hidden=32 ---
    B, T, L = 2, 8, 8
    x = jax.random.normal(kx, (B, T), jnp.float32)
    lengths = jnp.array([8, 5], jnp.int32)
    z, x_hat = scaling_ae_forward(x, lengths, kparams,
                                  custom_pad_length=L, hidden_dim=H, output_dim=O)
    jax.block_until_ready((z, x_hat))
    z_ref, xhat_ref = reference_forward(x, lengths, params, L)
    assert z.shape == (B, L, H) and x_hat.shape == (B, L, O)
    assert jnp.allclose(z, z_ref, atol=1e-4, rtol=1e-4)
    assert jnp.allclose(x_hat, xhat_ref, atol=1e-4, rtol=1e-4)

    # --- larger batch: exercises multi-block grid (megacore sharding on v7x) ---
    B2, T2, L2 = 32, 10, 12
    x2 = jax.random.normal(kx2, (B2, T2), jnp.float32)
    lengths2 = jax.random.randint(kl2, (B2,), 1, T2 + 1).astype(jnp.int32)
    z2, y2 = scaling_ae_forward(x2, lengths2, kparams,
                                custom_pad_length=L2, hidden_dim=H, output_dim=O)
    jax.block_until_ready((z2, y2))
    z2_ref, y2_ref = reference_forward(x2, lengths2, params, L2)
    assert jnp.allclose(z2, z2_ref, atol=1e-4, rtol=1e-4)
    assert jnp.allclose(y2, y2_ref, atol=1e-4, rtol=1e-4)

    print("KERNEL_OK")
</pallas_src>

<mosaic_0001>
module attributes {stable_mosaic.version = 11 : i64} {
  func.func @scaling_ae_kernel(%arg0: i32, %arg1: memref<8x8x1xf32, #tpu.memory_space<vmem>>, %arg2: memref<8x1xi32, #tpu.memory_space<vmem>>, %arg3: memref<1x512xf32, #tpu.memory_space<vmem>>, %arg4: memref<1x512xf32, #tpu.memory_space<vmem>>, %arg5: memref<128x512xf32, #tpu.memory_space<vmem>>, %arg6: memref<128x640xf32, #tpu.memory_space<vmem>>, %arg7: memref<1x640xf32, #tpu.memory_space<vmem>>, %arg8: memref<128x512xf32, #tpu.memory_space<vmem>>, %arg9: memref<128x128xf32, #tpu.memory_space<vmem>>, %arg10: memref<1x128xf32, #tpu.memory_space<vmem>>, %arg11: memref<8x8x128xf32, #tpu.memory_space<vmem>>, %arg12: memref<8x8x128xf32, #tpu.memory_space<vmem>>, %arg13: memref<8x8x128xf32, #tpu.memory_space<vmem>>) attributes {dimension_semantics = [#tpu.dimension_semantics<parallel>], iteration_bounds = array<i64: 1>, scalar_prefetch = 0 : i64, scratch_operands = 1 : i64, tpu.core_type = #tpu.core_type<tc>, window_params = [{transform_indices = @transform_0, window_bounds = array<i64: 8, 8, 1>}, {transform_indices = @transform_1, window_bounds = array<i64: 8, 1>}, {pipeline_mode = #tpu.pipeline_mode<synchronous>, transform_indices = @transform_2, window_bounds = array<i64: 1, 512>}, {pipeline_mode = #tpu.pipeline_mode<synchronous>, transform_indices = @transform_3, window_bounds = array<i64: 1, 512>}, {pipeline_mode = #tpu.pipeline_mode<synchronous>, transform_indices = @transform_4, window_bounds = array<i64: 128, 512>}, {pipeline_mode = #tpu.pipeline_mode<synchronous>, transform_indices = @transform_5, window_bounds = array<i64: 128, 640>}, {pipeline_mode = #tpu.pipeline_mode<synchronous>, transform_indices = @transform_6, window_bounds = array<i64: 1, 640>}, {pipeline_mode = #tpu.pipeline_mode<synchronous>, transform_indices = @transform_7, window_bounds = array<i64: 128, 512>}, {pipeline_mode = #tpu.pipeline_mode<synchronous>, transform_indices = @transform_8, window_bounds = array<i64: 128, 128>}, {pipeline_mode = #tpu.pipeline_mode<synchronous>, transform_indices = @transform_9, window_bounds = array<i64: 1, 128>}, {transform_indices = @transform_10, window_bounds = array<i64: 8, 8, 128>}, {transform_indices = @transform_11, window_bounds = array<i64: 8, 8, 128>}]} {
    %c0 = arith.constant 0 : index
    %c0_0 = arith.constant 0 : index
    %0 = vector.load %arg2[%c0, %c0_0] : memref<8x1xi32, #tpu.memory_space<vmem>>, vector<8x1xi32>
    %c0_1 = arith.constant 0 : index
    %c0_2 = arith.constant 0 : index
    %1 = vector.load %arg5[%c0_1, %c0_2] : memref<128x512xf32, #tpu.memory_space<vmem>>, vector<128x512xf32>
    %c0_3 = arith.constant 0 : index
    %c0_4 = arith.constant 0 : index
    %2 = vector.load %arg8[%c0_3, %c0_4] : memref<128x512xf32, #tpu.memory_space<vmem>>, vector<128x512xf32>
    %c0_5 = arith.constant 0 : index
    %c0_6 = arith.constant 0 : index
    %3 = vector.load %arg6[%c0_5, %c0_6] : memref<128x640xf32, #tpu.memory_space<vmem>>, vector<128x640xf32>
    %c0_7 = arith.constant 0 : index
    %c0_8 = arith.constant 0 : index
    %c0_9 = arith.constant 0 : index
    %4 = vector.load %arg1[%c0_7, %c0_8, %c0_9] : memref<8x8x1xf32, #tpu.memory_space<vmem>>, vector<8x8x1xf32>
    %c0_10 = arith.constant 0 : index
    %c0_11 = arith.constant 0 : index
    %5 = vector.load %arg3[%c0_10, %c0_11] : memref<1x512xf32, #tpu.memory_space<vmem>>, vector<1x512xf32>
    %6 = vector.shape_cast %5 : vector<1x512xf32> to vector<1x1x512xf32>
    %7 = vector.broadcast %4 : vector<8x8x1xf32> to vector<8x8x512xf32>
    %8 = vector.broadcast %6 : vector<1x1x512xf32> to vector<8x8x512xf32>
    %9 = arith.mulf %7, %8 : vector<8x8x512xf32>
    %c0_12 = arith.constant 0 : index
    %c0_13 = arith.constant 0 : index
    %10 = vector.load %arg4[%c0_12, %c0_13] : memref<1x512xf32, #tpu.memory_space<vmem>>, vector<1x512xf32>
    %11 = vector.shape_cast %10 : vector<1x512xf32> to vector<1x1x512xf32>
    %12 = vector.broadcast %11 : vector<1x1x512xf32> to vector<8x8x512xf32>
    %13 = arith.addf %9, %12 : vector<8x8x512xf32>
    %c0_14 = arith.constant 0 : index
    %c0_15 = arith.constant 0 : index
    %14 = vector.load %arg7[%c0_14, %c0_15] : memref<1x640xf32, #tpu.memory_space<vmem>>, vector<1x640xf32>
    %15 = vector.shape_cast %14 : vector<1x640xf32> to vector<1x640xf32>
    %16 = vector.broadcast %15 : vector<1x640xf32> to vector<8x640xf32>
    %cst = arith.constant 0.000000e+00 : f32
    %17 = vector.broadcast %cst : f32 to vector<8x128xf32>
    %18 = vector.extract_strided_slice %13 {offsets = [0, 0, 0], sizes = [1, 8, 512], strides = [1, 1, 1]} : vector<8x8x512xf32> to vector<1x8x512xf32>
    %19 = vector.shape_cast %18 : vector<1x8x512xf32> to vector<8x512xf32>
    %cst_16 = arith.constant dense<0.000000e+00> : vector<8x512xf32>
    %20 = tpu.matmul %17, %1, %cst_16 {dimension_numbers = #tpu.dot_dimension_numbers<[1], [0], [0], [1], [0, 0, 1, 1], [], []>} : vector<8x128xf32>, vector<128x512xf32>, vector<8x512xf32> -> vector<8x512xf32>
    %21 = arith.addf %19, %20 : vector<8x512xf32>
    %22 = vector.extract_strided_slice %21 {offsets = [0, 0], sizes = [8, 128], strides = [1, 1]} : vector<8x512xf32> to vector<8x128xf32>
    %cst_17 = arith.constant 5.000000e-01 : f32
    %23 = vector.broadcast %cst_17 : f32 to vector<8x128xf32>
    %24 = arith.mulf %23, %22 : vector<8x128xf32>
    %25 = math.tanh %24 : vector<8x128xf32>
    %cst_18 = arith.constant 5.000000e-01 : f32
    %26 = vector.broadcast %cst_18 : f32 to vector<8x128xf32>
    %27 = arith.mulf %26, %25 : vector<8x128xf32>
    %cst_19 = arith.constant 5.000000e-01 : f32
    %28 = vector.broadcast %cst_19 : f32 to vector<8x128xf32>
    %29 = arith.addf %27, %28 : vector<8x128xf32>
    %30 = vector.extract_strided_slice %21 {offsets = [0, 128], sizes = [8, 128], strides = [1, 1]} : vector<8x512xf32> to vector<8x128xf32>
    %cst_20 = arith.constant 5.000000e-01 : f32
    %31 = vector.broadcast %cst_20 : f32 to vector<8x128xf32>
    %32 = arith.mulf %31, %30 : vector<8x128xf32>
    %33 = math.tanh %32 : vector<8x128xf32>
    %cst_21 = arith.constant 5.000000e-01 : f32
    %34 = vector.broadcast %cst_21 : f32 to vector<8x128xf32>
    %35 = arith.mulf %34, %33 : vector<8x128xf32>
    %cst_22 = arith.constant 5.000000e-01 : f32
    %36 = vector.broadcast %cst_22 : f32 to vector<8x128xf32>
    %37 = arith.addf %35, %36 : vector<8x128xf32>
    %38 = vector.extract_strided_slice %21 {offsets = [0, 256], sizes = [8, 128], strides = [1, 1]} : vector<8x512xf32> to vector<8x128xf32>
    %39 = math.tanh %38 : vector<8x128xf32>
    %40 = vector.extract_strided_slice %21 {offsets = [0, 384], sizes = [8, 128], strides = [1, 1]} : vector<8x512xf32> to vector<8x128xf32>
    %cst_23 = arith.constant 5.000000e-01 : f32
    %41 = vector.broadcast %cst_23 : f32 to vector<8x128xf32>
    %42 = arith.mulf %41, %40 : vector<8x128xf32>
    %43 = math.tanh %42 : vector<8x128xf32>
    %cst_24 = arith.constant 5.000000e-01 : f32
    %44 = vector.broadcast %cst_24 : f32 to vector<8x128xf32>
    %45 = arith.mulf %44, %43 : vector<8x128xf32>
    %cst_25 = arith.constant 5.000000e-01 : f32
    %46 = vector.broadcast %cst_25 : f32 to vector<8x128xf32>
    %47 = arith.addf %45, %46 : vector<8x128xf32>
    %48 = arith.mulf %37, %17 : vector<8x128xf32>
    %49 = arith.mulf %29, %39 : vector<8x128xf32>
    %50 = arith.addf %48, %49 : vector<8x128xf32>
    %51 = math.tanh %50 : vector<8x128xf32>
    %52 = arith.mulf %47, %51 : vector<8x128xf32>
    %c0_i32 = arith.constant 0 : i32
    %53 = vector.broadcast %c0_i32 : i32 to vector<8x1xi32>
    %54 = arith.cmpi sgt, %0, %53 : vector<8x1xi32>
    %cst_26 = arith.constant 0.000000e+00 : f32
    %55 = vector.shape_cast %54 : vector<8x1xi1> to vector<8x1xi1>
    %56 = vector.broadcast %55 : vector<8x1xi1> to vector<8x128xi1>
    %57 = vector.broadcast %cst_26 : f32 to vector<8x128xf32>
    %58 = arith.select %56, %52, %57 : vector<8x128xi1>, vector<8x128xf32>
    %cst_27 = arith.constant dense<0.000000e+00> : vector<8x640xf32>
    %59 = tpu.matmul %58, %3, %cst_27 {dimension_numbers = #tpu.dot_dimension_numbers<[1], [0], [0], [1], [0, 0, 1, 1], [], []>} : vector<8x128xf32>, vector<128x640xf32>, vector<8x640xf32> -> vector<8x640xf32>
    %60 = arith.addf %59, %16 : vector<8x640xf32>
    %61 = vector.extract_strided_slice %60 {offsets = [0, 0], sizes = [8, 128], strides = [1, 1]} : vector<8x640xf32> to vector<8x128xf32>
    %c0_28 = arith.constant 0 : index
    %c0_29 = arith.constant 0 : index
    %c0_30 = arith.constant 0 : index
    %62 = vector.load %arg11[%c0_28, %c0_29, %c0_30] : memref<8x8x128xf32, #tpu.memory_space<vmem>>, vector<1x8x128xf32>
    %63 = vector.shape_cast %62 : vector<1x8x128xf32> to vector<8x128xf32>
    %64 = vector.shape_cast %61 : vector<8x128xf32> to vector<1x8x128xf32>
    tpu.vector_store %arg11[%c0_28, %c0_29, %c0_30], %64 {strides = array<i32>} : memref<8x8x128xf32, #tpu.memory_space<vmem>>, vector<1x8x128xf32>,
    %65 = vector.extract_strided_slice %60 {offsets = [0, 128], sizes = [8, 512], strides = [1, 1]} : vector<8x640xf32> to vector<8x512xf32>
    %cst_31 = arith.constant dense<0.000000e+00> : vector<8x512xf32>
    %66 = tpu.matmul %17, %2, %cst_31 {dimension_numbers = #tpu.dot_dimension_numbers<[1], [0], [0], [1], [0, 0, 1, 1], [], []>} : vector<8x128xf32>, vector<128x512xf32>, vector<8x512xf32> -> vector<8x512xf32>
    %67 = arith.addf %65, %66 : vector<8x512xf32>
    %68 = vector.extract_strided_slice %67 {offsets = [0, 0], sizes = [8, 128], strides = [1, 1]} : vector<8x512xf32> to vector<8x128xf32>
    %cst_32 = arith.constant 5.000000e-01 : f32
    %69 = vector.broadcast %cst_32 : f32 to vector<8x128xf32>
    %70 = arith.mulf %69, %68 : vector<8x128xf32>
    %71 = math.tanh %70 : vector<8x128xf32>
    %cst_33 = arith.constant 5.000000e-01 : f32
    %72 = vector.broadcast %cst_33 : f32 to vector<8x128xf32>
    %73 = arith.mulf %72, %71 : vector<8x128xf32>
    %cst_34 = arith.constant 5.000000e-01 : f32
    %74 = vector.broadcast %cst_34 : f32 to vector<8x128xf32>
    %75 = arith.addf %73, %74 : vector<8x128xf32>
    %76 = vector.extract_strided_slice %67 {offsets = [0, 128], sizes = [8, 128], strides = [1, 1]} : vector<8x512xf32> to vector<8x128xf32>
    %cst_35 = arith.constant 5.000000e-01 : f32
    %77 = vector.broadcast %cst_35 : f32 to vector<8x128xf32>
    %78 = arith.mulf %77, %76 : vector<8x128xf32>
    %79 = math.tanh %78 : vector<8x128xf32>
    %cst_36 = arith.constant 5.000000e-01 : f32
    %80 = vector.broadcast %cst_36 : f32 to vector<8x128xf32>
    %81 = arith.mulf %80, %79 : vector<8x128xf32>
    %cst_37 = arith.constant 5.000000e-01 : f32
    %82 = vector.broadcast %cst_37 : f32 to vector<8x128xf32>
    %83 = arith.addf %81, %82 : vector<8x128xf32>
    %84 = vector.extract_strided_slice %67 {offsets = [0, 256], sizes = [8, 128], strides = [1, 1]} : vector<8x512xf32> to vector<8x128xf32>
    %85 = math.tanh %84 : vector<8x128xf32>
    %86 = vector.extract_strided_slice %67 {offsets = [0, 384], sizes = [8, 128], strides = [1, 1]} : vector<8x512xf32> to vector<8x128xf32>
    %cst_38 = arith.constant 5.000000e-01 : f32
    %87 = vector.broadcast %cst_38 : f32 to vector<8x128xf32>
    %88 = arith.mulf %87, %86 : vector<8x128xf32>
    %89 = math.tanh %88 : vector<8x128xf32>
    %cst_39 = arith.constant 5.000000e-01 : f32
    %90 = vector.broadcast %cst_39 : f32 to vector<8x128xf32>
    %91 = arith.mulf %90, %89 : vector<8x128xf32>
    %cst_40 = arith.constant 5.000000e-01 : f32
    %92 = vector.broadcast %cst_40 : f32 to vector<8x128xf32>
    %93 = arith.addf %91, %92 : vector<8x128xf32>
    %94 = arith.mulf %83, %17 : vector<8x128xf32>
    %95 = arith.mulf %75, %85 : vector<8x128xf32>
    %96 = arith.addf %94, %95 : vector<8x128xf32>
    %97 = math.tanh %96 : vector<8x128xf32>
    %98 = arith.mulf %93, %97 : vector<8x128xf32>
    %c0_41 = arith.constant 0 : index
    %c0_42 = arith.constant 0 : index
    %c0_43 = arith.constant 0 : index
    %99 = vector.load %arg13[%c0_41, %c0_42, %c0_43] : memref<8x8x128xf32, #tpu.memory_space<vmem>>, vector<1x8x128xf32>
    %100 = vector.shape_cast %99 : vector<1x8x128xf32> to vector<8x128xf32>
    %101 = vector.shape_cast %98 : vector<8x128xf32> to vector<1x8x128xf32>
    tpu.vector_store %arg13[%c0_41, %c0_42, %c0_43], %101 {strides = array<i32>} : memref<8x8x128xf32, #tpu.memory_space<vmem>>, vector<1x8x128xf32>,
    %102 = vector.extract_strided_slice %13 {offsets = [1, 0, 0], sizes = [1, 8, 512], strides = [1, 1, 1]} : vector<8x8x512xf32> to vector<1x8x512xf32>
    %103 = vector.shape_cast %102 : vector<1x8x512xf32> to vector<8x512xf32>
    %cst_44 = arith.constant dense<0.000000e+00> : vector<8x512xf32>
    %104 = tpu.matmul %52, %1, %cst_44 {dimension_numbers = #tpu.dot_dimension_numbers<[1], [0], [0], [1], [0, 0, 1, 1], [], []>} : vector<8x128xf32>, vector<128x512xf32>, vector<8x512xf32> -> vector<8x512xf32>
    %105 = arith.addf %103, %104 : vector<8x512xf32>
    %106 = vector.extract_strided_slice %105 {offsets = [0, 0], sizes = [8, 128], strides = [1, 1]} : vector<8x512xf32> to vector<8x128xf32>
    %cst_45 = arith.constant 5.000000e-01 : f32
    %107 = vector.broadcast %cst_45 : f32 to vector<8x128xf32>
    %108 = arith.mulf %107, %106 : vector<8x128xf32>
    %109 = math.tanh %108 : vector<8x128xf32>
    %cst_46 = arith.constant 5.000000e-01 : f32
    %110 = vector.broadcast %cst_46 : f32 to vector<8x128xf32>
    %111 = arith.mulf %110, %109 : vector<8x128xf32>
    %cst_47 = arith.constant 5.000000e-01 : f32
    %112 = vector.broadcast %cst_47 : f32 to vector<8x128xf32>
    %113 = arith.addf %111, %112 : vector<8x128xf32>
    %114 = vector.extract_strided_slice %105 {offsets = [0, 128], sizes = [8, 128], strides = [1, 1]} : vector<8x512xf32> to vector<8x128xf32>
    %cst_48 = arith.constant 5.000000e-01 : f32
    %115 = vector.broadcast %cst_48 : f32 to vector<8x128xf32>
    %116 = arith.mulf %115, %114 : vector<8x128xf32>
    %117 = math.tanh %116 : vector<8x128xf32>
    %cst_49 = arith.constant 5.000000e-01 : f32
    %118 = vector.broadcast %cst_49 : f32 to vector<8x128xf32>
    %119 = arith.mulf %118, %117 : vector<8x128xf32>
    %cst_50 = arith.constant 5.000000e-01 : f32
    %120 = vector.broadcast %cst_50 : f32 to vector<8x128xf32>
    %121 = arith.addf %119, %120 : vector<8x128xf32>
    %122 = vector.extract_strided_slice %105 {offsets = [0, 256], sizes = [8, 128], strides = [1, 1]} : vector<8x512xf32> to vector<8x128xf32>
    %123 = math.tanh %122 : vector<8x128xf32>
    %124 = vector.extract_strided_slice %105 {offsets = [0, 384], sizes = [8, 128], strides = [1, 1]} : vector<8x512xf32> to vector<8x128xf32>
    %cst_51 = arith.constant 5.000000e-01 : f32
    %125 = vector.broadcast %cst_51 : f32 to vector<8x128xf32>
    %126 = arith.mulf %125, %124 : vector<8x128xf32>
    %127 = math.tanh %126 : vector<8x128xf32>
    %cst_52 = arith.constant 5.000000e-01 : f32
    %128 = vector.broadcast %cst_52 : f32 to vector<8x128xf32>
    %129 = arith.mulf %128, %127 : vector<8x128xf32>
    %cst_53 = arith.constant 5.000000e-01 : f32
    %130 = vector.broadcast %cst_53 : f32 to vector<8x128xf32>
    %131 = arith.addf %129, %130 : vector<8x128xf32>
    %132 = arith.mulf %121, %50 : vector<8x128xf32>
    %133 = arith.mulf %113, %123 : vector<8x128xf32>
    %134 = arith.addf %132, %133 : vector<8x128xf32>
    %135 = math.tanh %134 : vector<8x128xf32>
    %136 = arith.mulf %131, %135 : vector<8x128xf32>
    %c1_i32 = arith.constant 1 : i32
    %137 = vector.broadcast %c1_i32 : i32 to vector<8x1xi32>
    %138 = arith.cmpi sgt, %0, %137 : vector<8x1xi32>
    %cst_54 = arith.constant 0.000000e+00 : f32
    %139 = vector.shape_cast %138 : vector<8x1xi1> to vector<8x1xi1>
    %140 = vector.broadcast %139 : vector<8x1xi1> to vector<8x128xi1>
    %141 = vector.broadcast %cst_54 : f32 to vector<8x128xf32>
    %142 = arith.select %140, %136, %141 : vector<8x128xi1>, vector<8x128xf32>
    %cst_55 = arith.constant dense<0.000000e+00> : vector<8x640xf32>
    %143 = tpu.matmul %142, %3, %cst_55 {dimension_numbers = #tpu.dot_dimension_numbers<[1], [0], [0], [1], [0, 0, 1, 1], [], []>} : vector<8x128xf32>, vector<128x640xf32>, vector<8x640xf32> -> vector<8x640xf32>
    %144 = arith.addf %143, %16 : vector<8x640xf32>
    %145 = vector.extract_strided_slice %144 {offsets = [0, 0], sizes = [8, 128], strides = [1, 1]} : vector<8x640xf32> to vector<8x128xf32>
    %c1 = arith.constant 1 : index
    %c0_56 = arith.constant 0 : index
    %c0_57 = arith.constant 0 : index
    %146 = vector.load %arg11[%c1, %c0_56, %c0_57] : memref<8x8x128xf32, #tpu.memory_space<vmem>>, vector<1x8x128xf32>
    %147 = vector.shape_cast %146 : vector<1x8x128xf32> to vector<8x128xf32>
    %148 = vector.shape_cast %145 : vector<8x128xf32> to vector<1x8x128xf32>
    tpu.vector_store %arg11[%c1, %c0_56, %c0_57], %148 {strides = array<i32>} : memref<8x8x128xf32, #tpu.memory_space<vmem>>, vector<1x8x128xf32>,
    %149 = vector.extract_strided_slice %144 {offsets = [0, 128], sizes = [8, 512], strides = [1, 1]} : vector<8x640xf32> to vector<8x512xf32>
    %cst_58 = arith.constant dense<0.000000e+00> : vector<8x512xf32>
    %150 = tpu.matmul %98, %2, %cst_58 {dimension_numbers = #tpu.dot_dimension_numbers<[1], [0], [0], [1], [0, 0, 1, 1], [], []>} : vector<8x128xf32>, vector<128x512xf32>, vector<8x512xf32> -> vector<8x512xf32>
    %151 = arith.addf %149, %150 : vector<8x512xf32>
    %152 = vector.extract_strided_slice %151 {offsets = [0, 0], sizes = [8, 128], strides = [1, 1]} : vector<8x512xf32> to vector<8x128xf32>
    %cst_59 = arith.constant 5.000000e-01 : f32
    %153 = vector.broadcast %cst_59 : f32 to vector<8x128xf32>
    %154 = arith.mulf %153, %152 : vector<8x128xf32>
    %155 = math.tanh %154 : vector<8x128xf32>
    %cst_60 = arith.constant 5.000000e-01 : f32
    %156 = vector.broadcast %cst_60 : f32 to vector<8x128xf32>
    %157 = arith.mulf %156, %155 : vector<8x128xf32>
    %cst_61 = arith.constant 5.000000e-01 : f32
    %158 = vector.broadcast %cst_61 : f32 to vector<8x128xf32>
    %159 = arith.addf %157, %158 : vector<8x128xf32>
    %160 = vector.extract_strided_slice %151 {offsets = [0, 128], sizes = [8, 128], strides = [1, 1]} : vector<8x512xf32> to vector<8x128xf32>
    %cst_62 = arith.constant 5.000000e-01 : f32
    %161 = vector.broadcast %cst_62 : f32 to vector<8x128xf32>
    %162 = arith.mulf %161, %160 : vector<8x128xf32>
    %163 = math.tanh %162 : vector<8x128xf32>
    %cst_63 = arith.constant 5.000000e-01 : f32
    %164 = vector.broadcast %cst_63 : f32 to vector<8x128xf32>
    %165 = arith.mulf %164, %163 : vector<8x128xf32>
    %cst_64 = arith.constant 5.000000e-01 : f32
    %166 = vector.broadcast %cst_64 : f32 to vector<8x128xf32>
    %167 = arith.addf %165, %166 : vector<8x128xf32>
    %168 = vector.extract_strided_slice %151 {offsets = [0, 256], sizes = [8, 128], strides = [1, 1]} : vector<8x512xf32> to vector<8x128xf32>
    %169 = math.tanh %168 : vector<8x128xf32>
    %170 = vector.extract_strided_slice %151 {offsets = [0, 384], sizes = [8, 128], strides = [1, 1]} : vector<8x512xf32> to vector<8x128xf32>
    %cst_65 = arith.constant 5.000000e-01 : f32
    %171 = vector.broadcast %cst_65 : f32 to vector<8x128xf32>
    %172 = arith.mulf %171, %170 : vector<8x128xf32>
    %173 = math.tanh %172 : vector<8x128xf32>
    %cst_66 = arith.constant 5.000000e-01 : f32
    %174 = vector.broadcast %cst_66 : f32 to vector<8x128xf32>
    %175 = arith.mulf %174, %173 : vector<8x128xf32>
    %cst_67 = arith.constant 5.000000e-01 : f32
    %176 = vector.broadcast %cst_67 : f32 to vector<8x128xf32>
    %177 = arith.addf %175, %176 : vector<8x128xf32>
    %178 = arith.mulf %167, %96 : vector<8x128xf32>
    %179 = arith.mulf %159, %169 : vector<8x128xf32>
    %180 = arith.addf %178, %179 : vector<8x128xf32>
    %181 = math.tanh %180 : vector<8x128xf32>
    %182 = arith.mulf %177, %181 : vector<8x128xf32>
    %c1_68 = arith.constant 1 : index
    %c0_69 = arith.constant 0 : index
    %c0_70 = arith.constant 0 : index
    %183 = vector.load %arg13[%c1_68, %c0_69, %c0_70] : memref<8x8x128xf32, #tpu.memory_space<vmem>>, vector<1x8x128xf32>
    %184 = vector.shape_cast %183 : vector<1x8x128xf32> to vector<8x128xf32>
    %185 = vector.shape_cast %182 : vector<8x128xf32> to vector<1x8x128xf32>
    tpu.vector_store %arg13[%c1_68, %c0_69, %c0_70], %185 {strides = array<i32>} : memref<8x8x128xf32, #tpu.memory_space<vmem>>, vector<1x8x128xf32>,
    %186 = vector.extract_strided_slice %13 {offsets = [2, 0, 0], sizes = [1, 8, 512], strides = [1, 1, 1]} : vector<8x8x512xf32> to vector<1x8x512xf32>
    %187 = vector.shape_cast %186 : vector<1x8x512xf32> to vector<8x512xf32>
    %cst_71 = arith.constant dense<0.000000e+00> : vector<8x512xf32>
    %188 = tpu.matmul %136, %1, %cst_71 {dimension_numbers = #tpu.dot_dimension_numbers<[1], [0], [0], [1], [0, 0, 1, 1], [], []>} : vector<8x128xf32>, vector<128x512xf32>, vector<8x512xf32> -> vector<8x512xf32>
    %189 = arith.addf %187, %188 : vector<8x512xf32>
    %190 = vector.extract_strided_slice %189 {offsets = [0, 0], sizes = [8, 128], strides = [1, 1]} : vector<8x512xf32> to vector<8x128xf32>
    %cst_72 = arith.constant 5.000000e-01 : f32
    %191 = vector.broadcast %cst_72 : f32 to vector<8x128xf32>
    %192 = arith.mulf %191, %190 : vector<8x128xf32>
    %193 = math.tanh %192 : vector<8x128xf32>
    %cst_73 = arith.constant 5.000000e-01 : f32
    %194 = vector.broadcast %cst_73 : f32 to vector<8x128xf32>
    %195 = arith.mulf %194, %193 : vector<8x128xf32>
    %cst_74 = arith.constant 5.000000e-01 : f32
    %196 = vector.broadcast %cst_74 : f32 to vector<8x128xf32>
    %197 = arith.addf %195, %196 : vector<8x128xf32>
    %198 = vector.extract_strided_slice %189 {offsets = [0, 128], sizes = [8, 128], strides = [1, 1]} : vector<8x512xf32> to vector<8x128xf32>
    %cst_75 = arith.constant 5.000000e-01 : f32
    %199 = vector.broadcast %cst_75 : f32 to vector<8x128xf32>
    %200 = arith.mulf %199, %198 : vector<8x128xf32>
    %201 = math.tanh %200 : vector<8x128xf32>
    %cst_76 = arith.constant 5.000000e-01 : f32
    %202 = vector.broadcast %cst_76 : f32 to vector<8x128xf32>
    %203 = arith.mulf %202, %201 : vector<8x128xf32>
    %cst_77 = arith.constant 5.000000e-01 : f32
    %204 = vector.broadcast %cst_77 : f32 to vector<8x128xf32>
    %205 = arith.addf %203, %204 : vector<8x128xf32>
    %206 = vector.extract_strided_slice %189 {offsets = [0, 256], sizes = [8, 128], strides = [1, 1]} : vector<8x512xf32> to vector<8x128xf32>
    %207 = math.tanh %206 : vector<8x128xf32>
    %208 = vector.extract_strided_slice %189 {offsets = [0, 384], sizes = [8, 128], strides = [1, 1]} : vector<8x512xf32> to vector<8x128xf32>
    %cst_78 = arith.constant 5.000000e-01 : f32
    %209 = vector.broadcast %cst_78 : f32 to vector<8x128xf32>
    %210 = arith.mulf %209, %208 : vector<8x128xf32>
    %211 = math.tanh %210 : vector<8x128xf32>
    %cst_79 = arith.constant 5.000000e-01 : f32
    %212 = vector.broadcast %cst_79 : f32 to vector<8x128xf32>
    %213 = arith.mulf %212, %211 : vector<8x128xf32>
    %cst_80 = arith.constant 5.000000e-01 : f32
    %214 = vector.broadcast %cst_80 : f32 to vector<8x128xf32>
    %215 = arith.addf %213, %214 : vector<8x128xf32>
    %216 = arith.mulf %205, %134 : vector<8x128xf32>
    %217 = arith.mulf %197, %207 : vector<8x128xf32>
    %218 = arith.addf %216, %217 : vector<8x128xf32>
    %219 = math.tanh %218 : vector<8x128xf32>
    %220 = arith.mulf %215, %219 : vector<8x128xf32>
    %c2_i32 = arith.constant 2 : i32
    %221 = vector.broadcast %c2_i32 : i32 to vector<8x1xi32>
    %222 = arith.cmpi sgt, %0, %221 : vector<8x1xi32>
    %cst_81 = arith.constant 0.000000e+00 : f32
    %223 = vector.shape_cast %222 : vector<8x1xi1> to vector<8x1xi1>
    %224 = vector.broadcast %223 : vector<8x1xi1> to vector<8x128xi1>
    %225 = vector.broadcast %cst_81 : f32 to vector<8x128xf32>
    %226 = arith.select %224, %220, %225 : vector<8x128xi1>, vector<8x128xf32>
    %cst_82 = arith.constant dense<0.000000e+00> : vector<8x640xf32>
    %227 = tpu.matmul %226, %3, %cst_82 {dimension_numbers = #tpu.dot_dimension_numbers<[1], [0], [0], [1], [0, 0, 1, 1], [], []>} : vector<8x128xf32>, vector<128x640xf32>, vector<8x640xf32> -> vector<8x640xf32>
    %228 = arith.addf %227, %16 : vector<8x640xf32>
    %229 = vector.extract_strided_slice %228 {offsets = [0, 0], sizes = [8, 128], strides = [1, 1]} : vector<8x640xf32> to vector<8x128xf32>
    %c2 = arith.constant 2 : index
    %c0_83 = arith.constant 0 : index
    %c0_84 = arith.constant 0 : index
    %230 = vector.load %arg11[%c2, %c0_83, %c0_84] : memref<8x8x128xf32, #tpu.memory_space<vmem>>, vector<1x8x128xf32>
    %231 = vector.shape_cast %230 : vector<1x8x128xf32> to vector<8x128xf32>
    %232 = vector.shape_cast %229 : vector<8x128xf32> to vector<1x8x128xf32>
    tpu.vector_store %arg11[%c2, %c0_83, %c0_84], %232 {strides = array<i32>} : memref<8x8x128xf32, #tpu.memory_space<vmem>>, vector<1x8x128xf32>,
    %233 = vector.extract_strided_slice %228 {offsets = [0, 128], sizes = [8, 512], strides = [1, 1]} : vector<8x640xf32> to vector<8x512xf32>
    %cst_85 = arith.constant dense<0.000000e+00> : vector<8x512xf32>
    %234 = tpu.matmul %182, %2, %cst_85 {dimension_numbers = #tpu.dot_dimension_numbers<[1], [0], [0], [1], [0, 0, 1, 1], [], []>} : vector<8x128xf32>, vector<128x512xf32>, vector<8x512xf32> -> vector<8x512xf32>
    %235 = arith.addf %233, %234 : vector<8x512xf32>
    %236 = vector.extract_strided_slice %235 {offsets = [0, 0], sizes = [8, 128], strides = [1, 1]} : vector<8x512xf32> to vector<8x128xf32>
    %cst_86 = arith.constant 5.000000e-01 : f32
    %237 = vector.broadcast %cst_86 : f32 to vector<8x128xf32>
    %238 = arith.mulf %237, %236 : vector<8x128xf32>
    %239 = math.tanh %238 : vector<8x128xf32>
    %cst_87 = arith.constant 5.000000e-01 : f32
    %240 = vector.broadcast %cst_87 : f32 to vector<8x128xf32>
    %241 = arith.mulf %240, %239 : vector<8x128xf32>
    %cst_88 = arith.constant 5.000000e-01 : f32
    %242 = vector.broadcast %cst_88 : f32 to vector<8x128xf32>
    %243 = arith.addf %241, %242 : vector<8x128xf32>
    %244 = vector.extract_strided_slice %235 {offsets = [0, 128], sizes = [8, 128], strides = [1, 1]} : vector<8x512xf32> to vector<8x128xf32>
    %cst_89 = arith.constant 5.000000e-01 : f32
    %245 = vector.broadcast %cst_89 : f32 to vector<8x128xf32>
    %246 = arith.mulf %245, %244 : vector<8x128xf32>
    %247 = math.tanh %246 : vector<8x128xf32>
    %cst_90 = arith.constant 5.000000e-01 : f32
    %248 = vector.broadcast %cst_90 : f32 to vector<8x128xf32>
    %249 = arith.mulf %248, %247 : vector<8x128xf32>
    %cst_91 = arith.constant 5.000000e-01 : f32
    %250 = vector.broadcast %cst_91 : f32 to vector<8x128xf32>
    %251 = arith.addf %249, %250 : vector<8x128xf32>
    %252 = vector.extract_strided_slice %235 {offsets = [0, 256], sizes = [8, 128], strides = [1, 1]} : vector<8x512xf32> to vector<8x128xf32>
    %253 = math.tanh %252 : vector<8x128xf32>
    %254 = vector.extract_strided_slice %235 {offsets = [0, 384], sizes = [8, 128], strides = [1, 1]} : vector<8x512xf32> to vector<8x128xf32>
    %cst_92 = arith.constant 5.000000e-01 : f32
    %255 = vector.broadcast %cst_92 : f32 to vector<8x128xf32>
    %256 = arith.mulf %255, %254 : vector<8x128xf32>
    %257 = math.tanh %256 : vector<8x128xf32>
    %cst_93 = arith.constant 5.000000e-01 : f32
    %258 = vector.broadcast %cst_93 : f32 to vector<8x128xf32>
    %259 = arith.mulf %258, %257 : vector<8x128xf32>
    %cst_94 = arith.constant 5.000000e-01 : f32
    %260 = vector.broadcast %cst_94 : f32 to vector<8x128xf32>
    %261 = arith.addf %259, %260 : vector<8x128xf32>
    %262 = arith.mulf %251, %180 : vector<8x128xf32>
    %263 = arith.mulf %243, %253 : vector<8x128xf32>
    %264 = arith.addf %262, %263 : vector<8x128xf32>
    %265 = math.tanh %264 : vector<8x128xf32>
    %266 = arith.mulf %261, %265 : vector<8x128xf32>
    %c2_95 = arith.constant 2 : index
    %c0_96 = arith.constant 0 : index
    %c0_97 = arith.constant 0 : index
    %267 = vector.load %arg13[%c2_95, %c0_96, %c0_97] : memref<8x8x128xf32, #tpu.memory_space<vmem>>, vector<1x8x128xf32>
    %268 = vector.shape_cast %267 : vector<1x8x128xf32> to vector<8x128xf32>
    %269 = vector.shape_cast %266 : vector<8x128xf32> to vector<1x8x128xf32>
    tpu.vector_store %arg13[%c2_95, %c0_96, %c0_97], %269 {strides = array<i32>} : memref<8x8x128xf32, #tpu.memory_space<vmem>>, vector<1x8x128xf32>,
    %270 = vector.extract_strided_slice %13 {offsets = [3, 0, 0], sizes = [1, 8, 512], strides = [1, 1, 1]} : vector<8x8x512xf32> to vector<1x8x512xf32>
    %271 = vector.shape_cast %270 : vector<1x8x512xf32> to vector<8x512xf32>
    %cst_98 = arith.constant dense<0.000000e+00> : vector<8x512xf32>
    %272 = tpu.matmul %220, %1, %cst_98 {dimension_numbers = #tpu.dot_dimension_numbers<[1], [0], [0], [1], [0, 0, 1, 1], [], []>} : vector<8x128xf32>, vector<128x512xf32>, vector<8x512xf32> -> vector<8x512xf32>
    %273 = arith.addf %271, %272 : vector<8x512xf32>
    %274 = vector.extract_strided_slice %273 {offsets = [0, 0], sizes = [8, 128], strides = [1, 1]} : vector<8x512xf32> to vector<8x128xf32>
    %cst_99 = arith.constant 5.000000e-01 : f32
    %275 = vector.broadcast %cst_99 : f32 to vector<8x128xf32>
    %276 = arith.mulf %275, %274 : vector<8x128xf32>
    %277 = math.tanh %276 : vector<8x128xf32>
    %cst_100 = arith.constant 5.000000e-01 : f32
    %278 = vector.broadcast %cst_100 : f32 to vector<8x128xf32>
    %279 = arith.mulf %278, %277 : vector<8x128xf32>
    %cst_101 = arith.constant 5.000000e-01 : f32
    %280 = vector.broadcast %cst_101 : f32 to vector<8x128xf32>
    %281 = arith.addf %279, %280 : vector<8x128xf32>
    %282 = vector.extract_strided_slice %273 {offsets = [0, 128], sizes = [8, 128], strides = [1, 1]} : vector<8x512xf32> to vector<8x128xf32>
    %cst_102 = arith.constant 5.000000e-01 : f32
    %283 = vector.broadcast %cst_102 : f32 to vector<8x128xf32>
    %284 = arith.mulf %283, %282 : vector<8x128xf32>
    %285 = math.tanh %284 : vector<8x128xf32>
    %cst_103 = arith.constant 5.000000e-01 : f32
    %286 = vector.broadcast %cst_103 : f32 to vector<8x128xf32>
    %287 = arith.mulf %286, %285 : vector<8x128xf32>
    %cst_104 = arith.constant 5.000000e-01 : f32
    %288 = vector.broadcast %cst_104 : f32 to vector<8x128xf32>
    %289 = arith.addf %287, %288 : vector<8x128xf32>
    %290 = vector.extract_strided_slice %273 {offsets = [0, 256], sizes = [8, 128], strides = [1, 1]} : vector<8x512xf32> to vector<8x128xf32>
    %291 = math.tanh %290 : vector<8x128xf32>
    %292 = vector.extract_strided_slice %273 {offsets = [0, 384], sizes = [8, 128], strides = [1, 1]} : vector<8x512xf32> to vector<8x128xf32>
    %cst_105 = arith.constant 5.000000e-01 : f32
    %293 = vector.broadcast %cst_105 : f32 to vector<8x128xf32>
    %294 = arith.mulf %293, %292 : vector<8x128xf32>
    %295 = math.tanh %294 : vector<8x128xf32>
    %cst_106 = arith.constant 5.000000e-01 : f32
    %296 = vector.broadcast %cst_106 : f32 to vector<8x128xf32>
    %297 = arith.mulf %296, %295 : vector<8x128xf32>
    %cst_107 = arith.constant 5.000000e-01 : f32
    %298 = vector.broadcast %cst_107 : f32 to vector<8x128xf32>
    %299 = arith.addf %297, %298 : vector<8x128xf32>
    %300 = arith.mulf %289, %218 : vector<8x128xf32>
    %301 = arith.mulf %281, %291 : vector<8x128xf32>
    %302 = arith.addf %300, %301 : vector<8x128xf32>
    %303 = math.tanh %302 : vector<8x128xf32>
    %304 = arith.mulf %299, %303 : vector<8x128xf32>
    %c3_i32 = arith.constant 3 : i32
    %305 = vector.broadcast %c3_i32 : i32 to vector<8x1xi32>
    %306 = arith.cmpi sgt, %0, %305 : vector<8x1xi32>
    %cst_108 = arith.constant 0.000000e+00 : f32
    %307 = vector.shape_cast %306 : vector<8x1xi1> to vector<8x1xi1>
    %308 = vector.broadcast %307 : vector<8x1xi1> to vector<8x128xi1>
    %309 = vector.broadcast %cst_108 : f32 to vector<8x128xf32>
    %310 = arith.select %308, %304, %309 : vector<8x128xi1>, vector<8x128xf32>
    %cst_109 = arith.constant dense<0.000000e+00> : vector<8x640xf32>
    %311 = tpu.matmul %310, %3, %cst_109 {dimension_numbers = #tpu.dot_dimension_numbers<[1], [0], [0], [1], [0, 0, 1, 1], [], []>} : vector<8x128xf32>, vector<128x640xf32>, vector<8x640xf32> -> vector<8x640xf32>
    %312 = arith.addf %311, %16 : vector<8x640xf32>
    %313 = vector.extract_strided_slice %312 {offsets = [0, 0], sizes = [8, 128], strides = [1, 1]} : vector<8x640xf32> to vector<8x128xf32>
    %c3 = arith.constant 3 : index
    %c0_110 = arith.constant 0 : index
    %c0_111 = arith.constant 0 : index
    %314 = vector.load %arg11[%c3, %c0_110, %c0_111] : memref<8x8x128xf32, #tpu.memory_space<vmem>>, vector<1x8x128xf32>
    %315 = vector.shape_cast %314 : vector<1x8x128xf32> to vector<8x128xf32>
    %316 = vector.shape_cast %313 : vector<8x128xf32> to vector<1x8x128xf32>
    tpu.vector_store %arg11[%c3, %c0_110, %c0_111], %316 {strides = array<i32>} : memref<8x8x128xf32, #tpu.memory_space<vmem>>, vector<1x8x128xf32>,
    %317 = vector.extract_strided_slice %312 {offsets = [0, 128], sizes = [8, 512], strides = [1, 1]} : vector<8x640xf32> to vector<8x512xf32>
    %cst_112 = arith.constant dense<0.000000e+00> : vector<8x512xf32>
    %318 = tpu.matmul %266, %2, %cst_112 {dimension_numbers = #tpu.dot_dimension_numbers<[1], [0], [0], [1], [0, 0, 1, 1], [], []>} : vector<8x128xf32>, vector<128x512xf32>, vector<8x512xf32> -> vector<8x512xf32>
    %319 = arith.addf %317, %318 : vector<8x512xf32>
    %320 = vector.extract_strided_slice %319 {offsets = [0, 0], sizes = [8, 128], strides = [1, 1]} : vector<8x512xf32> to vector<8x128xf32>
    %cst_113 = arith.constant 5.000000e-01 : f32
    %321 = vector.broadcast %cst_113 : f32 to vector<8x128xf32>
    %322 = arith.mulf %321, %320 : vector<8x128xf32>
    %323 = math.tanh %322 : vector<8x128xf32>
    %cst_114 = arith.constant 5.000000e-01 : f32
    %324 = vector.broadcast %cst_114 : f32 to vector<8x128xf32>
    %325 = arith.mulf %324, %323 : vector<8x128xf32>
    %cst_115 = arith.constant 5.000000e-01 : f32
    %326 = vector.broadcast %cst_115 : f32 to vector<8x128xf32>
    %327 = arith.addf %325, %326 : vector<8x128xf32>
    %328 = vector.extract_strided_slice %319 {offsets = [0, 128], sizes = [8, 128], strides = [1, 1]} : vector<8x512xf32> to vector<8x128xf32>
    %cst_116 = arith.constant 5.000000e-01 : f32
    %329 = vector.broadcast %cst_116 : f32 to vector<8x128xf32>
    %330 = arith.mulf %329, %328 : vector<8x128xf32>
    %331 = math.tanh %330 : vector<8x128xf32>
    %cst_117 = arith.constant 5.000000e-01 : f32
    %332 = vector.broadcast %cst_117 : f32 to vector<8x128xf32>
    %333 = arith.mulf %332, %331 : vector<8x128xf32>
    %cst_118 = arith.constant 5.000000e-01 : f32
    %334 = vector.broadcast %cst_118 : f32 to vector<8x128xf32>
    %335 = arith.addf %333, %334 : vector<8x128xf32>
    %336 = vector.extract_strided_slice %319 {offsets = [0, 256], sizes = [8, 128], strides = [1, 1]} : vector<8x512xf32> to vector<8x128xf32>
    %337 = math.tanh %336 : vector<8x128xf32>
    %338 = vector.extract_strided_slice %319 {offsets = [0, 384], sizes = [8, 128], strides = [1, 1]} : vector<8x512xf32> to vector<8x128xf32>
    %cst_119 = arith.constant 5.000000e-01 : f32
    %339 = vector.broadcast %cst_119 : f32 to vector<8x128xf32>
    %340 = arith.mulf %339, %338 : vector<8x128xf32>
    %341 = math.tanh %340 : vector<8x128xf32>
    %cst_120 = arith.constant 5.000000e-01 : f32
    %342 = vector.broadcast %cst_120 : f32 to vector<8x128xf32>
    %343 = arith.mulf %342, %341 : vector<8x128xf32>
    %cst_121 = arith.constant 5.000000e-01 : f32
    %344 = vector.broadcast %cst_121 : f32 to vector<8x128xf32>
    %345 = arith.addf %343, %344 : vector<8x128xf32>
    %346 = arith.mulf %335, %264 : vector<8x128xf32>
    %347 = arith.mulf %327, %337 : vector<8x128xf32>
    %348 = arith.addf %346, %347 : vector<8x128xf32>
    %349 = math.tanh %348 : vector<8x128xf32>
    %350 = arith.mulf %345, %349 : vector<8x128xf32>
    %c3_122 = arith.constant 3 : index
    %c0_123 = arith.constant 0 : index
    %c0_124 = arith.constant 0 : index
    %351 = vector.load %arg13[%c3_122, %c0_123, %c0_124] : memref<8x8x128xf32, #tpu.memory_space<vmem>>, vector<1x8x128xf32>
    %352 = vector.shape_cast %351 : vector<1x8x128xf32> to vector<8x128xf32>
    %353 = vector.shape_cast %350 : vector<8x128xf32> to vector<1x8x128xf32>
    tpu.vector_store %arg13[%c3_122, %c0_123, %c0_124], %353 {strides = array<i32>} : memref<8x8x128xf32, #tpu.memory_space<vmem>>, vector<1x8x128xf32>,
    %354 = vector.extract_strided_slice %13 {offsets = [4, 0, 0], sizes = [1, 8, 512], strides = [1, 1, 1]} : vector<8x8x512xf32> to vector<1x8x512xf32>
    %355 = vector.shape_cast %354 : vector<1x8x512xf32> to vector<8x512xf32>
    %cst_125 = arith.constant dense<0.000000e+00> : vector<8x512xf32>
    %356 = tpu.matmul %304, %1, %cst_125 {dimension_numbers = #tpu.dot_dimension_numbers<[1], [0], [0], [1], [0, 0, 1, 1], [], []>} : vector<8x128xf32>, vector<128x512xf32>, vector<8x512xf32> -> vector<8x512xf32>
    %357 = arith.addf %355, %356 : vector<8x512xf32>
    %358 = vector.extract_strided_slice %357 {offsets = [0, 0], sizes = [8, 128], strides = [1, 1]} : vector<8x512xf32> to vector<8x128xf32>
    %cst_126 = arith.constant 5.000000e-01 : f32
    %359 = vector.broadcast %cst_126 : f32 to vector<8x128xf32>
    %360 = arith.mulf %359, %358 : vector<8x128xf32>
    %361 = math.tanh %360 : vector<8x128xf32>
    %cst_127 = arith.constant 5.000000e-01 : f32
    %362 = vector.broadcast %cst_127 : f32 to vector<8x128xf32>
    %363 = arith.mulf %362, %361 : vector<8x128xf32>
    %cst_128 = arith.constant 5.000000e-01 : f32
    %364 = vector.broadcast %cst_128 : f32 to vector<8x128xf32>
    %365 = arith.addf %363, %364 : vector<8x128xf32>
    %366 = vector.extract_strided_slice %357 {offsets = [0, 128], sizes = [8, 128], strides = [1, 1]} : vector<8x512xf32> to vector<8x128xf32>
    %cst_129 = arith.constant 5.000000e-01 : f32
    %367 = vector.broadcast %cst_129 : f32 to vector<8x128xf32>
    %368 = arith.mulf %367, %366 : vector<8x128xf32>
    %369 = math.tanh %368 : vector<8x128xf32>
    %cst_130 = arith.constant 5.000000e-01 : f32
    %370 = vector.broadcast %cst_130 : f32 to vector<8x128xf32>
    %371 = arith.mulf %370, %369 : vector<8x128xf32>
    %cst_131 = arith.constant 5.000000e-01 : f32
    %372 = vector.broadcast %cst_131 : f32 to vector<8x128xf32>
    %373 = arith.addf %371, %372 : vector<8x128xf32>
    %374 = vector.extract_strided_slice %357 {offsets = [0, 256], sizes = [8, 128], strides = [1, 1]} : vector<8x512xf32> to vector<8x128xf32>
    %375 = math.tanh %374 : vector<8x128xf32>
    %376 = vector.extract_strided_slice %357 {offsets = [0, 384], sizes = [8, 128], strides = [1, 1]} : vector<8x512xf32> to vector<8x128xf32>
    %cst_132 = arith.constant 5.000000e-01 : f32
    %377 = vector.broadcast %cst_132 : f32 to vector<8x128xf32>
    %378 = arith.mulf %377, %376 : vector<8x128xf32>
    %379 = math.tanh %378 : vector<8x128xf32>
    %cst_133 = arith.constant 5.000000e-01 : f32
    %380 = vector.broadcast %cst_133 : f32 to vector<8x128xf32>
    %381 = arith.mulf %380, %379 : vector<8x128xf32>
    %cst_134 = arith.constant 5.000000e-01 : f32
    %382 = vector.broadcast %cst_134 : f32 to vector<8x128xf32>
    %383 = arith.addf %381, %382 : vector<8x128xf32>
    %384 = arith.mulf %373, %302 : vector<8x128xf32>
    %385 = arith.mulf %365, %375 : vector<8x128xf32>
    %386 = arith.addf %384, %385 : vector<8x128xf32>
    %387 = math.tanh %386 : vector<8x128xf32>
    %388 = arith.mulf %383, %387 : vector<8x128xf32>
    %c4_i32 = arith.constant 4 : i32
    %389 = vector.broadcast %c4_i32 : i32 to vector<8x1xi32>
    %390 = arith.cmpi sgt, %0, %389 : vector<8x1xi32>
    %cst_135 = arith.constant 0.000000e+00 : f32
    %391 = vector.shape_cast %390 : vector<8x1xi1> to vector<8x1xi1>
    %392 = vector.broadcast %391 : vector<8x1xi1> to vector<8x128xi1>
    %393 = vector.broadcast %cst_135 : f32 to vector<8x128xf32>
    %394 = arith.select %392, %388, %393 : vector<8x128xi1>, vector<8x128xf32>
    %cst_136 = arith.constant dense<0.000000e+00> : vector<8x640xf32>
    %395 = tpu.matmul %394, %3, %cst_136 {dimension_numbers = #tpu.dot_dimension_numbers<[1], [0], [0], [1], [0, 0, 1, 1], [], []>} : vector<8x128xf32>, vector<128x640xf32>, vector<8x640xf32> -> vector<8x640xf32>
    %396 = arith.addf %395, %16 : vector<8x640xf32>
    %397 = vector.extract_strided_slice %396 {offsets = [0, 0], sizes = [8, 128], strides = [1, 1]} : vector<8x640xf32> to vector<8x128xf32>
    %c4 = arith.constant 4 : index
    %c0_137 = arith.constant 0 : index
    %c0_138 = arith.constant 0 : index
    %398 = vector.load %arg11[%c4, %c0_137, %c0_138] : memref<8x8x128xf32, #tpu.memory_space<vmem>>, vector<1x8x128xf32>
    %399 = vector.shape_cast %398 : vector<1x8x128xf32> to vector<8x128xf32>
    %400 = vector.shape_cast %397 : vector<8x128xf32> to vector<1x8x128xf32>
    tpu.vector_store %arg11[%c4, %c0_137, %c0_138], %400 {strides = array<i32>} : memref<8x8x128xf32, #tpu.memory_space<vmem>>, vector<1x8x128xf32>,
    %401 = vector.extract_strided_slice %396 {offsets = [0, 128], sizes = [8, 512], strides = [1, 1]} : vector<8x640xf32> to vector<8x512xf32>
    %cst_139 = arith.constant dense<0.000000e+00> : vector<8x512xf32>
    %402 = tpu.matmul %350, %2, %cst_139 {dimension_numbers = #tpu.dot_dimension_numbers<[1], [0], [0], [1], [0, 0, 1, 1], [], []>} : vector<8x128xf32>, vector<128x512xf32>, vector<8x512xf32> -> vector<8x512xf32>
    %403 = arith.addf %401, %402 : vector<8x512xf32>
    %404 = vector.extract_strided_slice %403 {offsets = [0, 0], sizes = [8, 128], strides = [1, 1]} : vector<8x512xf32> to vector<8x128xf32>
    %cst_140 = arith.constant 5.000000e-01 : f32
    %405 = vector.broadcast %cst_140 : f32 to vector<8x128xf32>
    %406 = arith.mulf %405, %404 : vector<8x128xf32>
    %407 = math.tanh %406 : vector<8x128xf32>
    %cst_141 = arith.constant 5.000000e-01 : f32
    %408 = vector.broadcast %cst_141 : f32 to vector<8x128xf32>
    %409 = arith.mulf %408, %407 : vector<8x128xf32>
    %cst_142 = arith.constant 5.000000e-01 : f32
    %410 = vector.broadcast %cst_142 : f32 to vector<8x128xf32>
    %411 = arith.addf %409, %410 : vector<8x128xf32>
    %412 = vector.extract_strided_slice %403 {offsets = [0, 128], sizes = [8, 128], strides = [1, 1]} : vector<8x512xf32> to vector<8x128xf32>
    %cst_143 = arith.constant 5.000000e-01 : f32
    %413 = vector.broadcast %cst_143 : f32 to vector<8x128xf32>
    %414 = arith.mulf %413, %412 : vector<8x128xf32>
    %415 = math.tanh %414 : vector<8x128xf32>
    %cst_144 = arith.constant 5.000000e-01 : f32
    %416 = vector.broadcast %cst_144 : f32 to vector<8x128xf32>
    %417 = arith.mulf %416, %415 : vector<8x128xf32>
    %cst_145 = arith.constant 5.000000e-01 : f32
    %418 = vector.broadcast %cst_145 : f32 to vector<8x128xf32>
    %419 = arith.addf %417, %418 : vector<8x128xf32>
    %420 = vector.extract_strided_slice %403 {offsets = [0, 256], sizes = [8, 128], strides = [1, 1]} : vector<8x512xf32> to vector<8x128xf32>
    %421 = math.tanh %420 : vector<8x128xf32>
    %422 = vector.extract_strided_slice %403 {offsets = [0, 384], sizes = [8, 128], strides = [1, 1]} : vector<8x512xf32> to vector<8x128xf32>
    %cst_146 = arith.constant 5.000000e-01 : f32
    %423 = vector.broadcast %cst_146 : f32 to vector<8x128xf32>
    %424 = arith.mulf %423, %422 : vector<8x128xf32>
    %425 = math.tanh %424 : vector<8x128xf32>
    %cst_147 = arith.constant 5.000000e-01 : f32
    %426 = vector.broadcast %cst_147 : f32 to vector<8x128xf32>
    %427 = arith.mulf %426, %425 : vector<8x128xf32>
    %cst_148 = arith.constant 5.000000e-01 : f32
    %428 = vector.broadcast %cst_148 : f32 to vector<8x128xf32>
    %429 = arith.addf %427, %428 : vector<8x128xf32>
    %430 = arith.mulf %419, %348 : vector<8x128xf32>
    %431 = arith.mulf %411, %421 : vector<8x128xf32>
    %432 = arith.addf %430, %431 : vector<8x128xf32>
    %433 = math.tanh %432 : vector<8x128xf32>
    %434 = arith.mulf %429, %433 : vector<8x128xf32>
    %c4_149 = arith.constant 4 : index
    %c0_150 = arith.constant 0 : index
    %c0_151 = arith.constant 0 : index
    %435 = vector.load %arg13[%c4_149, %c0_150, %c0_151] : memref<8x8x128xf32, #tpu.memory_space<vmem>>, vector<1x8x128xf32>
    %436 = vector.shape_cast %435 : vector<1x8x128xf32> to vector<8x128xf32>
    %437 = vector.shape_cast %434 : vector<8x128xf32> to vector<1x8x128xf32>
    tpu.vector_store %arg13[%c4_149, %c0_150, %c0_151], %437 {strides = array<i32>} : memref<8x8x128xf32, #tpu.memory_space<vmem>>, vector<1x8x128xf32>,
    %438 = vector.extract_strided_slice %13 {offsets = [5, 0, 0], sizes = [1, 8, 512], strides = [1, 1, 1]} : vector<8x8x512xf32> to vector<1x8x512xf32>
    %439 = vector.shape_cast %438 : vector<1x8x512xf32> to vector<8x512xf32>
    %cst_152 = arith.constant dense<0.000000e+00> : vector<8x512xf32>
    %440 = tpu.matmul %388, %1, %cst_152 {dimension_numbers = #tpu.dot_dimension_numbers<[1], [0], [0], [1], [0, 0, 1, 1], [], []>} : vector<8x128xf32>, vector<128x512xf32>, vector<8x512xf32> -> vector<8x512xf32>
    %441 = arith.addf %439, %440 : vector<8x512xf32>
    %442 = vector.extract_strided_slice %441 {offsets = [0, 0], sizes = [8, 128], strides = [1, 1]} : vector<8x512xf32> to vector<8x128xf32>
    %cst_153 = arith.constant 5.000000e-01 : f32
    %443 = vector.broadcast %cst_153 : f32 to vector<8x128xf32>
    %444 = arith.mulf %443, %442 : vector<8x128xf32>
    %445 = math.tanh %444 : vector<8x128xf32>
    %cst_154 = arith.constant 5.000000e-01 : f32
    %446 = vector.broadcast %cst_154 : f32 to vector<8x128xf32>
    %447 = arith.mulf %446, %445 : vector<8x128xf32>
    %cst_155 = arith.constant 5.000000e-01 : f32
    %448 = vector.broadcast %cst_155 : f32 to vector<8x128xf32>
    %449 = arith.addf %447, %448 : vector<8x128xf32>
    %450 = vector.extract_strided_slice %441 {offsets = [0, 128], sizes = [8, 128], strides = [1, 1]} : vector<8x512xf32> to vector<8x128xf32>
    %cst_156 = arith.constant 5.000000e-01 : f32
    %451 = vector.broadcast %cst_156 : f32 to vector<8x128xf32>
    %452 = arith.mulf %451, %450 : vector<8x128xf32>
    %453 = math.tanh %452 : vector<8x128xf32>
    %cst_157 = arith.constant 5.000000e-01 : f32
    %454 = vector.broadcast %cst_157 : f32 to vector<8x128xf32>
    %455 = arith.mulf %454, %453 : vector<8x128xf32>
    %cst_158 = arith.constant 5.000000e-01 : f32
    %456 = vector.broadcast %cst_158 : f32 to vector<8x128xf32>
    %457 = arith.addf %455, %456 : vector<8x128xf32>
    %458 = vector.extract_strided_slice %441 {offsets = [0, 256], sizes = [8, 128], strides = [1, 1]} : vector<8x512xf32> to vector<8x128xf32>
    %459 = math.tanh %458 : vector<8x128xf32>
    %460 = vector.extract_strided_slice %441 {offsets = [0, 384], sizes = [8, 128], strides = [1, 1]} : vector<8x512xf32> to vector<8x128xf32>
    %cst_159 = arith.constant 5.000000e-01 : f32
    %461 = vector.broadcast %cst_159 : f32 to vector<8x128xf32>
    %462 = arith.mulf %461, %460 : vector<8x128xf32>
    %463 = math.tanh %462 : vector<8x128xf32>
    %cst_160 = arith.constant 5.000000e-01 : f32
    %464 = vector.broadcast %cst_160 : f32 to vector<8x128xf32>
    %465 = arith.mulf %464, %463 : vector<8x128xf32>
    %cst_161 = arith.constant 5.000000e-01 : f32
    %466 = vector.broadcast %cst_161 : f32 to vector<8x128xf32>
    %467 = arith.addf %465, %466 : vector<8x128xf32>
    %468 = arith.mulf %457, %386 : vector<8x128xf32>
    %469 = arith.mulf %449, %459 : vector<8x128xf32>
    %470 = arith.addf %468, %469 : vector<8x128xf32>
    %471 = math.tanh %470 : vector<8x128xf32>
    %472 = arith.mulf %467, %471 : vector<8x128xf32>
    %c5_i32 = arith.constant 5 : i32
    %473 = vector.broadcast %c5_i32 : i32 to vector<8x1xi32>
    %474 = arith.cmpi sgt, %0, %473 : vector<8x1xi32>
    %cst_162 = arith.constant 0.000000e+00 : f32
    %475 = vector.shape_cast %474 : vector<8x1xi1> to vector<8x1xi1>
    %476 = vector.broadcast %475 : vector<8x1xi1> to vector<8x128xi1>
    %477 = vector.broadcast %cst_162 : f32 to vector<8x128xf32>
    %478 = arith.select %476, %472, %477 : vector<8x128xi1>, vector<8x128xf32>
    %cst_163 = arith.constant dense<0.000000e+00> : vector<8x640xf32>
    %479 = tpu.matmul %478, %3, %cst_163 {dimension_numbers = #tpu.dot_dimension_numbers<[1], [0], [0], [1], [0, 0, 1, 1], [], []>} : vector<8x128xf32>, vector<128x640xf32>, vector<8x640xf32> -> vector<8x640xf32>
    %480 = arith.addf %479, %16 : vector<8x640xf32>
    %481 = vector.extract_strided_slice %480 {offsets = [0, 0], sizes = [8, 128], strides = [1, 1]} : vector<8x640xf32> to vector<8x128xf32>
    %c5 = arith.constant 5 : index
    %c0_164 = arith.constant 0 : index
    %c0_165 = arith.constant 0 : index
    %482 = vector.load %arg11[%c5, %c0_164, %c0_165] : memref<8x8x128xf32, #tpu.memory_space<vmem>>, vector<1x8x128xf32>
    %483 = vector.shape_cast %482 : vector<1x8x128xf32> to vector<8x128xf32>
    %484 = vector.shape_cast %481 : vector<8x128xf32> to vector<1x8x128xf32>
    tpu.vector_store %arg11[%c5, %c0_164, %c0_165], %484 {strides = array<i32>} : memref<8x8x128xf32, #tpu.memory_space<vmem>>, vector<1x8x128xf32>,
    %485 = vector.extract_strided_slice %480 {offsets = [0, 128], sizes = [8, 512], strides = [1, 1]} : vector<8x640xf32> to vector<8x512xf32>
    %cst_166 = arith.constant dense<0.000000e+00> : vector<8x512xf32>
    %486 = tpu.matmul %434, %2, %cst_166 {dimension_numbers = #tpu.dot_dimension_numbers<[1], [0], [0], [1], [0, 0, 1, 1], [], []>} : vector<8x128xf32>, vector<128x512xf32>, vector<8x512xf32> -> vector<8x512xf32>
    %487 = arith.addf %485, %486 : vector<8x512xf32>
    %488 = vector.extract_strided_slice %487 {offsets = [0, 0], sizes = [8, 128], strides = [1, 1]} : vector<8x512xf32> to vector<8x128xf32>
    %cst_167 = arith.constant 5.000000e-01 : f32
    %489 = vector.broadcast %cst_167 : f32 to vector<8x128xf32>
    %490 = arith.mulf %489, %488 : vector<8x128xf32>
    %491 = math.tanh %490 : vector<8x128xf32>
    %cst_168 = arith.constant 5.000000e-01 : f32
    %492 = vector.broadcast %cst_168 : f32 to vector<8x128xf32>
    %493 = arith.mulf %492, %491 : vector<8x128xf32>
    %cst_169 = arith.constant 5.000000e-01 : f32
    %494 = vector.broadcast %cst_169 : f32 to vector<8x128xf32>
    %495 = arith.addf %493, %494 : vector<8x128xf32>
    %496 = vector.extract_strided_slice %487 {offsets = [0, 128], sizes = [8, 128], strides = [1, 1]} : vector<8x512xf32> to vector<8x128xf32>
    %cst_170 = arith.constant 5.000000e-01 : f32
    %497 = vector.broadcast %cst_170 : f32 to vector<8x128xf32>
    %498 = arith.mulf %497, %496 : vector<8x128xf32>
    %499 = math.tanh %498 : vector<8x128xf32>
    %cst_171 = arith.constant 5.000000e-01 : f32
    %500 = vector.broadcast %cst_171 : f32 to vector<8x128xf32>
    %501 = arith.mulf %500, %499 : vector<8x128xf32>
    %cst_172 = arith.constant 5.000000e-01 : f32
    %502 = vector.broadcast %cst_172 : f32 to vector<8x128xf32>
    %503 = arith.addf %501, %502 : vector<8x128xf32>
    %504 = vector.extract_strided_slice %487 {offsets = [0, 256], sizes = [8, 128], strides = [1, 1]} : vector<8x512xf32> to vector<8x128xf32>
    %505 = math.tanh %504 : vector<8x128xf32>
    %506 = vector.extract_strided_slice %487 {offsets = [0, 384], sizes = [8, 128], strides = [1, 1]} : vector<8x512xf32> to vector<8x128xf32>
    %cst_173 = arith.constant 5.000000e-01 : f32
    %507 = vector.broadcast %cst_173 : f32 to vector<8x128xf32>
    %508 = arith.mulf %507, %506 : vector<8x128xf32>
    %509 = math.tanh %508 : vector<8x128xf32>
    %cst_174 = arith.constant 5.000000e-01 : f32
    %510 = vector.broadcast %cst_174 : f32 to vector<8x128xf32>
    %511 = arith.mulf %510, %509 : vector<8x128xf32>
    %cst_175 = arith.constant 5.000000e-01 : f32
    %512 = vector.broadcast %cst_175 : f32 to vector<8x128xf32>
    %513 = arith.addf %511, %512 : vector<8x128xf32>
    %514 = arith.mulf %503, %432 : vector<8x128xf32>
    %515 = arith.mulf %495, %505 : vector<8x128xf32>
    %516 = arith.addf %514, %515 : vector<8x128xf32>
    %517 = math.tanh %516 : vector<8x128xf32>
    %518 = arith.mulf %513, %517 : vector<8x128xf32>
    %c5_176 = arith.constant 5 : index
    %c0_177 = arith.constant 0 : index
    %c0_178 = arith.constant 0 : index
    %519 = vector.load %arg13[%c5_176, %c0_177, %c0_178] : memref<8x8x128xf32, #tpu.memory_space<vmem>>, vector<1x8x128xf32>
    %520 = vector.shape_cast %519 : vector<1x8x128xf32> to vector<8x128xf32>
    %521 = vector.shape_cast %518 : vector<8x128xf32> to vector<1x8x128xf32>
    tpu.vector_store %arg13[%c5_176, %c0_177, %c0_178], %521 {strides = array<i32>} : memref<8x8x128xf32, #tpu.memory_space<vmem>>, vector<1x8x128xf32>,
    %522 = vector.extract_strided_slice %13 {offsets = [6, 0, 0], sizes = [1, 8, 512], strides = [1, 1, 1]} : vector<8x8x512xf32> to vector<1x8x512xf32>
    %523 = vector.shape_cast %522 : vector<1x8x512xf32> to vector<8x512xf32>
    %cst_179 = arith.constant dense<0.000000e+00> : vector<8x512xf32>
    %524 = tpu.matmul %472, %1, %cst_179 {dimension_numbers = #tpu.dot_dimension_numbers<[1], [0], [0], [1], [0, 0, 1, 1], [], []>} : vector<8x128xf32>, vector<128x512xf32>, vector<8x512xf32> -> vector<8x512xf32>
    %525 = arith.addf %523, %524 : vector<8x512xf32>
    %526 = vector.extract_strided_slice %525 {offsets = [0, 0], sizes = [8, 128], strides = [1, 1]} : vector<8x512xf32> to vector<8x128xf32>
    %cst_180 = arith.constant 5.000000e-01 : f32
    %527 = vector.broadcast %cst_180 : f32 to vector<8x128xf32>
    %528 = arith.mulf %527, %526 : vector<8x128xf32>
    %529 = math.tanh %528 : vector<8x128xf32>
    %cst_181 = arith.constant 5.000000e-01 : f32
    %530 = vector.broadcast %cst_181 : f32 to vector<8x128xf32>
    %531 = arith.mulf %530, %529 : vector<8x128xf32>
    %cst_182 = arith.constant 5.000000e-01 : f32
    %532 = vector.broadcast %cst_182 : f32 to vector<8x128xf32>
    %533 = arith.addf %531, %532 : vector<8x128xf32>
    %534 = vector.extract_strided_slice %525 {offsets = [0, 128], sizes = [8, 128], strides = [1, 1]} : vector<8x512xf32> to vector<8x128xf32>
    %cst_183 = arith.constant 5.000000e-01 : f32
    %535 = vector.broadcast %cst_183 : f32 to vector<8x128xf32>
    %536 = arith.mulf %535, %534 : vector<8x128xf32>
    %537 = math.tanh %536 : vector<8x128xf32>
    %cst_184 = arith.constant 5.000000e-01 : f32
    %538 = vector.broadcast %cst_184 : f32 to vector<8x128xf32>
    %539 = arith.mulf %538, %537 : vector<8x128xf32>
    %cst_185 = arith.constant 5.000000e-01 : f32
    %540 = vector.broadcast %cst_185 : f32 to vector<8x128xf32>
    %541 = arith.addf %539, %540 : vector<8x128xf32>
    %542 = vector.extract_strided_slice %525 {offsets = [0, 256], sizes = [8, 128], strides = [1, 1]} : vector<8x512xf32> to vector<8x128xf32>
    %543 = math.tanh %542 : vector<8x128xf32>
    %544 = vector.extract_strided_slice %525 {offsets = [0, 384], sizes = [8, 128], strides = [1, 1]} : vector<8x512xf32> to vector<8x128xf32>
    %cst_186 = arith.constant 5.000000e-01 : f32
    %545 = vector.broadcast %cst_186 : f32 to vector<8x128xf32>
    %546 = arith.mulf %545, %544 : vector<8x128xf32>
    %547 = math.tanh %546 : vector<8x128xf32>
    %cst_187 = arith.constant 5.000000e-01 : f32
    %548 = vector.broadcast %cst_187 : f32 to vector<8x128xf32>
    %549 = arith.mulf %548, %547 : vector<8x128xf32>
    %cst_188 = arith.constant 5.000000e-01 : f32
    %550 = vector.broadcast %cst_188 : f32 to vector<8x128xf32>
    %551 = arith.addf %549, %550 : vector<8x128xf32>
    %552 = arith.mulf %541, %470 : vector<8x128xf32>
    %553 = arith.mulf %533, %543 : vector<8x128xf32>
    %554 = arith.addf %552, %553 : vector<8x128xf32>
    %555 = math.tanh %554 : vector<8x128xf32>
    %556 = arith.mulf %551, %555 : vector<8x128xf32>
    %c6_i32 = arith.constant 6 : i32
    %557 = vector.broadcast %c6_i32 : i32 to vector<8x1xi32>
    %558 = arith.cmpi sgt, %0, %557 : vector<8x1xi32>
    %cst_189 = arith.constant 0.000000e+00 : f32
    %559 = vector.shape_cast %558 : vector<8x1xi1> to vector<8x1xi1>
    %560 = vector.broadcast %559 : vector<8x1xi1> to vector<8x128xi1>
    %561 = vector.broadcast %cst_189 : f32 to vector<8x128xf32>
    %562 = arith.select %560, %556, %561 : vector<8x128xi1>, vector<8x128xf32>
    %cst_190 = arith.constant dense<0.000000e+00> : vector<8x640xf32>
    %563 = tpu.matmul %562, %3, %cst_190 {dimension_numbers = #tpu.dot_dimension_numbers<[1], [0], [0], [1], [0, 0, 1, 1], [], []>} : vector<8x128xf32>, vector<128x640xf32>, vector<8x640xf32> -> vector<8x640xf32>
    %564 = arith.addf %563, %16 : vector<8x640xf32>
    %565 = vector.extract_strided_slice %564 {offsets = [0, 0], sizes = [8, 128], strides = [1, 1]} : vector<8x640xf32> to vector<8x128xf32>
    %c6 = arith.constant 6 : index
    %c0_191 = arith.constant 0 : index
    %c0_192 = arith.constant 0 : index
    %566 = vector.load %arg11[%c6, %c0_191, %c0_192] : memref<8x8x128xf32, #tpu.memory_space<vmem>>, vector<1x8x128xf32>
    %567 = vector.shape_cast %566 : vector<1x8x128xf32> to vector<8x128xf32>
    %568 = vector.shape_cast %565 : vector<8x128xf32> to vector<1x8x128xf32>
    tpu.vector_store %arg11[%c6, %c0_191, %c0_192], %568 {strides = array<i32>} : memref<8x8x128xf32, #tpu.memory_space<vmem>>, vector<1x8x128xf32>,
    %569 = vector.extract_strided_slice %564 {offsets = [0, 128], sizes = [8, 512], strides = [1, 1]} : vector<8x640xf32> to vector<8x512xf32>
    %cst_193 = arith.constant dense<0.000000e+00> : vector<8x512xf32>
    %570 = tpu.matmul %518, %2, %cst_193 {dimension_numbers = #tpu.dot_dimension_numbers<[1], [0], [0], [1], [0, 0, 1, 1], [], []>} : vector<8x128xf32>, vector<128x512xf32>, vector<8x512xf32> -> vector<8x512xf32>
    %571 = arith.addf %569, %570 : vector<8x512xf32>
    %572 = vector.extract_strided_slice %571 {offsets = [0, 0], sizes = [8, 128], strides = [1, 1]} : vector<8x512xf32> to vector<8x128xf32>
    %cst_194 = arith.constant 5.000000e-01 : f32
    %573 = vector.broadcast %cst_194 : f32 to vector<8x128xf32>
    %574 = arith.mulf %573, %572 : vector<8x128xf32>
    %575 = math.tanh %574 : vector<8x128xf32>
    %cst_195 = arith.constant 5.000000e-01 : f32
    %576 = vector.broadcast %cst_195 : f32 to vector<8x128xf32>
    %577 = arith.mulf %576, %575 : vector<8x128xf32>
    %cst_196 = arith.constant 5.000000e-01 : f32
    %578 = vector.broadcast %cst_196 : f32 to vector<8x128xf32>
    %579 = arith.addf %577, %578 : vector<8x128xf32>
    %580 = vector.extract_strided_slice %571 {offsets = [0, 128], sizes = [8, 128], strides = [1, 1]} : vector<8x512xf32> to vector<8x128xf32>
    %cst_197 = arith.constant 5.000000e-01 : f32
    %581 = vector.broadcast %cst_197 : f32 to vector<8x128xf32>
    %582 = arith.mulf %581, %580 : vector<8x128xf32>
    %583 = math.tanh %582 : vector<8x128xf32>
    %cst_198 = arith.constant 5.000000e-01 : f32
    %584 = vector.broadcast %cst_198 : f32 to vector<8x128xf32>
    %585 = arith.mulf %584, %583 : vector<8x128xf32>
    %cst_199 = arith.constant 5.000000e-01 : f32
    %586 = vector.broadcast %cst_199 : f32 to vector<8x128xf32>
    %587 = arith.addf %585, %586 : vector<8x128xf32>
    %588 = vector.extract_strided_slice %571 {offsets = [0, 256], sizes = [8, 128], strides = [1, 1]} : vector<8x512xf32> to vector<8x128xf32>
    %589 = math.tanh %588 : vector<8x128xf32>
    %590 = vector.extract_strided_slice %571 {offsets = [0, 384], sizes = [8, 128], strides = [1, 1]} : vector<8x512xf32> to vector<8x128xf32>
    %cst_200 = arith.constant 5.000000e-01 : f32
    %591 = vector.broadcast %cst_200 : f32 to vector<8x128xf32>
    %592 = arith.mulf %591, %590 : vector<8x128xf32>
    %593 = math.tanh %592 : vector<8x128xf32>
    %cst_201 = arith.constant 5.000000e-01 : f32
    %594 = vector.broadcast %cst_201 : f32 to vector<8x128xf32>
    %595 = arith.mulf %594, %593 : vector<8x128xf32>
    %cst_202 = arith.constant 5.000000e-01 : f32
    %596 = vector.broadcast %cst_202 : f32 to vector<8x128xf32>
    %597 = arith.addf %595, %596 : vector<8x128xf32>
    %598 = arith.mulf %587, %516 : vector<8x128xf32>
    %599 = arith.mulf %579, %589 : vector<8x128xf32>
    %600 = arith.addf %598, %599 : vector<8x128xf32>
    %601 = math.tanh %600 : vector<8x128xf32>
    %602 = arith.mulf %597, %601 : vector<8x128xf32>
    %c6_203 = arith.constant 6 : index
    %c0_204 = arith.constant 0 : index
    %c0_205 = arith.constant 0 : index
    %603 = vector.load %arg13[%c6_203, %c0_204, %c0_205] : memref<8x8x128xf32, #tpu.memory_space<vmem>>, vector<1x8x128xf32>
    %604 = vector.shape_cast %603 : vector<1x8x128xf32> to vector<8x128xf32>
    %605 = vector.shape_cast %602 : vector<8x128xf32> to vector<1x8x128xf32>
    tpu.vector_store %arg13[%c6_203, %c0_204, %c0_205], %605 {strides = array<i32>} : memref<8x8x128xf32, #tpu.memory_space<vmem>>, vector<1x8x128xf32>,
    %606 = vector.extract_strided_slice %13 {offsets = [7, 0, 0], sizes = [1, 8, 512], strides = [1, 1, 1]} : vector<8x8x512xf32> to vector<1x8x512xf32>
    %607 = vector.shape_cast %606 : vector<1x8x512xf32> to vector<8x512xf32>
    %cst_206 = arith.constant dense<0.000000e+00> : vector<8x512xf32>
    %608 = tpu.matmul %556, %1, %cst_206 {dimension_numbers = #tpu.dot_dimension_numbers<[1], [0], [0], [1], [0, 0, 1, 1], [], []>} : vector<8x128xf32>, vector<128x512xf32>, vector<8x512xf32> -> vector<8x512xf32>
    %609 = arith.addf %607, %608 : vector<8x512xf32>
    %610 = vector.extract_strided_slice %609 {offsets = [0, 0], sizes = [8, 128], strides = [1, 1]} : vector<8x512xf32> to vector<8x128xf32>
    %cst_207 = arith.constant 5.000000e-01 : f32
    %611 = vector.broadcast %cst_207 : f32 to vector<8x128xf32>
    %612 = arith.mulf %611, %610 : vector<8x128xf32>
    %613 = math.tanh %612 : vector<8x128xf32>
    %cst_208 = arith.constant 5.000000e-01 : f32
    %614 = vector.broadcast %cst_208 : f32 to vector<8x128xf32>
    %615 = arith.mulf %614, %613 : vector<8x128xf32>
    %cst_209 = arith.constant 5.000000e-01 : f32
    %616 = vector.broadcast %cst_209 : f32 to vector<8x128xf32>
    %617 = arith.addf %615, %616 : vector<8x128xf32>
    %618 = vector.extract_strided_slice %609 {offsets = [0, 128], sizes = [8, 128], strides = [1, 1]} : vector<8x512xf32> to vector<8x128xf32>
    %cst_210 = arith.constant 5.000000e-01 : f32
    %619 = vector.broadcast %cst_210 : f32 to vector<8x128xf32>
    %620 = arith.mulf %619, %618 : vector<8x128xf32>
    %621 = math.tanh %620 : vector<8x128xf32>
    %cst_211 = arith.constant 5.000000e-01 : f32
    %622 = vector.broadcast %cst_211 : f32 to vector<8x128xf32>
    %623 = arith.mulf %622, %621 : vector<8x128xf32>
    %cst_212 = arith.constant 5.000000e-01 : f32
    %624 = vector.broadcast %cst_212 : f32 to vector<8x128xf32>
    %625 = arith.addf %623, %624 : vector<8x128xf32>
    %626 = vector.extract_strided_slice %609 {offsets = [0, 256], sizes = [8, 128], strides = [1, 1]} : vector<8x512xf32> to vector<8x128xf32>
    %627 = math.tanh %626 : vector<8x128xf32>
    %628 = vector.extract_strided_slice %609 {offsets = [0, 384], sizes = [8, 128], strides = [1, 1]} : vector<8x512xf32> to vector<8x128xf32>
    %cst_213 = arith.constant 5.000000e-01 : f32
    %629 = vector.broadcast %cst_213 : f32 to vector<8x128xf32>
    %630 = arith.mulf %629, %628 : vector<8x128xf32>
    %631 = math.tanh %630 : vector<8x128xf32>
    %cst_214 = arith.constant 5.000000e-01 : f32
    %632 = vector.broadcast %cst_214 : f32 to vector<8x128xf32>
    %633 = arith.mulf %632, %631 : vector<8x128xf32>
    %cst_215 = arith.constant 5.000000e-01 : f32
    %634 = vector.broadcast %cst_215 : f32 to vector<8x128xf32>
    %635 = arith.addf %633, %634 : vector<8x128xf32>
    %636 = arith.mulf %625, %554 : vector<8x128xf32>
    %637 = arith.mulf %617, %627 : vector<8x128xf32>
    %638 = arith.addf %636, %637 : vector<8x128xf32>
    %639 = math.tanh %638 : vector<8x128xf32>
    %640 = arith.mulf %635, %639 : vector<8x128xf32>
    %c7_i32 = arith.constant 7 : i32
    %641 = vector.broadcast %c7_i32 : i32 to vector<8x1xi32>
    %642 = arith.cmpi sgt, %0, %641 : vector<8x1xi32>
    %cst_216 = arith.constant 0.000000e+00 : f32
    %643 = vector.shape_cast %642 : vector<8x1xi1> to vector<8x1xi1>
    %644 = vector.broadcast %643 : vector<8x1xi1> to vector<8x128xi1>
    %645 = vector.broadcast %cst_216 : f32 to vector<8x128xf32>
    %646 = arith.select %644, %640, %645 : vector<8x128xi1>, vector<8x128xf32>
    %cst_217 = arith.constant dense<0.000000e+00> : vector<8x640xf32>
    %647 = tpu.matmul %646, %3, %cst_217 {dimension_numbers = #tpu.dot_dimension_numbers<[1], [0], [0], [1], [0, 0, 1, 1], [], []>} : vector<8x128xf32>, vector<128x640xf32>, vector<8x640xf32> -> vector<8x640xf32>
    %648 = arith.addf %647, %16 : vector<8x640xf32>
    %649 = vector.extract_strided_slice %648 {offsets = [0, 0], sizes = [8, 128], strides = [1, 1]} : vector<8x640xf32> to vector<8x128xf32>
    %c7 = arith.constant 7 : index
    %c0_218 = arith.constant 0 : index
    %c0_219 = arith.constant 0 : index
    %650 = vector.load %arg11[%c7, %c0_218, %c0_219] : memref<8x8x128xf32, #tpu.memory_space<vmem>>, vector<1x8x128xf32>
    %651 = vector.shape_cast %650 : vector<1x8x128xf32> to vector<8x128xf32>
    %652 = vector.shape_cast %649 : vector<8x128xf32> to vector<1x8x128xf32>
    tpu.vector_store %arg11[%c7, %c0_218, %c0_219], %652 {strides = array<i32>} : memref<8x8x128xf32, #tpu.memory_space<vmem>>, vector<1x8x128xf32>,
    %653 = vector.extract_strided_slice %648 {offsets = [0, 128], sizes = [8, 512], strides = [1, 1]} : vector<8x640xf32> to vector<8x512xf32>
    %cst_220 = arith.constant dense<0.000000e+00> : vector<8x512xf32>
    %654 = tpu.matmul %602, %2, %cst_220 {dimension_numbers = #tpu.dot_dimension_numbers<[1], [0], [0], [1], [0, 0, 1, 1], [], []>} : vector<8x128xf32>, vector<128x512xf32>, vector<8x512xf32> -> vector<8x512xf32>
    %655 = arith.addf %653, %654 : vector<8x512xf32>
    %656 = vector.extract_strided_slice %655 {offsets = [0, 0], sizes = [8, 128], strides = [1, 1]} : vector<8x512xf32> to vector<8x128xf32>
    %cst_221 = arith.constant 5.000000e-01 : f32
    %657 = vector.broadcast %cst_221 : f32 to vector<8x128xf32>
    %658 = arith.mulf %657, %656 : vector<8x128xf32>
    %659 = math.tanh %658 : vector<8x128xf32>
    %cst_222 = arith.constant 5.000000e-01 : f32
    %660 = vector.broadcast %cst_222 : f32 to vector<8x128xf32>
    %661 = arith.mulf %660, %659 : vector<8x128xf32>
    %cst_223 = arith.constant 5.000000e-01 : f32
    %662 = vector.broadcast %cst_223 : f32 to vector<8x128xf32>
    %663 = arith.addf %661, %662 : vector<8x128xf32>
    %664 = vector.extract_strided_slice %655 {offsets = [0, 128], sizes = [8, 128], strides = [1, 1]} : vector<8x512xf32> to vector<8x128xf32>
    %cst_224 = arith.constant 5.000000e-01 : f32
    %665 = vector.broadcast %cst_224 : f32 to vector<8x128xf32>
    %666 = arith.mulf %665, %664 : vector<8x128xf32>
    %667 = math.tanh %666 : vector<8x128xf32>
    %cst_225 = arith.constant 5.000000e-01 : f32
    %668 = vector.broadcast %cst_225 : f32 to vector<8x128xf32>
    %669 = arith.mulf %668, %667 : vector<8x128xf32>
    %cst_226 = arith.constant 5.000000e-01 : f32
    %670 = vector.broadcast %cst_226 : f32 to vector<8x128xf32>
    %671 = arith.addf %669, %670 : vector<8x128xf32>
    %672 = vector.extract_strided_slice %655 {offsets = [0, 256], sizes = [8, 128], strides = [1, 1]} : vector<8x512xf32> to vector<8x128xf32>
    %673 = math.tanh %672 : vector<8x128xf32>
    %674 = vector.extract_strided_slice %655 {offsets = [0, 384], sizes = [8, 128], strides = [1, 1]} : vector<8x512xf32> to vector<8x128xf32>
    %cst_227 = arith.constant 5.000000e-01 : f32
    %675 = vector.broadcast %cst_227 : f32 to vector<8x128xf32>
    %676 = arith.mulf %675, %674 : vector<8x128xf32>
    %677 = math.tanh %676 : vector<8x128xf32>
    %cst_228 = arith.constant 5.000000e-01 : f32
    %678 = vector.broadcast %cst_228 : f32 to vector<8x128xf32>
    %679 = arith.mulf %678, %677 : vector<8x128xf32>
    %cst_229 = arith.constant 5.000000e-01 : f32
    %680 = vector.broadcast %cst_229 : f32 to vector<8x128xf32>
    %681 = arith.addf %679, %680 : vector<8x128xf32>
    %682 = arith.mulf %671, %600 : vector<8x128xf32>
    %683 = arith.mulf %663, %673 : vector<8x128xf32>
    %684 = arith.addf %682, %683 : vector<8x128xf32>
    %685 = math.tanh %684 : vector<8x128xf32>
    %686 = arith.mulf %681, %685 : vector<8x128xf32>
    %c7_230 = arith.constant 7 : index
    %c0_231 = arith.constant 0 : index
    %c0_232 = arith.constant 0 : index
    %687 = vector.load %arg13[%c7_230, %c0_231, %c0_232] : memref<8x8x128xf32, #tpu.memory_space<vmem>>, vector<1x8x128xf32>
    %688 = vector.shape_cast %687 : vector<1x8x128xf32> to vector<8x128xf32>
    %689 = vector.shape_cast %686 : vector<8x128xf32> to vector<1x8x128xf32>
    tpu.vector_store %arg13[%c7_230, %c0_231, %c0_232], %689 {strides = array<i32>} : memref<8x8x128xf32, #tpu.memory_space<vmem>>, vector<1x8x128xf32>,
    %c0_233 = arith.constant 0 : index
    %c0_234 = arith.constant 0 : index
    %c0_235 = arith.constant 0 : index
    %690 = vector.load %arg13[%c0_233, %c0_234, %c0_235] : memref<8x8x128xf32, #tpu.memory_space<vmem>>, vector<8x8x128xf32>
    %691 = vector.shape_cast %690 : vector<8x8x128xf32> to vector<64x128xf32>
    %c0_236 = arith.constant 0 : index
    %c0_237 = arith.constant 0 : index
    %692 = vector.load %arg9[%c0_236, %c0_237] : memref<128x128xf32, #tpu.memory_space<vmem>>, vector<128x128xf32>
    %cst_238 = arith.constant dense<0.000000e+00> : vector<64x128xf32>
    %693 = tpu.matmul %691, %692, %cst_238 {dimension_numbers = #tpu.dot_dimension_numbers<[1], [0], [0], [1], [0, 0, 1, 1], [], []>} : vector<64x128xf32>, vector<128x128xf32>, vector<64x128xf32> -> vector<64x128xf32>
    %c0_239 = arith.constant 0 : index
    %c0_240 = arith.constant 0 : index
    %694 = vector.load %arg10[%c0_239, %c0_240] : memref<1x128xf32, #tpu.memory_space<vmem>>, vector<1x128xf32>
    %695 = vector.broadcast %694 : vector<1x128xf32> to vector<64x128xf32>
    %696 = arith.addf %693, %695 : vector<64x128xf32>
    %697 = vector.shape_cast %696 : vector<64x128xf32> to vector<8x8x128xf32>
    %c0_241 = arith.constant 0 : index
    %c0_242 = arith.constant 0 : index
    %c0_243 = arith.constant 0 : index
    %698 = vector.load %arg12[%c0_241, %c0_242, %c0_243] : memref<8x8x128xf32, #tpu.memory_space<vmem>>, vector<8x8x128xf32>
    tpu.vector_store %arg12[%c0_241, %c0_242, %c0_243], %697 {strides = array<i32>} : memref<8x8x128xf32, #tpu.memory_space<vmem>>, vector<8x8x128xf32>,
    return
  }
  func.func @transform_0(%arg0: i32) -> (i32, i32, i32) {
    %c0_i32 = arith.constant 0 : i32
    %c0_i32_0 = arith.constant 0 : i32
    %c0_i32_1 = arith.constant 0 : i32
    return %c0_i32, %arg0, %c0_i32_0 : i32, i32, i32
  }
  func.func @transform_1(%arg0: i32) -> (i32, i32) {
    %c0_i32 = arith.constant 0 : i32
    %c0_i32_0 = arith.constant 0 : i32
    return %arg0, %c0_i32 : i32, i32
  }
  func.func @transform_2(%arg0: i32) -> (i32, i32) {
    %c0_i32 = arith.constant 0 : i32
    %c0_i32_0 = arith.constant 0 : i32
    %c0_i32_1 = arith.constant 0 : i32
    return %c0_i32, %c0_i32_0 : i32, i32
  }
  func.func @transform_3(%arg0: i32) -> (i32, i32) {
    %c0_i32 = arith.constant 0 : i32
    %c0_i32_0 = arith.constant 0 : i32
    %c0_i32_1 = arith.constant 0 : i32
    return %c0_i32, %c0_i32_0 : i32, i32
  }
  func.func @transform_4(%arg0: i32) -> (i32, i32) {
    %c0_i32 = arith.constant 0 : i32
    %c0_i32_0 = arith.constant 0 : i32
    %c0_i32_1 = arith.constant 0 : i32
    return %c0_i32, %c0_i32_0 : i32, i32
  }
  func.func @transform_5(%arg0: i32) -> (i32, i32) {
    %c0_i32 = arith.constant 0 : i32
    %c0_i32_0 = arith.constant 0 : i32
    %c0_i32_1 = arith.constant 0 : i32
    return %c0_i32, %c0_i32_0 : i32, i32
  }
  func.func @transform_6(%arg0: i32) -> (i32, i32) {
    %c0_i32 = arith.constant 0 : i32
    %c0_i32_0 = arith.constant 0 : i32
    %c0_i32_1 = arith.constant 0 : i32
    return %c0_i32, %c0_i32_0 : i32, i32
  }
  func.func @transform_7(%arg0: i32) -> (i32, i32) {
    %c0_i32 = arith.constant 0 : i32
    %c0_i32_0 = arith.constant 0 : i32
    %c0_i32_1 = arith.constant 0 : i32
    return %c0_i32, %c0_i32_0 : i32, i32
  }
  func.func @transform_8(%arg0: i32) -> (i32, i32) {
    %c0_i32 = arith.constant 0 : i32
    %c0_i32_0 = arith.constant 0 : i32
    %c0_i32_1 = arith.constant 0 : i32
    return %c0_i32, %c0_i32_0 : i32, i32
  }
  func.func @transform_9(%arg0: i32) -> (i32, i32) {
    %c0_i32 = arith.constant 0 : i32
    %c0_i32_0 = arith.constant 0 : i32
    %c0_i32_1 = arith.constant 0 : i32
    return %c0_i32, %c0_i32_0 : i32, i32
  }
  func.func @transform_10(%arg0: i32) -> (i32, i32, i32) {
    %c0_i32 = arith.constant 0 : i32
    %c0_i32_0 = arith.constant 0 : i32
    %c0_i32_1 = arith.constant 0 : i32
    return %c0_i32, %arg0, %c0_i32_0 : i32, i32, i32
  }
  func.func @transform_11(%arg0: i32) -> (i32, i32, i32) {
    %c0_i32 = arith.constant 0 : i32
    %c0_i32_0 = arith.constant 0 : i32
    %c0_i32_1 = arith.constant 0 : i32
    return %c0_i32, %arg0, %c0_i32_0 : i32, i32, i32
  }
}

</mosaic_0001>

<bundles_post_ra>
// kernel: scaling_ae_forward.1
= control target key start
LH: loop header
LB: loop body
LE: loop exit
PB: predicated region body
PF: predicated region fallthrough
CT: control target
= control target key end

     0   :  { %17 = vsyncpa [#allocation4], 0  ;;  %s7851_s0 = inlined_call_operand.vmem [shape: f32[8,8,1], index: 0, kind: input, shape index: {}]   ;;  %s7852_s1 = inlined_call_operand.vmem [shape: s32[8,1], index: 1, kind: input, shape index: {}]   ;;  %s7853_s2 = inlined_call_operand.vmem [shape: f32[1,512], index: 2, kind: input, shape index: {}]   ;;  %s7854_s3 = inlined_call_operand.vmem [shape: f32[1,512], index: 3, kind: input, shape index: {}]   ;;  %s7855_s4 = inlined_call_operand.hbm [shape: f32[128,512], index: 4, kind: input, shape index: {}]   ;;  %s7856_s5 = inlined_call_operand.hbm [shape: f32[128,640], index: 5, kind: input, shape index: {}]   ;;  %s7857_s6 = inlined_call_operand.vmem [shape: f32[1,640], index: 6, kind: input, shape index: {}]   ;;  %s7858_s7 = inlined_call_operand.hbm [shape: f32[128,512], index: 7, kind: input, shape index: {}]   ;;  %s7859_s8 = inlined_call_operand.hbm [shape: f32[128,128], index: 8, kind: input, shape index: {}]   ;;  %s7860_s9 = inlined_call_operand.vmem [shape: f32[1,128], index: 9, kind: input, shape index: {}]   ;;  %s7861_s10 = inlined_call_operand.vmem [shape: f32[8,8,128], index: 10, kind: output, shape index: {0}]   ;;  %s7862_s11 = inlined_call_operand.vmem [shape: f32[8,8,128], index: 11, kind: output, shape index: {1}]  }
   0x1   :  { %18 = vsyncpa [#allocation6], 0  ;;  %s45_s19 = sshll.u32 %s7856_s5, 4  ;;  %s46_s19 = int_to_ptr.hbm [resolvable:$true] %s45_s19 }
   0x2   :  { %19 = vsyncpa [#allocation9], 0  ;;  %s4011_s20 = smov [#allocation5]   ;;  %s32_s24 = sshll.u32 %s7855_s4, 4  ;;  %s33_s24 = int_to_ptr.hbm [resolvable:$true] %s32_s24 }
   0x3   :  { %s47_s21 = sshll.u32 %s4011_s20, 4  ;;  %s4012_s25 = smov 640   ;;  %s48_s21 = int_to_ptr.vmem [resolvable:$true] %s47_s21 }
   0x4   :  { %s4013_s26 = smov 40   ;;  %s4014_s27 = smov [#allocation3]  }
   0x5   :  { %53 = dma.hbm_to_vmem [thread:$0]  %s46_s19, 10240, %s48_s21, [#allocation6], %s4012_s25, %s4012_s25, %s4013_s26  }
   0x6   :  { %s34_s28 = sshll.u32 %s4014_s27, 4  ;;  %s4015_s29 = smov 512   ;;  %s35_s28 = int_to_ptr.vmem [resolvable:$true] %s34_s28 }
   0x7   :  { %s4016_s30 = smov 32   ;;  %s60_s13 = sshll.u32 %s7858_s7, 4  ;;  %s61_s13 = int_to_ptr.hbm [resolvable:$true] %s60_s13 }
   0x8   :  { %40 = dma.hbm_to_vmem [thread:$0]  %s33_s24, 8192, %s35_s28, [#allocation4], %s4015_s29, %s4015_s29, %s4016_s30  }
   0x9   :  { %s4017_s14 = smov [#allocation7]   ;;  %s73_s17 = sshll.u32 %s7859_s8, 4  ;;  %s74_s17 = int_to_ptr.hbm [resolvable:$true] %s73_s17 }
   0xa   :  { %s62_s15 = sshll.u32 %s4017_s14, 4  ;;  %s4018_s18 = smov [#allocation8]   ;;  %s63_s15 = int_to_ptr.vmem [resolvable:$true] %s62_s15 }
   0xb   :  { %68 = dma.hbm_to_vmem [thread:$0]  %s61_s13, 8192, %s63_s15, [#allocation6], %s4015_s29, %s4015_s29, %s4016_s30  }
   0xc   :  { %s75_s19 = sshll.u32 %s4018_s18, 4  ;;  %s4019_s20 = smov 128   ;;  %s76_s19 = int_to_ptr.vmem [resolvable:$true] %s75_s19 }
   0xd   :  { %s4020_s21 = smov 8  }
   0xe   :  { %81 = dma.hbm_to_vmem [thread:$0]  %s74_s17, 2048, %s76_s19, [#allocation9], %s4019_s20, %s4019_s20, %s4020_s21  }
   0xf   :  { %4005 = dma.done.wait [#allocation4], 8192  }
  0x10   :  { %4006 = vsyncadd [#allocation4], 4294959104 }
  0x11   :  { %4007 = dma.done.wait [#allocation6], 18432  }
  0x12   :  { %4008 = vsyncadd [#allocation6], 4294948864 }
  0x13   :  { %4009 = dma.done.wait [#allocation9], 2048  }
  0x14   :  { %4010 = vsyncadd [#allocation9], 4294965248  ;;  %v7865_v0 = vmov 0   ;;  %v4098_v1 = vld [vmem:[#allocation3 + $0x1e0] sm:$0xff]  ;;  %v4108_v5 = vld [vmem:[#allocation3 + $0x1f0] sm:$0xff]  ;;  %v7863_v58 = vmov 0.0  }
  0x15   :  { %3118 = vset.pattern.permute.xlu0 %v7865_v0  ;;  %3119 = vset.pattern.permute.xlu1 %v7865_v0  ;;  %v4100_v2 = vld [vmem:[#allocation3 + $0x1c0] sm:$0xff]  ;;  %v4110_v6 = vld [vmem:[#allocation3 + $0x1d0] sm:$0xff]  ;;  %v4116_v8 = vld [vmem:[#allocation3 + $0x1f8] sm:$0xff] }
  0x16   :  { %3120 = vset.pattern.permute.xlu2 %v7865_v0  ;;  %453 = vmatpush.msra.mxu1 %v4098_v1  ;;  %v4103_v3 = vld [vmem:[#allocation3 + $0x1a0] sm:$0xff]  ;;  %v4119_v9 = vld [vmem:[#allocation3 + $0x1b0] sm:$0xff]  ;;  %v4121_v10 = vld [vmem:[#allocation3 + $0x1d8] sm:$0xff] }
  0x17   :  { %v4106_v4 = vld [vmem:[#allocation3 + $0x180] sm:$0xff]  ;;  %493 = vmatpush.msra.mxu2 %v4108_v5  ;;  %513 = vmatpush.msra.mxu3 %v4116_v8  ;;  %v4128_v12 = vld [vmem:[#allocation3 + $0x1b8] sm:$0xff]  ;;  %v4133_v14 = vld [vmem:[#allocation3 + $0x190] sm:$0xff] }
  0x18   :  { %454 = vmatpush.msra.mxu1 %v4100_v2  ;;  %v4113_v7 = vld [vmem:[#allocation3 + $0x160] sm:$0xff]  ;;  %v4137_v15 = vld [vmem:[#allocation3 + $0x198] sm:$0xff]  ;;  %v4142_v17 = vld [vmem:[#allocation3 + $0x170] sm:$0xff] }
  0x19   :  { %v309_v11 = vld [vmem:[%s7851_s0] sm:$0xff]  ;;  %494 = vmatpush.msra.mxu2 %v4110_v6  ;;  %514 = vmatpush.msra.mxu3 %v4121_v10  ;;  %v4146_v18 = vld [vmem:[#allocation3 + $0x178] sm:$0xff]  ;;  %v4151_v20 = vld [vmem:[#allocation3 + $0x150] sm:$0xff] }
  0x1a   :  { %455 = vmatpush.msra.mxu1 %v4103_v3  ;;  %v4130_v13 = vld [vmem:[#allocation3 + $0x140] sm:$0xff]  ;;  %320 = vperm.xlu0 %3118, %v309_v11   ;;  %v4160_v22 = vld [vmem:[#allocation3 + $0x158] sm:$0xff]  ;;  %v4166_v24 = vld [vmem:[#allocation3 + $0x130] sm:$0xff] }
  0x1b   :  { %495 = vmatpush.msra.mxu2 %v4119_v9  ;;  %v4139_v16 = vld [vmem:[#allocation3 + $0x120] sm:$0xff]  ;;  %515 = vmatpush.msra.mxu3 %v4128_v12  ;;  %v4171_v26 = vld [vmem:[#allocation3 + $0x138] sm:$0xff]  ;;  %v4176_v28 = vld [vmem:[#allocation3 + $0x110] sm:$0xff] }
  0x1c   :  { %456 = vmatpush.msra.mxu1 %v4106_v4  ;;  %v4148_v19 = vld [vmem:[#allocation3 + $0x100] sm:$0xff]  ;;  %v4180_v29 = vld [vmem:[#allocation3 + $0x118] sm:$0xff]  ;;  %v4185_v31 = vld [vmem:[#allocation3 + $0xf0] sm:$0xff] }
  0x1d   :  { %496 = vmatpush.msra.mxu2 %v4133_v14  ;;  %516 = vmatpush.msra.mxu3 %v4137_v15  ;;  %v4156_v21 = vld [vmem:[%s7852_s1] sm:$0xff]  ;;  %v4189_v32 = vld [vmem:[#allocation3 + $0xf8] sm:$0xff]  ;;  %v4194_v34 = vld [vmem:[#allocation3 + $0xd0] sm:$0xff] }
  0x1e   :  { %457 = vmatpush.msra.mxu1 %v4113_v7  ;;  %vm555_vm0 = vcmp.gt.s32.totalorder %v4156_v21, 0  ;;  %v4163_v23 = vld [vmem:[#allocation3 + $0xe0] sm:$0xff]  ;;  %v4198_v35 = vld [vmem:[#allocation3 + $0xd8] sm:$0xff]  ;;  %v4206_v38 = vld [vmem:[#allocation3 + $0xb0] sm:$0xff]  ;;  %vm1813_vm1 = vcmp.gt.s32.totalorder %v4156_v21, 4  ;;  %vm2758_vm2 = vcmp.gt.s32.totalorder %v4156_v21, 7 }
  0x1f   :  { %497 = vmatpush.msra.mxu2 %v4142_v17  ;;  %517 = vmatpush.msra.mxu3 %v4146_v18  ;;  %v556_v25 = vsel %vm555_vm0, 1, %v7865_v0  ;;  %v4173_v27 = vld [vmem:[#allocation3 + $0xc0] sm:$0xff]  ;;  %v312_v36 = vld [vmem:[%s7851_s0 + $0x18] sm:$0xff]  ;;  %v4215_v41 = vld [vmem:[#allocation3 + $0x90] sm:$0xff]  ;;  %v1814_v51 = vsel %vm1813_vm1, 1, %v7865_v0 }
  0x20   :  { %458 = vmatpush.msra.mxu1 %v4130_v13  ;;  %v4182_v30 = vld [vmem:[#allocation3 + $0xa0] sm:$0xff]  ;;  %v4210_v39 = vld [vmem:[#allocation3 + $0xb8] sm:$0xff]  ;;  %v4224_v44 = vld [vmem:[#allocation3 + $0x70] sm:$0xff] }
  0x21   :  { %498 = vmatpush.msra.mxu2 %v4151_v20  ;;  %518 = vmatpush.msra.mxu3 %v4160_v22  ;;  %v4191_v33 = vld [vmem:[#allocation3 + $0x80] sm:$0xff]  ;;  %v4219_v42 = vld [vmem:[#allocation3 + $0x98] sm:$0xff]  ;;  %v4234_v47 = vld [vmem:[#allocation3 + $0x50] sm:$0xff] }
  0x22   :  { %459 = vmatpush.msra.mxu1 %v4139_v16  ;;  %558 = vperm.xlu0 %3118, %v556_v25   ;;  %v4203_v37 = vld [vmem:[#allocation3 + $0x60] sm:$0xff]  ;;  %v4228_v45 = vld [vmem:[#allocation3 + $0x78] sm:$0xff]  ;;  %8494 = vst [vmem:[#allocation15_spill] sm:$0xff] %v4234_v47  ;;  %v4237_v48 = vld [vmem:[#allocation3 + $0x1e8] sm:$0xff]  ;;  %v2759_v25 = vsel %vm2758_vm2, 1, %v7865_v0 }
  0x23   :  { %499 = vmatpush.msra.mxu2 %v4166_v24  ;;  %519 = vmatpush.msra.mxu3 %v4171_v26  ;;  %v4212_v40 = vld [vmem:[#allocation3 + $0x40] sm:$0xff]  ;;  %8495 = vst [vmem:[#allocation16_spill] sm:$0xff] %v4237_v48  ;;  %v4240_v49 = vld [vmem:[#allocation3 + $0x58] sm:$0xff]  ;;  %v4243_v50 = vld [vmem:[#allocation3 + $0x30] sm:$0xff] }
  0x24   :  { %460 = vmatpush.msra.mxu1 %v4148_v19  ;;  %v4221_v43 = vld [vmem:[#allocation3 + $0x20] sm:$0xff]  ;;  %8496 = vst [vmem:[#allocation17_spill] sm:$0xff] %v4240_v49  ;;  %v4247_v52 = vld [vmem:[#allocation3 + $0x1c8] sm:$0xff]  ;;  %v4250_v53 = vld [vmem:[#allocation3 + $0x38] sm:$0xff] }
  0x25   :  { %500 = vmatpush.msra.mxu2 %v4176_v28  ;;  %520 = vmatpush.msra.mxu3 %v4180_v29  ;;  %8492 = vst [vmem:[#allocation13_spill] sm:$0xff] %v4221_v43  ;;  %v4231_v46 = vld [vmem:[#allocation3] sm:$0xff]  ;;  %v4254_v54 = vld [vmem:[#allocation3 + $0x10] sm:$0xff]  ;;  %v4256_v55 = vld [vmem:[#allocation3 + $0x1a8] sm:$0xff] }
  0x26   :  { %461 = vmatpush.msra.mxu1 %v4163_v23  ;;  %8493 = vst [vmem:[#allocation14_spill] sm:$0xff] %v4231_v46  ;;  %v4261_v56 = vld [vmem:[#allocation3 + $0x18] sm:$0xff]  ;;  %v4263_v57 = vld [vmem:[#allocation3 + $0x188] sm:$0xff]  ;;  %v315_v60 = vld [vmem:[%s7851_s0 + $0x30] sm:$0xff] }
  0x27   :  { %501 = vmatpush.msra.mxu2 %v4185_v31  ;;  %521 = vmatpush.msra.mxu3 %v4189_v32  ;;  %8497 = vst [vmem:[#allocation18_spill] sm:$0xff] %v4243_v50  ;;  %v4269_v59 = vld [vmem:[#allocation3 + $0x168] sm:$0xff] }
  0x28   :  { %462 = vmatpush.msra.mxu1 %v4173_v27  ;;  %8498 = vst [vmem:[#allocation19_spill] sm:$0xff] %v4247_v52  ;;  %v4277_v61 = vld [vmem:[#allocation3 + $0x148] sm:$0xff] }
  0x29   :  { %502 = vmatpush.msra.mxu2 %v4194_v34  ;;  %522 = vmatpush.msra.mxu3 %v4198_v35  ;;  %8499 = vst [vmem:[#allocation20_spill] sm:$0xff] %v4250_v53  ;;  %v4280_v62 = vld [vmem:[#allocation3 + $0x128] sm:$0xff] }
  0x2a   :  { %463 = vmatpush.msra.mxu1 %v4182_v30  ;;  %335 = vperm.xlu0 %3118, %v312_v36   ;;  %8500 = vst [vmem:[#allocation21_spill] sm:$0xff] %v4254_v54  ;;  %v4283_v63 = vld [vmem:[#allocation3 + $0x108] sm:$0xff] }
  0x2b   :  { %503 = vmatpush.msra.mxu2 %v4206_v38  ;;  %523 = vmatpush.msra.mxu3 %v4210_v39  ;;  %8501 = vst [vmem:[#allocation22_spill] sm:$0xff] %v4256_v55  ;;  %v4287_v11 = vld [vmem:[#allocation3 + $0xe8] sm:$0xff] }
  0x2c   :  { %464 = vmatpush.msra.mxu1 %v4191_v33  ;;  %8502 = vst [vmem:[#allocation23_spill] sm:$0xff] %v4261_v56  ;;  %v4291_v36 = vld [vmem:[#allocation3 + $0xc8] sm:$0xff] }
  0x2d   :  { %504 = vmatpush.msra.mxu2 %v4215_v41  ;;  %524 = vmatpush.msra.mxu3 %v4219_v42  ;;  %8503 = vst [vmem:[#allocation24_spill] sm:$0xff] %v4263_v57  ;;  %v4300_v21 = vld [vmem:[#allocation3 + $0x68] sm:$0xff] }
  0x2e   :  { %465 = vmatpush.msra.mxu1 %v4203_v37  ;;  %8504 = vst [vmem:[#allocation25_spill] sm:$0xff] %v4269_v59  ;;  %v4306_v0 = vld [vmem:[#allocation3 + $0x28] sm:$0xff] }
  0x2f   :  { %505 = vmatpush.msra.mxu2 %v4224_v44  ;;  %525 = vmatpush.msra.mxu3 %v4228_v45  ;;  %8505 = vst [vmem:[#allocation26_spill] sm:$0xff] %v4277_v61 }
  0x30   :  { %466 = vmatpush.msra.mxu1 %v4212_v40  ;;  %8506 = vst [vmem:[#allocation27_spill] sm:$0xff] %v4280_v62 }
  0x31   :  { %506 = vmatpush.msra.mxu2 %v4234_v47  ;;  %526 = vmatpush.msra.mxu3 %v4240_v49  ;;  %8507 = vst [vmem:[#allocation28_spill] sm:$0xff] %v4283_v63 }
  0x32   :  { %467 = vmatpush.msra.mxu1 %v4221_v43  ;;  %1816 = vperm.xlu0 %3118, %v1814_v51   ;;  %8508 = vst [vmem:[#allocation29_spill] sm:$0xff] %v4287_v11  ;;  %v4294_v51 = vld [vmem:[#allocation3 + $0xa8] sm:$0xff] }
  0x33   :  { %507 = vmatpush.msra.mxu2 %v4243_v50  ;;  %527 = vmatpush.msra.mxu3 %v4250_v53  ;;  %8509 = vst [vmem:[#allocation30_spill] sm:$0xff] %v4291_v36 }
  0x34   :  { %468 = vmatpush.msra.mxu1 %v4231_v46  ;;  %8510 = vst [vmem:[#allocation31_spill] sm:$0xff] %v4294_v51 }
  0x35   :  { %508 = vmatpush.msra.mxu2 %v4254_v54  ;;  %469 = vmatmul.f32.vlgmr.msra.gmra.mxu1 %v7863_v58  ;;  %8512 = vst [vmem:[#allocation33_spill] sm:$0xff] %v4300_v21 }
  0x36   :  { %473 = vmatpush.msrb.mxu1 %v4237_v48  ;;  %509 = vmatmul.f32.vlgmr.msra.gmra.mxu2 %v7863_v58  ;;  %8514 = vst [vmem:[#allocation35_spill] sm:$0xff] %v4306_v0  ;;  %v4687_v48 = vld [vmem:[#allocation7 + $0x50] sm:$0xff] }
  0x37   :  { %528 = vmatpush.msra.mxu3 %v4261_v56  ;;  %8637 = vst [vmem:[#allocation157_spill] sm:$0xff] %v4687_v48  ;;  %v4722_v56 = vld [vmem:[#allocation7] sm:$0xff] }
  0x38   :  { %474 = vmatpush.msrb.mxu1 %v4247_v52  ;;  %529 = vmatmul.f32.vlgmr.msra.gmra.mxu3 %v7863_v58  ;;  %v4303_v58 = vld [vmem:[#allocation3 + $0x48] sm:$0xff]  ;;  %8647 = vst [vmem:[#allocation167_spill] sm:$0xff] %v4722_v56 }
  0x39   :  { %8513 = vst [vmem:[#allocation34_spill] sm:$0xff] %v4303_v58 }
  0x3a   :  { %475 = vmatpush.msrb.mxu1 %v4256_v55  ;;  %350 = vperm.xlu0 %3118, %v315_v60   ;;  %v4297_v60 = vld [vmem:[#allocation3 + $0x88] sm:$0xff]  ;;  %v4448_v55 = vld [vmem:[#allocation5 + $0xb8] sm:$0xff] }
  0x3b   :  { %8511 = vst [vmem:[#allocation32_spill] sm:$0xff] %v4297_v60 }
  0x3c   :  { %476 = vmatpush.msrb.mxu1 %v4263_v57  ;;  %v4354_v57 = vld [vmem:[#allocation5 + $0x1f8] sm:$0xff]  ;;  %8563 = vst [vmem:[#allocation83_spill] sm:$0xff] %v4448_v55 }
  0x3d   :  { %8531 = vst [vmem:[#allocation51_spill] sm:$0xff] %v4354_v57 }
  0x3e   :  { %477 = vmatpush.msrb.mxu1 %v4269_v59  ;;  %v4342_v59 = vld [vmem:[#allocation5 + $0x228] sm:$0xff] }
  0x3f   :  { %8528 = vst [vmem:[#allocation48_spill] sm:$0xff] %v4342_v59 }
  0x40   :  { %478 = vmatpush.msrb.mxu1 %v4277_v61  ;;  %v4340_v61 = vld [vmem:[#allocation5 + $0x220] sm:$0xff] }
  0x41   :  { %8527 = vst [vmem:[#allocation47_spill] sm:$0xff] %v4340_v61 }
  0x42   :  { %479 = vmatpush.msrb.mxu1 %v4280_v62  ;;  %2761 = vperm.xlu0 %3118, %v2759_v25   ;;  %v8516_v25 = vmov 0.0   ;;  %v4334_v62 = vld [vmem:[#allocation5 + $0x208] sm:$0xff] }
  0x43   :  { %8525 = vst [vmem:[#allocation45_spill] sm:$0xff] %v4334_v62 }
  0x44   :  { %480 = vmatpush.msrb.mxu1 %v4283_v63  ;;  %v4326_v63 = vld [vmem:[#allocation5 + $0x238] sm:$0xff] }
  0x45   :  { %8522 = vst [vmem:[#allocation42_spill] sm:$0xff] %v4326_v63 }
  0x46   :  { %481 = vmatpush.msrb.mxu1 %v4287_v11  ;;  %v4309_v11 = vld [vmem:[#allocation3 + $0x8] sm:$0xff] }
  0x47   :  { %8515 = vst [vmem:[#allocation36_spill] sm:$0xff] %v4309_v11 }
  0x48   :  { %482 = vmatpush.msrb.mxu1 %v4291_v36  ;;  %v4316_v36 = vld [vmem:[#allocation5 + $0x260] sm:$0xff] }
  0x49   :  { %8518 = vst [vmem:[#allocation38_spill] sm:$0xff] %v4316_v36 }
  0x4a   :  { %483 = vmatpush.msrb.mxu1 %v4294_v51  ;;  %v4314_v51 = vld [vmem:[#allocation5 + $0x258] sm:$0xff] }
  0x4b   :  { %8517 = vst [vmem:[#allocation37_spill] sm:$0xff] %v4314_v51  ;;  %562 = vmatpush.msrb.mxu2 %v4314_v51  ;;  %v4632_v51 = vld [vmem:[#allocation7 + $0xd0] sm:$0xff] }
  0x4c   :  { %484 = vmatpush.msrb.mxu1 %v4297_v60  ;;  %v4318_v60 = vld [vmem:[#allocation5 + $0x270] sm:$0xff]  ;;  %8619 = vst [vmem:[#allocation139_spill] sm:$0xff] %v4632_v51 }
  0x4d   :  { %8519 = vst [vmem:[#allocation39_spill] sm:$0xff] %v4318_v60  ;;  %622 = vmatpush.msrb.mxu3 %v4318_v60 }
  0x4e   :  { %485 = vmatpush.msrb.mxu1 %v4300_v21  ;;  %v4322_v21 = vld [vmem:[#allocation5 + $0x278] sm:$0xff] }
  0x4f   :  { %8520 = vst [vmem:[#allocation40_spill] sm:$0xff] %v4322_v21  ;;  %642 = vmatpush.msra.mxu0 %v4322_v21  ;;  %v4350_v21 = vld [vmem:[#allocation5 + $0x1e0] sm:$0xff] }
  0x50   :  { %486 = vmatpush.msrb.mxu1 %v4303_v58  ;;  %v4324_v58 = vld [vmem:[#allocation5 + $0x230] sm:$0xff]  ;;  %8529 = vst [vmem:[#allocation49_spill] sm:$0xff] %v4350_v21 }
  0x51   :  { %8521 = vst [vmem:[#allocation41_spill] sm:$0xff] %v4324_v58  ;;  %563 = vmatpush.msrb.mxu2 %v4324_v58  ;;  %v4378_v58 = vld [vmem:[#allocation5 + $0x1b0] sm:$0xff] }
  0x52   :  { %487 = vmatpush.msrb.mxu1 %v4306_v0  ;;  %v4332_v0 = vld [vmem:[#allocation5 + $0x250] sm:$0xff]  ;;  %8540 = vst [vmem:[#allocation60_spill] sm:$0xff] %v4378_v58 }
  0x53   :  { %8524 = vst [vmem:[#allocation44_spill] sm:$0xff] %v4332_v0  ;;  %643 = vmatpush.msra.mxu0 %v4332_v0  ;;  %564 = vmatpush.msrb.mxu2 %v4334_v62  ;;  %v4360_v0 = vld [vmem:[#allocation5 + $0x1b8] sm:$0xff]  ;;  %v4362_v62 = vld [vmem:[#allocation5 + $0x1c0] sm:$0xff] }
  0x54   :  { %488 = vmatpush.msrb.mxu1 %v4309_v11  ;;  %v4330_v11 = vld [vmem:[#allocation5 + $0x248] sm:$0xff]  ;;  %8533 = vst [vmem:[#allocation53_spill] sm:$0xff] %v4360_v0 }
  0x55   :  { %489 = vmatmul.f32.vlgmr.msrb.gmra.mxu1 %v8516_v25  ;;  %8523 = vst [vmem:[#allocation43_spill] sm:$0xff] %v4330_v11  ;;  %623 = vmatpush.msrb.mxu3 %v4330_v11  ;;  %v4358_v11 = vld [vmem:[#allocation5 + $0x200] sm:$0xff] }
  0x56   :  { %582 = vmatpush.msra.mxu1 %v4316_v36  ;;  %v4338_v36 = vld [vmem:[#allocation5 + $0x210] sm:$0xff]  ;;  %644 = vmatpush.msra.mxu0 %v4342_v59  ;;  %8532 = vst [vmem:[#allocation52_spill] sm:$0xff] %v4358_v11 }
  0x57   :  { %8526 = vst [vmem:[#allocation46_spill] sm:$0xff] %v4338_v36  ;;  %624 = vmatpush.msrb.mxu3 %v4340_v61  ;;  %565 = vmatpush.msrb.mxu2 %v4350_v21  ;;  %v4366_v59 = vld [vmem:[#allocation5 + $0x1d0] sm:$0xff]  ;;  %v4376_v21 = vld [vmem:[#allocation5 + $0x1a8] sm:$0xff] }
  0x58   :  { %583 = vmatpush.msra.mxu1 %v4326_v63  ;;  %v4352_v63 = vld [vmem:[#allocation5 + $0x1e8] sm:$0xff]  ;;  %8534 = vst [vmem:[#allocation54_spill] sm:$0xff] %v4362_v62  ;;  %645 = vmatpush.msra.mxu0 %v4358_v11  ;;  %v4370_v61 = vld [vmem:[#allocation5 + $0x190] sm:$0xff] }
  0x59   :  { %8530 = vst [vmem:[#allocation50_spill] sm:$0xff] %v4352_v63  ;;  %625 = vmatpush.msrb.mxu3 %v4354_v57  ;;  %566 = vmatpush.msrb.mxu2 %v4360_v0  ;;  %v4382_v11 = vld [vmem:[#allocation5 + $0x168] sm:$0xff]  ;;  %v4384_v57 = vld [vmem:[#allocation5 + $0x170] sm:$0xff]  ;;  %v4388_v0 = vld [vmem:[#allocation5 + $0x180] sm:$0xff] }
  0x5a   :  { %584 = vmatpush.msra.mxu1 %v4338_v36  ;;  %8535 = vst [vmem:[#allocation55_spill] sm:$0xff] %v4366_v59  ;;  %v4368_v36 = vld [vmem:[#allocation5 + $0x1d8] sm:$0xff] }
  0x5b   :  { %8536 = vst [vmem:[#allocation56_spill] sm:$0xff] %v4368_v36  ;;  %626 = vmatpush.msrb.mxu3 %v4366_v59  ;;  %646 = vmatpush.msra.mxu0 %v4368_v36  ;;  %v4398_v36 = vld [vmem:[#allocation5 + $0x140] sm:$0xff]  ;;  %v4426_v59 = vld [vmem:[#allocation5 + $0x110] sm:$0xff] }
  0x5c   :  { %585 = vmatpush.msra.mxu1 %v4352_v63  ;;  %8537 = vst [vmem:[#allocation57_spill] sm:$0xff] %v4370_v61  ;;  %v4374_v63 = vld [vmem:[#allocation5 + $0x198] sm:$0xff]  ;;  %567 = vmatpush.msrb.mxu2 %v4370_v61  ;;  %v4400_v61 = vld [vmem:[#allocation5 + $0x148] sm:$0xff] }
  0x5d   :  { %8538 = vst [vmem:[#allocation58_spill] sm:$0xff] %v4374_v63  ;;  %627 = vmatpush.msrb.mxu3 %v4376_v21  ;;  %647 = vmatpush.msra.mxu0 %v4378_v58  ;;  %v4408_v58 = vld [vmem:[#allocation5 + $0x118] sm:$0xff] }
  0x5e   :  { %586 = vmatpush.msra.mxu1 %v4362_v62  ;;  %8539 = vst [vmem:[#allocation59_spill] sm:$0xff] %v4376_v21  ;;  %v4390_v62 = vld [vmem:[#allocation5 + $0x188] sm:$0xff]  ;;  %568 = vmatpush.msrb.mxu2 %v4382_v11  ;;  %v4406_v21 = vld [vmem:[#allocation5 + $0x160] sm:$0xff] }
  0x5f   :  { %8541 = vst [vmem:[#allocation61_spill] sm:$0xff] %v4382_v11  ;;  %628 = vmatpush.msrb.mxu3 %v4388_v0  ;;  %648 = vmatpush.msra.mxu0 %v4390_v62  ;;  %v4410_v11 = vld [vmem:[#allocation5 + $0x120] sm:$0xff] }
  0x60   :  { %8542 = vst [vmem:[#allocation62_spill] sm:$0xff] %v4384_v57  ;;  %587 = vmatpush.msra.mxu1 %v4374_v63  ;;  %v4402_v63 = vld [vmem:[#allocation5 + $0x158] sm:$0xff]  ;;  %569 = vmatpush.msrb.mxu2 %v4398_v36 }
  0x61   :  { %8543 = vst [vmem:[#allocation63_spill] sm:$0xff] %v4388_v0  ;;  %629 = vmatpush.msrb.mxu3 %v4402_v63  ;;  %649 = vmatpush.msra.mxu0 %v4406_v21  ;;  %v4418_v0 = vld [vmem:[#allocation5 + $0xf0] sm:$0xff] }
  0x62   :  { %8544 = vst [vmem:[#allocation64_spill] sm:$0xff] %v4390_v62  ;;  %588 = vmatpush.msra.mxu1 %v4384_v57  ;;  %v4414_v62 = vld [vmem:[#allocation5 + $0x130] sm:$0xff]  ;;  %v4416_v57 = vld [vmem:[#allocation5 + $0x138] sm:$0xff]  ;;  %570 = vmatpush.msrb.mxu2 %v4408_v58 }
  0x63   :  { %8545 = vst [vmem:[#allocation65_spill] sm:$0xff] %v4398_v36  ;;  %v4424_v36 = vld [vmem:[#allocation5 + $0x108] sm:$0xff]  ;;  %630 = vmatpush.msrb.mxu3 %v4414_v62  ;;  %650 = vmatpush.msra.mxu0 %v4416_v57 }
  0x64   :  { %8546 = vst [vmem:[#allocation66_spill] sm:$0xff] %v4400_v61  ;;  %589 = vmatpush.msra.mxu1 %v4400_v61  ;;  %v4422_v61 = vld [vmem:[#allocation5 + $0xf8] sm:$0xff]  ;;  %571 = vmatpush.msrb.mxu2 %v4418_v0 }
  0x65   :  { %8547 = vst [vmem:[#allocation67_spill] sm:$0xff] %v4402_v63  ;;  %v4432_v63 = vld [vmem:[#allocation5 + $0xd0] sm:$0xff]  ;;  %631 = vmatpush.msrb.mxu3 %v4424_v36  ;;  %651 = vmatpush.msra.mxu0 %v4426_v59 }
  0x66   :  { %8548 = vst [vmem:[#allocation68_spill] sm:$0xff] %v4406_v21  ;;  %590 = vmatpush.msra.mxu1 %v4410_v11  ;;  %v4430_v21 = vld [vmem:[#allocation5 + $0xc8] sm:$0xff] }
  0x67   :  { %8549 = vst [vmem:[#allocation69_spill] sm:$0xff] %v4408_v58  ;;  %v4436_v58 = vld [vmem:[#allocation5 + $0xe0] sm:$0xff]  ;;  %572 = vmatpush.msrb.mxu2 %v4430_v21 }
  0x68   :  { %8550 = vst [vmem:[#allocation70_spill] sm:$0xff] %v4410_v11  ;;  %591 = vmatpush.msra.mxu1 %v4422_v61  ;;  %v4438_v11 = vld [vmem:[#allocation5 + $0xe8] sm:$0xff]  ;;  %632 = vmatpush.msrb.mxu3 %v4436_v58 }
  0x69   :  { %8551 = vst [vmem:[#allocation71_spill] sm:$0xff] %v4414_v62  ;;  %v4446_v62 = vld [vmem:[#allocation5 + $0xa8] sm:$0xff]  ;;  %652 = vmatpush.msra.mxu0 %v4438_v11 }
  0x6a   :  { %8552 = vst [vmem:[#allocation72_spill] sm:$0xff] %v4416_v57  ;;  %592 = vmatpush.msra.mxu1 %v4432_v63  ;;  %v4444_v57 = vld [vmem:[#allocation5 + $0xa0] sm:$0xff]  ;;  %633 = vmatpush.msrb.mxu3 %v4448_v55  ;;  %v4478_v55 = vld [vmem:[#allocation5 + $0x70] sm:$0xff] }
  0x6b   :  { %8553 = vst [vmem:[#allocation73_spill] sm:$0xff] %v4418_v0  ;;  %v4454_v0 = vld [vmem:[#allocation5 + $0x78] sm:$0xff]  ;;  %573 = vmatpush.msrb.mxu2 %v4444_v57 }
  0x6c   :  { %8554 = vst [vmem:[#allocation74_spill] sm:$0xff] %v4422_v61  ;;  %v4452_v61 = vld [vmem:[#allocation5 + $0xc0] sm:$0xff]  ;;  %593 = vmatpush.msra.mxu1 %v4446_v62 }
  0x6d   :  { %8555 = vst [vmem:[#allocation75_spill] sm:$0xff] %v4424_v36  ;;  %v4456_v36 = vld [vmem:[#allocation5 + $0x80] sm:$0xff]  ;;  %653 = vmatpush.msra.mxu0 %v4452_v61  ;;  %574 = vmatpush.msrb.mxu2 %v4454_v0 }
  0x6e   :  { %8556 = vst [vmem:[#allocation76_spill] sm:$0xff] %v4426_v59  ;;  %v4460_v59 = vld [vmem:[#allocation5 + $0x90] sm:$0xff]  ;;  %594 = vmatpush.msra.mxu1 %v4456_v36 }
  0x6f   :  { %8557 = vst [vmem:[#allocation77_spill] sm:$0xff] %v4430_v21  ;;  %634 = vmatpush.msrb.mxu3 %v4460_v59  ;;  %v4556_v21 = vld [vmem:[#allocation7 + $0x178] sm:$0xff] }
  0x70   :  { %8558 = vst [vmem:[#allocation78_spill] sm:$0xff] %v4432_v63  ;;  %v4462_v63 = vld [vmem:[#allocation5 + $0x98] sm:$0xff] }
  0x71   :  { %8559 = vst [vmem:[#allocation79_spill] sm:$0xff] %v4436_v58  ;;  %654 = vmatpush.msra.mxu0 %v4462_v63  ;;  %v4498_v58 = vld [vmem:[#allocation5 + $0x20] sm:$0xff] }
  0x72   :  { %8560 = vst [vmem:[#allocation80_spill] sm:$0xff] %v4438_v11  ;;  %v4470_v11 = vld [vmem:[#allocation5 + $0x50] sm:$0xff] }
  0x73   :  { %8561 = vst [vmem:[#allocation81_spill] sm:$0xff] %v4444_v57  ;;  %v4472_v57 = vld [vmem:[#allocation5 + $0x58] sm:$0xff]  ;;  %575 = vmatpush.msrb.mxu2 %v4470_v11  ;;  %655 = vmatpush.msra.mxu0 %v4478_v55 }
  0x74   :  { %8562 = vst [vmem:[#allocation82_spill] sm:$0xff] %v4446_v62  ;;  %v4474_v62 = vld [vmem:[#allocation5 + $0x68] sm:$0xff]  ;;  %595 = vmatpush.msra.mxu1 %v4472_v57 }
  0x75   :  { %8564 = vst [vmem:[#allocation84_spill] sm:$0xff] %v4452_v61  ;;  %v4480_v61 = vld [vmem:[#allocation5 + $0x28] sm:$0xff]  ;;  %635 = vmatpush.msrb.mxu3 %v4474_v62 }
  0x76   :  { %8565 = vst [vmem:[#allocation85_spill] sm:$0xff] %v4454_v0  ;;  %v4482_v0 = vld [vmem:[#allocation5 + $0x30] sm:$0xff]  ;;  %576 = vmatpush.msrb.mxu2 %v4480_v61 }
  0x77   :  { %8566 = vst [vmem:[#allocation86_spill] sm:$0xff] %v4456_v36  ;;  %v4488_v36 = vld [vmem:[#allocation5 + $0x48] sm:$0xff]  ;;  %596 = vmatpush.msra.mxu1 %v4482_v0 }
  0x78   :  { %8567 = vst [vmem:[#allocation87_spill] sm:$0xff] %v4460_v59  ;;  %v4490_v59 = vld [vmem:[#allocation5] sm:$0xff]  ;;  %656 = vmatpush.msra.mxu0 %v4488_v36 }
  0x79   :  { %8568 = vst [vmem:[#allocation88_spill] sm:$0xff] %v4462_v63  ;;  %v4486_v63 = vld [vmem:[#allocation5 + $0x40] sm:$0xff]  ;;  %577 = vmatpush.msrb.mxu2 %v4490_v59 }
  0x7a   :  { %8569 = vst [vmem:[#allocation89_spill] sm:$0xff] %v4470_v11  ;;  %v4496_v11 = vld [vmem:[#allocation5 + $0x18] sm:$0xff]  ;;  %636 = vmatpush.msrb.mxu3 %v4486_v63  ;;  %657 = vmatpush.msra.mxu0 %v4498_v58 }
  0x7b   :  { %8570 = vst [vmem:[#allocation90_spill] sm:$0xff] %v4472_v57  ;;  %v4494_v57 = vld [vmem:[#allocation5 + $0x8] sm:$0xff] }
  0x7c   :  { %8571 = vst [vmem:[#allocation91_spill] sm:$0xff] %v4474_v62  ;;  %v4504_v62 = vld [vmem:[#allocation7 + $0x1e0] sm:$0xff]  ;;  %597 = vmatpush.msra.mxu1 %v4494_v57  ;;  %637 = vmatpush.msrb.mxu3 %v4496_v11 }
  0x7d   :  { %8572 = vst [vmem:[#allocation92_spill] sm:$0xff] %v4478_v55  ;;  %v4502_v55 = vld [vmem:[#allocation5 + $0x268] sm:$0xff] }
  0x7e   :  { %8573 = vst [vmem:[#allocation93_spill] sm:$0xff] %v4480_v61  ;;  %v4508_v61 = vld [vmem:[#allocation7 + $0x1f0] sm:$0xff]  ;;  %602 = vmatpush.msra.mxu2 %v4502_v55  ;;  %663 = vmatpush.msrb.mxu1 %v4504_v62 }
  0x7f   :  { %8574 = vst [vmem:[#allocation94_spill] sm:$0xff] %v4482_v0  ;;  %v228_v0 = vld [vmem:[#allocation7 + $0x1f8] sm:$0xff]  ;;  %703 = vmatpush.msra.mxu3 %v4508_v61 }
  0x80   :  { %8575 = vst [vmem:[#allocation95_spill] sm:$0xff] %v4486_v63  ;;  %723 = vmatpush.msrb.mxu0 %v228_v0  ;;  %v4517_v63 = vld [vmem:[#allocation7 + $0x1c0] sm:$0xff]  ;;  %v4532_v0 = vld [vmem:[#allocation7 + $0x1b8] sm:$0xff] }
  0x81   :  { %8576 = vst [vmem:[#allocation96_spill] sm:$0xff] %v4488_v36  ;;  %v4515_v36 = vld [vmem:[#allocation5 + $0x240] sm:$0xff]  ;;  %664 = vmatpush.msrb.mxu1 %v4517_v63 }
  0x82   :  { %8577 = vst [vmem:[#allocation97_spill] sm:$0xff] %v4490_v59  ;;  %v4519_v59 = vld [vmem:[#allocation7 + $0x1d0] sm:$0xff]  ;;  %603 = vmatpush.msra.mxu2 %v4515_v36 }
  0x83   :  { %8578 = vst [vmem:[#allocation98_spill] sm:$0xff] %v4494_v57  ;;  %v224_v57 = vld [vmem:[#allocation7 + $0x1d8] sm:$0xff]  ;;  %704 = vmatpush.msra.mxu3 %v4519_v59 }
  0x84   :  { %8579 = vst [vmem:[#allocation99_spill] sm:$0xff] %v4496_v11  ;;  %724 = vmatpush.msrb.mxu0 %v224_v57  ;;  %v4540_v57 = vld [vmem:[#allocation7 + $0x190] sm:$0xff]  ;;  %v4544_v11 = vld [vmem:[#allocation7 + $0x198] sm:$0xff] }
  0x85   :  { %8580 = vst [vmem:[#allocation100_spill] sm:$0xff] %v4498_v58  ;;  %v4524_v58 = vld [vmem:[#allocation5 + $0x218] sm:$0xff] }
  0x86   :  { %8581 = vst [vmem:[#allocation101_spill] sm:$0xff] %v4502_v55  ;;  %604 = vmatpush.msra.mxu2 %v4524_v58  ;;  %725 = vmatpush.msrb.mxu0 %v4532_v0  ;;  %v4630_v55 = vld [vmem:[#allocation7 + $0xc0] sm:$0xff] }
  0x87   :  { %8582 = vst [vmem:[#allocation102_spill] sm:$0xff] %v4504_v62  ;;  %v4526_v62 = vld [vmem:[#allocation7 + $0x1a0] sm:$0xff] }
  0x88   :  { %8583 = vst [vmem:[#allocation103_spill] sm:$0xff] %v4508_v61  ;;  %v4528_v61 = vld [vmem:[#allocation7 + $0x1b0] sm:$0xff]  ;;  %665 = vmatpush.msrb.mxu1 %v4526_v62  ;;  %726 = vmatpush.msrb.mxu0 %v4544_v11 }
  0x89   :  { %8584 = vst [vmem:[#allocation104_spill] sm:$0xff] %v4515_v36  ;;  %705 = vmatpush.msra.mxu3 %v4528_v61  ;;  %v4613_v36 = vld [vmem:[#allocation7 + $0xf0] sm:$0xff] }
  0x8a   :  { %8585 = vst [vmem:[#allocation105_spill] sm:$0xff] %v4517_v63  ;;  %v4536_v63 = vld [vmem:[#allocation5 + $0x1f0] sm:$0xff]  ;;  %727 = vmatpush.msrb.mxu0 %v4556_v21 }
  0x8b   :  { %8586 = vst [vmem:[#allocation106_spill] sm:$0xff] %v4519_v59  ;;  %v4538_v59 = vld [vmem:[#allocation7 + $0x180] sm:$0xff]  ;;  %605 = vmatpush.msra.mxu2 %v4536_v63  ;;  %706 = vmatpush.msra.mxu3 %v4540_v57 }
  0x8c   :  { %8587 = vst [vmem:[#allocation107_spill] sm:$0xff] %v4524_v58  ;;  %666 = vmatpush.msrb.mxu1 %v4538_v59  ;;  %v4585_v58 = vld [vmem:[#allocation7 + $0x138] sm:$0xff]  ;;  %v4615_v60 = vpop.permute.xlu0 %320 }
  0x8d   :  { %8588 = vst [vmem:[#allocation108_spill] sm:$0xff] %v4526_v62  ;;  %v4548_v62 = vld [vmem:[#allocation5 + $0x1c8] sm:$0xff] }
  0x8e   :  { %8589 = vst [vmem:[#allocation109_spill] sm:$0xff] %v4528_v61  ;;  %v4550_v61 = vld [vmem:[#allocation7 + $0x160] sm:$0xff]  ;;  %606 = vmatpush.msra.mxu2 %v4548_v62 }
  0x8f   :  { %8590 = vst [vmem:[#allocation110_spill] sm:$0xff] %v4532_v0  ;;  %v4552_v0 = vld [vmem:[#allocation7 + $0x170] sm:$0xff]  ;;  %667 = vmatpush.msrb.mxu1 %v4550_v61 }
  0x90   :  { %8591 = vst [vmem:[#allocation111_spill] sm:$0xff] %v4536_v63  ;;  %707 = vmatpush.msra.mxu3 %v4552_v0  ;;  %v4569_v63 = vld [vmem:[%s7853_s2] sm:$0xf] }
  0x91   :  { %8592 = vst [vmem:[#allocation112_spill] sm:$0xff] %v4538_v59  ;;  %v4560_v59 = vld [vmem:[#allocation5 + $0x1a0] sm:$0xff] }
  0x92   :  { %8593 = vst [vmem:[#allocation113_spill] sm:$0xff] %v4540_v57  ;;  %v4562_v57 = vld [vmem:[#allocation7 + $0x140] sm:$0xff]  ;;  %607 = vmatpush.msra.mxu2 %v4560_v59 }
  0x93   :  { %8594 = vst [vmem:[#allocation114_spill] sm:$0xff] %v4544_v11  ;;  %v4564_v11 = vld [vmem:[#allocation7 + $0x150] sm:$0xff]  ;;  %668 = vmatpush.msrb.mxu1 %v4562_v57 }
  0x94   :  { %8595 = vst [vmem:[#allocation115_spill] sm:$0xff] %v4548_v62  ;;  %708 = vmatpush.msra.mxu3 %v4564_v11  ;;  %v4581_v62 = vld [vmem:[#allocation7 + $0x130] sm:$0xff] }
  0x95   :  { %8596 = vst [vmem:[#allocation116_spill] sm:$0xff] %v4550_v61  ;;  %v4573_v61 = vld [vmem:[#allocation7 + $0x158] sm:$0xff] }
  0x96   :  { %8597 = vst [vmem:[#allocation117_spill] sm:$0xff] %v4552_v0  ;;  %728 = vmatpush.msrb.mxu0 %v4573_v61  ;;  %v4579_v0 = vld [vmem:[#allocation7 + $0x120] sm:$0xff]  ;;  %709 = vmatpush.msra.mxu3 %v4581_v62 }
  0x97   :  { %8598 = vst [vmem:[#allocation118_spill] sm:$0xff] %v4556_v21  ;;  %v4577_v21 = vld [vmem:[#allocation5 + $0x178] sm:$0xff]  ;;  %669 = vmatpush.msrb.mxu1 %v4579_v0 }
  0x98   :  { %8599 = vst [vmem:[#allocation119_spill] sm:$0xff] %v4560_v59  ;;  %608 = vmatpush.msra.mxu2 %v4577_v21  ;;  %729 = vmatpush.msrb.mxu0 %v4585_v58  ;;  %v4596_v59 = vld [vmem:[#allocation7 + $0x110] sm:$0xff] }
  0x99   :  { %8600 = vst [vmem:[#allocation120_spill] sm:$0xff] %v4562_v57  ;;  %v4588_v57 = vperm.slane %v4569_v63, 0  ;;  %710 = vmatpush.msra.mxu3 %v4596_v59 }
  0x9a   :  { %8601 = vst [vmem:[#allocation121_spill] sm:$0xff] %v4564_v11  ;;  %v4594_v11 = vld [vmem:[#allocation7 + $0x100] sm:$0xff] }
  0x9b   :  { %8602 = vst [vmem:[#allocation122_spill] sm:$0xff] %v4573_v61  ;;  %v4592_v61 = vld [vmem:[#allocation5 + $0x150] sm:$0xff]  ;;  %670 = vmatpush.msrb.mxu1 %v4594_v11  ;;  %711 = vmatpush.msra.mxu3 %v4613_v36 }
  0x9c   :  { %8603 = vst [vmem:[#allocation123_spill] sm:$0xff] %v4577_v21  ;;  %v4601_v21 = vld [vmem:[%s7854_s3] sm:$0xf]  ;;  %609 = vmatpush.msra.mxu2 %v4592_v61 }
  0x9d   :  { %8604 = vst [vmem:[#allocation124_spill] sm:$0xff] %v4579_v0  ;;  %v4605_v0 = vld [vmem:[#allocation7 + $0x118] sm:$0xff]  ;;  %712 = vmatpush.msra.mxu3 %v4632_v51  ;;  %v4653_v51 = vld [vmem:[#allocation5 + $0xb0] sm:$0xff] }
  0x9e   :  { %8605 = vst [vmem:[#allocation125_spill] sm:$0xff] %v4581_v62  ;;  %730 = vmatpush.msrb.mxu0 %v4605_v0  ;;  %v4611_v62 = vld [vmem:[#allocation7 + $0xe0] sm:$0xff] }
  0x9f   :  { %8606 = vst [vmem:[#allocation126_spill] sm:$0xff] %v4585_v58  ;;  %v4609_v58 = vld [vmem:[#allocation5 + $0x128] sm:$0xff]  ;;  %671 = vmatpush.msrb.mxu1 %v4611_v62 }
  0xa0   :  { %8607 = vst [vmem:[#allocation127_spill] sm:$0xff] %v4588_v57  ;;  %610 = vmatpush.msra.mxu2 %v4609_v58 }
  0xa1   :  { %8608 = vst [vmem:[#allocation128_spill] sm:$0xff] %v4592_v61  ;;  %v4619_v61 = vld [vmem:[#allocation7 + $0xf8] sm:$0xff]  ;;  %672 = vmatpush.msrb.mxu1 %v4630_v55 }
  0xa2   :  { %8609 = vst [vmem:[#allocation129_spill] sm:$0xff] %v4594_v11  ;;  %v367_v11 = vmul.f32 %v4588_v57, %v4615_v60  ;;  %731 = vmatpush.msrb.mxu0 %v4619_v61  ;;  %v4640_v57 = vld [vmem:[#allocation5 + $0xd8] sm:$0xff] }
  0xa3   :  { %8610 = vst [vmem:[#allocation130_spill] sm:$0xff] %v4596_v59  ;;  %v4624_v59 = vperm.slane %v4601_v21, 0 }
  0xa4   :  { %8611 = vst [vmem:[#allocation131_spill] sm:$0xff] %v4605_v0  ;;  %v4628_v0 = vld [vmem:[#allocation5 + $0x100] sm:$0xff] }
  0xa5   :  { %8612 = vst [vmem:[#allocation132_spill] sm:$0xff] %v4609_v58  ;;  %611 = vmatpush.msra.mxu2 %v4628_v0  ;;  %v4648_v58 = vld [vmem:[#allocation7 + $0xb8] sm:$0xff] }
  0xa6   :  { %8613 = vst [vmem:[#allocation133_spill] sm:$0xff] %v4611_v62  ;;  %v4636_v62 = vld [vmem:[#allocation7 + $0xd8] sm:$0xff] }
  0xa7   :  { %8614 = vst [vmem:[#allocation134_spill] sm:$0xff] %v4613_v36  ;;  %732 = vmatpush.msrb.mxu0 %v4636_v62  ;;  %v4642_v36 = vld [vmem:[#allocation7 + $0xa0] sm:$0xff]  ;;  %612 = vmatpush.msra.mxu2 %v4640_v57 }
  0xa8   :  { %8615 = vst [vmem:[#allocation135_spill] sm:$0xff] %v4619_v61  ;;  %v4644_v61 = vld [vmem:[#allocation7 + $0xb0] sm:$0xff]  ;;  %673 = vmatpush.msrb.mxu1 %v4642_v36 }
  0xa9   :  { %8616 = vst [vmem:[#allocation136_spill] sm:$0xff] %v4624_v59  ;;  %713 = vmatpush.msra.mxu3 %v4644_v61  ;;  %733 = vmatpush.msrb.mxu0 %v4648_v58 }
  0xaa   :  { %8617 = vst [vmem:[#allocation137_spill] sm:$0xff] %v4628_v0  ;;  %v4657_v0 = vld [vmem:[#allocation7 + $0x90] sm:$0xff]  ;;  %613 = vmatpush.msra.mxu2 %v4653_v51 }
  0xab   :  { %8618 = vst [vmem:[#allocation138_spill] sm:$0xff] %v4630_v55  ;;  %v409_v55 = vadd.f32 %v4624_v59, %v367_v11  ;;  %714 = vmatpush.msra.mxu3 %v4657_v0  ;;  %v4668_v11 = vld [vmem:[#allocation5 + $0x88] sm:$0xff]  ;;  %v4672_v59 = vld [vmem:[#allocation7 + $0x70] sm:$0xff] }
  0xac   :  { %8620 = vst [vmem:[#allocation140_spill] sm:$0xff] %v4636_v62  ;;  %v4655_v62 = vld [vmem:[#allocation7 + $0x80] sm:$0xff]  ;;  %614 = vmatpush.msra.mxu2 %v4668_v11 }
  0xad   :  { %8621 = vst [vmem:[#allocation141_spill] sm:$0xff] %v4640_v57  ;;  %674 = vmatpush.msrb.mxu1 %v4655_v62  ;;  %v4664_v57 = vperm.slane %v4569_v63, 1  ;;  %715 = vmatpush.msra.mxu3 %v4672_v59 }
  0xae   :  { %8622 = vst [vmem:[#allocation142_spill] sm:$0xff] %v4642_v36  ;;  %v4661_v36 = vld [vmem:[#allocation7 + $0x98] sm:$0xff] }
  0xaf   :  { %8623 = vst [vmem:[#allocation143_spill] sm:$0xff] %v4644_v61  ;;  %734 = vmatpush.msrb.mxu0 %v4661_v36  ;;  %716 = vmatpush.msra.mxu3 %v4687_v48  ;;  %v4716_v48 = vperm.slane %v4601_v21, 2 }
  0xb0   :  { %8624 = vst [vmem:[#allocation144_spill] sm:$0xff] %v4648_v58  ;;  %v4670_v58 = vld [vmem:[#allocation7 + $0x60] sm:$0xff] }
  0xb1   :  { %8625 = vst [vmem:[#allocation145_spill] sm:$0xff] %v4653_v51  ;;  %675 = vmatpush.msrb.mxu1 %v4670_v58  ;;  %v4679_v51 = vperm.slane %v4569_v63, 2 }
  0xb2   :  { %8626 = vst [vmem:[#allocation146_spill] sm:$0xff] %v4655_v62  ;;  %v470_v52 = vpop.f32.mrf.mxu1  ;;  %v4676_v62 = vld [vmem:[#allocation7 + $0x78] sm:$0xff] }
  0xb3   :  { %8627 = vst [vmem:[#allocation147_spill] sm:$0xff] %v4657_v0  ;;  %v533_v61 = vadd.f32 %v470_v52, %v409_v55  ;;  %735 = vmatpush.msrb.mxu0 %v4676_v62  ;;  %v4685_v0 = vld [vmem:[#allocation7 + $0x40] sm:$0xff]  ;;  %v4694_v52 = vld [vmem:[#allocation7 + $0x58] sm:$0xff]  ;;  %v368_v55 = vmul.f32 %v4664_v57, %v4615_v60 }
  0xb4   :  { %8628 = vst [vmem:[#allocation148_spill] sm:$0xff] %v4661_v36  ;;  %v4683_v36 = vld [vmem:[#allocation5 + $0x60] sm:$0xff]  ;;  %676 = vmatpush.msrb.mxu1 %v4685_v0 }
  0xb5   :  { %8629 = vst [vmem:[#allocation149_spill] sm:$0xff] %v4664_v57  ;;  %615 = vmatpush.msra.mxu2 %v4683_v36  ;;  %736 = vmatpush.msrb.mxu0 %v4694_v52  ;;  %v537_v57 = vmul.f32 0.5, %v533_v61  ;;  %v4729_v61 = vperm.slane %v4601_v21, 3 }
  0xb6   :  { %8630 = vst [vmem:[#allocation150_spill] sm:$0xff] %v4668_v11  ;;  %v4690_v11 = vperm.slane %v4569_v63, 3  ;;  %v4705_v63 = vld [vmem:[#allocation7 + $0x20] sm:$0xff] }
  0xb7   :  { %8631 = vst [vmem:[#allocation151_spill] sm:$0xff] %v4670_v58  ;;  %v4703_v58 = vld [vmem:[#allocation5 + $0x38] sm:$0xff]  ;;  %677 = vmatpush.msrb.mxu1 %v4705_v63  ;;  %3122 = vtanh.f32 %v537_v57 }
  0xb8   :  { %8632 = vst [vmem:[#allocation152_spill] sm:$0xff] %v4672_v59  ;;  %v4707_v59 = vld [vmem:[#allocation7 + $0x30] sm:$0xff]  ;;  %616 = vmatpush.msra.mxu2 %v4703_v58 }
  0xb9   :  { %8633 = vst [vmem:[#allocation153_spill] sm:$0xff] %v4676_v62  ;;  %v4699_v62 = vperm.slane %v4601_v21, 1  ;;  %717 = vmatpush.msra.mxu3 %v4707_v59  ;;  %678 = vmatpush.msrb.mxu1 %v4722_v56  ;;  %v510_v54 = vpop.f32.mrf.mxu2 }
  0xba   :  { %8634 = vst [vmem:[#allocation154_spill] sm:$0xff] %v4679_v51 }
  0xbb   :  { %8635 = vst [vmem:[#allocation155_spill] sm:$0xff] %v4683_v36  ;;  %v369_v36 = vmul.f32 %v4679_v51, %v4615_v60  ;;  %v4733_v51 = vld [vmem:[#allocation7 + $0x18] sm:$0xff]  ;;  %v530_v46 = vpop.f32.mrf.mxu3 }
  0xbc   :  { %8636 = vst [vmem:[#allocation156_spill] sm:$0xff] %v4685_v0  ;;  %v4711_v0 = vld [vmem:[#allocation7 + $0x38] sm:$0xff] }
  0xbd   :  { %8638 = vst [vmem:[#allocation158_spill] sm:$0xff] %v4690_v11  ;;  %737 = vmatpush.msrb.mxu0 %v4711_v0  ;;  %v3123_v50 = vpop.eup %3122 }
  0xbe   :  { %8639 = vst [vmem:[#allocation159_spill] sm:$0xff] %v4694_v52  ;;  %v4720_v52 = vld [vmem:[#allocation5 + $0x10] sm:$0xff] }
  0xbf   :  { %8640 = vst [vmem:[#allocation160_spill] sm:$0xff] %v4699_v62  ;;  %617 = vmatpush.msra.mxu2 %v4720_v52  ;;  %738 = vmatpush.msrb.mxu0 %v4733_v51 }
  0xc0   :  { %8641 = vst [vmem:[#allocation161_spill] sm:$0xff] %v4703_v58  ;;  %v4724_v58 = vld [vmem:[#allocation7 + $0x10] sm:$0xff] }
  0xc1   :  { %8642 = vst [vmem:[#allocation162_spill] sm:$0xff] %v4705_v63  ;;  %v370_v63 = vmul.f32 %v4690_v11, %v4615_v60  ;;  %718 = vmatpush.msra.mxu3 %v4724_v58 }
  0xc2   :  { %8643 = vst [vmem:[#allocation163_spill] sm:$0xff] %v4707_v59  ;;  %v411_v59 = vadd.f32 %v4716_v48, %v369_v36 }
  0xc3   :  { %8644 = vst [vmem:[#allocation164_spill] sm:$0xff] %v4711_v0  ;;  %v410_v0 = vadd.f32 %v4699_v62, %v368_v55  ;;  %v412_v21 = vadd.f32 %v4729_v61, %v370_v63  ;;  %v539_v55 = vmul.f32 0.5, %v3123_v50  ;;  %v4745_v50 = vld [vmem:[#allocation7 + $0x1e8] sm:$0xff] }
  0xc4   :  { %8645 = vst [vmem:[#allocation165_spill] sm:$0xff] %v4716_v48 }
  0xc5   :  { %8646 = vst [vmem:[#allocation166_spill] sm:$0xff] %v4720_v52  ;;  %v535_v52 = vadd.f32 %v510_v54, %v411_v59  ;;  %v536_v56 = vadd.f32 %v530_v46, %v412_v21  ;;  %v540_v43 = vadd.f32 0.5, %v539_v55  ;;  %v8684_v55 = vld [vmem:[#allocation59_spill] sm:$0xff] }
  0xc6   :  { %8648 = vst [vmem:[#allocation168_spill] sm:$0xff] %v4724_v58 }
  0xc7   :  { %8649 = vst [vmem:[#allocation169_spill] sm:$0xff] %v4733_v51  ;;  %v546_v62 = vmul.f32 0.5, %v536_v56  ;;  %v8676_v56 = vld [vmem:[#allocation51_spill] sm:$0xff] }
  0xd2   :  { %v490_v60 = vpop.f32.mrf.mxu1 }
  0xd3   :  { %v534_v11 = vadd.f32 %v490_v60, %v410_v0  ;;  %v8683_v60 = vld [vmem:[#allocation28_spill] sm:$0xff] }
  0xd5   :  { %v541_v53 = vmul.f32 0.5, %v534_v11  ;;  %v8681_v11 = vld [vmem:[#allocation57_spill] sm:$0xff] }
  0xd7   :  { %3124 = vtanh.f32 %v541_v53  ;;  %v559_v53 = vpop.permute.xlu0 %558 }
  0xd8   :  { %3126 = vtanh.f32 %v535_v52  ;;  %vm560_vm3 = vcmp.eq.s32.totalorder %v559_v53, 1  ;;  %v8682_v52 = vld [vmem:[#allocation119_spill] sm:$0xff]  ;;  %v8690_v53 = vld [vmem:[#allocation30_spill] sm:$0xff] }
  0xd9   :  { %3128 = vtanh.f32 %v546_v62  ;;  %v8678_v62 = vld [vmem:[#allocation115_spill] sm:$0xff] }
  0xdd   :  { %v3125_v58 = vpop.eup %3124 }
  0xde   :  { %v543_v51 = vmul.f32 0.5, %v3125_v58  ;;  %v3127_v57 = vpop.eup %3126  ;;  %v8677_v58 = vld [vmem:[#allocation53_spill] sm:$0xff] }
  0xdf   :  { %v551_v48 = vmul.f32 %v3127_v57, %v540_v43  ;;  %v3129_v47 = vpop.eup %3128  ;;  %v4755_v43 = vld [vmem:[#allocation7 + $0x1c8] sm:$0xff]  ;;  %v8685_v57 = vld [vmem:[#allocation61_spill] sm:$0xff] }
  0xe0   :  { %v544_v36 = vadd.f32 0.5, %v543_v51  ;;  %v548_v54 = vmul.f32 0.5, %v3129_v47  ;;  %v4761_v47 = vld [vmem:[#allocation7 + $0x1a8] sm:$0xff]  ;;  %v8679_v51 = vld [vmem:[#allocation27_spill] sm:$0xff] }
  0xe2   :  { %v550_v49 = vmul.f32 0.0, %v544_v36  ;;  %v549_v46 = vadd.f32 0.5, %v548_v54  ;;  %v8686_v36 = vld [vmem:[#allocation123_spill] sm:$0xff]  ;;  %v8687_v54 = vld [vmem:[#allocation29_spill] sm:$0xff] }
  0xe4   :  { %v4740_v63 = vadd.f32 %v551_v48, %v550_v49  ;;  %v4767_v48 = vld [vmem:[#allocation7 + $0x188] sm:$0xff] }
  0xe5   :  { %v8675_v49 = vld [vmem:[#allocation26_spill] sm:$0xff] }
  0xe6   :  { %3130 = vtanh.f32 %v4740_v63 }
  0xec   :  { %v3131_v59 = vpop.eup %3130 }
  0xed   :  { %v4743_v0 = vmul.f32 %v3131_v59, %v549_v46  ;;  %v8688_v46 = vld [vmem:[#allocation63_spill] sm:$0xff]  ;;  %v8689_v59 = vld [vmem:[#allocation65_spill] sm:$0xff] }
  0xef   :  { %3059 = vmatmul.msk.f32.vlgmr.msrb.gmra.mxu2 %vm560_vm3, %v4743_v0  ;;  %3060 = vmatmul.msk.f32.vlgmr.msra.gmra.mxu1 %vm560_vm3, %v4743_v0 }
  0xf0   :  { %3062 = vmatmul.msk.f32.vlgmr.msrb.gmra.mxu3 %vm560_vm3, %v4743_v0  ;;  %3063 = vmatmul.msk.f32.vlgmr.msra.gmra.mxu0 %vm560_vm3, %v4743_v0 }
  0xf1   :  { %683 = vmatpush.msrb.mxu2 %v4745_v50  ;;  %766 = vmatpush.msra.mxu1 %v4098_v1  ;;  %v4775_v1 = vld [vmem:[#allocation7 + $0x168] sm:$0xff] }
  0xf2   :  { %806 = vmatpush.msrb.mxu3 %v4108_v5  ;;  %826 = vmatpush.msra.mxu0 %v4116_v8  ;;  %v4802_v5 = vld [vmem:[#allocation7 + $0xe8] sm:$0xff] }
  0xf3   :  { %684 = vmatpush.msrb.mxu2 %v4755_v43  ;;  %767 = vmatpush.msra.mxu1 %v4100_v2  ;;  %v4784_v2 = vld [vmem:[#allocation7 + $0x148] sm:$0xff] }
  0xf4   :  { %807 = vmatpush.msrb.mxu3 %v4110_v6  ;;  %827 = vmatpush.msra.mxu0 %v4121_v10  ;;  %v4808_v6 = vld [vmem:[#allocation7 + $0xc8] sm:$0xff] }
  0xf5   :  { %685 = vmatpush.msrb.mxu2 %v4761_v47  ;;  %768 = vmatpush.msra.mxu1 %v4103_v3  ;;  %v4790_v3 = vld [vmem:[#allocation7 + $0x128] sm:$0xff] }
  0xf6   :  { %808 = vmatpush.msrb.mxu3 %v4119_v9  ;;  %828 = vmatpush.msra.mxu0 %v4128_v12  ;;  %v4820_v8 = vld [vmem:[#allocation7 + $0x88] sm:$0xff] }
  0xf7   :  { %686 = vmatpush.msrb.mxu2 %v4767_v48  ;;  %769 = vmatpush.msra.mxu1 %v4106_v4  ;;  %v4796_v4 = vld [vmem:[#allocation7 + $0x108] sm:$0xff] }
  0xf8   :  { %809 = vmatpush.msrb.mxu3 %v4133_v14  ;;  %829 = vmatpush.msra.mxu0 %v4137_v15  ;;  %v4826_v9 = vld [vmem:[#allocation7 + $0x68] sm:$0xff]  ;;  %v8651_v14 = vld [vmem:[#allocation17_spill] sm:$0xff] }
  0xf9   :  { %3061 = vmatmul.msk.f32.vlgmr.msra.gmra.mxu2 %vm560_vm3, %v4743_v0  ;;  %679 = vmatmul.f32.vlgmr.msrb.gmra.mxu1 %v8516_v25  ;;  %v4832_v10 = vld [vmem:[#allocation7 + $0x48] sm:$0xff] }
  0xfa   :  { %687 = vmatpush.msrb.mxu2 %v4775_v1  ;;  %719 = vmatmul.f32.vlgmr.msra.gmra.mxu3 %v8516_v25  ;;  %v4838_v12 = vld [vmem:[#allocation7 + $0x28] sm:$0xff] }
  0xfb   :  { %739 = vmatmul.f32.vlgmr.msrb.gmra.mxu0 %v8516_v25  ;;  %770 = vmatpush.msra.mxu1 %v4113_v7  ;;  %v4814_v7 = vld [vmem:[#allocation7 + $0xa8] sm:$0xff] }
  0xfc   :  { %810 = vmatpush.msrb.mxu3 %v4142_v17  ;;  %830 = vmatpush.msra.mxu0 %v4146_v18  ;;  %v4844_v15 = vld [vmem:[#allocation7 + $0x8] sm:$0xff]  ;;  %v8654_v18 = vld [vmem:[#allocation20_spill] sm:$0xff] }
  0xfd   :  { %688 = vmatpush.msrb.mxu2 %v4784_v2  ;;  %771 = vmatpush.msra.mxu1 %v4130_v13  ;;  %v8650_v13 = vld [vmem:[#allocation15_spill] sm:$0xff]  ;;  %v8653_v17 = vld [vmem:[#allocation18_spill] sm:$0xff] }
  0xfe   :  { %811 = vmatpush.msrb.mxu3 %v4151_v20  ;;  %831 = vmatpush.msra.mxu0 %v4160_v22  ;;  %v8656_v20 = vld [vmem:[#allocation21_spill] sm:$0xff]  ;;  %v8657_v22 = vld [vmem:[#allocation23_spill] sm:$0xff] }
  0xff   :  { %689 = vmatpush.msrb.mxu2 %v4790_v3  ;;  %772 = vmatpush.msra.mxu1 %v4139_v16  ;;  %v8652_v16 = vld [vmem:[#allocation13_spill] sm:$0xff] }
 0x100   :  { %812 = vmatpush.msrb.mxu3 %v4166_v24  ;;  %832 = vmatpush.msra.mxu0 %v4171_v26  ;;  %v8658_v24 = vld [vmem:[#allocation16_spill] sm:$0xff]  ;;  %v8659_v26 = vld [vmem:[#allocation19_spill] sm:$0xff] }
 0x101   :  { %690 = vmatpush.msrb.mxu2 %v4796_v4  ;;  %773 = vmatpush.msra.mxu1 %v4148_v19  ;;  %v8655_v19 = vld [vmem:[#allocation14_spill] sm:$0xff] }
 0x102   :  { %813 = vmatpush.msrb.mxu3 %v4176_v28  ;;  %833 = vmatpush.msra.mxu0 %v4180_v29  ;;  %v4867_v28 = vld [vmem:[%s7852_s1] sm:$0xff] }
 0x103   :  { %691 = vmatpush.msrb.mxu2 %v4802_v5  ;;  %774 = vmatpush.msra.mxu1 %v4163_v23  ;;  %v310_v23 = vld [vmem:[%s7851_s0 + $0x8] sm:$0xff]  ;;  %vm868_vm4 = vcmp.gt.s32.totalorder %v4867_v28, 1  ;;  %v8661_v29 = vld [vmem:[#allocation101_spill] sm:$0xff]  ;;  %vm1498_vm5 = vcmp.gt.s32.totalorder %v4867_v28, 3  ;;  %vm2443_vm6 = vcmp.gt.s32.totalorder %v4867_v28, 6  ;;  %vm1183_vm8 = vcmp.gt.s32.totalorder %v4867_v28, 2 }
 0x104   :  { %814 = vmatpush.msrb.mxu3 %v4185_v31  ;;  %834 = vmatpush.msra.mxu0 %v4189_v32  ;;  %v8663_v31 = vld [vmem:[#allocation22_spill] sm:$0xff]  ;;  %v8664_v32 = vld [vmem:[#allocation41_spill] sm:$0xff]  ;;  %vm2128_vm9 = vcmp.gt.s32.totalorder %v4867_v28, 5 }
 0x105   :  { %692 = vmatpush.msrb.mxu2 %v4808_v6  ;;  %775 = vmatpush.msra.mxu1 %v4173_v27  ;;  %v8660_v27 = vld [vmem:[#allocation37_spill] sm:$0xff] }
 0x106   :  { %815 = vmatpush.msrb.mxu3 %v4194_v34  ;;  %835 = vmatpush.msra.mxu0 %v4198_v35  ;;  %v8666_v34 = vld [vmem:[#allocation43_spill] sm:$0xff]  ;;  %v8667_v35 = vld [vmem:[#allocation24_spill] sm:$0xff] }
 0x107   :  { %693 = vmatpush.msrb.mxu2 %v4814_v7  ;;  %776 = vmatpush.msra.mxu1 %v4182_v30  ;;  %v8662_v30 = vld [vmem:[#allocation39_spill] sm:$0xff] }
 0x108   :  { %816 = vmatpush.msrb.mxu3 %v4206_v38  ;;  %836 = vmatpush.msra.mxu0 %v4210_v39  ;;  %v8669_v39 = vld [vmem:[#allocation45_spill] sm:$0xff] }
 0x109   :  { %694 = vmatpush.msrb.mxu2 %v4820_v8  ;;  %777 = vmatpush.msra.mxu1 %v4191_v33  ;;  %v8665_v33 = vld [vmem:[#allocation104_spill] sm:$0xff] }
 0x10a   :  { %817 = vmatpush.msrb.mxu3 %v4215_v41  ;;  %837 = vmatpush.msra.mxu0 %v4219_v42  ;;  %v8671_v41 = vld [vmem:[#allocation47_spill] sm:$0xff]  ;;  %v8672_v42 = vld [vmem:[#allocation25_spill] sm:$0xff] }
 0x10b   :  { %695 = vmatpush.msrb.mxu2 %v4826_v9  ;;  %778 = vmatpush.msra.mxu1 %v4203_v37  ;;  %v8668_v37 = vmov 0  }
 0x10c   :  { %818 = vmatpush.msrb.mxu3 %v4224_v44  ;;  %838 = vmatpush.msra.mxu0 %v4228_v45  ;;  %v869_v38 = vsel %vm868_vm4, 1, %v8668_v37  ;;  %v8673_v44 = vld [vmem:[#allocation49_spill] sm:$0xff]  ;;  %v8674_v45 = vld [vmem:[#allocation111_spill] sm:$0xff]  ;;  %v1499_v21 = vsel %vm1498_vm5, 1, %v8668_v37  ;;  %v2129_v28 = vsel %vm2128_vm9, 1, %v8668_v37 }
 0x10d   :  { %696 = vmatpush.msrb.mxu2 %v4832_v10  ;;  %779 = vmatpush.msra.mxu1 %v4212_v40  ;;  %v8670_v40 = vld [vmem:[#allocation107_spill] sm:$0xff] }
 0x10e   :  { %819 = vmatpush.msrb.mxu3 %v8650_v13  ;;  %839 = vmatpush.msra.mxu0 %v8651_v14  ;;  %v8691_v13 = vld [vmem:[#allocation128_spill] sm:$0xff]  ;;  %v8692_v14 = vld [vmem:[#allocation67_spill] sm:$0xff] }
 0x10f   :  { %697 = vmatpush.msrb.mxu2 %v4838_v12  ;;  %780 = vmatpush.msra.mxu1 %v8652_v16  ;;  %v8693_v16 = vld [vmem:[#allocation69_spill] sm:$0xff] }
 0x110   :  { %820 = vmatpush.msrb.mxu3 %v8653_v17  ;;  %840 = vmatpush.msra.mxu0 %v8654_v18  ;;  %v8694_v17 = vld [vmem:[#allocation31_spill] sm:$0xff]  ;;  %v8695_v18 = vld [vmem:[#allocation132_spill] sm:$0xff] }
 0x111   :  { %698 = vmatpush.msrb.mxu2 %v4844_v15  ;;  %781 = vmatpush.msra.mxu1 %v8655_v19  ;;  %v8696_v19 = vld [vmem:[#allocation71_spill] sm:$0xff] }
 0x112   :  { %821 = vmatpush.msrb.mxu3 %v8656_v20  ;;  %841 = vmatpush.msra.mxu0 %v8657_v22  ;;  %v8697_v20 = vld [vmem:[#allocation73_spill] sm:$0xff]  ;;  %v8698_v22 = vld [vmem:[#allocation32_spill] sm:$0xff] }
 0x113   :  { %699 = vmatmul.f32.vlgmr.msrb.gmra.mxu2 %v8516_v25  ;;  %782 = vmatmul.f32.vlgmr.msra.gmra.mxu1 %v4743_v0  ;;  %v8680_v25 = vld [vmem:[#allocation55_spill] sm:$0xff] }
 0x114   :  { %786 = vmatpush.msra.mxu2 %v8658_v24  ;;  %822 = vmatmul.f32.vlgmr.msrb.gmra.mxu3 %v4743_v0  ;;  %v8699_v24 = vld [vmem:[#allocation137_spill] sm:$0xff] }
 0x115   :  { %842 = vmatmul.f32.vlgmr.msra.gmra.mxu0 %v4743_v0  ;;  %325 = vperm.xlu1 %3119, %v310_v23   ;;  %v314_v23 = vld [vmem:[%s7851_s0 + $0x28] sm:$0xff] }
 0x116   :  { %787 = vmatpush.msra.mxu2 %v8659_v26  ;;  %875 = vmatpush.msrb.mxu1 %v8660_v27  ;;  %v8700_v26 = vld [vmem:[#allocation75_spill] sm:$0xff]  ;;  %v8701_v27 = vld [vmem:[#allocation77_spill] sm:$0xff] }
 0x117   :  { %915 = vmatpush.msra.mxu3 %v8661_v29  ;;  %935 = vmatpush.msrb.mxu0 %v8662_v30  ;;  %v8702_v29 = vld [vmem:[#allocation33_spill] sm:$0xff] }
 0x118   :  { %788 = vmatpush.msra.mxu2 %v8663_v31  ;;  %876 = vmatpush.msrb.mxu1 %v8664_v32  ;;  %v8703_v30 = vld [vmem:[#allocation141_spill] sm:$0xff]  ;;  %v8704_v31 = vld [vmem:[#allocation79_spill] sm:$0xff]  ;;  %v8705_v32 = vld [vmem:[#allocation34_spill] sm:$0xff] }
 0x119   :  { %916 = vmatpush.msra.mxu3 %v8665_v33  ;;  %936 = vmatpush.msrb.mxu0 %v8666_v34  ;;  %v8706_v33 = vld [vmem:[#allocation81_spill] sm:$0xff] }
 0x11a   :  { %789 = vmatpush.msra.mxu2 %v8667_v35  ;;  %877 = vmatpush.msrb.mxu1 %v8669_v39  ;;  %v8707_v34 = vld [vmem:[#allocation145_spill] sm:$0xff]  ;;  %v8708_v35 = vld [vmem:[#allocation83_spill] sm:$0xff] }
 0x11b   :  { %917 = vmatpush.msra.mxu3 %v8670_v40  ;;  %937 = vmatpush.msrb.mxu0 %v8671_v41  ;;  %v8710_v39 = vld [vmem:[#allocation85_spill] sm:$0xff]  ;;  %v8711_v40 = vld [vmem:[#allocation150_spill] sm:$0xff]  ;;  %v8712_v41 = vld [vmem:[#allocation87_spill] sm:$0xff] }
 0x11c   :  { %790 = vmatpush.msra.mxu2 %v8672_v42  ;;  %878 = vmatpush.msrb.mxu1 %v8673_v44  ;;  %v8713_v42 = vld [vmem:[#allocation36_spill] sm:$0xff]  ;;  %v2444_v44 = vsel %vm2443_vm6, 1, %v8668_v37 }
 0x11d   :  { %871 = vperm.xlu1 %3119, %v869_v38   ;;  %918 = vmatpush.msra.mxu3 %v8674_v45  ;;  %v8709_v38 = vld [vmem:[#allocation35_spill] sm:$0xff]  ;;  %v8714_v45 = vld [vmem:[#allocation89_spill] sm:$0xff] }
 0x11e   :  { %791 = vmatpush.msra.mxu2 %v8675_v49  ;;  %938 = vmatpush.msrb.mxu0 %v8676_v56  ;;  %v8715_v49 = vld [vmem:[#allocation155_spill] sm:$0xff]  ;;  %v8716_v56 = vld [vmem:[#allocation38_spill] sm:$0xff] }
 0x11f   :  { %879 = vmatpush.msrb.mxu1 %v8677_v58  ;;  %919 = vmatpush.msra.mxu3 %v8678_v62  ;;  %v8717_v58 = vld [vmem:[#allocation91_spill] sm:$0xff]  ;;  %v8718_v62 = vld [vmem:[#allocation93_spill] sm:$0xff] }
 0x120   :  { %792 = vmatpush.msra.mxu2 %v8679_v51  ;;  %939 = vmatpush.msrb.mxu0 %v8680_v25  ;;  %v8719_v51 = vld [vmem:[#allocation42_spill] sm:$0xff]  ;;  %v8720_v25 = vld [vmem:[#allocation161_spill] sm:$0xff] }
 0x121   :  { %880 = vmatpush.msrb.mxu1 %v8681_v11  ;;  %920 = vmatpush.msra.mxu3 %v8682_v52  ;;  %v8721_v11 = vld [vmem:[#allocation95_spill] sm:$0xff]  ;;  %v8722_v52 = vld [vmem:[#allocation97_spill] sm:$0xff] }
 0x122   :  { %793 = vmatpush.msra.mxu2 %v8683_v60  ;;  %940 = vmatpush.msrb.mxu0 %v8684_v55  ;;  %v8723_v60 = vld [vmem:[#allocation46_spill] sm:$0xff]  ;;  %v8726_v55 = vld [vmem:[#allocation40_spill] sm:$0xff] }
 0x123   :  { %881 = vmatpush.msrb.mxu1 %v8685_v57  ;;  %921 = vmatpush.msra.mxu3 %v8686_v36  ;;  %v8727_v57 = vld [vmem:[#allocation50_spill] sm:$0xff]  ;;  %v8728_v36 = vld [vmem:[#allocation103_spill] sm:$0xff] }
 0x124   :  { %794 = vmatpush.msra.mxu2 %v8687_v54  ;;  %941 = vmatpush.msrb.mxu0 %v8688_v46  ;;  %v8729_v54 = vld [vmem:[#allocation44_spill] sm:$0xff]  ;;  %v8730_v46 = vld [vmem:[#allocation54_spill] sm:$0xff] }
 0x125   :  { %1501 = vperm.xlu1 %3119, %v1499_v21   ;;  %882 = vmatpush.msrb.mxu1 %v8689_v59  ;;  %v8725_v21 = vld [vmem:[#allocation99_spill] sm:$0xff]  ;;  %v8731_v59 = vld [vmem:[#allocation106_spill] sm:$0xff] }
 0x126   :  { %795 = vmatpush.msra.mxu2 %v8690_v53  ;;  %922 = vmatpush.msra.mxu3 %v8691_v13  ;;  %v8732_v53 = vld [vmem:[#allocation48_spill] sm:$0xff]  ;;  %v8733_v13 = vld [vmem:[#allocation58_spill] sm:$0xff] }
 0x127   :  { %942 = vmatpush.msrb.mxu0 %v8692_v14  ;;  %883 = vmatpush.msrb.mxu1 %v8693_v16  ;;  %v8734_v14 = vld [vmem:[#allocation109_spill] sm:$0xff]  ;;  %v8735_v16 = vld [vmem:[#allocation52_spill] sm:$0xff] }
 0x128   :  { %796 = vmatpush.msra.mxu2 %v8694_v17  ;;  %923 = vmatpush.msra.mxu3 %v8695_v18  ;;  %v8736_v17 = vld [vmem:[#allocation62_spill] sm:$0xff]  ;;  %v8737_v18 = vld [vmem:[#allocation113_spill] sm:$0xff] }
 0x129   :  { %943 = vmatpush.msrb.mxu0 %v8696_v19  ;;  %884 = vmatpush.msrb.mxu1 %v8697_v20  ;;  %v8738_v19 = vld [vmem:[#allocation56_spill] sm:$0xff]  ;;  %v8739_v20 = vld [vmem:[#allocation66_spill] sm:$0xff] }
 0x12a   :  { %797 = vmatpush.msra.mxu2 %v8698_v22  ;;  %924 = vmatpush.msra.mxu3 %v8699_v24  ;;  %v8740_v22 = vld [vmem:[#allocation117_spill] sm:$0xff]  ;;  %v8742_v24 = vld [vmem:[#allocation70_spill] sm:$0xff] }
 0x12b   :  { %944 = vmatpush.msrb.mxu0 %v8700_v26  ;;  %885 = vmatpush.msrb.mxu1 %v8701_v27  ;;  %v8743_v26 = vld [vmem:[#allocation121_spill] sm:$0xff]  ;;  %v8744_v27 = vld [vmem:[#allocation64_spill] sm:$0xff] }
 0x12c   :  { %798 = vmatpush.msra.mxu2 %v8702_v29  ;;  %925 = vmatpush.msra.mxu3 %v8703_v30  ;;  %v8745_v29 = vld [vmem:[#allocation74_spill] sm:$0xff]  ;;  %v8746_v30 = vld [vmem:[#allocation125_spill] sm:$0xff] }
 0x12d   :  { %345 = vperm.xlu1 %3119, %v314_v23   ;;  %945 = vmatpush.msrb.mxu0 %v8704_v31  ;;  %v8741_v23 = vld [vmem:[#allocation60_spill] sm:$0xff] }
 0x12e   :  { %799 = vmatpush.msra.mxu2 %v8705_v32  ;;  %886 = vmatpush.msrb.mxu1 %v8706_v33  ;;  %v8747_v31 = vld [vmem:[#allocation68_spill] sm:$0xff]  ;;  %v8748_v32 = vld [vmem:[#allocation78_spill] sm:$0xff] }
 0x12f   :  { %926 = vmatpush.msra.mxu3 %v8707_v34  ;;  %946 = vmatpush.msrb.mxu0 %v8708_v35  ;;  %v8749_v33 = vld [vmem:[#allocation130_spill] sm:$0xff]  ;;  %v8750_v34 = vld [vmem:[#allocation72_spill] sm:$0xff] }
 0x130   :  { %800 = vmatpush.msra.mxu2 %v8709_v38  ;;  %887 = vmatpush.msrb.mxu1 %v8710_v39  ;;  %v8751_v35 = vld [vmem:[#allocation82_spill] sm:$0xff]  ;;  %v8753_v39 = vld [vmem:[#allocation76_spill] sm:$0xff] }
 0x131   :  { %927 = vmatpush.msra.mxu3 %v8711_v40  ;;  %947 = vmatpush.msrb.mxu0 %v8712_v41  ;;  %v8752_v38 = vld [vmem:[#allocation134_spill] sm:$0xff]  ;;  %v8755_v41 = vld [vmem:[#allocation139_spill] sm:$0xff] }
 0x132   :  { %801 = vmatpush.msra.mxu2 %v8713_v42  ;;  %888 = vmatpush.msrb.mxu1 %v8714_v45  ;;  %v8754_v40 = vld [vmem:[#allocation86_spill] sm:$0xff]  ;;  %v8756_v42 = vld [vmem:[#allocation80_spill] sm:$0xff]  ;;  %v8758_v45 = vld [vmem:[#allocation143_spill] sm:$0xff] }
 0x133   :  { %802 = vmatmul.f32.vlgmr.msra.gmra.mxu2 %v4743_v0  ;;  %928 = vmatpush.msra.mxu3 %v8715_v49  ;;  %v8724_v0 = vld [vmem:[#allocation166_spill] sm:$0xff]  ;;  %v8759_v49 = vld [vmem:[#allocation84_spill] sm:$0xff] }
 0x134   :  { %895 = vmatpush.msrb.mxu2 %v8716_v56  ;;  %948 = vmatpush.msrb.mxu0 %v8717_v58  ;;  %v8760_v56 = vld [vmem:[#allocation94_spill] sm:$0xff]  ;;  %v8761_v58 = vld [vmem:[#allocation147_spill] sm:$0xff] }
 0x135   :  { %2446 = vperm.xlu1 %3119, %v2444_v44   ;;  %889 = vmatpush.msrb.mxu1 %v8718_v62  ;;  %v8757_v44 = vld [vmem:[#allocation90_spill] sm:$0xff]  ;;  %v8762_v62 = vld [vmem:[#allocation88_spill] sm:$0xff] }
 0x136   :  { %896 = vmatpush.msrb.mxu2 %v8719_v51  ;;  %929 = vmatpush.msra.mxu3 %v8720_v25  ;;  %v8763_v51 = vld [vmem:[#allocation98_spill] sm:$0xff] }
 0x137   :  { %949 = vmatpush.msrb.mxu0 %v8721_v11  ;;  %890 = vmatpush.msrb.mxu1 %v8722_v52  ;;  %v8764_v25 = vld [vmem:[#allocation102_spill] sm:$0xff]  ;;  %v8765_v11 = vld [vmem:[#allocation152_spill] sm:$0xff] }
 0x138   :  { %897 = vmatpush.msrb.mxu2 %v8723_v60  ;;  %930 = vmatpush.msra.mxu3 %v8724_v0  ;;  %v8766_v52 = vld [vmem:[#allocation92_spill] sm:$0xff]  ;;  %v8767_v60 = vld [vmem:[#allocation105_spill] sm:$0xff] }
 0x139   :  { %950 = vmatpush.msrb.mxu0 %v8725_v21  ;;  %955 = vmatpush.msra.mxu1 %v8726_v55  ;;  %v8768_v0 = vld [vmem:[#allocation157_spill] sm:$0xff]  ;;  %v8769_v21 = vld [vmem:[#allocation96_spill] sm:$0xff] }
 0x13a   :  { %898 = vmatpush.msrb.mxu2 %v8727_v57  ;;  %997 = vmatpush.msrb.mxu3 %v4745_v50  ;;  %v8770_v55 = vld [vmem:[#allocation108_spill] sm:$0xff]  ;;  %v8771_v57 = vld [vmem:[#allocation163_spill] sm:$0xff] }
 0x13b   :  { %1017 = vmatpush.msra.mxu0 %v8728_v36  ;;  %956 = vmatpush.msra.mxu1 %v8729_v54  ;;  %v8772_v36 = vld [vmem:[#allocation100_spill] sm:$0xff] }
 0x13c   :  { %899 = vmatpush.msrb.mxu2 %v8730_v46  ;;  %998 = vmatpush.msrb.mxu3 %v4755_v43  ;;  %v8773_v54 = vld [vmem:[#allocation112_spill] sm:$0xff] }
 0x13d   :  { %1018 = vmatpush.msra.mxu0 %v8731_v59  ;;  %957 = vmatpush.msra.mxu1 %v8732_v53  ;;  %v8774_v46 = vld [vmem:[#allocation168_spill] sm:$0xff] }
 0x13e   :  { %900 = vmatpush.msrb.mxu2 %v8733_v13  ;;  %999 = vmatpush.msrb.mxu3 %v4761_v47  ;;  %v8775_v59 = vld [vmem:[#allocation116_spill] sm:$0xff] }
 0x13f   :  { %1019 = vmatpush.msra.mxu0 %v8734_v14  ;;  %958 = vmatpush.msra.mxu1 %v8735_v16  ;;  %v8776_v53 = vld [vmem:[#allocation120_spill] sm:$0xff]  ;;  %v8778_v14 = vld [vmem:[#allocation129_spill] sm:$0xff] }
 0x140   :  { %901 = vmatpush.msrb.mxu2 %v8736_v17  ;;  %1000 = vmatpush.msrb.mxu3 %v4767_v48  ;;  %v8777_v13 = vld [vmem:[#allocation124_spill] sm:$0xff]  ;;  %v8779_v16 = vld [vmem:[#allocation133_spill] sm:$0xff]  ;;  %v8780_v17 = vld [vmem:[#allocation138_spill] sm:$0xff] }
 0x141   :  { %1020 = vmatpush.msra.mxu0 %v8737_v18  ;;  %959 = vmatpush.msra.mxu1 %v8738_v19  ;;  %v8781_v18 = vld [vmem:[#allocation142_spill] sm:$0xff] }
 0x142   :  { %902 = vmatpush.msrb.mxu2 %v8739_v20  ;;  %1001 = vmatpush.msrb.mxu3 %v4775_v1  ;;  %v8782_v19 = vld [vmem:[#allocation146_spill] sm:$0xff]  ;;  %v8783_v20 = vld [vmem:[#allocation151_spill] sm:$0xff] }
 0x143   :  { %1021 = vmatpush.msra.mxu0 %v8740_v22  ;;  %960 = vmatpush.msra.mxu1 %v8741_v23  ;;  %v8784_v22 = vld [vmem:[#allocation156_spill] sm:$0xff]  ;;  %v441_v23 = vld [vmem:[%s7857_s6] sm:$0x1f] }
 0x144   :  { %903 = vmatpush.msrb.mxu2 %v8742_v24  ;;  %1002 = vmatpush.msrb.mxu3 %v4784_v2  ;;  %v5021_v24 = vperm.slane %v441_v23, 0 }
 0x145   :  { %1022 = vmatpush.msra.mxu0 %v8743_v26  ;;  %961 = vmatpush.msra.mxu1 %v8744_v27  ;;  %v8786_v26 = vld [vmem:[#allocation162_spill] sm:$0xff]  ;;  %v8787_v27 = vld [vmem:[#allocation167_spill] sm:$0xff] }
 0x146   :  { %904 = vmatpush.msrb.mxu2 %v8745_v29  ;;  %1003 = vmatpush.msrb.mxu3 %v4790_v3  ;;  %8785 = vst [vmem:[#allocation15_spill] sm:$0xff] %v5021_v24 }
 0x147   :  { %1023 = vmatpush.msra.mxu0 %v8746_v30  ;;  %962 = vmatpush.msra.mxu1 %v8747_v31 }
 0x148   :  { %905 = vmatpush.msrb.mxu2 %v8748_v32  ;;  %1004 = vmatpush.msrb.mxu3 %v4796_v4 }
 0x149   :  { %1024 = vmatpush.msra.mxu0 %v8749_v33  ;;  %963 = vmatpush.msra.mxu1 %v8750_v34 }
 0x14a   :  { %906 = vmatpush.msrb.mxu2 %v8751_v35  ;;  %1005 = vmatpush.msrb.mxu3 %v4802_v5 }
 0x14b   :  { %1025 = vmatpush.msra.mxu0 %v8752_v38  ;;  %964 = vmatpush.msra.mxu1 %v8753_v39  ;;  %v8788_v38 = vld [vmem:[#allocation127_spill] sm:$0xff] }
 0x14c   :  { %907 = vmatpush.msrb.mxu2 %v8754_v40  ;;  %1006 = vmatpush.msrb.mxu3 %v4808_v6 }
 0x14d   :  { %1026 = vmatpush.msra.mxu0 %v8755_v41  ;;  %965 = vmatpush.msra.mxu1 %v8756_v42  ;;  %v8789_v41 = vld [vmem:[#allocation136_spill] sm:$0xff] }
 0x14e   :  { %908 = vmatpush.msrb.mxu2 %v8757_v44  ;;  %1007 = vmatpush.msrb.mxu3 %v4814_v7 }
 0x14f   :  { %1027 = vmatpush.msra.mxu0 %v8758_v45  ;;  %966 = vmatpush.msra.mxu1 %v8759_v49  ;;  %v5031_v45 = vperm.slane %v441_v23, 2  ;;  %v5033_v49 = vperm.slane %v441_v23, 1 }
 0x150   :  { %909 = vmatpush.msrb.mxu2 %v8760_v56  ;;  %1008 = vmatpush.msrb.mxu3 %v4820_v8 }
 0x151   :  { %1028 = vmatpush.msra.mxu0 %v8761_v58  ;;  %967 = vmatpush.msra.mxu1 %v8762_v62 }
 0x152   :  { %910 = vmatpush.msrb.mxu2 %v8763_v51  ;;  %1009 = vmatpush.msrb.mxu3 %v4826_v9 }
 0x153   :  { %1029 = vmatpush.msra.mxu0 %v8765_v11  ;;  %968 = vmatpush.msra.mxu1 %v8766_v52  ;;  %v8790_v11 = vld [vmem:[#allocation149_spill] sm:$0xff] }
 0x154   :  { %977 = vmatpush.msra.mxu2 %v8764_v25  ;;  %1010 = vmatpush.msrb.mxu3 %v4832_v10 }
 0x155   :  { %1030 = vmatpush.msra.mxu0 %v8768_v0  ;;  %969 = vmatpush.msra.mxu1 %v8769_v21 }
 0x156   :  { %978 = vmatpush.msra.mxu2 %v8767_v60  ;;  %1011 = vmatpush.msrb.mxu3 %v4838_v12 }
 0x157   :  { %1031 = vmatpush.msra.mxu0 %v8771_v57  ;;  %970 = vmatpush.msra.mxu1 %v8772_v36 }
 0x158   :  { %979 = vmatpush.msra.mxu2 %v8770_v55  ;;  %1012 = vmatpush.msrb.mxu3 %v4844_v15  ;;  %v8791_v55 = vld [vmem:[#allocation154_spill] sm:$0xff] }
 0x159   :  { %1032 = vmatpush.msra.mxu0 %v8774_v46 }
 0x15a   :  { %980 = vmatpush.msra.mxu2 %v8773_v54  ;;  %v8792_v54 = vld [vmem:[#allocation158_spill] sm:$0xff] }
 0x15c   :  { %981 = vmatpush.msra.mxu2 %v8775_v59  ;;  %v8793_v59 = vld [vmem:[#allocation160_spill] sm:$0xff] }
 0x15e   :  { %982 = vmatpush.msra.mxu2 %v8776_v53 }
 0x160   :  { %983 = vmatpush.msra.mxu2 %v8777_v13 }
 0x162   :  { %984 = vmatpush.msra.mxu2 %v8778_v14  ;;  %v8794_v14 = vld [vmem:[#allocation165_spill] sm:$0xff] }
 0x164   :  { %985 = vmatpush.msra.mxu2 %v8779_v16 }
 0x166   :  { %986 = vmatpush.msra.mxu2 %v8780_v17 }
 0x168   :  { %987 = vmatpush.msra.mxu2 %v8781_v18 }
 0x16a   :  { %988 = vmatpush.msra.mxu2 %v8782_v19 }
 0x16c   :  { %989 = vmatpush.msra.mxu2 %v8783_v20  ;;  %v599_v31 = vpop.f32.mrf.mxu1 }
 0x16d   :  { %v659_v35 = vpop.f32.mrf.mxu0  ;;  %v600_v60 = vadd.f32 %v599_v31, %v5033_v49 }
 0x16e   :  { %990 = vmatpush.msra.mxu2 %v8784_v22 }
 0x170   :  { %991 = vmatpush.msra.mxu2 %v8786_v26 }
 0x172   :  { %992 = vmatpush.msra.mxu2 %v8787_v27  ;;  %v579_v29 = vpop.f32.mrf.mxu2  ;;  %v5043_v27 = vperm.slane %v441_v23, 3 }
 0x173   :  { %v580_v30 = vadd.f32 %v579_v29, %v5021_v24  ;;  %v639_v34 = vpop.f32.mrf.mxu3 }
 0x175   :  { %662 = vst [vmem:[%s7861_s10] sm:$0xff] %v580_v30 }
 0x176   :  { %v680_v32 = vpop.f32.mrf.mxu1 }
 0x177   :  { %v743_v36 = vadd.f32 %v680_v32, %v600_v60 }
 0x178   :  { %v740_v51 = vpop.f32.mrf.mxu0 }
 0x179   :  { %v747_v17 = vmul.f32 0.5, %v743_v36 }
 0x17c   :  { %v619_v40 = vpop.f32.mrf.mxu2 }
 0x17d   :  { %v720_v58 = vpop.f32.mrf.mxu3  ;;  %v620_v25 = vadd.f32 %v619_v40, %v5031_v45 }
 0x187   :  { %v326_v33 = vpop.permute.xlu1 %325 }
 0x188   :  { %v371_v39 = vmul.f32 %v8788_v38, %v326_v33  ;;  %v372_v52 = vmul.f32 %v8790_v11, %v326_v33  ;;  %v373_v57 = vmul.f32 %v8791_v55, %v326_v33  ;;  %v374_v46 = vmul.f32 %v8792_v54, %v326_v33 }
 0x189   :  { %v5045_v33 = vperm.slane %v441_v23, 4 }
 0x18a   :  { %v413_v42 = vadd.f32 %v8789_v41, %v371_v39  ;;  %v414_v53 = vadd.f32 %v8793_v59, %v372_v52  ;;  %v415_v16 = vadd.f32 %v8794_v14, %v373_v57  ;;  %v416_v18 = vadd.f32 %v4729_v61, %v374_v46 }
 0x18b   :  { %v640_v39 = vadd.f32 %v639_v34, %v5043_v27  ;;  %v660_v52 = vadd.f32 %v659_v35, %v5045_v33 }
 0x18d   :  { %v746_v23 = vadd.f32 %v740_v51, %v660_v52  ;;  %v5084_v52 = vld [vmem:[#allocation3 + $0x1c8] sm:$0xff] }
 0x190   :  { %v783_v44 = vpop.f32.mrf.mxu1 }
 0x191   :  { %v846_v56 = vadd.f32 %v783_v44, %v413_v42 }
 0x192   :  { %v843_v22 = vpop.f32.mrf.mxu0 }
 0x193   :  { %v850_v0 = vmul.f32 0.5, %v846_v56  ;;  %v849_v31 = vadd.f32 %v843_v22, %v416_v18  ;;  %v745_v56 = vadd.f32 %v720_v58, %v640_v39  ;;  %v756_v58 = vmul.f32 0.5, %v746_v23  ;;  %v5066_v39 = vld [vmem:[#allocation7 + $0x1f8] sm:$0xff]  ;;  %v5097_v23 = vld [vmem:[#allocation3 + $0x1b0] sm:$0xff] }
 0x195   :  { %3132 = vtanh.f32 %v850_v0  ;;  %v859_v42 = vmul.f32 0.5, %v849_v31 }
 0x196   :  { %v700_v62 = vpop.f32.mrf.mxu2 }
 0x197   :  { %v744_v21 = vadd.f32 %v700_v62, %v620_v25  ;;  %v823_v19 = vpop.f32.mrf.mxu3 }
 0x198   :  { %v848_v29 = vadd.f32 %v823_v19, %v415_v16 }
 0x199   :  { %v751_v13 = vmul.f32 0.5, %v744_v21 }
 0x19b   :  { %3134 = vtanh.f32 %v751_v13  ;;  %v3133_v32 = vpop.eup %3132 }
 0x19c   :  { %3136 = vtanh.f32 %v747_v17  ;;  %v852_v40 = vmul.f32 0.5, %v3133_v32 }
 0x19e   :  { %v853_v60 = vadd.f32 0.5, %v852_v40  ;;  %v5069_v40 = vld [vmem:[#allocation3 + $0x1e0] sm:$0xff] }
 0x1a1   :  { %v3135_v44 = vpop.eup %3134 }
 0x1a2   :  { %v3137_v62 = vpop.eup %3136  ;;  %v753_v0 = vmul.f32 0.5, %v3135_v44  ;;  %v5075_v44 = vld [vmem:[#allocation3 + $0x1f0] sm:$0xff] }
 0x1a3   :  { %v749_v36 = vmul.f32 0.5, %v3137_v62  ;;  %v5081_v62 = vld [vmem:[#allocation3 + $0x1c0] sm:$0xff] }
 0x1a5   :  { %v750_v17 = vadd.f32 0.5, %v749_v36  ;;  %v5094_v36 = vld [vmem:[#allocation3 + $0x1a8] sm:$0xff] }
 0x1b6   :  { %v803_v20 = vpop.f32.mrf.mxu2 }
 0x1b7   :  { %v847_v26 = vadd.f32 %v803_v20, %v414_v53  ;;  %v754_v53 = vadd.f32 0.5, %v753_v0 }
 0x1b9   :  { %v854_v30 = vmul.f32 0.5, %v847_v26  ;;  %v760_v35 = vmul.f32 0.0, %v754_v53  ;;  %v5101_v53 = vld [vmem:[#allocation3 + $0x180] sm:$0xff] }
 0x1bb   :  { %3138 = vtanh.f32 %v854_v30  ;;  %v872_v30 = vpop.permute.xlu1 %871 }
 0x1bc   :  { %3140 = vtanh.f32 %v848_v29  ;;  %vm873_vm7 = vcmp.eq.s32.totalorder %v872_v30, 1  ;;  %v8800_v30 = vld [vmem:[#allocation126_spill] sm:$0xff] }
 0x1bd   :  { %3142 = vtanh.f32 %v859_v42  ;;  %v5072_v42 = vld [vmem:[#allocation3 + $0x1e8] sm:$0xff] }
 0x1be   :  { %3144 = vtanh.f32 %v745_v56  ;;  %v5078_v56 = vld [vmem:[#allocation7 + $0x1d8] sm:$0xff] }
 0x1c1   :  { %v3139_v25 = vpop.eup %3138 }
 0x1c2   :  { %v856_v21 = vmul.f32 0.5, %v3139_v25  ;;  %v3141_v57 = vpop.eup %3140 }
 0x1c3   :  { %v864_v34 = vmul.f32 %v3141_v57, %v853_v60  ;;  %v3143_v16 = vpop.eup %3142  ;;  %v5087_v60 = vld [vmem:[#allocation3 + $0x1d0] sm:$0xff]  ;;  %v5091_v57 = vld [vmem:[#allocation3 + $0x1a0] sm:$0xff] }
 0x1c4   :  { %v857_v46 = vadd.f32 0.5, %v856_v21  ;;  %v3145_v19 = vpop.eup %3144  ;;  %v861_v20 = vmul.f32 0.5, %v3143_v16  ;;  %v8795_v21 = vld [vmem:[#allocation110_spill] sm:$0xff]  ;;  %v5109_v16 = vld [vmem:[#allocation3 + $0x190] sm:$0xff] }
 0x1c5   :  { %v761_v22 = vmul.f32 %v3145_v19, %v750_v17  ;;  %v8798_v17 = vld [vmem:[#allocation118_spill] sm:$0xff] }
 0x1c6   :  { %v863_v13 = vmul.f32 %v857_v46, %v4740_v63  ;;  %v862_v51 = vadd.f32 0.5, %v861_v20  ;;  %v8796_v46 = vld [vmem:[#allocation114_spill] sm:$0xff] }
 0x1c7   :  { %v5053_v26 = vadd.f32 %v761_v22, %v760_v35  ;;  %v5121_v19 = vld [vmem:[#allocation3 + $0x168] sm:$0xff]  ;;  %v5124_v35 = vld [vmem:[#allocation3 + $0x170] sm:$0xff]  ;;  %v5128_v22 = vld [vmem:[#allocation3 + $0x140] sm:$0xff] }
 0x1c8   :  { %v5050_v18 = vadd.f32 %v864_v34, %v863_v13  ;;  %v5106_v13 = vld [vmem:[#allocation3 + $0x188] sm:$0xff] }
 0x1c9   :  { %v8799_v20 = vld [vmem:[#allocation122_spill] sm:$0xff] }
 0x1ca   :  { %3146 = vtanh.f32 %v5050_v18 }
 0x1cb   :  { %3148 = vtanh.f32 %v756_v58  ;;  %v5118_v58 = vld [vmem:[#allocation3 + $0x160] sm:$0xff] }
 0x1cc   :  { %3150 = vtanh.f32 %v5053_v26 }
 0x1d0   :  { %v3147_v29 = vpop.eup %3146 }
 0x1d1   :  { %v5055_v31 = vmul.f32 %v3147_v29, %v862_v51  ;;  %v3149_v63 = vpop.eup %3148  ;;  %v5131_v51 = vld [vmem:[#allocation3 + $0x148] sm:$0xff]  ;;  %v5134_v29 = vld [vmem:[#allocation3 + $0x150] sm:$0xff] }
 0x1d2   :  { %v758_v32 = vmul.f32 0.5, %v3149_v63  ;;  %v3151_v25 = vpop.eup %3150  ;;  %v5138_v63 = vld [vmem:[#allocation3 + $0x120] sm:$0xff] }
 0x1d3   :  { %3064 = vmatmul.msk.f32.vlgmr.msrb.gmra.mxu1 %vm873_vm7, %v5055_v31  ;;  %3065 = vmatmul.msk.f32.vlgmr.msrb.gmra.mxu2 %vm873_vm7, %v5055_v31 }
 0x1d4   :  { %3066 = vmatmul.msk.f32.vlgmr.msra.gmra.mxu3 %vm873_vm7, %v5055_v31  ;;  %3067 = vmatmul.msk.f32.vlgmr.msrb.gmra.mxu0 %vm873_vm7, %v5055_v31  ;;  %v759_v0 = vadd.f32 0.5, %v758_v32  ;;  %v5141_v32 = vld [vmem:[#allocation3 + $0x128] sm:$0xff] }
 0x1d5   :  { %1037 = vmatpush.msrb.mxu1 %v5066_v39  ;;  %1081 = vmatpush.msrb.mxu2 %v5069_v40 }
 0x1d6   :  { %1101 = vmatpush.msra.mxu3 %v5072_v42  ;;  %1121 = vmatpush.msrb.mxu0 %v5075_v44  ;;  %v5104_v34 = vmul.f32 %v3151_v25, %v759_v0  ;;  %v5144_v25 = vld [vmem:[#allocation3 + $0x130] sm:$0xff] }
 0x1d7   :  { %1038 = vmatpush.msrb.mxu1 %v5078_v56  ;;  %1082 = vmatpush.msrb.mxu2 %v5081_v62  ;;  %8801 = vst [vmem:[#allocation13_spill] sm:$0xff] %v5144_v25  ;;  %v8802_v0 = vld [vmem:[#allocation131_spill] sm:$0xff] }
 0x1d8   :  { %1102 = vmatpush.msra.mxu3 %v5084_v52  ;;  %1122 = vmatpush.msrb.mxu0 %v5087_v60  ;;  %8797 = vst [vmem:[#allocation17_spill] sm:$0xff] %v5104_v34 }
 0x1d9   :  { %1039 = vmatpush.msrb.mxu1 %v8795_v21  ;;  %1083 = vmatpush.msrb.mxu2 %v5091_v57  ;;  %v5148_v21 = vld [vmem:[#allocation3 + $0x100] sm:$0xff] }
 0x1da   :  { %1103 = vmatpush.msra.mxu3 %v5094_v36  ;;  %1123 = vmatpush.msrb.mxu0 %v5097_v23  ;;  %8803 = vst [vmem:[#allocation18_spill] sm:$0xff] %v5148_v21 }
 0x1db   :  { %1040 = vmatpush.msrb.mxu1 %v8796_v46  ;;  %1084 = vmatpush.msrb.mxu2 %v5101_v53  ;;  %v5151_v46 = vld [vmem:[#allocation3 + $0x108] sm:$0xff] }
 0x1dc   :  { %1104 = vmatpush.msra.mxu3 %v5106_v13  ;;  %1124 = vmatpush.msrb.mxu0 %v5109_v16  ;;  %8804 = vst [vmem:[#allocation20_spill] sm:$0xff] %v5151_v46 }
 0x1dd   :  { %3068 = vmatmul.msk.f32.vlgmr.msra.gmra.mxu1 %vm873_vm7, %v5055_v31  ;;  %993 = vmatmul.f32.vlgmr.msra.gmra.mxu2 %v5104_v34 }
 0x1de   :  { %1013 = vmatmul.f32.vlgmr.msrb.gmra.mxu3 %v5104_v34  ;;  %1033 = vmatmul.f32.vlgmr.msra.gmra.mxu0 %v5104_v34 }
 0x1df   :  { %1041 = vmatpush.msrb.mxu1 %v8798_v17  ;;  %1085 = vmatpush.msrb.mxu2 %v5118_v58  ;;  %v5154_v17 = vld [vmem:[#allocation3 + $0x110] sm:$0xff] }
 0x1e0   :  { %1105 = vmatpush.msra.mxu3 %v5121_v19  ;;  %1125 = vmatpush.msrb.mxu0 %v5124_v35  ;;  %8805 = vst [vmem:[#allocation14_spill] sm:$0xff] %v5154_v17 }
 0x1e1   :  { %1042 = vmatpush.msrb.mxu1 %v8799_v20  ;;  %1086 = vmatpush.msrb.mxu2 %v5128_v22  ;;  %v8806_v20 = vld [vmem:[#allocation135_spill] sm:$0xff] }
 0x1e2   :  { %1106 = vmatpush.msra.mxu3 %v5131_v51  ;;  %1126 = vmatpush.msrb.mxu0 %v5134_v29 }
 0x1e3   :  { %1043 = vmatpush.msrb.mxu1 %v8800_v30  ;;  %1087 = vmatpush.msrb.mxu2 %v5138_v63  ;;  %v5158_v30 = vld [vmem:[#allocation3 + $0xe0] sm:$0xff] }
 0x1e4   :  { %1107 = vmatpush.msra.mxu3 %v5141_v32  ;;  %1127 = vmatpush.msrb.mxu0 %v5144_v25  ;;  %8807 = vst [vmem:[#allocation21_spill] sm:$0xff] %v5158_v30  ;;  %v5161_v25 = vld [vmem:[#allocation3 + $0xe8] sm:$0xff] }
 0x1e5   :  { %1044 = vmatpush.msrb.mxu1 %v8802_v0  ;;  %1088 = vmatpush.msrb.mxu2 %v5148_v21  ;;  %8808 = vst [vmem:[#allocation23_spill] sm:$0xff] %v5161_v25  ;;  %v5164_v0 = vld [vmem:[#allocation3 + $0xf0] sm:$0xff]  ;;  %v8810_v21 = vld [vmem:[#allocation140_spill] sm:$0xff] }
 0x1e6   :  { %1108 = vmatpush.msra.mxu3 %v5151_v46  ;;  %1128 = vmatpush.msrb.mxu0 %v5154_v17  ;;  %8809 = vst [vmem:[#allocation16_spill] sm:$0xff] %v5164_v0  ;;  %v5168_v46 = vld [vmem:[#allocation3 + $0xc0] sm:$0xff]  ;;  %v5171_v17 = vld [vmem:[#allocation3 + $0xc8] sm:$0xff] }
 0x1e7   :  { %1045 = vmatpush.msrb.mxu1 %v8806_v20  ;;  %1089 = vmatpush.msrb.mxu2 %v5158_v30  ;;  %8811 = vst [vmem:[#allocation19_spill] sm:$0xff] %v5168_v46  ;;  %v5174_v20 = vld [vmem:[#allocation3 + $0xd0] sm:$0xff]  ;;  %v8814_v30 = vld [vmem:[#allocation144_spill] sm:$0xff] }
 0x1e8   :  { %1109 = vmatpush.msra.mxu3 %v5161_v25  ;;  %1129 = vmatpush.msrb.mxu0 %v5164_v0  ;;  %8812 = vst [vmem:[#allocation37_spill] sm:$0xff] %v5171_v17  ;;  %v5178_v25 = vld [vmem:[#allocation3 + $0xa0] sm:$0xff]  ;;  %v5181_v0 = vld [vmem:[#allocation3 + $0xa8] sm:$0xff] }
 0x1e9   :  { %1046 = vmatpush.msrb.mxu1 %v8810_v21  ;;  %1090 = vmatpush.msrb.mxu2 %v5168_v46  ;;  %8813 = vst [vmem:[#allocation101_spill] sm:$0xff] %v5174_v20  ;;  %v5184_v21 = vld [vmem:[#allocation3 + $0xb0] sm:$0xff]  ;;  %v8818_v46 = vld [vmem:[#allocation148_spill] sm:$0xff] }
 0x1ea   :  { %1110 = vmatpush.msra.mxu3 %v5171_v17  ;;  %1130 = vmatpush.msrb.mxu0 %v5174_v20  ;;  %8815 = vst [vmem:[#allocation39_spill] sm:$0xff] %v5178_v25  ;;  %v5188_v17 = vld [vmem:[#allocation3 + $0x80] sm:$0xff]  ;;  %v5191_v20 = vld [vmem:[#allocation3 + $0x88] sm:$0xff] }
 0x1eb   :  { %1047 = vmatpush.msrb.mxu1 %v8814_v30  ;;  %1091 = vmatpush.msrb.mxu2 %v5178_v25  ;;  %8816 = vst [vmem:[#allocation22_spill] sm:$0xff] %v5181_v0  ;;  %v5194_v30 = vld [vmem:[#allocation3 + $0x90] sm:$0xff]  ;;  %v8822_v25 = vld [vmem:[#allocation153_spill] sm:$0xff] }
 0x1ec   :  { %1111 = vmatpush.msra.mxu3 %v5181_v0  ;;  %8817 = vst [vmem:[#allocation41_spill] sm:$0xff] %v5184_v21  ;;  %1131 = vmatpush.msrb.mxu0 %v5184_v21  ;;  %v5198_v0 = vld [vmem:[#allocation3 + $0x60] sm:$0xff]  ;;  %v5201_v21 = vld [vmem:[#allocation3 + $0x68] sm:$0xff] }
 0x1ed   :  { %1048 = vmatpush.msrb.mxu1 %v8818_v46  ;;  %8819 = vst [vmem:[#allocation104_spill] sm:$0xff] %v5188_v17  ;;  %1092 = vmatpush.msrb.mxu2 %v5188_v17  ;;  %v5204_v46 = vld [vmem:[#allocation3 + $0x70] sm:$0xff] }
 0x1ee   :  { %8820 = vst [vmem:[#allocation43_spill] sm:$0xff] %v5191_v20  ;;  %1112 = vmatpush.msra.mxu3 %v5191_v20  ;;  %1132 = vmatpush.msrb.mxu0 %v5194_v30  ;;  %v8826_v17 = vld [vmem:[#allocation159_spill] sm:$0xff]  ;;  %v5208_v20 = vld [vmem:[#allocation3 + $0x40] sm:$0xff] }
 0x1ef   :  { %8821 = vst [vmem:[#allocation24_spill] sm:$0xff] %v5194_v30  ;;  %1049 = vmatpush.msrb.mxu1 %v8822_v25  ;;  %1093 = vmatpush.msrb.mxu2 %v5198_v0  ;;  %v5211_v30 = vld [vmem:[#allocation3 + $0x48] sm:$0xff]  ;;  %v5214_v25 = vld [vmem:[#allocation3 + $0x50] sm:$0xff] }
 0x1f0   :  { %8823 = vst [vmem:[#allocation45_spill] sm:$0xff] %v5198_v0  ;;  %1113 = vmatpush.msra.mxu3 %v5201_v21  ;;  %1133 = vmatpush.msrb.mxu0 %v5204_v46  ;;  %v8830_v0 = vld [vmem:[#allocation164_spill] sm:$0xff] }
 0x1f1   :  { %8824 = vst [vmem:[#allocation107_spill] sm:$0xff] %v5201_v21  ;;  %1050 = vmatpush.msrb.mxu1 %v8826_v17  ;;  %1094 = vmatpush.msrb.mxu2 %v5208_v20  ;;  %v5218_v21 = vld [vmem:[#allocation3 + $0x20] sm:$0xff]  ;;  %v5224_v17 = vld [vmem:[#allocation3 + $0x30] sm:$0xff] }
 0x1f2   :  { %8825 = vst [vmem:[#allocation47_spill] sm:$0xff] %v5204_v46  ;;  %1114 = vmatpush.msra.mxu3 %v5211_v30  ;;  %1134 = vmatpush.msrb.mxu0 %v5214_v25  ;;  %v5221_v46 = vld [vmem:[#allocation3 + $0x28] sm:$0xff] }
 0x1f3   :  { %8827 = vst [vmem:[#allocation25_spill] sm:$0xff] %v5208_v20  ;;  %1051 = vmatpush.msrb.mxu1 %v8830_v0  ;;  %1095 = vmatpush.msrb.mxu2 %v5218_v21  ;;  %v8833_v20 = vld [vmem:[#allocation169_spill] sm:$0xff]  ;;  %v5234_v0 = vld [vmem:[#allocation3 + $0x10] sm:$0xff] }
 0x1f4   :  { %8828 = vst [vmem:[#allocation49_spill] sm:$0xff] %v5211_v30  ;;  %1115 = vmatpush.msra.mxu3 %v5221_v46  ;;  %1135 = vmatpush.msrb.mxu0 %v5224_v17  ;;  %v5228_v30 = vld [vmem:[#allocation3] sm:$0xff] }
 0x1f5   :  { %8829 = vst [vmem:[#allocation111_spill] sm:$0xff] %v5214_v25  ;;  %1052 = vmatpush.msrb.mxu1 %v8833_v20  ;;  %1096 = vmatpush.msrb.mxu2 %v5228_v30  ;;  %v5231_v25 = vld [vmem:[#allocation3 + $0x8] sm:$0xff]  ;;  %v5244_v20 = vld [vmem:[#allocation3 + $0x1f8] sm:$0xff] }
 0x1f6   :  { %8831 = vst [vmem:[#allocation26_spill] sm:$0xff] %v5221_v46  ;;  %1116 = vmatpush.msra.mxu3 %v5231_v25  ;;  %1136 = vmatpush.msrb.mxu0 %v5234_v0  ;;  %v311_v46 = vld [vmem:[%s7851_s0 + $0x10] sm:$0xff] }
 0x1f7   :  { %8832 = vst [vmem:[#allocation51_spill] sm:$0xff] %v5224_v17  ;;  %1053 = vmatmul.f32.vlgmr.msrb.gmra.mxu1 %v5104_v34  ;;  %1097 = vmatmul.f32.vlgmr.msrb.gmra.mxu2 %v5055_v31  ;;  %v5253_v34 = vld [vmem:[#allocation3 + $0x1d8] sm:$0xff]  ;;  %v5273_v17 = vld [vmem:[#allocation5 + $0x208] sm:$0xff] }
 0x1f8   :  { %8834 = vst [vmem:[#allocation53_spill] sm:$0xff] %v5228_v30  ;;  %1117 = vmatmul.f32.vlgmr.msra.gmra.mxu3 %v5055_v31  ;;  %1137 = vmatmul.f32.vlgmr.msrb.gmra.mxu0 %v5055_v31  ;;  %v5257_v30 = vld [vmem:[#allocation5 + $0x268] sm:$0xff] }
 0x1f9   :  { %8835 = vst [vmem:[#allocation115_spill] sm:$0xff] %v5231_v25  ;;  %1141 = vmatpush.msra.mxu1 %v5244_v20  ;;  %330 = vperm.xlu2 %3120, %v311_v46   ;;  %v5247_v25 = vld [vmem:[#allocation5 + $0x258] sm:$0xff] }
 0x1fa   :  { %8836 = vst [vmem:[#allocation27_spill] sm:$0xff] %v5234_v0  ;;  %1190 = vmatpush.msra.mxu2 %v5247_v25  ;;  %v5250_v0 = vld [vmem:[#allocation5 + $0x260] sm:$0xff]  ;;  %1230 = vmatpush.msra.mxu0 %v5257_v30  ;;  %v5263_v46 = vld [vmem:[#allocation5 + $0x238] sm:$0xff] }
 0x1fb   :  { %8837 = vst [vmem:[#allocation55_spill] sm:$0xff] %v5244_v20  ;;  %1210 = vmatpush.msrb.mxu3 %v5250_v0  ;;  %1142 = vmatpush.msra.mxu1 %v5253_v34  ;;  %v5260_v20 = vld [vmem:[#allocation5 + $0x230] sm:$0xff] }
 0x1fc   :  { %8838 = vst [vmem:[#allocation57_spill] sm:$0xff] %v5247_v25  ;;  %1191 = vmatpush.msra.mxu2 %v5260_v20  ;;  %v5266_v25 = vld [vmem:[#allocation3 + $0x1b8] sm:$0xff] }
 0x1fd   :  { %8839 = vst [vmem:[#allocation119_spill] sm:$0xff] %v5250_v0  ;;  %1211 = vmatpush.msrb.mxu3 %v5263_v46  ;;  %1143 = vmatpush.msra.mxu1 %v5266_v25  ;;  %v5269_v0 = vld [vmem:[#allocation5 + $0x240] sm:$0xff] }
 0x1fe   :  { %8840 = vst [vmem:[#allocation28_spill] sm:$0xff] %v5253_v34  ;;  %1231 = vmatpush.msra.mxu0 %v5269_v0  ;;  %v1184_v34 = vsel %vm1183_vm8, 1, %v8668_v37  ;;  %1192 = vmatpush.msra.mxu2 %v5273_v17  ;;  %v5383_v37 = vld [vmem:[#allocation5 + $0xd8] sm:$0xff] }
 0x1ff   :  { %8841 = vst [vmem:[#allocation59_spill] sm:$0xff] %v5257_v30  ;;  %v5276_v30 = vld [vmem:[#allocation5 + $0x210] sm:$0xff] }
 0x200   :  { %8842 = vst [vmem:[#allocation61_spill] sm:$0xff] %v5260_v20  ;;  %1212 = vmatpush.msrb.mxu3 %v5276_v30  ;;  %v5279_v20 = vld [vmem:[#allocation3 + $0x198] sm:$0xff] }
 0x201   :  { %8843 = vst [vmem:[#allocation123_spill] sm:$0xff] %v5263_v46  ;;  %1144 = vmatpush.msra.mxu1 %v5279_v20  ;;  %v5282_v46 = vld [vmem:[#allocation5 + $0x218] sm:$0xff]  ;;  %1186 = vperm.xlu2 %3120, %v1184_v34   ;;  %v5309_v34 = vld [vmem:[#allocation5 + $0x190] sm:$0xff] }
 0x202   :  { %8844 = vst [vmem:[#allocation29_spill] sm:$0xff] %v5266_v25  ;;  %1232 = vmatpush.msra.mxu0 %v5282_v46  ;;  %v5285_v25 = vld [vmem:[#allocation5 + $0x1e0] sm:$0xff] }
 0x203   :  { %8845 = vst [vmem:[#allocation63_spill] sm:$0xff] %v5269_v0  ;;  %1193 = vmatpush.msra.mxu2 %v5285_v25  ;;  %v5288_v0 = vld [vmem:[#allocation5 + $0x1e8] sm:$0xff] }
 0x204   :  { %8846 = vst [vmem:[#allocation65_spill] sm:$0xff] %v5273_v17  ;;  %1213 = vmatpush.msrb.mxu3 %v5288_v0  ;;  %v5291_v17 = vld [vmem:[#allocation3 + $0x178] sm:$0xff] }
 0x205   :  { %8847 = vst [vmem:[#allocation30_spill] sm:$0xff] %v5276_v30  ;;  %1145 = vmatpush.msra.mxu1 %v5291_v17  ;;  %v5294_v30 = vld [vmem:[#allocation5 + $0x1f0] sm:$0xff] }
 0x206   :  { %8848 = vst [vmem:[#allocation128_spill] sm:$0xff] %v5279_v20  ;;  %1233 = vmatpush.msra.mxu0 %v5294_v30  ;;  %v5297_v20 = vld [vmem:[#allocation5 + $0x1b8] sm:$0xff] }
 0x207   :  { %8849 = vst [vmem:[#allocation67_spill] sm:$0xff] %v5282_v46  ;;  %1194 = vmatpush.msra.mxu2 %v5297_v20  ;;  %v5300_v46 = vld [vmem:[#allocation3 + $0x158] sm:$0xff] }
 0x208   :  { %8850 = vst [vmem:[#allocation69_spill] sm:$0xff] %v5285_v25  ;;  %1146 = vmatpush.msra.mxu1 %v5300_v46  ;;  %v5303_v25 = vld [vmem:[#allocation5 + $0x1c0] sm:$0xff] }
 0x209   :  { %8851 = vst [vmem:[#allocation31_spill] sm:$0xff] %v5288_v0  ;;  %1214 = vmatpush.msrb.mxu3 %v5303_v25  ;;  %v5306_v0 = vld [vmem:[#allocation5 + $0x1c8] sm:$0xff]  ;;  %1195 = vmatpush.msra.mxu2 %v5309_v34 }
 0x20a   :  { %8852 = vst [vmem:[#allocation132_spill] sm:$0xff] %v5291_v17  ;;  %1234 = vmatpush.msra.mxu0 %v5306_v0  ;;  %v5312_v17 = vld [vmem:[#allocation3 + $0x138] sm:$0xff] }
 0x20b   :  { %8853 = vst [vmem:[#allocation71_spill] sm:$0xff] %v5294_v30  ;;  %1147 = vmatpush.msra.mxu1 %v5312_v17  ;;  %v5336_v30 = vld [vmem:[#allocation5 + $0x140] sm:$0xff] }
 0x20c   :  { %8854 = vst [vmem:[#allocation73_spill] sm:$0xff] %v5297_v20  ;;  %v5315_v20 = vld [vmem:[#allocation5 + $0x198] sm:$0xff] }
 0x20d   :  { %8855 = vst [vmem:[#allocation32_spill] sm:$0xff] %v5300_v46  ;;  %1215 = vmatpush.msrb.mxu3 %v5315_v20  ;;  %v313_v46 = vld [vmem:[%s7851_s0 + $0x20] sm:$0xff] }
 0x20e   :  { %8856 = vst [vmem:[#allocation137_spill] sm:$0xff] %v5303_v25  ;;  %v5321_v25 = vld [vmem:[#allocation5 + $0x1a0] sm:$0xff]  ;;  %340 = vperm.xlu2 %3120, %v313_v46   ;;  %v5358_v46 = vld [vmem:[#allocation5 + $0x128] sm:$0xff] }
 0x20f   :  { %8857 = vst [vmem:[#allocation75_spill] sm:$0xff] %v5306_v0  ;;  %1235 = vmatpush.msra.mxu0 %v5321_v25  ;;  %v5324_v0 = vld [vmem:[#allocation5 + $0x168] sm:$0xff] }
 0x210   :  { %8858 = vst [vmem:[#allocation77_spill] sm:$0xff] %v5309_v34  ;;  %1196 = vmatpush.msra.mxu2 %v5324_v0  ;;  %v5327_v34 = vld [vmem:[#allocation3 + $0x118] sm:$0xff] }
 0x211   :  { %8859 = vst [vmem:[#allocation33_spill] sm:$0xff] %v5312_v17  ;;  %1148 = vmatpush.msra.mxu1 %v5327_v34  ;;  %v5330_v17 = vld [vmem:[#allocation5 + $0x170] sm:$0xff] }
 0x212   :  { %8860 = vst [vmem:[#allocation141_spill] sm:$0xff] %v5315_v20  ;;  %1216 = vmatpush.msrb.mxu3 %v5330_v17  ;;  %v5333_v20 = vld [vmem:[#allocation5 + $0x178] sm:$0xff]  ;;  %1197 = vmatpush.msra.mxu2 %v5336_v30 }
 0x213   :  { %8861 = vst [vmem:[#allocation79_spill] sm:$0xff] %v5321_v25  ;;  %1236 = vmatpush.msra.mxu0 %v5333_v20  ;;  %v5339_v25 = vld [vmem:[#allocation3 + $0xf8] sm:$0xff] }
 0x214   :  { %8862 = vst [vmem:[#allocation34_spill] sm:$0xff] %v5324_v0  ;;  %1149 = vmatpush.msra.mxu1 %v5339_v25  ;;  %v5342_v0 = vld [vmem:[#allocation5 + $0x148] sm:$0xff] }
 0x215   :  { %8863 = vst [vmem:[#allocation81_spill] sm:$0xff] %v5327_v34  ;;  %1217 = vmatpush.msrb.mxu3 %v5342_v0  ;;  %v5345_v34 = vld [vmem:[#allocation5 + $0x150] sm:$0xff] }
 0x216   :  { %8864 = vst [vmem:[#allocation145_spill] sm:$0xff] %v5330_v17  ;;  %1237 = vmatpush.msra.mxu0 %v5345_v34  ;;  %v5348_v17 = vld [vmem:[#allocation3 + $0xd8] sm:$0xff]  ;;  %2131 = vperm.xlu2 %3120, %v2129_v28   ;;  %v5404_v28 = vld [vmem:[#allocation5 + $0x80] sm:$0xff] }
 0x217   :  { %8865 = vst [vmem:[#allocation83_spill] sm:$0xff] %v5336_v30  ;;  %1150 = vmatpush.msra.mxu1 %v5348_v17  ;;  %v5352_v30 = vld [vmem:[#allocation5 + $0x118] sm:$0xff] }
 0x218   :  { %8866 = vst [vmem:[#allocation35_spill] sm:$0xff] %v5339_v25  ;;  %1198 = vmatpush.msra.mxu2 %v5352_v30  ;;  %v5355_v25 = vld [vmem:[#allocation5 + $0x120] sm:$0xff]  ;;  %1238 = vmatpush.msra.mxu0 %v5358_v46 }
 0x219   :  { %8867 = vst [vmem:[#allocation85_spill] sm:$0xff] %v5342_v0  ;;  %1218 = vmatpush.msrb.mxu3 %v5355_v25  ;;  %v5361_v0 = vld [vmem:[#allocation3 + $0xb8] sm:$0xff] }
 0x21a   :  { %8868 = vst [vmem:[#allocation150_spill] sm:$0xff] %v5345_v34  ;;  %1151 = vmatpush.msra.mxu1 %v5361_v0  ;;  %v5364_v34 = vld [vmem:[#allocation5 + $0xf0] sm:$0xff] }
 0x21b   :  { %8869 = vst [vmem:[#allocation87_spill] sm:$0xff] %v5348_v17  ;;  %1199 = vmatpush.msra.mxu2 %v5364_v34  ;;  %v5368_v17 = vld [vmem:[#allocation5 + $0xf8] sm:$0xff] }
 0x21c   :  { %8870 = vst [vmem:[#allocation36_spill] sm:$0xff] %v5352_v30  ;;  %1219 = vmatpush.msrb.mxu3 %v5368_v17  ;;  %v5371_v30 = vld [vmem:[#allocation5 + $0x100] sm:$0xff] }
 0x21d   :  { %8871 = vst [vmem:[#allocation89_spill] sm:$0xff] %v5355_v25  ;;  %1239 = vmatpush.msra.mxu0 %v5371_v30  ;;  %v5374_v25 = vld [vmem:[#allocation3 + $0x98] sm:$0xff] }
 0x21e   :  { %8872 = vst [vmem:[#allocation155_spill] sm:$0xff] %v5358_v46  ;;  %1152 = vmatpush.msra.mxu1 %v5374_v25  ;;  %v5377_v46 = vld [vmem:[#allocation5 + $0xc8] sm:$0xff] }
 0x21f   :  { %8873 = vst [vmem:[#allocation38_spill] sm:$0xff] %v5361_v0  ;;  %1200 = vmatpush.msra.mxu2 %v5377_v46  ;;  %v5380_v0 = vld [vmem:[#allocation5 + $0xd0] sm:$0xff]  ;;  %1240 = vmatpush.msra.mxu0 %v5383_v37 }
 0x220   :  { %8874 = vst [vmem:[#allocation91_spill] sm:$0xff] %v5368_v17  ;;  %1220 = vmatpush.msrb.mxu3 %v5380_v0  ;;  %v5386_v17 = vld [vmem:[#allocation3 + $0x78] sm:$0xff] }
 0x221   :  { %8875 = vst [vmem:[#allocation93_spill] sm:$0xff] %v5371_v30  ;;  %1153 = vmatpush.msra.mxu1 %v5386_v17  ;;  %v5389_v30 = vld [vmem:[#allocation5 + $0xa0] sm:$0xff] }
 0x222   :  { %8876 = vst [vmem:[#allocation42_spill] sm:$0xff] %v5374_v25  ;;  %1201 = vmatpush.msra.mxu2 %v5389_v30  ;;  %v5392_v25 = vld [vmem:[#allocation5 + $0xa8] sm:$0xff] }
 0x223   :  { %8877 = vst [vmem:[#allocation161_spill] sm:$0xff] %v5377_v46  ;;  %1221 = vmatpush.msrb.mxu3 %v5392_v25  ;;  %v5395_v46 = vld [vmem:[#allocation3 + $0x58] sm:$0xff] }
 0x224   :  { %8878 = vst [vmem:[#allocation95_spill] sm:$0xff] %v5380_v0  ;;  %1154 = vmatpush.msra.mxu1 %v5395_v46  ;;  %v5398_v0 = vld [vmem:[#allocation5 + $0xb0] sm:$0xff] }
 0x225   :  { %8879 = vst [vmem:[#allocation97_spill] sm:$0xff] %v5383_v37  ;;  %1241 = vmatpush.msra.mxu0 %v5398_v0  ;;  %v5401_v37 = vld [vmem:[#allocation5 + $0x78] sm:$0xff]  ;;  %1222 = vmatpush.msrb.mxu3 %v5404_v28 }
 0x226   :  { %8880 = vst [vmem:[#allocation46_spill] sm:$0xff] %v5386_v17  ;;  %1202 = vmatpush.msra.mxu2 %v5401_v37  ;;  %v5407_v17 = vld [vmem:[#allocation3 + $0x38] sm:$0xff] }
 0x227   :  { %8881 = vst [vmem:[#allocation166_spill] sm:$0xff] %v5392_v25  ;;  %1155 = vmatpush.msra.mxu1 %v5407_v17  ;;  %v5410_v25 = vld [vmem:[#allocation5 + $0x88] sm:$0xff] }
 0x228   :  { %8882 = vst [vmem:[#allocation99_spill] sm:$0xff] %v5395_v46  ;;  %1242 = vmatpush.msra.mxu0 %v5410_v25  ;;  %v316_v46 = vld [vmem:[%s7851_s0 + $0x38] sm:$0xff] }
 0x229   :  { %8883 = vst [vmem:[#allocation40_spill] sm:$0xff] %v5398_v0  ;;  %v5416_v0 = vld [vmem:[#allocation5 + $0x50] sm:$0xff]  ;;  %355 = vperm.xlu2 %3120, %v316_v46   ;;  %v5447_v46 = vld [vmem:[#allocation5 + $0x8] sm:$0xff] }
 0x22a   :  { %8884 = vst [vmem:[#allocation50_spill] sm:$0xff] %v5401_v37  ;;  %1203 = vmatpush.msra.mxu2 %v5416_v0  ;;  %v5419_v37 = vld [vmem:[#allocation5 + $0x58] sm:$0xff] }
 0x22b   :  { %8885 = vst [vmem:[#allocation103_spill] sm:$0xff] %v5404_v28  ;;  %1223 = vmatpush.msrb.mxu3 %v5419_v37  ;;  %v5422_v28 = vld [vmem:[#allocation3 + $0x18] sm:$0xff] }
 0x22c   :  { %8886 = vst [vmem:[#allocation44_spill] sm:$0xff] %v5407_v17  ;;  %1156 = vmatpush.msra.mxu1 %v5422_v28  ;;  %v5425_v17 = vld [vmem:[#allocation5 + $0x60] sm:$0xff] }
 0x22d   :  { %8887 = vst [vmem:[#allocation54_spill] sm:$0xff] %v5410_v25  ;;  %1243 = vmatpush.msra.mxu0 %v5425_v17  ;;  %1157 = vmatmul.f32.vlgmr.msra.gmra.mxu1 %v5055_v31  ;;  %v5429_v25 = vld [vmem:[#allocation5 + $0x28] sm:$0xff]  ;;  %v5444_v31 = vld [vmem:[#allocation5] sm:$0xff] }
 0x22e   :  { %8888 = vst [vmem:[#allocation106_spill] sm:$0xff] %v5416_v0  ;;  %1204 = vmatpush.msra.mxu2 %v5429_v25  ;;  %v5432_v0 = vld [vmem:[#allocation5 + $0x270] sm:$0xff] }
 0x22f   :  { %8889 = vst [vmem:[#allocation48_spill] sm:$0xff] %v5419_v37  ;;  %1250 = vmatpush.msrb.mxu1 %v5432_v0  ;;  %v5435_v37 = vld [vmem:[#allocation5 + $0x30] sm:$0xff] }
 0x230   :  { %8890 = vst [vmem:[#allocation58_spill] sm:$0xff] %v5422_v28  ;;  %1224 = vmatpush.msrb.mxu3 %v5435_v37  ;;  %v5438_v28 = vld [vmem:[#allocation5 + $0x38] sm:$0xff]  ;;  %1205 = vmatpush.msra.mxu2 %v5444_v31 }
 0x231   :  { %8891 = vst [vmem:[#allocation109_spill] sm:$0xff] %v5425_v17  ;;  %1244 = vmatpush.msra.mxu0 %v5438_v28  ;;  %v5441_v17 = vld [vmem:[#allocation5 + $0x248] sm:$0xff] }
 0x232   :  { %8892 = vst [vmem:[#allocation52_spill] sm:$0xff] %v5432_v0  ;;  %1251 = vmatpush.msrb.mxu1 %v5441_v17  ;;  %1225 = vmatpush.msrb.mxu3 %v5447_v46  ;;  %v5450_v0 = vld [vmem:[#allocation5 + $0x10] sm:$0xff] }
 0x233   :  { %8893 = vst [vmem:[#allocation62_spill] sm:$0xff] %v5435_v37  ;;  %1245 = vmatpush.msra.mxu0 %v5450_v0  ;;  %v5453_v37 = vld [vmem:[#allocation5 + $0x220] sm:$0xff] }
 0x234   :  { %8894 = vst [vmem:[#allocation113_spill] sm:$0xff] %v5438_v28  ;;  %1252 = vmatpush.msrb.mxu1 %v5453_v37  ;;  %v5456_v28 = vld [vmem:[#allocation5 + $0x278] sm:$0xff] }
 0x235   :  { %8895 = vst [vmem:[#allocation56_spill] sm:$0xff] %v5441_v17  ;;  %1270 = vmatpush.msrb.mxu2 %v5456_v28  ;;  %v5459_v17 = vld [vmem:[#allocation7 + $0x1e0] sm:$0xff]  ;;  %1312 = vmatpush.msrb.mxu0 %v4745_v50 }
 0x236   :  { %8896 = vst [vmem:[#allocation66_spill] sm:$0xff] %v5444_v31  ;;  %1292 = vmatpush.msra.mxu3 %v5459_v17  ;;  %v5463_v31 = vld [vmem:[#allocation5 + $0x1f8] sm:$0xff]  ;;  %v5479_v50 = vld [vmem:[#allocation7 + $0x1a0] sm:$0xff] }
 0x237   :  { %8897 = vst [vmem:[#allocation117_spill] sm:$0xff] %v5447_v46  ;;  %1253 = vmatpush.msrb.mxu1 %v5463_v31  ;;  %v5466_v46 = vld [vmem:[#allocation5 + $0x250] sm:$0xff]  ;;  %1313 = vmatpush.msrb.mxu0 %v4755_v43  ;;  %v5489_v43 = vld [vmem:[#allocation7 + $0x180] sm:$0xff] }
 0x238   :  { %8898 = vst [vmem:[#allocation60_spill] sm:$0xff] %v5450_v0  ;;  %1271 = vmatpush.msrb.mxu2 %v5466_v46  ;;  %v5469_v0 = vld [vmem:[#allocation7 + $0x1c0] sm:$0xff] }
 0x239   :  { %8899 = vst [vmem:[#allocation70_spill] sm:$0xff] %v5453_v37  ;;  %1293 = vmatpush.msra.mxu3 %v5469_v0  ;;  %v5473_v37 = vld [vmem:[#allocation5 + $0x1d0] sm:$0xff]  ;;  %1314 = vmatpush.msrb.mxu0 %v4761_v47  ;;  %v5499_v47 = vld [vmem:[#allocation7 + $0x160] sm:$0xff] }
 0x23a   :  { %8900 = vst [vmem:[#allocation121_spill] sm:$0xff] %v5459_v17  ;;  %1254 = vmatpush.msrb.mxu1 %v5473_v37  ;;  %v5476_v17 = vld [vmem:[#allocation5 + $0x228] sm:$0xff] }
 0x23b   :  { %8901 = vst [vmem:[#allocation64_spill] sm:$0xff] %v5463_v31  ;;  %1272 = vmatpush.msrb.mxu2 %v5476_v17  ;;  %1294 = vmatpush.msra.mxu3 %v5479_v50  ;;  %v5483_v31 = vld [vmem:[#allocation5 + $0x1a8] sm:$0xff] }
 0x23c   :  { %8902 = vst [vmem:[#allocation74_spill] sm:$0xff] %v5469_v0  ;;  %1255 = vmatpush.msrb.mxu1 %v5483_v31  ;;  %v5486_v0 = vld [vmem:[#allocation5 + $0x200] sm:$0xff]  ;;  %1315 = vmatpush.msrb.mxu0 %v4767_v48 }
 0x23d   :  { %8903 = vst [vmem:[#allocation125_spill] sm:$0xff] %v5473_v37  ;;  %1273 = vmatpush.msrb.mxu2 %v5486_v0  ;;  %1295 = vmatpush.msra.mxu3 %v5489_v43  ;;  %v5493_v37 = vld [vmem:[#allocation5 + $0x180] sm:$0xff] }
 0x23e   :  { %8904 = vst [vmem:[#allocation68_spill] sm:$0xff] %v5479_v50  ;;  %1256 = vmatpush.msrb.mxu1 %v5493_v37  ;;  %v5496_v50 = vld [vmem:[#allocation5 + $0x1d8] sm:$0xff]  ;;  %1316 = vmatpush.msrb.mxu0 %v4775_v1  ;;  %v5509_v48 = vld [vmem:[#allocation7 + $0x140] sm:$0xff] }
 0x23f   :  { %8905 = vst [vmem:[#allocation78_spill] sm:$0xff] %v5483_v31  ;;  %1274 = vmatpush.msrb.mxu2 %v5496_v50  ;;  %1296 = vmatpush.msra.mxu3 %v5499_v47  ;;  %v5503_v31 = vld [vmem:[#allocation5 + $0x158] sm:$0xff]  ;;  %v5519_v1 = vld [vmem:[#allocation7 + $0x120] sm:$0xff] }
 0x240   :  { %8906 = vst [vmem:[#allocation130_spill] sm:$0xff] %v5486_v0  ;;  %1257 = vmatpush.msrb.mxu1 %v5503_v31  ;;  %1317 = vmatpush.msrb.mxu0 %v4784_v2  ;;  %v5529_v2 = vld [vmem:[#allocation7 + $0x100] sm:$0xff] }
 0x241   :  { %8907 = vst [vmem:[#allocation72_spill] sm:$0xff] %v5489_v43  ;;  %v5506_v43 = vld [vmem:[#allocation5 + $0x1b0] sm:$0xff]  ;;  %1297 = vmatpush.msra.mxu3 %v5509_v48 }
 0x242   :  { %8908 = vst [vmem:[#allocation82_spill] sm:$0xff] %v5493_v37  ;;  %1275 = vmatpush.msrb.mxu2 %v5506_v43  ;;  %v5513_v37 = vld [vmem:[#allocation5 + $0x130] sm:$0xff]  ;;  %1318 = vmatpush.msrb.mxu0 %v4790_v3  ;;  %v5539_v3 = vld [vmem:[#allocation7 + $0xe0] sm:$0xff] }
 0x243   :  { %8909 = vst [vmem:[#allocation134_spill] sm:$0xff] %v5496_v50  ;;  %1258 = vmatpush.msrb.mxu1 %v5513_v37  ;;  %1298 = vmatpush.msra.mxu3 %v5519_v1 }
 0x244   :  { %8910 = vst [vmem:[#allocation76_spill] sm:$0xff] %v5499_v47  ;;  %v5516_v47 = vld [vmem:[#allocation5 + $0x188] sm:$0xff]  ;;  %1319 = vmatpush.msrb.mxu0 %v4796_v4  ;;  %v5549_v4 = vld [vmem:[#allocation7 + $0xc0] sm:$0xff] }
 0x245   :  { %8911 = vst [vmem:[#allocation86_spill] sm:$0xff] %v5503_v31  ;;  %1276 = vmatpush.msrb.mxu2 %v5516_v47  ;;  %v5523_v31 = vld [vmem:[#allocation5 + $0x108] sm:$0xff]  ;;  %1299 = vmatpush.msra.mxu3 %v5529_v2 }
 0x246   :  { %8912 = vst [vmem:[#allocation139_spill] sm:$0xff] %v5506_v43  ;;  %1259 = vmatpush.msrb.mxu1 %v5523_v31  ;;  %1320 = vmatpush.msrb.mxu0 %v4802_v5  ;;  %v5559_v5 = vld [vmem:[#allocation7 + $0xa0] sm:$0xff] }
 0x247   :  { %8913 = vst [vmem:[#allocation80_spill] sm:$0xff] %v5509_v48  ;;  %v5526_v48 = vld [vmem:[#allocation5 + $0x160] sm:$0xff]  ;;  %1300 = vmatpush.msra.mxu3 %v5539_v3 }
 0x248   :  { %8914 = vst [vmem:[#allocation90_spill] sm:$0xff] %v5513_v37  ;;  %1277 = vmatpush.msrb.mxu2 %v5526_v48  ;;  %v5533_v37 = vld [vmem:[#allocation5 + $0xe0] sm:$0xff]  ;;  %1321 = vmatpush.msrb.mxu0 %v4808_v6 }
 0x249   :  { %8915 = vst [vmem:[#allocation143_spill] sm:$0xff] %v5516_v47  ;;  %1260 = vmatpush.msrb.mxu1 %v5533_v37  ;;  %1301 = vmatpush.msra.mxu3 %v5549_v4  ;;  %v5569_v6 = vld [vmem:[#allocation7 + $0x80] sm:$0xff] }
 0x24a   :  { %8916 = vst [vmem:[#allocation84_spill] sm:$0xff] %v5519_v1  ;;  %v5536_v1 = vld [vmem:[#allocation5 + $0x138] sm:$0xff]  ;;  %1322 = vmatpush.msrb.mxu0 %v4814_v7  ;;  %v5579_v7 = vld [vmem:[#allocation7 + $0x60] sm:$0xff] }
 0x24b   :  { %8917 = vst [vmem:[#allocation94_spill] sm:$0xff] %v5523_v31  ;;  %1278 = vmatpush.msrb.mxu2 %v5536_v1  ;;  %v5543_v31 = vld [vmem:[#allocation5 + $0xb8] sm:$0xff]  ;;  %1302 = vmatpush.msra.mxu3 %v5559_v5 }
 0x24c   :  { %8918 = vst [vmem:[#allocation147_spill] sm:$0xff] %v5526_v48  ;;  %1261 = vmatpush.msrb.mxu1 %v5543_v31  ;;  %1323 = vmatpush.msrb.mxu0 %v4820_v8  ;;  %v5589_v8 = vld [vmem:[#allocation7 + $0x1f0] sm:$0xff] }
 0x24d   :  { %8919 = vst [vmem:[#allocation88_spill] sm:$0xff] %v5529_v2  ;;  %v5546_v2 = vld [vmem:[#allocation5 + $0x110] sm:$0xff]  ;;  %1303 = vmatpush.msra.mxu3 %v5569_v6 }
 0x24e   :  { %8920 = vst [vmem:[#allocation98_spill] sm:$0xff] %v5533_v37  ;;  %1279 = vmatpush.msrb.mxu2 %v5546_v2  ;;  %v5553_v37 = vld [vmem:[#allocation5 + $0x90] sm:$0xff]  ;;  %1324 = vmatpush.msrb.mxu0 %v4826_v9 }
 0x24f   :  { %8921 = vst [vmem:[#allocation102_spill] sm:$0xff] %v5536_v1  ;;  %1262 = vmatpush.msrb.mxu1 %v5553_v37  ;;  %1304 = vmatpush.msra.mxu3 %v5579_v7  ;;  %v5599_v9 = vld [vmem:[#allocation7 + $0x1d0] sm:$0xff] }
 0x250   :  { %8922 = vst [vmem:[#allocation152_spill] sm:$0xff] %v5539_v3  ;;  %v5556_v3 = vld [vmem:[#allocation5 + $0xe8] sm:$0xff]  ;;  %1325 = vmatpush.msrb.mxu0 %v4832_v10  ;;  %v5612_v10 = vld [vmem:[#allocation7] sm:$0xff] }
 0x251   :  { %8923 = vst [vmem:[#allocation92_spill] sm:$0xff] %v5543_v31  ;;  %1280 = vmatpush.msrb.mxu2 %v5556_v3  ;;  %v5563_v31 = vld [vmem:[#allocation5 + $0x68] sm:$0xff] }
 0x252   :  { %8924 = vst [vmem:[#allocation105_spill] sm:$0xff] %v5546_v2  ;;  %1263 = vmatpush.msrb.mxu1 %v5563_v31  ;;  %1326 = vmatpush.msrb.mxu0 %v4838_v12  ;;  %v5622_v12 = vld [vmem:[#allocation7 + $0x150] sm:$0xff] }
 0x253   :  { %8925 = vst [vmem:[#allocation157_spill] sm:$0xff] %v5549_v4  ;;  %v5566_v4 = vld [vmem:[#allocation5 + $0xc0] sm:$0xff] }
 0x254   :  { %8926 = vst [vmem:[#allocation96_spill] sm:$0xff] %v5553_v37  ;;  %1281 = vmatpush.msrb.mxu2 %v5566_v4  ;;  %v5573_v37 = vld [vmem:[#allocation5 + $0x40] sm:$0xff]  ;;  %1327 = vmatpush.msrb.mxu0 %v4844_v15  ;;  %v5631_v15 = vld [vmem:[#allocation7 + $0xf0] sm:$0xff] }
 0x255   :  { %8927 = vst [vmem:[#allocation108_spill] sm:$0xff] %v5556_v3  ;;  %1264 = vmatpush.msrb.mxu1 %v5573_v37 }
 0x256   :  { %8928 = vst [vmem:[#allocation163_spill] sm:$0xff] %v5559_v5  ;;  %v5576_v5 = vld [vmem:[#allocation5 + $0x98] sm:$0xff] }
 0x257   :  { %8929 = vst [vmem:[#allocation100_spill] sm:$0xff] %v5563_v31  ;;  %1282 = vmatpush.msrb.mxu2 %v5576_v5  ;;  %v5583_v31 = vld [vmem:[#allocation5 + $0x18] sm:$0xff] }
 0x258   :  { %8930 = vst [vmem:[#allocation112_spill] sm:$0xff] %v5566_v4  ;;  %1265 = vmatpush.msrb.mxu1 %v5583_v31 }
 0x259   :  { %8931 = vst [vmem:[#allocation168_spill] sm:$0xff] %v5569_v6  ;;  %v5586_v6 = vld [vmem:[#allocation5 + $0x70] sm:$0xff] }
 0x25a   :  { %8932 = vst [vmem:[#allocation116_spill] sm:$0xff] %v5573_v37  ;;  %1283 = vmatpush.msrb.mxu2 %v5586_v6  ;;  %1332 = vmatpush.msra.mxu1 %v5589_v8  ;;  %v5592_v37 = vld [vmem:[#allocation7 + $0x40] sm:$0xff] }
 0x25b   :  { %8933 = vst [vmem:[#allocation120_spill] sm:$0xff] %v5576_v5  ;;  %1305 = vmatpush.msra.mxu3 %v5592_v37  ;;  %v952_v5 = vpop.f32.mrf.mxu0 }
 0x25c   :  { %8934 = vst [vmem:[#allocation124_spill] sm:$0xff] %v5579_v7  ;;  %v5596_v7 = vld [vmem:[#allocation5 + $0x48] sm:$0xff]  ;;  %1333 = vmatpush.msra.mxu1 %v5599_v9 }
 0x25d   :  { %8935 = vst [vmem:[#allocation129_spill] sm:$0xff] %v5583_v31  ;;  %1284 = vmatpush.msrb.mxu2 %v5596_v7  ;;  %v5602_v31 = vld [vmem:[#allocation7 + $0x20] sm:$0xff] }
 0x25e   :  { %8936 = vst [vmem:[#allocation133_spill] sm:$0xff] %v5586_v6  ;;  %1306 = vmatpush.msra.mxu3 %v5602_v31 }
 0x25f   :  { %8937 = vst [vmem:[#allocation138_spill] sm:$0xff] %v5589_v8  ;;  %v5606_v8 = vld [vmem:[#allocation5 + $0x20] sm:$0xff] }
 0x260   :  { %8938 = vst [vmem:[#allocation142_spill] sm:$0xff] %v5592_v37  ;;  %1285 = vmatpush.msrb.mxu2 %v5606_v8  ;;  %v5609_v37 = vld [vmem:[#allocation7 + $0x1b0] sm:$0xff]  ;;  %1307 = vmatpush.msra.mxu3 %v5612_v10 }
 0x261   :  { %8939 = vst [vmem:[#allocation146_spill] sm:$0xff] %v5596_v7  ;;  %1334 = vmatpush.msra.mxu1 %v5609_v37 }
 0x262   :  { %8940 = vst [vmem:[#allocation151_spill] sm:$0xff] %v5599_v9  ;;  %v5616_v9 = vld [vmem:[#allocation7 + $0x190] sm:$0xff] }
 0x263   :  { %8941 = vst [vmem:[#allocation156_spill] sm:$0xff] %v5602_v31  ;;  %1335 = vmatpush.msra.mxu1 %v5616_v9  ;;  %v5619_v31 = vld [vmem:[#allocation7 + $0x170] sm:$0xff]  ;;  %v1034_v48 = vpop.f32.mrf.mxu0 }
 0x264   :  { %8942 = vst [vmem:[#allocation162_spill] sm:$0xff] %v5606_v8  ;;  %v5625_v8 = vld [vmem:[#allocation7 + $0x130] sm:$0xff] }
 0x265   :  { %8943 = vst [vmem:[#allocation167_spill] sm:$0xff] %v5609_v37  ;;  %1336 = vmatpush.msra.mxu1 %v5619_v31  ;;  %v5628_v37 = vld [vmem:[#allocation7 + $0x110] sm:$0xff] }
 0x266   :  { %8944 = vst [vmem:[#allocation154_spill] sm:$0xff] %v5612_v10  ;;  %v5643_v10 = vld [vmem:[#allocation7 + $0x70] sm:$0xff] }
 0x267   :  { %8945 = vst [vmem:[#allocation158_spill] sm:$0xff] %v5616_v9  ;;  %1337 = vmatpush.msra.mxu1 %v5622_v12  ;;  %v5634_v9 = vld [vmem:[#allocation7 + $0xd0] sm:$0xff] }
 0x268   :  { %8946 = vst [vmem:[#allocation165_spill] sm:$0xff] %v5619_v31  ;;  %v5637_v31 = vld [vmem:[#allocation7 + $0xb0] sm:$0xff] }
 0x269   :  { %8947 = vst [vmem:[#allocation110_spill] sm:$0xff] %v5622_v12  ;;  %1338 = vmatpush.msra.mxu1 %v5625_v8  ;;  %v5640_v12 = vld [vmem:[#allocation7 + $0x90] sm:$0xff] }
 0x26a   :  { %8948 = vst [vmem:[#allocation114_spill] sm:$0xff] %v5625_v8  ;;  %v892_v8 = vpop.f32.mrf.mxu1 }
 0x26b   :  { %8949 = vst [vmem:[#allocation118_spill] sm:$0xff] %v5628_v37  ;;  %1339 = vmatpush.msra.mxu1 %v5628_v37  ;;  %v893_v37 = vadd.f32 %v892_v8, %v5021_v24  ;;  %v331_v24 = vpop.permute.xlu2 %330 }
 0x26c   :  { %8950 = vst [vmem:[#allocation122_spill] sm:$0xff] %v5631_v15  ;;  %v375_v6 = vmul.f32 %v8788_v38, %v331_v24  ;;  %v377_v50 = vmul.f32 %v8791_v55, %v331_v24 }
 0x26d   :  { %1340 = vmatpush.msra.mxu1 %v5631_v15  ;;  %8951 = vst [vmem:[#allocation126_spill] sm:$0xff] %v5634_v9  ;;  %v5647_v15 = vld [vmem:[#allocation7 + $0x50] sm:$0xff] }
 0x26e   :  { %8952 = vst [vmem:[#allocation131_spill] sm:$0xff] %v5637_v31 }
 0x26f   :  { %1341 = vmatpush.msra.mxu1 %v5634_v9  ;;  %8953 = vst [vmem:[#allocation135_spill] sm:$0xff] %v5640_v12  ;;  %v912_v9 = vpop.f32.mrf.mxu2 }
 0x270   :  { %8954 = vst [vmem:[#allocation140_spill] sm:$0xff] %v5643_v10  ;;  %v913_v43 = vadd.f32 %v912_v9, %v5033_v49 }
 0x271   :  { %1342 = vmatpush.msra.mxu1 %v5637_v31  ;;  %8955 = vst [vmem:[#allocation144_spill] sm:$0xff] %v5647_v15  ;;  %v5653_v31 = vld [vmem:[#allocation7 + $0x30] sm:$0xff] }
 0x272   :  { %3069 = vst [vmem:[%s7861_s10 + $0x8] sm:$0xff] %v893_v37  ;;  %v417_v37 = vadd.f32 %v8789_v41, %v375_v6 }
 0x273   :  { %1343 = vmatpush.msra.mxu1 %v5640_v12  ;;  %8956 = vst [vmem:[#allocation148_spill] sm:$0xff] %v5653_v31  ;;  %v5656_v12 = vld [vmem:[#allocation7 + $0x10] sm:$0xff] }
 0x274   :  { %8957 = vst [vmem:[#allocation153_spill] sm:$0xff] %v5656_v12 }
 0x275   :  { %1344 = vmatpush.msra.mxu1 %v5643_v10  ;;  %v932_v10 = vpop.f32.mrf.mxu3 }
 0x276   :  { %v933_v38 = vadd.f32 %v932_v10, %v5031_v45  ;;  %v378_v10 = vmul.f32 %v8792_v54, %v331_v24 }
 0x277   :  { %1345 = vmatpush.msra.mxu1 %v5647_v15  ;;  %v994_v7 = vpop.f32.mrf.mxu2  ;;  %v376_v15 = vmul.f32 %v8790_v11, %v331_v24  ;;  %v972_v11 = vpop.f32.mrf.mxu1 }
 0x278   :  { %v1057_v0 = vadd.f32 %v994_v7, %v913_v43  ;;  %v420_v7 = vadd.f32 %v4729_v61, %v378_v10 }
 0x279   :  { %1346 = vmatpush.msra.mxu1 %v5653_v31  ;;  %v418_v4 = vadd.f32 %v8793_v59, %v376_v15  ;;  %v419_v15 = vadd.f32 %v8794_v14, %v377_v50  ;;  %v1138_v59 = vpop.f32.mrf.mxu0  ;;  %v973_v50 = vadd.f32 %v972_v11, %v5045_v33 }
 0x27a   :  { %v1061_v41 = vmul.f32 0.5, %v1057_v0 }
 0x27b   :  { %1347 = vmatpush.msra.mxu1 %v5656_v12 }
 0x27d   :  { %v1014_v8 = vpop.f32.mrf.mxu3 }
 0x27e   :  { %v1058_v6 = vadd.f32 %v1014_v8, %v933_v38  ;;  %v953_v38 = vadd.f32 %v952_v5, %v5043_v27 }
 0x27f   :  { %v1098_v3 = vpop.f32.mrf.mxu2 }
 0x280   :  { %v1161_v2 = vadd.f32 %v1098_v3, %v417_v37 }
 0x282   :  { %v1165_v12 = vmul.f32 0.5, %v1161_v2  ;;  %v1163_v2 = vadd.f32 %v1138_v59, %v419_v15  ;;  %v1059_v59 = vadd.f32 %v1034_v48, %v953_v38 }
 0x284   :  { %3152 = vtanh.f32 %v1165_v12 }
 0x285   :  { %v1118_v31 = vpop.f32.mrf.mxu3 }
 0x286   :  { %v1162_v1 = vadd.f32 %v1118_v31, %v418_v4  ;;  %v1065_v31 = vmul.f32 0.5, %v1058_v6 }
 0x288   :  { %v1169_v47 = vmul.f32 0.5, %v1162_v1  ;;  %v1054_v1 = vpop.f32.mrf.mxu1 }
 0x28a   :  { %3154 = vtanh.f32 %v1169_v47  ;;  %v3153_v3 = vpop.eup %3152 }
 0x28b   :  { %3156 = vtanh.f32 %v1061_v41  ;;  %v1167_v9 = vmul.f32 0.5, %v3153_v3  ;;  %v1060_v41 = vadd.f32 %v1054_v1, %v973_v50 }
 0x28c   :  { %3158 = vtanh.f32 %v1065_v31 }
 0x28d   :  { %3160 = vtanh.f32 %v1163_v2  ;;  %v1168_v12 = vadd.f32 0.5, %v1167_v9  ;;  %v1070_v9 = vmul.f32 0.5, %v1060_v41  ;;  %v8971_v41 = vld [vmem:[#allocation41_spill] sm:$0xff] }
 0x28e   :  { %3162 = vtanh.f32 %v1059_v59  ;;  %v5697_v59 = vld [vmem:[#allocation7 + $0x1b8] sm:$0xff] }
 0x290   :  { %v3155_v4 = vpop.eup %3154 }
 0x291   :  { %v1171_v37 = vmul.f32 0.5, %v3155_v4  ;;  %v3157_v47 = vpop.eup %3156 }
 0x292   :  { %v3159_v0 = vpop.eup %3158  ;;  %v1063_v4 = vmul.f32 0.5, %v3157_v47 }
 0x293   :  { %v1172_v43 = vadd.f32 0.5, %v1171_v37  ;;  %v3161_v8 = vpop.eup %3160  ;;  %v1067_v24 = vmul.f32 0.5, %v3159_v0  ;;  %v1187_v0 = vpop.permute.xlu2 %1186 }
 0x294   :  { %v1179_v15 = vmul.f32 %v3161_v8, %v1168_v12  ;;  %v1064_v11 = vadd.f32 0.5, %v1063_v4  ;;  %v3163_v48 = vpop.eup %3162  ;;  %vm1188_vm10 = vcmp.eq.s32.totalorder %v1187_v0, 1  ;;  %v5764_v4 = vld [vmem:[#allocation7 + $0x78] sm:$0xff]  ;;  %v8985_v0 = vld [vmem:[#allocation27_spill] sm:$0xff] }
 0x295   :  { %v1178_v3 = vmul.f32 %v1172_v43, %v5050_v18  ;;  %v1068_v5 = vadd.f32 0.5, %v1067_v24  ;;  %v8975_v24 = vld [vmem:[#allocation45_spill] sm:$0xff] }
 0x296   :  { %v1075_v10 = vmul.f32 %v3163_v48, %v1064_v11  ;;  %v5770_v11 = vld [vmem:[#allocation7 + $0x58] sm:$0xff]  ;;  %v8979_v48 = vld [vmem:[#allocation49_spill] sm:$0xff] }
 0x297   :  { %v5672_v37 = vadd.f32 %v1179_v15, %v1178_v3  ;;  %v1074_v12 = vmul.f32 %v1068_v5, %v5053_v26  ;;  %v8972_v15 = vld [vmem:[#allocation104_spill] sm:$0xff]  ;;  %v8973_v3 = vld [vmem:[#allocation43_spill] sm:$0xff]  ;;  %v8978_v5 = vld [vmem:[#allocation25_spill] sm:$0xff] }
 0x299   :  { %v5676_v50 = vadd.f32 %v1075_v10, %v1074_v12  ;;  %v5776_v10 = vld [vmem:[#allocation7 + $0x38] sm:$0xff]  ;;  %v8981_v12 = vld [vmem:[#allocation26_spill] sm:$0xff] }
 0x2aa   :  { %v1158_v6 = vpop.f32.mrf.mxu1 }
 0x2ab   :  { %v1164_v31 = vadd.f32 %v1158_v6, %v420_v7  ;;  %v5758_v6 = vld [vmem:[#allocation7 + $0x98] sm:$0xff] }
 0x2ad   :  { %v1174_v2 = vmul.f32 0.5, %v1164_v31  ;;  %v8974_v31 = vld [vmem:[#allocation24_spill] sm:$0xff] }
 0x2af   :  { %3164 = vtanh.f32 %v1174_v2  ;;  %v8976_v2 = vld [vmem:[#allocation107_spill] sm:$0xff] }
 0x2b0   :  { %3166 = vtanh.f32 %v1070_v9  ;;  %v8977_v9 = vld [vmem:[#allocation47_spill] sm:$0xff] }
 0x2b1   :  { %3168 = vtanh.f32 %v5672_v37 }
 0x2b2   :  { %3170 = vtanh.f32 %v5676_v50 }
 0x2b5   :  { %v3165_v1 = vpop.eup %3164 }
 0x2b6   :  { %v1176_v18 = vmul.f32 0.5, %v3165_v1  ;;  %v3167_v43 = vpop.eup %3166  ;;  %v8980_v1 = vld [vmem:[#allocation111_spill] sm:$0xff] }
 0x2b7   :  { %v3169_v38 = vpop.eup %3168  ;;  %v1072_v8 = vmul.f32 0.5, %v3167_v43  ;;  %v5782_v43 = vld [vmem:[#allocation7 + $0x18] sm:$0xff] }
 0x2b8   :  { %v1177_v47 = vadd.f32 0.5, %v1176_v18  ;;  %v8982_v18 = vld [vmem:[#allocation51_spill] sm:$0xff] }
 0x2b9   :  { %v1073_v26 = vadd.f32 0.5, %v1072_v8  ;;  %v8987_v8 = vld [vmem:[#allocation57_spill] sm:$0xff] }
 0x2ba   :  { %v5678_v7 = vmul.f32 %v3169_v38, %v1177_v47  ;;  %v8983_v47 = vld [vmem:[#allocation53_spill] sm:$0xff]  ;;  %v8984_v38 = vld [vmem:[#allocation115_spill] sm:$0xff] }
 0x2bc   :  { %3070 = vmatmul.msk.f32.vlgmr.msra.gmra.mxu2 %vm1188_vm10, %v5678_v7  ;;  %3071 = vmatmul.msk.f32.vlgmr.msrb.gmra.mxu3 %vm1188_vm10, %v5678_v7 }
 0x2bd   :  { %3072 = vmatmul.msk.f32.vlgmr.msra.gmra.mxu0 %vm1188_vm10, %v5678_v7  ;;  %3073 = vmatmul.msk.f32.vlgmr.msrb.gmra.mxu1 %vm1188_vm10, %v5678_v7 }
 0x2be   :  { %1352 = vmatpush.msra.mxu2 %v5066_v39  ;;  %1396 = vmatpush.msrb.mxu3 %v5069_v40  ;;  %v3171_v39 = vpop.eup %3170 }
 0x2bf   :  { %1416 = vmatpush.msra.mxu0 %v5072_v42  ;;  %1436 = vmatpush.msrb.mxu1 %v5075_v44  ;;  %v5703_v40 = vmul.f32 %v3171_v39, %v1073_v26  ;;  %v5705_v42 = vld [vmem:[#allocation7 + $0x198] sm:$0xff]  ;;  %v8988_v26 = vld [vmem:[#allocation119_spill] sm:$0xff] }
 0x2c0   :  { %1353 = vmatpush.msra.mxu2 %v5078_v56  ;;  %1397 = vmatpush.msrb.mxu3 %v5081_v62  ;;  %v5716_v44 = vld [vmem:[#allocation7 + $0x178] sm:$0xff]  ;;  %v8989_v39 = vld [vmem:[#allocation59_spill] sm:$0xff] }
 0x2c1   :  { %1417 = vmatpush.msra.mxu0 %v5084_v52  ;;  %1437 = vmatpush.msrb.mxu1 %v5087_v60  ;;  %8958 = vst [vmem:[#allocation159_spill] sm:$0xff] %v5703_v40  ;;  %v5722_v56 = vld [vmem:[#allocation7 + $0x158] sm:$0xff]  ;;  %v8959_v52 = vld [vmem:[#allocation13_spill] sm:$0xff] }
 0x2c2   :  { %1354 = vmatpush.msra.mxu2 %v5697_v59  ;;  %1398 = vmatpush.msrb.mxu3 %v5091_v57  ;;  %v5728_v62 = vld [vmem:[#allocation7 + $0x138] sm:$0xff]  ;;  %v8960_v57 = vld [vmem:[#allocation18_spill] sm:$0xff] }
 0x2c3   :  { %1418 = vmatpush.msra.mxu0 %v5094_v36  ;;  %1438 = vmatpush.msrb.mxu1 %v5097_v23  ;;  %v5734_v60 = vld [vmem:[#allocation7 + $0x118] sm:$0xff]  ;;  %v8962_v23 = vld [vmem:[#allocation14_spill] sm:$0xff] }
 0x2c4   :  { %1355 = vmatpush.msra.mxu2 %v5705_v42  ;;  %1399 = vmatpush.msrb.mxu3 %v5101_v53  ;;  %v8961_v36 = vld [vmem:[#allocation20_spill] sm:$0xff] }
 0x2c5   :  { %1419 = vmatpush.msra.mxu0 %v5106_v13  ;;  %1439 = vmatpush.msrb.mxu1 %v5109_v16  ;;  %v5740_v53 = vld [vmem:[#allocation7 + $0xf8] sm:$0xff]  ;;  %v8963_v13 = vld [vmem:[#allocation21_spill] sm:$0xff]  ;;  %v8964_v16 = vld [vmem:[#allocation23_spill] sm:$0xff] }
 0x2c6   :  { %3074 = vmatmul.msk.f32.vlgmr.msrb.gmra.mxu2 %vm1188_vm10, %v5678_v7  ;;  %1308 = vmatmul.f32.vlgmr.msra.gmra.mxu3 %v5703_v40 }
 0x2c7   :  { %1328 = vmatmul.f32.vlgmr.msrb.gmra.mxu0 %v5703_v40  ;;  %1348 = vmatmul.f32.vlgmr.msra.gmra.mxu1 %v5703_v40 }
 0x2c8   :  { %1356 = vmatpush.msra.mxu2 %v5716_v44  ;;  %1400 = vmatpush.msrb.mxu3 %v5118_v58  ;;  %v8965_v58 = vld [vmem:[#allocation16_spill] sm:$0xff] }
 0x2c9   :  { %1420 = vmatpush.msra.mxu0 %v5121_v19  ;;  %1440 = vmatpush.msrb.mxu1 %v5124_v35  ;;  %v5746_v19 = vld [vmem:[#allocation7 + $0xd8] sm:$0xff]  ;;  %v8966_v35 = vld [vmem:[#allocation19_spill] sm:$0xff] }
 0x2ca   :  { %1357 = vmatpush.msra.mxu2 %v5722_v56  ;;  %1401 = vmatpush.msrb.mxu3 %v5128_v22  ;;  %v8967_v22 = vld [vmem:[#allocation37_spill] sm:$0xff] }
 0x2cb   :  { %1421 = vmatpush.msra.mxu0 %v5131_v51  ;;  %1441 = vmatpush.msrb.mxu1 %v5134_v29  ;;  %v8968_v51 = vld [vmem:[#allocation101_spill] sm:$0xff]  ;;  %v5752_v29 = vld [vmem:[#allocation7 + $0xb8] sm:$0xff] }
 0x2cc   :  { %1358 = vmatpush.msra.mxu2 %v5728_v62  ;;  %1402 = vmatpush.msrb.mxu3 %v5138_v63  ;;  %v8969_v63 = vld [vmem:[#allocation39_spill] sm:$0xff] }
 0x2cd   :  { %1422 = vmatpush.msra.mxu0 %v5141_v32  ;;  %1442 = vmatpush.msrb.mxu1 %v8959_v52  ;;  %v8970_v32 = vld [vmem:[#allocation22_spill] sm:$0xff]  ;;  %v8990_v52 = vld [vmem:[#allocation28_spill] sm:$0xff] }
 0x2ce   :  { %1359 = vmatpush.msra.mxu2 %v5734_v60  ;;  %1403 = vmatpush.msrb.mxu3 %v8960_v57  ;;  %v8991_v57 = vld [vmem:[#allocation61_spill] sm:$0xff] }
 0x2cf   :  { %1423 = vmatpush.msra.mxu0 %v8961_v36  ;;  %1443 = vmatpush.msrb.mxu1 %v8962_v23  ;;  %v8992_v36 = vld [vmem:[#allocation123_spill] sm:$0xff] }
 0x2d0   :  { %1360 = vmatpush.msra.mxu2 %v5740_v53  ;;  %1404 = vmatpush.msrb.mxu3 %v8963_v13  ;;  %v8993_v23 = vld [vmem:[#allocation63_spill] sm:$0xff]  ;;  %v8994_v13 = vld [vmem:[#allocation29_spill] sm:$0xff] }
 0x2d1   :  { %1424 = vmatpush.msra.mxu0 %v8964_v16  ;;  %1444 = vmatpush.msrb.mxu1 %v8965_v58  ;;  %v8995_v16 = vld [vmem:[#allocation65_spill] sm:$0xff]  ;;  %v8996_v58 = vld [vmem:[#allocation30_spill] sm:$0xff] }
 0x2d2   :  { %1361 = vmatpush.msra.mxu2 %v5746_v19  ;;  %1405 = vmatpush.msrb.mxu3 %v8966_v35  ;;  %v8997_v35 = vld [vmem:[#allocation67_spill] sm:$0xff] }
 0x2d3   :  { %1425 = vmatpush.msra.mxu0 %v8967_v22  ;;  %1445 = vmatpush.msrb.mxu1 %v8968_v51  ;;  %v8998_v22 = vld [vmem:[#allocation128_spill] sm:$0xff]  ;;  %v8999_v51 = vld [vmem:[#allocation69_spill] sm:$0xff] }
 0x2d4   :  { %1362 = vmatpush.msra.mxu2 %v5752_v29  ;;  %1406 = vmatpush.msrb.mxu3 %v8969_v63  ;;  %v9000_v63 = vld [vmem:[#allocation31_spill] sm:$0xff] }
 0x2d5   :  { %1426 = vmatpush.msra.mxu0 %v8970_v32  ;;  %1446 = vmatpush.msrb.mxu1 %v8971_v41  ;;  %v9001_v32 = vld [vmem:[#allocation71_spill] sm:$0xff]  ;;  %v9002_v41 = vld [vmem:[#allocation132_spill] sm:$0xff] }
 0x2d6   :  { %1363 = vmatpush.msra.mxu2 %v5758_v6  ;;  %1407 = vmatpush.msrb.mxu3 %v8972_v15  ;;  %v9003_v15 = vld [vmem:[#allocation73_spill] sm:$0xff] }
 0x2d7   :  { %1427 = vmatpush.msra.mxu0 %v8973_v3  ;;  %1447 = vmatpush.msrb.mxu1 %v8974_v31  ;;  %v9004_v3 = vld [vmem:[#allocation137_spill] sm:$0xff]  ;;  %v9005_v31 = vld [vmem:[#allocation75_spill] sm:$0xff] }
 0x2d8   :  { %1364 = vmatpush.msra.mxu2 %v5764_v4  ;;  %1408 = vmatpush.msrb.mxu3 %v8975_v24  ;;  %v9006_v24 = vld [vmem:[#allocation32_spill] sm:$0xff] }
 0x2d9   :  { %1428 = vmatpush.msra.mxu0 %v8976_v2  ;;  %1448 = vmatpush.msrb.mxu1 %v8977_v9  ;;  %v9007_v2 = vld [vmem:[#allocation77_spill] sm:$0xff] }
 0x2da   :  { %1365 = vmatpush.msra.mxu2 %v5770_v11  ;;  %1409 = vmatpush.msrb.mxu3 %v8978_v5  ;;  %v9008_v9 = vld [vmem:[#allocation141_spill] sm:$0xff]  ;;  %v9009_v5 = vld [vmem:[#allocation79_spill] sm:$0xff] }
 0x2db   :  { %1429 = vmatpush.msra.mxu0 %v8979_v48  ;;  %1449 = vmatpush.msrb.mxu1 %v8980_v1  ;;  %v9010_v48 = vld [vmem:[#allocation33_spill] sm:$0xff]  ;;  %v9011_v1 = vld [vmem:[#allocation34_spill] sm:$0xff] }
 0x2dc   :  { %1366 = vmatpush.msra.mxu2 %v5776_v10  ;;  %1410 = vmatpush.msrb.mxu3 %v5218_v21  ;;  %v8986_v21 = vld [vmem:[#allocation55_spill] sm:$0xff] }
 0x2dd   :  { %1430 = vmatpush.msra.mxu0 %v8981_v12  ;;  %1450 = vmatpush.msrb.mxu1 %v8982_v18  ;;  %v9012_v12 = vld [vmem:[#allocation145_spill] sm:$0xff] }
 0x2de   :  { %1367 = vmatpush.msra.mxu2 %v5782_v43  ;;  %1411 = vmatpush.msrb.mxu3 %v8983_v47  ;;  %v9013_v18 = vld [vmem:[#allocation81_spill] sm:$0xff]  ;;  %v9014_v47 = vld [vmem:[#allocation83_spill] sm:$0xff] }
 0x2df   :  { %1431 = vmatpush.msra.mxu0 %v8984_v38  ;;  %1451 = vmatpush.msrb.mxu1 %v8985_v0  ;;  %v9015_v38 = vld [vmem:[#allocation85_spill] sm:$0xff]  ;;  %v9016_v0 = vld [vmem:[#allocation150_spill] sm:$0xff] }
 0x2e0   :  { %1368 = vmatmul.f32.vlgmr.msra.gmra.mxu2 %v5703_v40  ;;  %1412 = vmatmul.f32.vlgmr.msrb.gmra.mxu3 %v5678_v7 }
 0x2e1   :  { %1432 = vmatmul.f32.vlgmr.msra.gmra.mxu0 %v5678_v7  ;;  %1452 = vmatmul.f32.vlgmr.msrb.gmra.mxu1 %v5678_v7 }
 0x2e2   :  { %1456 = vmatpush.msrb.mxu2 %v8986_v21  ;;  %1505 = vmatpush.msra.mxu3 %v8987_v8  ;;  %v9017_v21 = vld [vmem:[#allocation35_spill] sm:$0xff]  ;;  %v9018_v8 = vld [vmem:[#allocation36_spill] sm:$0xff] }
 0x2e3   :  { %1525 = vmatpush.msrb.mxu0 %v8988_v26  ;;  %1545 = vmatpush.msra.mxu1 %v8989_v39  ;;  %v9019_v26 = vld [vmem:[#allocation89_spill] sm:$0xff]  ;;  %v9020_v39 = vld [vmem:[#allocation155_spill] sm:$0xff] }
 0x2e4   :  { %1457 = vmatpush.msrb.mxu2 %v8990_v52  ;;  %1506 = vmatpush.msra.mxu3 %v8991_v57  ;;  %v9021_v52 = vld [vmem:[#allocation87_spill] sm:$0xff]  ;;  %v9023_v57 = vld [vmem:[#allocation93_spill] sm:$0xff] }
 0x2e5   :  { %1526 = vmatpush.msrb.mxu0 %v8992_v36  ;;  %1546 = vmatpush.msra.mxu1 %v8993_v23  ;;  %v9024_v36 = vld [vmem:[#allocation38_spill] sm:$0xff]  ;;  %v9025_v23 = vld [vmem:[#allocation161_spill] sm:$0xff] }
 0x2e6   :  { %1458 = vmatpush.msrb.mxu2 %v8994_v13  ;;  %1507 = vmatpush.msra.mxu3 %v8995_v16  ;;  %v9026_v13 = vld [vmem:[#allocation95_spill] sm:$0xff]  ;;  %v9027_v16 = vld [vmem:[#allocation97_spill] sm:$0xff] }
 0x2e7   :  { %1527 = vmatpush.msrb.mxu0 %v8996_v58  ;;  %1547 = vmatpush.msra.mxu1 %v8997_v35  ;;  %v9028_v58 = vld [vmem:[#allocation42_spill] sm:$0xff] }
 0x2e8   :  { %1459 = vmatpush.msrb.mxu2 %v8998_v22  ;;  %1508 = vmatpush.msra.mxu3 %v8999_v51  ;;  %v9029_v35 = vld [vmem:[#allocation166_spill] sm:$0xff]  ;;  %v9030_v22 = vld [vmem:[#allocation40_spill] sm:$0xff] }
 0x2e9   :  { %1528 = vmatpush.msrb.mxu0 %v9000_v63  ;;  %1548 = vmatpush.msra.mxu1 %v9001_v32  ;;  %v9032_v51 = vld [vmem:[#allocation50_spill] sm:$0xff]  ;;  %v9033_v63 = vld [vmem:[#allocation103_spill] sm:$0xff] }
 0x2ea   :  { %1460 = vmatpush.msrb.mxu2 %v9002_v41  ;;  %1509 = vmatpush.msra.mxu3 %v9003_v15  ;;  %v9034_v32 = vld [vmem:[#allocation54_spill] sm:$0xff]  ;;  %v9035_v41 = vld [vmem:[#allocation99_spill] sm:$0xff] }
 0x2eb   :  { %1529 = vmatpush.msrb.mxu0 %v9004_v3  ;;  %1549 = vmatpush.msra.mxu1 %v9005_v31  ;;  %v9036_v15 = vld [vmem:[#allocation106_spill] sm:$0xff]  ;;  %v9037_v3 = vld [vmem:[#allocation48_spill] sm:$0xff]  ;;  %v9038_v31 = vld [vmem:[#allocation109_spill] sm:$0xff] }
 0x2ec   :  { %1461 = vmatpush.msrb.mxu2 %v9006_v24  ;;  %1510 = vmatpush.msra.mxu3 %v9007_v2  ;;  %v9040_v24 = vld [vmem:[#allocation62_spill] sm:$0xff]  ;;  %v9041_v2 = vld [vmem:[#allocation113_spill] sm:$0xff] }
 0x2ed   :  { %1530 = vmatpush.msrb.mxu0 %v9008_v9  ;;  %1550 = vmatpush.msra.mxu1 %v9009_v5  ;;  %v9042_v9 = vld [vmem:[#allocation58_spill] sm:$0xff] }
 0x2ee   :  { %1462 = vmatpush.msrb.mxu2 %v9010_v48  ;;  %1511 = vmatpush.msra.mxu3 %v9011_v1  ;;  %v9043_v5 = vld [vmem:[#allocation66_spill] sm:$0xff]  ;;  %v9044_v48 = vld [vmem:[#allocation117_spill] sm:$0xff]  ;;  %v9045_v1 = vld [vmem:[#allocation52_spill] sm:$0xff] }
 0x2ef   :  { %1531 = vmatpush.msrb.mxu0 %v9012_v12  ;;  %1551 = vmatpush.msra.mxu1 %v5333_v20  ;;  %v9022_v20 = vld [vmem:[#allocation91_spill] sm:$0xff]  ;;  %v9046_v12 = vld [vmem:[#allocation60_spill] sm:$0xff] }
 0x2f0   :  { %1463 = vmatpush.msrb.mxu2 %v9013_v18  ;;  %1512 = vmatpush.msra.mxu3 %v9014_v47  ;;  %v9047_v18 = vld [vmem:[#allocation121_spill] sm:$0xff]  ;;  %v5861_v47 = vld [vmem:[#allocation7 + $0x1e8] sm:$0xff] }
 0x2f1   :  { %1532 = vmatpush.msrb.mxu0 %v9015_v38  ;;  %1552 = vmatpush.msra.mxu1 %v9016_v0  ;;  %v9049_v38 = vld [vmem:[#allocation74_spill] sm:$0xff] }
 0x2f2   :  { %1464 = vmatpush.msrb.mxu2 %v9017_v21  ;;  %1513 = vmatpush.msra.mxu3 %v9018_v8  ;;  %v5867_v0 = vld [vmem:[#allocation7 + $0x1c8] sm:$0xff]  ;;  %v9052_v21 = vld [vmem:[#allocation64_spill] sm:$0xff] }
 0x2f3   :  { %1533 = vmatpush.msrb.mxu0 %v9019_v26  ;;  %1553 = vmatpush.msra.mxu1 %v9020_v39  ;;  %v5873_v8 = vld [vmem:[#allocation7 + $0x1a8] sm:$0xff]  ;;  %v9055_v39 = vld [vmem:[#allocation125_spill] sm:$0xff] }
 0x2f4   :  { %1465 = vmatpush.msrb.mxu2 %v9021_v52  ;;  %1514 = vmatpush.msra.mxu3 %v5364_v34  ;;  %v9031_v34 = vld [vmem:[#allocation46_spill] sm:$0xff] }
 0x2f5   :  { %1534 = vmatpush.msrb.mxu0 %v9022_v20  ;;  %1554 = vmatpush.msra.mxu1 %v9023_v57  ;;  %v9053_v26 = vld [vmem:[#allocation130_spill] sm:$0xff] }
 0x2f6   :  { %1466 = vmatpush.msrb.mxu2 %v9024_v36  ;;  %1515 = vmatpush.msra.mxu3 %v9025_v23  ;;  %v5879_v52 = vld [vmem:[#allocation7 + $0x188] sm:$0xff]  ;;  %v9059_v23 = vld [vmem:[#allocation139_spill] sm:$0xff] }
 0x2f7   :  { %1535 = vmatpush.msrb.mxu0 %v9026_v13  ;;  %1555 = vmatpush.msra.mxu1 %v9027_v16  ;;  %v9056_v20 = vld [vmem:[#allocation134_spill] sm:$0xff]  ;;  %v9060_v13 = vld [vmem:[#allocation80_spill] sm:$0xff] }
 0x2f8   :  { %1467 = vmatpush.msrb.mxu2 %v9028_v58  ;;  %1516 = vmatpush.msra.mxu3 %v5389_v30  ;;  %v9039_v30 = vld [vmem:[#allocation44_spill] sm:$0xff]  ;;  %v9058_v57 = vld [vmem:[#allocation78_spill] sm:$0xff] }
 0x2f9   :  { %1536 = vmatpush.msrb.mxu0 %v9029_v35  ;;  %1556 = vmatpush.msra.mxu1 %v9030_v22  ;;  %v5885_v36 = vld [vmem:[#allocation7 + $0x168] sm:$0xff]  ;;  %v9062_v35 = vld [vmem:[#allocation143_spill] sm:$0xff]  ;;  %v9063_v22 = vld [vmem:[#allocation84_spill] sm:$0xff] }
 0x2fa   :  { %1468 = vmatpush.msrb.mxu2 %v9031_v34  ;;  %1517 = vmatpush.msra.mxu3 %v9032_v51  ;;  %v9061_v16 = vld [vmem:[#allocation82_spill] sm:$0xff] }
 0x2fb   :  { %1537 = vmatpush.msrb.mxu0 %v9033_v63  ;;  %1557 = vmatpush.msra.mxu1 %v9034_v32  ;;  %v5891_v58 = vld [vmem:[#allocation7 + $0x148] sm:$0xff]  ;;  %v9065_v63 = vld [vmem:[#allocation147_spill] sm:$0xff]  ;;  %v9066_v32 = vld [vmem:[#allocation88_spill] sm:$0xff] }
 0x2fc   :  { %1469 = vmatpush.msrb.mxu2 %v9035_v41  ;;  %1518 = vmatpush.msra.mxu3 %v9036_v15  ;;  %v9064_v34 = vld [vmem:[#allocation86_spill] sm:$0xff] }
 0x2fd   :  { %1538 = vmatpush.msrb.mxu0 %v9037_v3  ;;  %1558 = vmatpush.msra.mxu1 %v9038_v31  ;;  %v5897_v51 = vld [vmem:[#allocation7 + $0x128] sm:$0xff]  ;;  %v9069_v31 = vld [vmem:[#allocation152_spill] sm:$0xff] }
 0x2fe   :  { %1470 = vmatpush.msrb.mxu2 %v9039_v30  ;;  %1519 = vmatpush.msra.mxu3 %v5429_v25  ;;  %v9048_v25 = vld [vmem:[#allocation56_spill] sm:$0xff]  ;;  %v9067_v41 = vld [vmem:[#allocation90_spill] sm:$0xff] }
 0x2ff   :  { %1539 = vmatpush.msrb.mxu0 %v9040_v24  ;;  %1559 = vmatpush.msra.mxu1 %v9041_v2  ;;  %v5903_v15 = vld [vmem:[#allocation7 + $0x108] sm:$0xff]  ;;  %v9071_v2 = vld [vmem:[#allocation105_spill] sm:$0xff] }
 0x300   :  { %1471 = vmatpush.msrb.mxu2 %v9042_v9  ;;  %1520 = vmatpush.msra.mxu3 %v9043_v5  ;;  %v9068_v3 = vld [vmem:[#allocation102_spill] sm:$0xff]  ;;  %v9072_v9 = vld [vmem:[#allocation157_spill] sm:$0xff] }
 0x301   :  { %1472 = vmatmul.f32.vlgmr.msrb.gmra.mxu2 %v5678_v7  ;;  %1540 = vmatpush.msrb.mxu0 %v9044_v48  ;;  %v9050_v7 = vld [vmem:[#allocation70_spill] sm:$0xff] }
 0x302   :  { %1565 = vmatpush.msra.mxu2 %v9045_v1  ;;  %1560 = vmatpush.msra.mxu1 %v9046_v12  ;;  %v9070_v30 = vld [vmem:[#allocation94_spill] sm:$0xff]  ;;  %v9074_v1 = vld [vmem:[#allocation108_spill] sm:$0xff]  ;;  %v9075_v12 = vld [vmem:[#allocation163_spill] sm:$0xff] }
 0x303   :  { %1585 = vmatpush.msrb.mxu3 %v5456_v28  ;;  %1607 = vmatpush.msra.mxu0 %v9047_v18  ;;  %v9051_v28 = vld [vmem:[#allocation68_spill] sm:$0xff]  ;;  %v5909_v24 = vld [vmem:[#allocation7 + $0xe8] sm:$0xff] }
 0x304   :  { %1566 = vmatpush.msra.mxu2 %v9048_v25  ;;  %1627 = vmatpush.msrb.mxu1 %v5861_v47  ;;  %v9073_v5 = vld [vmem:[#allocation98_spill] sm:$0xff]  ;;  %v9076_v18 = vld [vmem:[#allocation92_spill] sm:$0xff] }
 0x305   :  { %1586 = vmatpush.msrb.mxu3 %v5466_v46  ;;  %1608 = vmatpush.msra.mxu0 %v9049_v38  ;;  %v9054_v46 = vld [vmem:[#allocation72_spill] sm:$0xff]  ;;  %v5915_v48 = vld [vmem:[#allocation7 + $0xc8] sm:$0xff] }
 0x306   :  { %1567 = vmatpush.msra.mxu2 %v9050_v7  ;;  %1628 = vmatpush.msrb.mxu1 %v5867_v0  ;;  %v5921_v25 = vld [vmem:[#allocation7 + $0xa8] sm:$0xff]  ;;  %v9077_v38 = vld [vmem:[#allocation112_spill] sm:$0xff] }
 0x307   :  { %1587 = vmatpush.msrb.mxu3 %v5476_v17  ;;  %1609 = vmatpush.msra.mxu0 %v9051_v28  ;;  %v9057_v17 = vld [vmem:[#allocation76_spill] sm:$0xff] }
 0x308   :  { %1568 = vmatpush.msra.mxu2 %v9052_v21  ;;  %1629 = vmatpush.msrb.mxu1 %v5873_v8  ;;  %v9078_v7 = vld [vmem:[#allocation168_spill] sm:$0xff]  ;;  %v5927_v21 = vld [vmem:[#allocation7 + $0x88] sm:$0xff] }
 0x309   :  { %1588 = vmatpush.msrb.mxu3 %v9053_v26  ;;  %1610 = vmatpush.msra.mxu0 %v9054_v46  ;;  %v9079_v28 = vld [vmem:[#allocation96_spill] sm:$0xff] }
 0x30a   :  { %1569 = vmatpush.msra.mxu2 %v9055_v39  ;;  %1630 = vmatpush.msrb.mxu1 %v5879_v52  ;;  %v9080_v26 = vld [vmem:[#allocation120_spill] sm:$0xff] }
 0x30b   :  { %1589 = vmatpush.msrb.mxu3 %v9056_v20  ;;  %1611 = vmatpush.msra.mxu0 %v9057_v17  ;;  %v9081_v46 = vld [vmem:[#allocation124_spill] sm:$0xff]  ;;  %v5933_v20 = vld [vmem:[#allocation7 + $0x68] sm:$0xff]  ;;  %v9083_v17 = vld [vmem:[#allocation133_spill] sm:$0xff] }
 0x30c   :  { %1570 = vmatpush.msra.mxu2 %v9058_v57  ;;  %1631 = vmatpush.msrb.mxu1 %v5885_v36  ;;  %v9082_v39 = vld [vmem:[#allocation100_spill] sm:$0xff]  ;;  %v9084_v57 = vld [vmem:[#allocation142_spill] sm:$0xff] }
 0x30d   :  { %1590 = vmatpush.msrb.mxu3 %v9059_v23  ;;  %1612 = vmatpush.msra.mxu0 %v9060_v13  ;;  %v9085_v23 = vld [vmem:[#allocation116_spill] sm:$0xff]  ;;  %v5939_v13 = vld [vmem:[#allocation7 + $0x48] sm:$0xff] }
 0x30e   :  { %1571 = vmatpush.msra.mxu2 %v9061_v16  ;;  %1632 = vmatpush.msrb.mxu1 %v5891_v58  ;;  %v9086_v16 = vld [vmem:[#allocation146_spill] sm:$0xff] }
 0x30f   :  { %1591 = vmatpush.msrb.mxu3 %v9062_v35  ;;  %1613 = vmatpush.msra.mxu0 %v9063_v22  ;;  %v9087_v35 = vld [vmem:[#allocation156_spill] sm:$0xff]  ;;  %v9088_v22 = vld [vmem:[#allocation129_spill] sm:$0xff] }
 0x310   :  { %1572 = vmatpush.msra.mxu2 %v9064_v34  ;;  %1633 = vmatpush.msrb.mxu1 %v5897_v51  ;;  %v5945_v34 = vld [vmem:[#allocation7 + $0x28] sm:$0xff] }
 0x311   :  { %1592 = vmatpush.msrb.mxu3 %v9065_v63  ;;  %1614 = vmatpush.msra.mxu0 %v9066_v32  ;;  %v9089_v63 = vld [vmem:[#allocation138_spill] sm:$0xff] }
 0x312   :  { %1573 = vmatpush.msra.mxu2 %v9067_v41  ;;  %1634 = vmatpush.msrb.mxu1 %v5903_v15  ;;  %v9090_v32 = vld [vmem:[#allocation162_spill] sm:$0xff] }
 0x313   :  { %1593 = vmatpush.msrb.mxu3 %v9068_v3  ;;  %1615 = vmatpush.msra.mxu0 %v9069_v31  ;;  %v9091_v41 = vld [vmem:[#allocation154_spill] sm:$0xff]  ;;  %v9093_v31 = vld [vmem:[#allocation151_spill] sm:$0xff] }
 0x314   :  { %1574 = vmatpush.msra.mxu2 %v9070_v30  ;;  %1635 = vmatpush.msrb.mxu1 %v5909_v24  ;;  %v5951_v3 = vld [vmem:[#allocation7 + $0x8] sm:$0xff]  ;;  %v9094_v30 = vld [vmem:[#allocation167_spill] sm:$0xff] }
 0x315   :  { %1594 = vmatpush.msrb.mxu3 %v9071_v2  ;;  %1616 = vmatpush.msra.mxu0 %v9072_v9  ;;  %9092 = vst [vmem:[#allocation164_spill] sm:$0xff] %v5951_v3  ;;  %v9095_v2 = vld [vmem:[#allocation158_spill] sm:$0xff]  ;;  %v9096_v9 = vld [vmem:[#allocation165_spill] sm:$0xff] }
 0x316   :  { %1575 = vmatpush.msra.mxu2 %v9073_v5  ;;  %1636 = vmatpush.msrb.mxu1 %v5915_v48  ;;  %v9097_v5 = vld [vmem:[#allocation110_spill] sm:$0xff] }
 0x317   :  { %1595 = vmatpush.msrb.mxu3 %v9074_v1  ;;  %1617 = vmatpush.msra.mxu0 %v9075_v12  ;;  %v9098_v1 = vld [vmem:[#allocation114_spill] sm:$0xff] }
 0x318   :  { %1576 = vmatpush.msra.mxu2 %v9076_v18  ;;  %1637 = vmatpush.msrb.mxu1 %v5921_v25  ;;  %v9099_v12 = vld [vmem:[#allocation118_spill] sm:$0xff] }
 0x319   :  { %1596 = vmatpush.msrb.mxu3 %v9077_v38  ;;  %1618 = vmatpush.msra.mxu0 %v9078_v7  ;;  %v9100_v18 = vld [vmem:[#allocation122_spill] sm:$0xff]  ;;  %v9102_v7 = vld [vmem:[#allocation131_spill] sm:$0xff] }
 0x31a   :  { %1577 = vmatpush.msra.mxu2 %v9079_v28  ;;  %1638 = vmatpush.msrb.mxu1 %v5927_v21  ;;  %v9101_v38 = vld [vmem:[#allocation126_spill] sm:$0xff]  ;;  %v9103_v28 = vld [vmem:[#allocation135_spill] sm:$0xff] }
 0x31b   :  { %1597 = vmatpush.msrb.mxu3 %v9080_v26  ;;  %1619 = vmatpush.msra.mxu0 %v9081_v46  ;;  %v9104_v26 = vld [vmem:[#allocation140_spill] sm:$0xff] }
 0x31c   :  { %1578 = vmatpush.msra.mxu2 %v9082_v39  ;;  %1639 = vmatpush.msrb.mxu1 %v5933_v20  ;;  %v9105_v46 = vld [vmem:[#allocation144_spill] sm:$0xff] }
 0x31d   :  { %1598 = vmatpush.msrb.mxu3 %v9083_v17  ;;  %1620 = vmatpush.msra.mxu0 %v9084_v57  ;;  %v9106_v39 = vld [vmem:[#allocation148_spill] sm:$0xff]  ;;  %v9107_v57 = vld [vmem:[#allocation153_spill] sm:$0xff] }
 0x31e   :  { %1579 = vmatpush.msra.mxu2 %v9085_v23  ;;  %1640 = vmatpush.msrb.mxu1 %v5939_v13  ;;  %v9108_v23 = vld [vmem:[#allocation15_spill] sm:$0xff] }
 0x31f   :  { %1599 = vmatpush.msrb.mxu3 %v9086_v16  ;;  %1621 = vmatpush.msra.mxu0 %v9087_v35 }
 0x320   :  { %1580 = vmatpush.msra.mxu2 %v9088_v22  ;;  %1641 = vmatpush.msrb.mxu1 %v5945_v34 }
 0x321   :  { %1600 = vmatpush.msrb.mxu3 %v9090_v32  ;;  %1622 = vmatpush.msra.mxu0 %v9091_v41  ;;  %v336_v41 = vpop.permute.xlu0 %335 }
 0x322   :  { %1647 = vmatpush.msrb.mxu2 %v9089_v63  ;;  %1642 = vmatpush.msrb.mxu1 %v5951_v3 }
 0x324   :  { %1648 = vmatpush.msrb.mxu2 %v9093_v31 }
 0x326   :  { %1649 = vmatpush.msrb.mxu2 %v9094_v30  ;;  %v9109_v30 = vld [vmem:[#allocation127_spill] sm:$0xff] }
 0x328   :  { %1650 = vmatpush.msrb.mxu2 %v9095_v2  ;;  %v379_v2 = vmul.f32 %v9109_v30, %v336_v41 }
 0x32a   :  { %1651 = vmatpush.msrb.mxu2 %v9096_v9  ;;  %v9110_v9 = vld [vmem:[#allocation149_spill] sm:$0xff] }
 0x32c   :  { %1652 = vmatpush.msrb.mxu2 %v9097_v5  ;;  %v380_v5 = vmul.f32 %v9110_v9, %v336_v41 }
 0x32e   :  { %1653 = vmatpush.msrb.mxu2 %v9098_v1 }
 0x330   :  { %1654 = vmatpush.msrb.mxu2 %v9099_v12  ;;  %v9111_v12 = vld [vmem:[#allocation136_spill] sm:$0xff] }
 0x332   :  { %1655 = vmatpush.msrb.mxu2 %v9100_v18  ;;  %v421_v18 = vadd.f32 %v9111_v12, %v379_v2 }
 0x334   :  { %1656 = vmatpush.msrb.mxu2 %v9101_v38 }
 0x336   :  { %1657 = vmatpush.msrb.mxu2 %v9102_v7  ;;  %v9112_v7 = vld [vmem:[#allocation160_spill] sm:$0xff] }
 0x338   :  { %1658 = vmatpush.msrb.mxu2 %v9103_v28  ;;  %v422_v28 = vadd.f32 %v9112_v7, %v380_v5 }
 0x33a   :  { %1659 = vmatpush.msrb.mxu2 %v9104_v26  ;;  %v1247_v22 = vpop.f32.mrf.mxu0  ;;  %v1267_v31 = vpop.f32.mrf.mxu1 }
 0x33b   :  { %v1248_v9 = vadd.f32 %v1247_v22, %v5031_v45  ;;  %v1268_v22 = vadd.f32 %v1267_v31, %v5043_v27 }
 0x33c   :  { %1660 = vmatpush.msrb.mxu2 %v9105_v46 }
 0x33e   :  { %1661 = vmatpush.msrb.mxu2 %v9106_v39 }
 0x33f   :  { %v1207_v17 = vpop.f32.mrf.mxu2  ;;  %v1227_v35 = vpop.f32.mrf.mxu3 }
 0x340   :  { %1662 = vmatpush.msrb.mxu2 %v9107_v57  ;;  %v1208_v16 = vadd.f32 %v1207_v17, %v9108_v23  ;;  %v381_v23 = vmul.f32 %v8791_v55, %v336_v41 }
 0x342   :  { %3075 = vst [vmem:[%s7861_s10 + $0x10] sm:$0xff] %v1208_v16  ;;  %v1228_v16 = vadd.f32 %v1227_v35, %v5033_v49  ;;  %v423_v12 = vadd.f32 %v8794_v14, %v381_v23 }
 0x344   :  { %v1329_v32 = vpop.f32.mrf.mxu0  ;;  %v1349_v39 = vpop.f32.mrf.mxu1 }
 0x345   :  { %v1373_v2 = vadd.f32 %v1329_v32, %v1248_v9 }
 0x349   :  { %v1309_v63 = vpop.f32.mrf.mxu3  ;;  %v1287_v40 = vpop.f32.mrf.mxu2 }
 0x34a   :  { %v1372_v30 = vadd.f32 %v1309_v63, %v1228_v16  ;;  %v1288_v32 = vadd.f32 %v1287_v40, %v5045_v33 }
 0x34c   :  { %v1376_v5 = vmul.f32 0.5, %v1372_v30 }
 0x35e   :  { %v1433_v38 = vpop.f32.mrf.mxu0  ;;  %v1453_v3 = vpop.f32.mrf.mxu1 }
 0x35f   :  { %v1477_v46 = vadd.f32 %v1433_v38, %v422_v28  ;;  %v1380_v28 = vmul.f32 0.5, %v1373_v2 }
 0x361   :  { %v1484_v57 = vmul.f32 0.5, %v1477_v46 }
 0x363   :  { %v1413_v1 = vpop.f32.mrf.mxu3 }
 0x364   :  { %v1476_v26 = vadd.f32 %v1413_v1, %v421_v18  ;;  %v1478_v18 = vadd.f32 %v1453_v3, %v423_v12  ;;  %v1374_v12 = vadd.f32 %v1349_v39, %v1268_v22 }
 0x366   :  { %v1480_v17 = vmul.f32 0.5, %v1476_v26  ;;  %v1369_v26 = vpop.f32.mrf.mxu2 }
 0x368   :  { %3172 = vtanh.f32 %v1480_v17  ;;  %v382_v17 = vmul.f32 %v8792_v54, %v336_v41 }
 0x369   :  { %3174 = vtanh.f32 %v1484_v57  ;;  %v1375_v57 = vadd.f32 %v1369_v26, %v1288_v32 }
 0x36a   :  { %3176 = vtanh.f32 %v1376_v5  ;;  %v424_v30 = vadd.f32 %v4729_v61, %v382_v17 }
 0x36b   :  { %3178 = vtanh.f32 %v1478_v18 }
 0x36c   :  { %3180 = vtanh.f32 %v1380_v28  ;;  %v1385_v28 = vmul.f32 0.5, %v1375_v57  ;;  %v6006_v57 = vld [vmem:[#allocation3 + $0x1e0] sm:$0xff] }
 0x36d   :  { %3182 = vtanh.f32 %v1374_v12 }
 0x36e   :  { %v3173_v1 = vpop.eup %3172 }
 0x36f   :  { %v3175_v38 = vpop.eup %3174  ;;  %v1482_v35 = vmul.f32 0.5, %v3173_v1 }
 0x370   :  { %v1486_v46 = vmul.f32 0.5, %v3175_v38  ;;  %v3177_v9 = vpop.eup %3176 }
 0x371   :  { %v1483_v63 = vadd.f32 0.5, %v1482_v35  ;;  %v3179_v3 = vpop.eup %3178  ;;  %v1378_v18 = vmul.f32 0.5, %v3177_v9 }
 0x372   :  { %v1487_v23 = vadd.f32 0.5, %v1486_v46  ;;  %v3181_v1 = vpop.eup %3180 }
 0x373   :  { %v1494_v2 = vmul.f32 %v3179_v3, %v1483_v63  ;;  %v1382_v31 = vmul.f32 0.5, %v3181_v1  ;;  %v1379_v40 = vadd.f32 0.5, %v1378_v18  ;;  %v3183_v39 = vpop.eup %3182  ;;  %v6015_v1 = vld [vmem:[#allocation7 + $0x1d8] sm:$0xff]  ;;  %v6018_v18 = vld [vmem:[#allocation3 + $0x1c0] sm:$0xff] }
 0x374   :  { %v1493_v41 = vmul.f32 %v1487_v23, %v5672_v37 }
 0x375   :  { %v1383_v46 = vadd.f32 0.5, %v1382_v31  ;;  %v1390_v17 = vmul.f32 %v3183_v39, %v1379_v40  ;;  %v6031_v40 = vld [vmem:[#allocation3 + $0x1a8] sm:$0xff] }
 0x376   :  { %v5986_v35 = vadd.f32 %v1494_v2, %v1493_v41  ;;  %v6012_v2 = vld [vmem:[#allocation3 + $0x1f0] sm:$0xff]  ;;  %v6021_v41 = vld [vmem:[#allocation3 + $0x1c8] sm:$0xff] }
 0x377   :  { %v1389_v22 = vmul.f32 %v1383_v46, %v5676_v50  ;;  %v6003_v50 = vld [vmem:[#allocation7 + $0x1f8] sm:$0xff]  ;;  %v6034_v46 = vld [vmem:[#allocation3 + $0x1b0] sm:$0xff] }
 0x379   :  { %v5990_v23 = vadd.f32 %v1390_v17, %v1389_v22  ;;  %v6046_v17 = vld [vmem:[#allocation3 + $0x190] sm:$0xff] }
 0x37a   :  { %v6061_v22 = vld [vmem:[#allocation3 + $0x170] sm:$0xff] }
 0x384   :  { %v1473_v16 = vpop.f32.mrf.mxu2 }
 0x385   :  { %v1479_v5 = vadd.f32 %v1473_v16, %v424_v30  ;;  %v1502_v30 = vpop.permute.xlu1 %1501  ;;  %v6009_v16 = vld [vmem:[#allocation3 + $0x1e8] sm:$0xff] }
 0x386   :  { %vm1503_vm11 = vcmp.eq.s32.totalorder %v1502_v30, 1  ;;  %v6078_v30 = vld [vmem:[#allocation3 + $0x128] sm:$0xff] }
 0x387   :  { %v1489_v38 = vmul.f32 0.5, %v1479_v5 }
 0x389   :  { %3184 = vtanh.f32 %v1489_v38  ;;  %v6024_v38 = vld [vmem:[#allocation3 + $0x1d0] sm:$0xff] }
 0x38a   :  { %3186 = vtanh.f32 %v1385_v28  ;;  %v6028_v28 = vld [vmem:[#allocation3 + $0x1a0] sm:$0xff] }
 0x38b   :  { %3188 = vtanh.f32 %v5986_v35 }
 0x38c   :  { %3190 = vtanh.f32 %v5990_v23 }
 0x38f   :  { %v3185_v26 = vpop.eup %3184 }
 0x390   :  { %v1491_v63 = vmul.f32 0.5, %v3185_v26  ;;  %v3187_v32 = vpop.eup %3186  ;;  %v6040_v26 = vld [vmem:[#allocation3 + $0x180] sm:$0xff] }
 0x391   :  { %v3189_v9 = vpop.eup %3188  ;;  %v1387_v12 = vmul.f32 0.5, %v3187_v32  ;;  %v6065_v32 = vld [vmem:[#allocation3 + $0x140] sm:$0xff] }
 0x392   :  { %v1492_v37 = vadd.f32 0.5, %v1491_v63  ;;  %v3191_v31 = vpop.eup %3190  ;;  %v6058_v63 = vld [vmem:[#allocation3 + $0x168] sm:$0xff] }
 0x393   :  { %v1388_v5 = vadd.f32 0.5, %v1387_v12  ;;  %v6085_v12 = vld [vmem:[#allocation3 + $0x100] sm:$0xff] }
 0x394   :  { %v5992_v3 = vmul.f32 %v3189_v9, %v1492_v37  ;;  %v6068_v37 = vld [vmem:[#allocation3 + $0x148] sm:$0xff]  ;;  %v6075_v9 = vld [vmem:[#allocation3 + $0x120] sm:$0xff] }
 0x395   :  { %v6037_v39 = vmul.f32 %v3191_v31, %v1388_v5  ;;  %v6088_v5 = vld [vmem:[#allocation3 + $0x108] sm:$0xff]  ;;  %v6095_v31 = vld [vmem:[#allocation3 + $0xe0] sm:$0xff] }
 0x396   :  { %3076 = vmatmul.msk.f32.vlgmr.msra.gmra.mxu3 %vm1503_vm11, %v5992_v3  ;;  %3077 = vmatmul.msk.f32.vlgmr.msrb.gmra.mxu0 %vm1503_vm11, %v5992_v3  ;;  %9115 = vst [vmem:[#allocation18_spill] sm:$0xff] %v6088_v5 }
 0x397   :  { %3078 = vmatmul.msk.f32.vlgmr.msra.gmra.mxu1 %vm1503_vm11, %v5992_v3  ;;  %3079 = vmatmul.msk.f32.vlgmr.msra.gmra.mxu2 %vm1503_vm11, %v5992_v3  ;;  %9113 = vst [vmem:[#allocation169_spill] sm:$0xff] %v6037_v39 }
 0x398   :  { %1667 = vmatpush.msra.mxu3 %v6003_v50  ;;  %1711 = vmatpush.msrb.mxu0 %v6006_v57 }
 0x399   :  { %1731 = vmatpush.msra.mxu1 %v6009_v16  ;;  %1751 = vmatpush.msra.mxu2 %v6012_v2 }
 0x39a   :  { %1668 = vmatpush.msra.mxu3 %v6015_v1  ;;  %1712 = vmatpush.msrb.mxu0 %v6018_v18 }
 0x39b   :  { %1732 = vmatpush.msra.mxu1 %v6021_v41  ;;  %1752 = vmatpush.msra.mxu2 %v6024_v38 }
 0x39c   :  { %1669 = vmatpush.msra.mxu3 %v5697_v59  ;;  %1713 = vmatpush.msrb.mxu0 %v6028_v28  ;;  %v6043_v59 = vld [vmem:[#allocation3 + $0x188] sm:$0xff] }
 0x39d   :  { %1733 = vmatpush.msra.mxu1 %v6031_v40  ;;  %1753 = vmatpush.msra.mxu2 %v6034_v46 }
 0x39e   :  { %1670 = vmatpush.msra.mxu3 %v5705_v42  ;;  %1714 = vmatpush.msrb.mxu0 %v6040_v26  ;;  %v6055_v42 = vld [vmem:[#allocation3 + $0x160] sm:$0xff] }
 0x39f   :  { %1734 = vmatpush.msra.mxu1 %v6043_v59  ;;  %1754 = vmatpush.msra.mxu2 %v6046_v17 }
 0x3a0   :  { %3080 = vmatmul.msk.f32.vlgmr.msrb.gmra.mxu3 %vm1503_vm11, %v5992_v3  ;;  %1623 = vmatmul.f32.vlgmr.msra.gmra.mxu0 %v6037_v39 }
 0x3a1   :  { %1643 = vmatmul.f32.vlgmr.msrb.gmra.mxu1 %v6037_v39  ;;  %1663 = vmatmul.f32.vlgmr.msrb.gmra.mxu2 %v6037_v39 }
 0x3a2   :  { %1671 = vmatpush.msra.mxu3 %v5716_v44  ;;  %1715 = vmatpush.msrb.mxu0 %v6055_v42  ;;  %v6071_v44 = vld [vmem:[#allocation3 + $0x150] sm:$0xff] }
 0x3a3   :  { %1735 = vmatpush.msra.mxu1 %v6058_v63  ;;  %1755 = vmatpush.msra.mxu2 %v6061_v22 }
 0x3a4   :  { %1672 = vmatpush.msra.mxu3 %v5722_v56  ;;  %1716 = vmatpush.msrb.mxu0 %v6065_v32  ;;  %v6081_v56 = vld [vmem:[#allocation3 + $0x130] sm:$0xff] }
 0x3a5   :  { %1736 = vmatpush.msra.mxu1 %v6068_v37  ;;  %1756 = vmatpush.msra.mxu2 %v6071_v44  ;;  %9114 = vst [vmem:[#allocation13_spill] sm:$0xff] %v6081_v56 }
 0x3a6   :  { %1673 = vmatpush.msra.mxu3 %v5728_v62  ;;  %1717 = vmatpush.msrb.mxu0 %v6075_v9  ;;  %v6091_v62 = vld [vmem:[#allocation3 + $0x110] sm:$0xff] }
 0x3a7   :  { %1737 = vmatpush.msra.mxu1 %v6078_v30  ;;  %1757 = vmatpush.msra.mxu2 %v6081_v56  ;;  %9116 = vst [vmem:[#allocation20_spill] sm:$0xff] %v6091_v62  ;;  %v6098_v56 = vld [vmem:[#allocation3 + $0xe8] sm:$0xff] }
 0x3a8   :  { %1674 = vmatpush.msra.mxu3 %v5734_v60  ;;  %1718 = vmatpush.msrb.mxu0 %v6085_v12  ;;  %9117 = vst [vmem:[#allocation14_spill] sm:$0xff] %v6098_v56  ;;  %v6101_v60 = vld [vmem:[#allocation3 + $0xf0] sm:$0xff] }
 0x3a9   :  { %1738 = vmatpush.msra.mxu1 %v6088_v5  ;;  %1758 = vmatpush.msra.mxu2 %v6091_v62  ;;  %9118 = vst [vmem:[#allocation21_spill] sm:$0xff] %v6101_v60  ;;  %v6105_v5 = vld [vmem:[#allocation3 + $0xc0] sm:$0xff]  ;;  %v6108_v62 = vld [vmem:[#allocation3 + $0xc8] sm:$0xff] }
 0x3aa   :  { %1675 = vmatpush.msra.mxu3 %v5740_v53  ;;  %1719 = vmatpush.msrb.mxu0 %v6095_v31  ;;  %9119 = vst [vmem:[#allocation23_spill] sm:$0xff] %v6108_v62  ;;  %v6111_v53 = vld [vmem:[#allocation3 + $0xd0] sm:$0xff] }
 0x3ab   :  { %1739 = vmatpush.msra.mxu1 %v6098_v56  ;;  %1759 = vmatpush.msra.mxu2 %v6101_v60  ;;  %9120 = vst [vmem:[#allocation16_spill] sm:$0xff] %v6111_v53  ;;  %v6115_v56 = vld [vmem:[#allocation3 + $0xa0] sm:$0xff]  ;;  %v6118_v60 = vld [vmem:[#allocation3 + $0xa8] sm:$0xff] }
 0x3ac   :  { %1676 = vmatpush.msra.mxu3 %v5746_v19  ;;  %1720 = vmatpush.msrb.mxu0 %v6105_v5  ;;  %9121 = vst [vmem:[#allocation19_spill] sm:$0xff] %v6118_v60  ;;  %v6121_v19 = vld [vmem:[#allocation3 + $0xb0] sm:$0xff] }
 0x3ad   :  { %1740 = vmatpush.msra.mxu1 %v6108_v62  ;;  %1760 = vmatpush.msra.mxu2 %v6111_v53  ;;  %9122 = vst [vmem:[#allocation37_spill] sm:$0xff] %v6121_v19  ;;  %v6125_v62 = vld [vmem:[#allocation3 + $0x80] sm:$0xff]  ;;  %v6128_v53 = vld [vmem:[#allocation3 + $0x88] sm:$0xff] }
 0x3ae   :  { %1677 = vmatpush.msra.mxu3 %v5752_v29  ;;  %1721 = vmatpush.msrb.mxu0 %v6115_v56  ;;  %9123 = vst [vmem:[#allocation101_spill] sm:$0xff] %v6128_v53  ;;  %v6131_v29 = vld [vmem:[#allocation3 + $0x90] sm:$0xff] }
 0x3af   :  { %1741 = vmatpush.msra.mxu1 %v6118_v60  ;;  %1761 = vmatpush.msra.mxu2 %v6121_v19  ;;  %9124 = vst [vmem:[#allocation39_spill] sm:$0xff] %v6131_v29  ;;  %v6135_v60 = vld [vmem:[#allocation3 + $0x60] sm:$0xff]  ;;  %v6138_v19 = vld [vmem:[#allocation3 + $0x68] sm:$0xff] }
 0x3b0   :  { %1678 = vmatpush.msra.mxu3 %v5758_v6  ;;  %1722 = vmatpush.msrb.mxu0 %v6125_v62  ;;  %9125 = vst [vmem:[#allocation22_spill] sm:$0xff] %v6138_v19  ;;  %v6141_v6 = vld [vmem:[#allocation3 + $0x70] sm:$0xff] }
 0x3b1   :  { %1742 = vmatpush.msra.mxu1 %v6128_v53  ;;  %1762 = vmatpush.msra.mxu2 %v6131_v29  ;;  %9126 = vst [vmem:[#allocation41_spill] sm:$0xff] %v6141_v6  ;;  %v6145_v53 = vld [vmem:[#allocation3 + $0x40] sm:$0xff]  ;;  %v6148_v29 = vld [vmem:[#allocation3 + $0x48] sm:$0xff] }
 0x3b2   :  { %1679 = vmatpush.msra.mxu3 %v5764_v4  ;;  %1723 = vmatpush.msrb.mxu0 %v6135_v60  ;;  %9127 = vst [vmem:[#allocation104_spill] sm:$0xff] %v6148_v29  ;;  %v6151_v4 = vld [vmem:[#allocation3 + $0x50] sm:$0xff] }
 0x3b3   :  { %1743 = vmatpush.msra.mxu1 %v6138_v19  ;;  %1763 = vmatpush.msra.mxu2 %v6141_v6  ;;  %9128 = vst [vmem:[#allocation43_spill] sm:$0xff] %v6151_v4  ;;  %v6155_v19 = vld [vmem:[#allocation3 + $0x20] sm:$0xff]  ;;  %v6158_v6 = vld [vmem:[#allocation3 + $0x28] sm:$0xff] }
 0x3b4   :  { %1680 = vmatpush.msra.mxu3 %v5770_v11  ;;  %1724 = vmatpush.msrb.mxu0 %v6145_v53  ;;  %9129 = vst [vmem:[#allocation24_spill] sm:$0xff] %v6155_v19  ;;  %v6161_v11 = vld [vmem:[#allocation3 + $0x30] sm:$0xff] }
 0x3b5   :  { %1744 = vmatpush.msra.mxu1 %v6148_v29  ;;  %1764 = vmatpush.msra.mxu2 %v6151_v4  ;;  %9130 = vst [vmem:[#allocation45_spill] sm:$0xff] %v6158_v6  ;;  %v6165_v29 = vld [vmem:[#allocation3] sm:$0xff]  ;;  %v6168_v4 = vld [vmem:[#allocation3 + $0x8] sm:$0xff] }
 0x3b6   :  { %1681 = vmatpush.msra.mxu3 %v5776_v10  ;;  %1725 = vmatpush.msrb.mxu0 %v6155_v19  ;;  %9131 = vst [vmem:[#allocation107_spill] sm:$0xff] %v6161_v11  ;;  %v6171_v10 = vld [vmem:[#allocation3 + $0x10] sm:$0xff] }
 0x3b7   :  { %1745 = vmatpush.msra.mxu1 %v6158_v6  ;;  %1765 = vmatpush.msra.mxu2 %v6161_v11  ;;  %9132 = vst [vmem:[#allocation47_spill] sm:$0xff] %v6165_v29  ;;  %v6193_v11 = vld [vmem:[#allocation5 + $0x230] sm:$0xff] }
 0x3b8   :  { %1682 = vmatpush.msra.mxu3 %v5782_v43  ;;  %1726 = vmatpush.msrb.mxu0 %v6165_v29  ;;  %9133 = vst [vmem:[#allocation25_spill] sm:$0xff] %v6168_v4  ;;  %v6178_v43 = vld [vmem:[#allocation3 + $0x1f8] sm:$0xff] }
 0x3b9   :  { %1746 = vmatpush.msra.mxu1 %v6168_v4  ;;  %9134 = vst [vmem:[#allocation49_spill] sm:$0xff] %v6171_v10  ;;  %1766 = vmatpush.msra.mxu2 %v6171_v10  ;;  %v6181_v29 = vld [vmem:[#allocation5 + $0x258] sm:$0xff]  ;;  %v6184_v4 = vld [vmem:[#allocation5 + $0x260] sm:$0xff]  ;;  %v6187_v10 = vld [vmem:[#allocation5 + $0x268] sm:$0xff] }
 0x3ba   :  { %1683 = vmatmul.f32.vlgmr.msra.gmra.mxu3 %v6037_v39  ;;  %1727 = vmatmul.f32.vlgmr.msrb.gmra.mxu0 %v5992_v3  ;;  %9135 = vst [vmem:[#allocation111_spill] sm:$0xff] %v6178_v43  ;;  %v6190_v39 = vld [vmem:[#allocation3 + $0x1d8] sm:$0xff] }
 0x3bb   :  { %1747 = vmatmul.f32.vlgmr.msra.gmra.mxu1 %v5992_v3  ;;  %1767 = vmatmul.f32.vlgmr.msra.gmra.mxu2 %v5992_v3  ;;  %9136 = vst [vmem:[#allocation26_spill] sm:$0xff] %v6181_v29 }
 0x3bc   :  { %1771 = vmatpush.msrb.mxu3 %v6178_v43  ;;  %1820 = vmatpush.msra.mxu0 %v6181_v29  ;;  %9137 = vst [vmem:[#allocation51_spill] sm:$0xff] %v6184_v4  ;;  %v6196_v43 = vld [vmem:[#allocation5 + $0x238] sm:$0xff]  ;;  %v6199_v29 = vld [vmem:[#allocation5 + $0x240] sm:$0xff] }
 0x3bd   :  { %1840 = vmatpush.msrb.mxu1 %v6184_v4  ;;  %9138 = vst [vmem:[#allocation53_spill] sm:$0xff] %v6187_v10  ;;  %1860 = vmatpush.msrb.mxu2 %v6187_v10  ;;  %v6202_v4 = vld [vmem:[#allocation3 + $0x1b8] sm:$0xff]  ;;  %v6205_v10 = vld [vmem:[#allocation5 + $0x208] sm:$0xff] }
 0x3be   :  { %9139 = vst [vmem:[#allocation115_spill] sm:$0xff] %v6190_v39  ;;  %1772 = vmatpush.msrb.mxu3 %v6190_v39  ;;  %1821 = vmatpush.msra.mxu0 %v6193_v11  ;;  %v6208_v39 = vld [vmem:[#allocation5 + $0x210] sm:$0xff] }
 0x3bf   :  { %9140 = vst [vmem:[#allocation27_spill] sm:$0xff] %v6193_v11  ;;  %1841 = vmatpush.msrb.mxu1 %v6196_v43  ;;  %1861 = vmatpush.msrb.mxu2 %v6199_v29  ;;  %v6211_v11 = vld [vmem:[#allocation5 + $0x218] sm:$0xff] }
 0x3c0   :  { %9141 = vst [vmem:[#allocation55_spill] sm:$0xff] %v6196_v43  ;;  %1773 = vmatpush.msrb.mxu3 %v6202_v4  ;;  %1822 = vmatpush.msra.mxu0 %v6205_v10  ;;  %v6214_v43 = vld [vmem:[#allocation3 + $0x198] sm:$0xff] }
 0x3c1   :  { %9142 = vst [vmem:[#allocation57_spill] sm:$0xff] %v6199_v29  ;;  %1842 = vmatpush.msrb.mxu1 %v6208_v39  ;;  %1862 = vmatpush.msrb.mxu2 %v6211_v11  ;;  %v6217_v29 = vld [vmem:[#allocation5 + $0x1e0] sm:$0xff] }
 0x3c2   :  { %9143 = vst [vmem:[#allocation119_spill] sm:$0xff] %v6202_v4  ;;  %1774 = vmatpush.msrb.mxu3 %v6214_v43  ;;  %1823 = vmatpush.msra.mxu0 %v6217_v29  ;;  %v6220_v4 = vld [vmem:[#allocation5 + $0x1e8] sm:$0xff] }
 0x3c3   :  { %9144 = vst [vmem:[#allocation59_spill] sm:$0xff] %v6205_v10  ;;  %1843 = vmatpush.msrb.mxu1 %v6220_v4  ;;  %v6223_v10 = vld [vmem:[#allocation5 + $0x1f0] sm:$0xff] }
 0x3c4   :  { %9145 = vst [vmem:[#allocation28_spill] sm:$0xff] %v6208_v39  ;;  %1863 = vmatpush.msrb.mxu2 %v6223_v10  ;;  %v6226_v39 = vld [vmem:[#allocation3 + $0x178] sm:$0xff] }
 0x3c5   :  { %9146 = vst [vmem:[#allocation61_spill] sm:$0xff] %v6211_v11  ;;  %1775 = vmatpush.msrb.mxu3 %v6226_v39  ;;  %v6229_v11 = vld [vmem:[#allocation5 + $0x1b8] sm:$0xff] }
 0x3c6   :  { %9147 = vst [vmem:[#allocation123_spill] sm:$0xff] %v6214_v43  ;;  %1824 = vmatpush.msra.mxu0 %v6229_v11  ;;  %v6232_v43 = vld [vmem:[#allocation5 + $0x1c0] sm:$0xff] }
 0x3c7   :  { %9148 = vst [vmem:[#allocation63_spill] sm:$0xff] %v6217_v29  ;;  %1844 = vmatpush.msrb.mxu1 %v6232_v43  ;;  %v6235_v29 = vld [vmem:[#allocation5 + $0x1c8] sm:$0xff] }
 0x3c8   :  { %9149 = vst [vmem:[#allocation29_spill] sm:$0xff] %v6220_v4  ;;  %1864 = vmatpush.msrb.mxu2 %v6235_v29  ;;  %v6238_v4 = vld [vmem:[#allocation3 + $0x158] sm:$0xff] }
 0x3c9   :  { %9150 = vst [vmem:[#allocation65_spill] sm:$0xff] %v6223_v10  ;;  %1776 = vmatpush.msrb.mxu3 %v6238_v4  ;;  %v6241_v10 = vld [vmem:[#allocation5 + $0x190] sm:$0xff] }
 0x3ca   :  { %9151 = vst [vmem:[#allocation30_spill] sm:$0xff] %v6226_v39  ;;  %1825 = vmatpush.msra.mxu0 %v6241_v10  ;;  %v6244_v39 = vld [vmem:[#allocation5 + $0x198] sm:$0xff] }
 0x3cb   :  { %9152 = vst [vmem:[#allocation67_spill] sm:$0xff] %v6229_v11  ;;  %1845 = vmatpush.msrb.mxu1 %v6244_v39  ;;  %v6247_v11 = vld [vmem:[#allocation5 + $0x1a0] sm:$0xff] }
 0x3cc   :  { %9153 = vst [vmem:[#allocation128_spill] sm:$0xff] %v6232_v43  ;;  %1865 = vmatpush.msrb.mxu2 %v6247_v11  ;;  %v6250_v43 = vld [vmem:[#allocation3 + $0x138] sm:$0xff] }
 0x3cd   :  { %9154 = vst [vmem:[#allocation69_spill] sm:$0xff] %v6235_v29  ;;  %1777 = vmatpush.msrb.mxu3 %v6250_v43  ;;  %v6253_v29 = vld [vmem:[#allocation5 + $0x168] sm:$0xff] }
 0x3ce   :  { %9155 = vst [vmem:[#allocation31_spill] sm:$0xff] %v6238_v4  ;;  %1826 = vmatpush.msra.mxu0 %v6253_v29  ;;  %v6256_v4 = vld [vmem:[#allocation5 + $0x170] sm:$0xff] }
 0x3cf   :  { %9156 = vst [vmem:[#allocation71_spill] sm:$0xff] %v6241_v10  ;;  %1846 = vmatpush.msrb.mxu1 %v6256_v4  ;;  %v6259_v10 = vld [vmem:[#allocation5 + $0x178] sm:$0xff] }
 0x3d0   :  { %9157 = vst [vmem:[#allocation132_spill] sm:$0xff] %v6244_v39  ;;  %1866 = vmatpush.msrb.mxu2 %v6259_v10  ;;  %v6262_v39 = vld [vmem:[#allocation3 + $0x118] sm:$0xff] }
 0x3d1   :  { %9158 = vst [vmem:[#allocation73_spill] sm:$0xff] %v6247_v11  ;;  %1778 = vmatpush.msrb.mxu3 %v6262_v39  ;;  %v6265_v11 = vld [vmem:[#allocation5 + $0x140] sm:$0xff] }
 0x3d2   :  { %9159 = vst [vmem:[#allocation137_spill] sm:$0xff] %v6250_v43  ;;  %1827 = vmatpush.msra.mxu0 %v6265_v11  ;;  %v6268_v43 = vld [vmem:[#allocation5 + $0x148] sm:$0xff] }
 0x3d3   :  { %9160 = vst [vmem:[#allocation75_spill] sm:$0xff] %v6253_v29  ;;  %1847 = vmatpush.msrb.mxu1 %v6268_v43  ;;  %v6271_v29 = vld [vmem:[#allocation5 + $0x150] sm:$0xff] }
 0x3d4   :  { %9161 = vst [vmem:[#allocation32_spill] sm:$0xff] %v6256_v4  ;;  %1867 = vmatpush.msrb.mxu2 %v6271_v29  ;;  %v6274_v4 = vld [vmem:[#allocation3 + $0xf8] sm:$0xff] }
 0x3d5   :  { %9162 = vst [vmem:[#allocation77_spill] sm:$0xff] %v6259_v10  ;;  %1779 = vmatpush.msrb.mxu3 %v6274_v4  ;;  %v6277_v10 = vld [vmem:[#allocation5 + $0x118] sm:$0xff] }
 0x3d6   :  { %9163 = vst [vmem:[#allocation141_spill] sm:$0xff] %v6262_v39  ;;  %1828 = vmatpush.msra.mxu0 %v6277_v10  ;;  %v6280_v39 = vld [vmem:[#allocation5 + $0x120] sm:$0xff] }
 0x3d7   :  { %9164 = vst [vmem:[#allocation79_spill] sm:$0xff] %v6265_v11  ;;  %1848 = vmatpush.msrb.mxu1 %v6280_v39  ;;  %v6283_v11 = vld [vmem:[#allocation5 + $0x128] sm:$0xff] }
 0x3d8   :  { %9165 = vst [vmem:[#allocation33_spill] sm:$0xff] %v6268_v43  ;;  %1868 = vmatpush.msrb.mxu2 %v6283_v11  ;;  %v6286_v43 = vld [vmem:[#allocation3 + $0xd8] sm:$0xff] }
 0x3d9   :  { %9166 = vst [vmem:[#allocation34_spill] sm:$0xff] %v6271_v29  ;;  %1780 = vmatpush.msrb.mxu3 %v6286_v43  ;;  %v6289_v29 = vld [vmem:[#allocation5 + $0xf0] sm:$0xff] }
 0x3da   :  { %9167 = vst [vmem:[#allocation145_spill] sm:$0xff] %v6274_v4  ;;  %1829 = vmatpush.msra.mxu0 %v6289_v29  ;;  %v6292_v4 = vld [vmem:[#allocation5 + $0xf8] sm:$0xff] }
 0x3db   :  { %9168 = vst [vmem:[#allocation81_spill] sm:$0xff] %v6277_v10  ;;  %1849 = vmatpush.msrb.mxu1 %v6292_v4  ;;  %v6295_v10 = vld [vmem:[#allocation5 + $0x100] sm:$0xff] }
 0x3dc   :  { %9169 = vst [vmem:[#allocation83_spill] sm:$0xff] %v6280_v39  ;;  %1869 = vmatpush.msrb.mxu2 %v6295_v10  ;;  %v6298_v39 = vld [vmem:[#allocation3 + $0xb8] sm:$0xff] }
 0x3dd   :  { %9170 = vst [vmem:[#allocation85_spill] sm:$0xff] %v6283_v11  ;;  %1781 = vmatpush.msrb.mxu3 %v6298_v39  ;;  %v6301_v11 = vld [vmem:[#allocation5 + $0xc8] sm:$0xff] }
 0x3de   :  { %9171 = vst [vmem:[#allocation150_spill] sm:$0xff] %v6286_v43  ;;  %1830 = vmatpush.msra.mxu0 %v6301_v11  ;;  %v6304_v43 = vld [vmem:[#allocation5 + $0xd0] sm:$0xff] }
 0x3df   :  { %9172 = vst [vmem:[#allocation35_spill] sm:$0xff] %v6289_v29  ;;  %1850 = vmatpush.msrb.mxu1 %v6304_v43  ;;  %v6307_v29 = vld [vmem:[#allocation5 + $0xd8] sm:$0xff] }
 0x3e0   :  { %9173 = vst [vmem:[#allocation36_spill] sm:$0xff] %v6292_v4  ;;  %1870 = vmatpush.msrb.mxu2 %v6307_v29  ;;  %v6310_v4 = vld [vmem:[#allocation3 + $0x98] sm:$0xff] }
 0x3e1   :  { %9174 = vst [vmem:[#allocation89_spill] sm:$0xff] %v6295_v10  ;;  %1782 = vmatpush.msrb.mxu3 %v6310_v4  ;;  %v6313_v10 = vld [vmem:[#allocation5 + $0xa0] sm:$0xff] }
 0x3e2   :  { %9175 = vst [vmem:[#allocation155_spill] sm:$0xff] %v6298_v39  ;;  %1831 = vmatpush.msra.mxu0 %v6313_v10  ;;  %v6316_v39 = vld [vmem:[#allocation5 + $0xa8] sm:$0xff] }
 0x3e3   :  { %9176 = vst [vmem:[#allocation87_spill] sm:$0xff] %v6301_v11  ;;  %1851 = vmatpush.msrb.mxu1 %v6316_v39  ;;  %v6319_v11 = vld [vmem:[#allocation5 + $0xb0] sm:$0xff] }
 0x3e4   :  { %9177 = vst [vmem:[#allocation91_spill] sm:$0xff] %v6304_v43  ;;  %1871 = vmatpush.msrb.mxu2 %v6319_v11  ;;  %v6322_v43 = vld [vmem:[#allocation3 + $0x78] sm:$0xff] }
 0x3e5   :  { %9178 = vst [vmem:[#allocation93_spill] sm:$0xff] %v6307_v29  ;;  %1783 = vmatpush.msrb.mxu3 %v6322_v43  ;;  %v6325_v29 = vld [vmem:[#allocation5 + $0x78] sm:$0xff] }
 0x3e6   :  { %9179 = vst [vmem:[#allocation38_spill] sm:$0xff] %v6310_v4  ;;  %1832 = vmatpush.msra.mxu0 %v6325_v29  ;;  %v6328_v4 = vld [vmem:[#allocation5 + $0x80] sm:$0xff] }
 0x3e7   :  { %9180 = vst [vmem:[#allocation161_spill] sm:$0xff] %v6313_v10  ;;  %1852 = vmatpush.msrb.mxu1 %v6328_v4  ;;  %v6331_v10 = vld [vmem:[#allocation5 + $0x88] sm:$0xff] }
 0x3e8   :  { %9181 = vst [vmem:[#allocation95_spill] sm:$0xff] %v6316_v39  ;;  %1872 = vmatpush.msrb.mxu2 %v6331_v10  ;;  %v6334_v39 = vld [vmem:[#allocation3 + $0x58] sm:$0xff] }
 0x3e9   :  { %9182 = vst [vmem:[#allocation97_spill] sm:$0xff] %v6319_v11  ;;  %1784 = vmatpush.msrb.mxu3 %v6334_v39  ;;  %v6337_v11 = vld [vmem:[#allocation5 + $0x50] sm:$0xff] }
 0x3ea   :  { %9183 = vst [vmem:[#allocation42_spill] sm:$0xff] %v6322_v43  ;;  %1833 = vmatpush.msra.mxu0 %v6337_v11  ;;  %v6340_v43 = vld [vmem:[#allocation5 + $0x58] sm:$0xff] }
 0x3eb   :  { %9184 = vst [vmem:[#allocation166_spill] sm:$0xff] %v6325_v29  ;;  %1853 = vmatpush.msrb.mxu1 %v6340_v43  ;;  %v6343_v29 = vld [vmem:[#allocation5 + $0x60] sm:$0xff] }
 0x3ec   :  { %9185 = vst [vmem:[#allocation40_spill] sm:$0xff] %v6328_v4  ;;  %1873 = vmatpush.msrb.mxu2 %v6343_v29  ;;  %v6346_v4 = vld [vmem:[#allocation3 + $0x38] sm:$0xff] }
 0x3ed   :  { %9186 = vst [vmem:[#allocation46_spill] sm:$0xff] %v6331_v10  ;;  %1785 = vmatpush.msrb.mxu3 %v6346_v4  ;;  %v6349_v10 = vld [vmem:[#allocation5 + $0x28] sm:$0xff] }
 0x3ee   :  { %9187 = vst [vmem:[#allocation50_spill] sm:$0xff] %v6334_v39  ;;  %1834 = vmatpush.msra.mxu0 %v6349_v10  ;;  %v6352_v39 = vld [vmem:[#allocation5 + $0x30] sm:$0xff] }
 0x3ef   :  { %9188 = vst [vmem:[#allocation103_spill] sm:$0xff] %v6337_v11  ;;  %1854 = vmatpush.msrb.mxu1 %v6352_v39  ;;  %v6355_v11 = vld [vmem:[#allocation5 + $0x38] sm:$0xff] }
 0x3f0   :  { %9189 = vst [vmem:[#allocation54_spill] sm:$0xff] %v6340_v43  ;;  %1874 = vmatpush.msrb.mxu2 %v6355_v11  ;;  %v6358_v43 = vld [vmem:[#allocation3 + $0x18] sm:$0xff] }
 0x3f1   :  { %9190 = vst [vmem:[#allocation99_spill] sm:$0xff] %v6343_v29  ;;  %1786 = vmatpush.msrb.mxu3 %v6358_v43  ;;  %v6361_v29 = vld [vmem:[#allocation5] sm:$0xff] }
 0x3f2   :  { %9191 = vst [vmem:[#allocation106_spill] sm:$0xff] %v6346_v4  ;;  %1835 = vmatpush.msra.mxu0 %v6361_v29  ;;  %1787 = vmatmul.f32.vlgmr.msrb.gmra.mxu3 %v5992_v3  ;;  %v6365_v4 = vld [vmem:[#allocation5 + $0x8] sm:$0xff] }
 0x3f3   :  { %9192 = vst [vmem:[#allocation48_spill] sm:$0xff] %v6349_v10  ;;  %1855 = vmatpush.msrb.mxu1 %v6365_v4  ;;  %v6368_v10 = vld [vmem:[#allocation5 + $0x270] sm:$0xff]  ;;  %v6380_v3 = vld [vmem:[#allocation5 + $0x248] sm:$0xff] }
 0x3f4   :  { %9193 = vst [vmem:[#allocation109_spill] sm:$0xff] %v6352_v39  ;;  %1880 = vmatpush.msra.mxu3 %v6368_v10  ;;  %v6371_v39 = vld [vmem:[#allocation5 + $0x10] sm:$0xff] }
 0x3f5   :  { %9194 = vst [vmem:[#allocation44_spill] sm:$0xff] %v6355_v11  ;;  %1875 = vmatpush.msrb.mxu2 %v6371_v39  ;;  %v6374_v11 = vld [vmem:[#allocation5 + $0x278] sm:$0xff] }
 0x3f6   :  { %9195 = vst [vmem:[#allocation62_spill] sm:$0xff] %v6358_v43  ;;  %1900 = vmatpush.msrb.mxu0 %v6374_v11  ;;  %v6377_v43 = vld [vmem:[#allocation7 + $0x1e0] sm:$0xff]  ;;  %1881 = vmatpush.msra.mxu3 %v6380_v3 }
 0x3f7   :  { %9196 = vst [vmem:[#allocation113_spill] sm:$0xff] %v6361_v29  ;;  %1922 = vmatpush.msra.mxu1 %v6377_v43  ;;  %1942 = vmatpush.msra.mxu2 %v5861_v47  ;;  %v6400_v47 = vld [vmem:[#allocation5 + $0x1f8] sm:$0xff] }
 0x3f8   :  { %9197 = vst [vmem:[#allocation58_spill] sm:$0xff] %v6365_v4  ;;  %v6384_v4 = vld [vmem:[#allocation5 + $0x250] sm:$0xff] }
 0x3f9   :  { %9198 = vst [vmem:[#allocation66_spill] sm:$0xff] %v6368_v10  ;;  %1901 = vmatpush.msrb.mxu0 %v6384_v4  ;;  %v6387_v10 = vld [vmem:[#allocation7 + $0x1c0] sm:$0xff]  ;;  %1943 = vmatpush.msra.mxu2 %v5867_v0  ;;  %v6410_v0 = vld [vmem:[#allocation5 + $0x1d0] sm:$0xff] }
 0x3fa   :  { %9199 = vst [vmem:[#allocation117_spill] sm:$0xff] %v6371_v39  ;;  %1923 = vmatpush.msra.mxu1 %v6387_v10  ;;  %v6390_v39 = vld [vmem:[#allocation5 + $0x220] sm:$0xff] }
 0x3fb   :  { %9200 = vst [vmem:[#allocation52_spill] sm:$0xff] %v6374_v11  ;;  %1882 = vmatpush.msra.mxu3 %v6390_v39  ;;  %1944 = vmatpush.msra.mxu2 %v5873_v8  ;;  %v6420_v8 = vld [vmem:[#allocation5 + $0x1a8] sm:$0xff] }
 0x3fc   :  { %9201 = vst [vmem:[#allocation60_spill] sm:$0xff] %v6377_v43  ;;  %v6394_v43 = vld [vmem:[#allocation5 + $0x228] sm:$0xff] }
 0x3fd   :  { %9202 = vst [vmem:[#allocation121_spill] sm:$0xff] %v6380_v3  ;;  %1902 = vmatpush.msrb.mxu0 %v6394_v43  ;;  %v6397_v3 = vld [vmem:[#allocation7 + $0x1a0] sm:$0xff]  ;;  %1883 = vmatpush.msra.mxu3 %v6400_v47 }
 0x3fe   :  { %9203 = vst [vmem:[#allocation56_spill] sm:$0xff] %v6384_v4  ;;  %1924 = vmatpush.msra.mxu1 %v6397_v3  ;;  %1945 = vmatpush.msra.mxu2 %v5879_v52  ;;  %v6430_v52 = vld [vmem:[#allocation5 + $0x180] sm:$0xff] }
 0x3ff   :  { %9204 = vst [vmem:[#allocation74_spill] sm:$0xff] %v6387_v10  ;;  %v6404_v10 = vld [vmem:[#allocation5 + $0x200] sm:$0xff]  ;;  %1884 = vmatpush.msra.mxu3 %v6410_v0 }
 0x400   :  { %9205 = vst [vmem:[#allocation70_spill] sm:$0xff] %v6390_v39  ;;  %1903 = vmatpush.msrb.mxu0 %v6404_v10  ;;  %v6407_v39 = vld [vmem:[#allocation7 + $0x180] sm:$0xff]  ;;  %1946 = vmatpush.msra.mxu2 %v5885_v36  ;;  %v6440_v36 = vld [vmem:[#allocation5 + $0x158] sm:$0xff] }
 0x401   :  { %9206 = vst [vmem:[#allocation68_spill] sm:$0xff] %v6394_v43  ;;  %1925 = vmatpush.msra.mxu1 %v6407_v39  ;;  %1885 = vmatpush.msra.mxu3 %v6420_v8 }
 0x402   :  { %9207 = vst [vmem:[#allocation64_spill] sm:$0xff] %v6397_v3  ;;  %v6414_v3 = vld [vmem:[#allocation5 + $0x1d8] sm:$0xff]  ;;  %1947 = vmatpush.msra.mxu2 %v5891_v58  ;;  %v6450_v58 = vld [vmem:[#allocation5 + $0x130] sm:$0xff] }
 0x403   :  { %9208 = vst [vmem:[#allocation130_spill] sm:$0xff] %v6400_v47  ;;  %1904 = vmatpush.msrb.mxu0 %v6414_v3  ;;  %v6417_v47 = vld [vmem:[#allocation7 + $0x160] sm:$0xff]  ;;  %1886 = vmatpush.msra.mxu3 %v6430_v52 }
 0x404   :  { %9209 = vst [vmem:[#allocation72_spill] sm:$0xff] %v6404_v10  ;;  %1926 = vmatpush.msra.mxu1 %v6417_v47  ;;  %1948 = vmatpush.msra.mxu2 %v5897_v51  ;;  %v6460_v51 = vld [vmem:[#allocation5 + $0x108] sm:$0xff] }
 0x405   :  { %9210 = vst [vmem:[#allocation125_spill] sm:$0xff] %v6407_v39  ;;  %v6424_v39 = vld [vmem:[#allocation5 + $0x1b0] sm:$0xff]  ;;  %1887 = vmatpush.msra.mxu3 %v6440_v36 }
 0x406   :  { %9211 = vst [vmem:[#allocation134_spill] sm:$0xff] %v6410_v0  ;;  %1905 = vmatpush.msrb.mxu0 %v6424_v39  ;;  %v6427_v0 = vld [vmem:[#allocation7 + $0x140] sm:$0xff]  ;;  %1949 = vmatpush.msra.mxu2 %v5903_v15 }
 0x407   :  { %9212 = vst [vmem:[#allocation76_spill] sm:$0xff] %v6414_v3  ;;  %1927 = vmatpush.msra.mxu1 %v6427_v0  ;;  %1888 = vmatpush.msra.mxu3 %v6450_v58  ;;  %v6470_v15 = vld [vmem:[#allocation5 + $0xe0] sm:$0xff] }
 0x408   :  { %9213 = vst [vmem:[#allocation78_spill] sm:$0xff] %v6417_v47  ;;  %v6434_v47 = vld [vmem:[#allocation5 + $0x188] sm:$0xff]  ;;  %1950 = vmatpush.msra.mxu2 %v5909_v24  ;;  %v6480_v24 = vld [vmem:[#allocation5 + $0xb8] sm:$0xff] }
 0x409   :  { %9214 = vst [vmem:[#allocation139_spill] sm:$0xff] %v6420_v8  ;;  %1906 = vmatpush.msrb.mxu0 %v6434_v47  ;;  %v6437_v8 = vld [vmem:[#allocation7 + $0x120] sm:$0xff]  ;;  %1889 = vmatpush.msra.mxu3 %v6460_v51 }
 0x40a   :  { %9215 = vst [vmem:[#allocation80_spill] sm:$0xff] %v6424_v39  ;;  %1928 = vmatpush.msra.mxu1 %v6437_v8  ;;  %1951 = vmatpush.msra.mxu2 %v5915_v48  ;;  %v6490_v48 = vld [vmem:[#allocation5 + $0x90] sm:$0xff]  ;;  %v9267_v39 = vld [vmem:[#allocation136_spill] sm:$0xff] }
 0x40b   :  { %9216 = vst [vmem:[#allocation82_spill] sm:$0xff] %v6427_v0  ;;  %v6444_v0 = vld [vmem:[#allocation5 + $0x160] sm:$0xff]  ;;  %1890 = vmatpush.msra.mxu3 %v6470_v15 }
 0x40c   :  { %9217 = vst [vmem:[#allocation143_spill] sm:$0xff] %v6430_v52  ;;  %1907 = vmatpush.msrb.mxu0 %v6444_v0  ;;  %v6447_v52 = vld [vmem:[#allocation7 + $0x100] sm:$0xff]  ;;  %1952 = vmatpush.msra.mxu2 %v5921_v25  ;;  %v6500_v25 = vld [vmem:[#allocation5 + $0x68] sm:$0xff] }
 0x40d   :  { %9218 = vst [vmem:[#allocation84_spill] sm:$0xff] %v6434_v47  ;;  %1929 = vmatpush.msra.mxu1 %v6447_v52  ;;  %1891 = vmatpush.msra.mxu3 %v6480_v24 }
 0x40e   :  { %9219 = vst [vmem:[#allocation86_spill] sm:$0xff] %v6437_v8  ;;  %v6454_v8 = vld [vmem:[#allocation5 + $0x138] sm:$0xff]  ;;  %1953 = vmatpush.msra.mxu2 %v5927_v21  ;;  %v6510_v21 = vld [vmem:[#allocation5 + $0x40] sm:$0xff] }
 0x40f   :  { %9220 = vst [vmem:[#allocation147_spill] sm:$0xff] %v6440_v36  ;;  %1908 = vmatpush.msrb.mxu0 %v6454_v8  ;;  %v6457_v36 = vld [vmem:[#allocation7 + $0xe0] sm:$0xff]  ;;  %1892 = vmatpush.msra.mxu3 %v6490_v48 }
 0x410   :  { %9221 = vst [vmem:[#allocation88_spill] sm:$0xff] %v6444_v0  ;;  %1930 = vmatpush.msra.mxu1 %v6457_v36  ;;  %1954 = vmatpush.msra.mxu2 %v5933_v20  ;;  %v6520_v20 = vld [vmem:[#allocation5 + $0x18] sm:$0xff] }
 0x411   :  { %9222 = vst [vmem:[#allocation90_spill] sm:$0xff] %v6447_v52  ;;  %v6464_v52 = vld [vmem:[#allocation5 + $0x110] sm:$0xff]  ;;  %1893 = vmatpush.msra.mxu3 %v6500_v25 }
 0x412   :  { %9223 = vst [vmem:[#allocation102_spill] sm:$0xff] %v6450_v58  ;;  %1909 = vmatpush.msrb.mxu0 %v6464_v52  ;;  %v6467_v58 = vld [vmem:[#allocation7 + $0xc0] sm:$0xff]  ;;  %1955 = vmatpush.msra.mxu2 %v5939_v13 }
 0x413   :  { %9224 = vst [vmem:[#allocation152_spill] sm:$0xff] %v6454_v8  ;;  %1931 = vmatpush.msra.mxu1 %v6467_v58  ;;  %1894 = vmatpush.msra.mxu3 %v6510_v21  ;;  %v6530_v13 = vld [vmem:[#allocation7] sm:$0xff] }
 0x414   :  { %9225 = vst [vmem:[#allocation94_spill] sm:$0xff] %v6457_v36  ;;  %v6474_v36 = vld [vmem:[#allocation5 + $0xe8] sm:$0xff]  ;;  %1956 = vmatpush.msra.mxu2 %v5945_v34  ;;  %v6540_v34 = vld [vmem:[#allocation7 + $0x190] sm:$0xff] }
 0x415   :  { %9226 = vst [vmem:[#allocation105_spill] sm:$0xff] %v6460_v51  ;;  %1910 = vmatpush.msrb.mxu0 %v6474_v36  ;;  %v6477_v51 = vld [vmem:[#allocation7 + $0xa0] sm:$0xff]  ;;  %1895 = vmatpush.msra.mxu3 %v6520_v20 }
 0x416   :  { %9227 = vst [vmem:[#allocation157_spill] sm:$0xff] %v6464_v52  ;;  %1932 = vmatpush.msra.mxu1 %v6477_v51  ;;  %v9265_v52 = vld [vmem:[#allocation127_spill] sm:$0xff] }
 0x417   :  { %9228 = vst [vmem:[#allocation98_spill] sm:$0xff] %v6467_v58  ;;  %v6484_v58 = vld [vmem:[#allocation5 + $0xc0] sm:$0xff] }
 0x418   :  { %9229 = vst [vmem:[#allocation108_spill] sm:$0xff] %v6470_v15  ;;  %1911 = vmatpush.msrb.mxu0 %v6484_v58  ;;  %v6487_v15 = vld [vmem:[#allocation7 + $0x80] sm:$0xff] }
 0x419   :  { %9230 = vst [vmem:[#allocation163_spill] sm:$0xff] %v6474_v36  ;;  %1933 = vmatpush.msra.mxu1 %v6487_v15  ;;  %v341_v36 = vpop.permute.xlu2 %340 }
 0x41a   :  { %9231 = vst [vmem:[#allocation92_spill] sm:$0xff] %v6477_v51  ;;  %v6494_v51 = vld [vmem:[#allocation5 + $0x98] sm:$0xff]  ;;  %v383_v8 = vmul.f32 %v9265_v52, %v341_v36  ;;  %v385_v11 = vmul.f32 %v8791_v55, %v341_v36 }
 0x41b   :  { %9232 = vst [vmem:[#allocation112_spill] sm:$0xff] %v6480_v24  ;;  %1912 = vmatpush.msrb.mxu0 %v6494_v51  ;;  %v6497_v24 = vld [vmem:[#allocation7 + $0x60] sm:$0xff] }
 0x41c   :  { %9233 = vst [vmem:[#allocation168_spill] sm:$0xff] %v6484_v58  ;;  %1934 = vmatpush.msra.mxu1 %v6497_v24  ;;  %v425_v3 = vadd.f32 %v9267_v39, %v383_v8  ;;  %v427_v39 = vadd.f32 %v8794_v14, %v385_v11 }
 0x41d   :  { %9234 = vst [vmem:[#allocation96_spill] sm:$0xff] %v6487_v15  ;;  %v6504_v15 = vld [vmem:[#allocation5 + $0x70] sm:$0xff] }
 0x41e   :  { %9235 = vst [vmem:[#allocation120_spill] sm:$0xff] %v6490_v48  ;;  %1913 = vmatpush.msrb.mxu0 %v6504_v15  ;;  %v6507_v48 = vld [vmem:[#allocation7 + $0x40] sm:$0xff] }
 0x41f   :  { %9236 = vst [vmem:[#allocation124_spill] sm:$0xff] %v6494_v51  ;;  %1935 = vmatpush.msra.mxu1 %v6507_v48 }
 0x420   :  { %9237 = vst [vmem:[#allocation100_spill] sm:$0xff] %v6497_v24  ;;  %v6514_v24 = vld [vmem:[#allocation5 + $0x48] sm:$0xff] }
 0x421   :  { %9238 = vst [vmem:[#allocation133_spill] sm:$0xff] %v6500_v25  ;;  %1914 = vmatpush.msrb.mxu0 %v6514_v24  ;;  %v6517_v25 = vld [vmem:[#allocation7 + $0x20] sm:$0xff] }
 0x422   :  { %9239 = vst [vmem:[#allocation142_spill] sm:$0xff] %v6504_v15  ;;  %1936 = vmatpush.msra.mxu1 %v6517_v25 }
 0x423   :  { %9240 = vst [vmem:[#allocation116_spill] sm:$0xff] %v6507_v48  ;;  %v6524_v48 = vld [vmem:[#allocation7 + $0x1f0] sm:$0xff] }
 0x424   :  { %9241 = vst [vmem:[#allocation146_spill] sm:$0xff] %v6510_v21  ;;  %1962 = vmatpush.msrb.mxu3 %v6524_v48  ;;  %v6527_v21 = vld [vmem:[#allocation5 + $0x20] sm:$0xff]  ;;  %1937 = vmatpush.msra.mxu1 %v6530_v13 }
 0x425   :  { %9242 = vst [vmem:[#allocation156_spill] sm:$0xff] %v6514_v24  ;;  %1915 = vmatpush.msrb.mxu0 %v6527_v21  ;;  %v9248_v24 = vld [vmem:[#allocation164_spill] sm:$0xff] }
 0x426   :  { %9243 = vst [vmem:[#allocation129_spill] sm:$0xff] %v6517_v25  ;;  %1957 = vmatpush.msra.mxu2 %v9248_v24  ;;  %v6534_v25 = vld [vmem:[#allocation7 + $0x1d0] sm:$0xff] }
 0x427   :  { %9244 = vst [vmem:[#allocation138_spill] sm:$0xff] %v6520_v20  ;;  %1963 = vmatpush.msrb.mxu3 %v6534_v25  ;;  %v6537_v20 = vld [vmem:[#allocation7 + $0x1b0] sm:$0xff] }
 0x428   :  { %9245 = vst [vmem:[#allocation162_spill] sm:$0xff] %v6524_v48  ;;  %v6543_v48 = vld [vmem:[#allocation7 + $0x170] sm:$0xff] }
 0x429   :  { %9246 = vst [vmem:[#allocation154_spill] sm:$0xff] %v6527_v21  ;;  %1964 = vmatpush.msrb.mxu3 %v6537_v20  ;;  %v6546_v21 = vld [vmem:[#allocation7 + $0x150] sm:$0xff] }
 0x42a   :  { %9247 = vst [vmem:[#allocation151_spill] sm:$0xff] %v6530_v13  ;;  %v6549_v24 = vld [vmem:[#allocation7 + $0x130] sm:$0xff] }
 0x42b   :  { %9249 = vst [vmem:[#allocation167_spill] sm:$0xff] %v6534_v25  ;;  %1965 = vmatpush.msrb.mxu3 %v6540_v34  ;;  %v6552_v25 = vld [vmem:[#allocation7 + $0x110] sm:$0xff] }
 0x42c   :  { %9250 = vst [vmem:[#allocation158_spill] sm:$0xff] %v6537_v20  ;;  %v6555_v20 = vld [vmem:[#allocation7 + $0xf0] sm:$0xff] }
 0x42d   :  { %9251 = vst [vmem:[#allocation165_spill] sm:$0xff] %v6540_v34  ;;  %1966 = vmatpush.msrb.mxu3 %v6543_v48  ;;  %v6558_v34 = vld [vmem:[#allocation7 + $0xd0] sm:$0xff] }
 0x42e   :  { %9252 = vst [vmem:[#allocation110_spill] sm:$0xff] %v6543_v48  ;;  %v6561_v48 = vld [vmem:[#allocation7 + $0xb0] sm:$0xff] }
 0x42f   :  { %9253 = vst [vmem:[#allocation114_spill] sm:$0xff] %v6546_v21  ;;  %1967 = vmatpush.msrb.mxu3 %v6546_v21  ;;  %v6564_v21 = vld [vmem:[#allocation7 + $0x90] sm:$0xff] }
 0x430   :  { %9254 = vst [vmem:[#allocation118_spill] sm:$0xff] %v6549_v24  ;;  %v6576_v13 = vld [vmem:[#allocation7 + $0x10] sm:$0xff] }
 0x431   :  { %1968 = vmatpush.msrb.mxu3 %v6549_v24  ;;  %9255 = vst [vmem:[#allocation122_spill] sm:$0xff] %v6552_v25  ;;  %v6567_v24 = vld [vmem:[#allocation7 + $0x70] sm:$0xff] }
 0x432   :  { %9256 = vst [vmem:[#allocation126_spill] sm:$0xff] %v6555_v20 }
 0x433   :  { %1969 = vmatpush.msrb.mxu3 %v6552_v25  ;;  %9257 = vst [vmem:[#allocation131_spill] sm:$0xff] %v6558_v34  ;;  %v6570_v25 = vld [vmem:[#allocation7 + $0x50] sm:$0xff] }
 0x434   :  { %9258 = vst [vmem:[#allocation135_spill] sm:$0xff] %v6561_v48 }
 0x435   :  { %1970 = vmatpush.msrb.mxu3 %v6555_v20  ;;  %9259 = vst [vmem:[#allocation140_spill] sm:$0xff] %v6564_v21  ;;  %v6573_v20 = vld [vmem:[#allocation7 + $0x30] sm:$0xff] }
 0x436   :  { %9260 = vst [vmem:[#allocation144_spill] sm:$0xff] %v6567_v24 }
 0x437   :  { %1971 = vmatpush.msrb.mxu3 %v6558_v34  ;;  %9261 = vst [vmem:[#allocation148_spill] sm:$0xff] %v6570_v25  ;;  %v1522_v34 = vpop.f32.mrf.mxu3 }
 0x438   :  { %9262 = vst [vmem:[#allocation153_spill] sm:$0xff] %v6573_v20 }
 0x439   :  { %1972 = vmatpush.msrb.mxu3 %v6561_v48  ;;  %9263 = vst [vmem:[#allocation164_spill] sm:$0xff] %v6576_v13  ;;  %v9264_v48 = vld [vmem:[#allocation15_spill] sm:$0xff] }
 0x43a   :  { %v1523_v15 = vadd.f32 %v1522_v34, %v9264_v48 }
 0x43b   :  { %1973 = vmatpush.msrb.mxu3 %v6564_v21  ;;  %v1562_v21 = vpop.f32.mrf.mxu1 }
 0x43c   :  { %3081 = vst [vmem:[%s7861_s10 + $0x18] sm:$0xff] %v1523_v15  ;;  %v1563_v52 = vadd.f32 %v1562_v21, %v5031_v45  ;;  %v386_v21 = vmul.f32 %v8792_v54, %v341_v36 }
 0x43d   :  { %1974 = vmatpush.msrb.mxu3 %v6567_v24  ;;  %v1542_v24 = vpop.f32.mrf.mxu0 }
 0x43e   :  { %v1543_v29 = vadd.f32 %v1542_v24, %v5033_v49 }
 0x43f   :  { %1975 = vmatpush.msrb.mxu3 %v6570_v25  ;;  %v1582_v25 = vpop.f32.mrf.mxu2  ;;  %v1602_v6 = vpop.f32.mrf.mxu3 }
 0x440   :  { %v1603_v11 = vadd.f32 %v1602_v6, %v5045_v33 }
 0x441   :  { %1976 = vmatpush.msrb.mxu3 %v6573_v20  ;;  %v9266_v20 = vld [vmem:[#allocation149_spill] sm:$0xff] }
 0x442   :  { %v384_v0 = vmul.f32 %v9266_v20, %v341_v36 }
 0x443   :  { %1977 = vmatpush.msrb.mxu3 %v6576_v13  ;;  %v1644_v58 = vpop.f32.mrf.mxu1 }
 0x444   :  { %v426_v34 = vadd.f32 %v9112_v7, %v384_v0  ;;  %v1688_v8 = vadd.f32 %v1644_v58, %v1563_v52  ;;  %v428_v58 = vadd.f32 %v4729_v61, %v386_v21 }
 0x445   :  { %v1624_v51 = vpop.f32.mrf.mxu0 }
 0x446   :  { %v1687_v20 = vadd.f32 %v1624_v51, %v1543_v29 }
 0x447   :  { %v1664_v43 = vpop.f32.mrf.mxu2 }
 0x44b   :  { %v1748_v13 = vpop.f32.mrf.mxu1 }
 0x44c   :  { %v1792_v10 = vadd.f32 %v1748_v13, %v426_v34 }
 0x44d   :  { %v1728_v47 = vpop.f32.mrf.mxu0 }
 0x44e   :  { %v1791_v48 = vadd.f32 %v1728_v47, %v425_v3  ;;  %v1799_v4 = vmul.f32 0.5, %v1792_v10  ;;  %v1691_v47 = vmul.f32 0.5, %v1687_v20  ;;  %v1684_v10 = vpop.f32.mrf.mxu3 }
 0x44f   :  { %v1768_v19 = vpop.f32.mrf.mxu2 }
 0x450   :  { %v1795_v15 = vmul.f32 0.5, %v1791_v48  ;;  %v1793_v0 = vadd.f32 %v1768_v19, %v427_v39  ;;  %v1695_v48 = vmul.f32 0.5, %v1688_v8 }
 0x452   :  { %3192 = vtanh.f32 %v1795_v15  ;;  %v1690_v15 = vadd.f32 %v1684_v10, %v1603_v11 }
 0x453   :  { %3194 = vtanh.f32 %v1799_v4  ;;  %v1583_v4 = vadd.f32 %v1582_v25, %v5043_v27 }
 0x454   :  { %3196 = vtanh.f32 %v1793_v0 }
 0x455   :  { %3198 = vtanh.f32 %v1691_v47  ;;  %v1689_v39 = vadd.f32 %v1664_v43, %v1583_v4 }
 0x456   :  { %3200 = vtanh.f32 %v1695_v48  ;;  %v1700_v48 = vmul.f32 0.5, %v1690_v15  ;;  %v9283_v15 = vld [vmem:[#allocation43_spill] sm:$0xff] }
 0x457   :  { %3202 = vtanh.f32 %v1689_v39  ;;  %v1817_v39 = vpop.permute.xlu0 %1816 }
 0x458   :  { %v3193_v3 = vpop.eup %3192  ;;  %vm1818_vm12 = vcmp.eq.s32.totalorder %v1817_v39, 1  ;;  %v9302_v39 = vld [vmem:[#allocation123_spill] sm:$0xff] }
 0x459   :  { %v3195_v13 = vpop.eup %3194  ;;  %v1797_v34 = vmul.f32 0.5, %v3193_v3 }
 0x45a   :  { %v1801_v24 = vmul.f32 0.5, %v3195_v13  ;;  %v3197_v52 = vpop.eup %3196 }
 0x45b   :  { %v1798_v29 = vadd.f32 0.5, %v1797_v34  ;;  %v3199_v19 = vpop.eup %3198 }
 0x45c   :  { %v1802_v51 = vadd.f32 0.5, %v1801_v24  ;;  %v3201_v20 = vpop.eup %3200  ;;  %v1693_v36 = vmul.f32 0.5, %v3199_v19 }
 0x45d   :  { %v1809_v3 = vmul.f32 %v3197_v52, %v1798_v29  ;;  %v1697_v13 = vmul.f32 0.5, %v3201_v20  ;;  %v3203_v24 = vpop.eup %3202  ;;  %v6621_v20 = vld [vmem:[#allocation7 + $0x1b8] sm:$0xff] }
 0x45e   :  { %v1808_v0 = vmul.f32 %v1802_v51, %v5986_v35  ;;  %v1694_v6 = vadd.f32 0.5, %v1693_v36  ;;  %v9287_v36 = vld [vmem:[#allocation47_spill] sm:$0xff] }
 0x45f   :  { %v1698_v43 = vadd.f32 0.5, %v1697_v13  ;;  %v9289_v13 = vld [vmem:[#allocation49_spill] sm:$0xff] }
 0x460   :  { %v6596_v34 = vadd.f32 %v1809_v3, %v1808_v0  ;;  %v1705_v35 = vmul.f32 %v3203_v24, %v1694_v6  ;;  %v9284_v0 = vld [vmem:[#allocation24_spill] sm:$0xff]  ;;  %v9286_v3 = vld [vmem:[#allocation107_spill] sm:$0xff] }
 0x461   :  { %v1704_v21 = vmul.f32 %v1698_v43, %v5990_v23  ;;  %v9292_v6 = vld [vmem:[#allocation51_spill] sm:$0xff]  ;;  %v9293_v43 = vld [vmem:[#allocation53_spill] sm:$0xff] }
 0x462   :  { %v9294_v24 = vld [vmem:[#allocation115_spill] sm:$0xff] }
 0x463   :  { %v6600_v11 = vadd.f32 %v1705_v35, %v1704_v21  ;;  %v9296_v21 = vld [vmem:[#allocation55_spill] sm:$0xff]  ;;  %v9297_v35 = vld [vmem:[#allocation57_spill] sm:$0xff] }
 0x475   :  { %v1788_v8 = vpop.f32.mrf.mxu3 }
 0x476   :  { %v1794_v47 = vadd.f32 %v1788_v8, %v428_v58  ;;  %v6700_v8 = vld [vmem:[#allocation7 + $0x38] sm:$0xff] }
 0x478   :  { %v1804_v25 = vmul.f32 0.5, %v1794_v47  ;;  %v6706_v47 = vld [vmem:[#allocation7 + $0x18] sm:$0xff] }
 0x47a   :  { %3204 = vtanh.f32 %v1804_v25  ;;  %v9290_v25 = vld [vmem:[#allocation111_spill] sm:$0xff] }
 0x47b   :  { %3206 = vtanh.f32 %v1700_v48  ;;  %v9291_v48 = vld [vmem:[#allocation26_spill] sm:$0xff] }
 0x47c   :  { %3208 = vtanh.f32 %v6596_v34 }
 0x47d   :  { %3210 = vtanh.f32 %v6600_v11 }
 0x480   :  { %v3205_v10 = vpop.eup %3204 }
 0x481   :  { %v1806_v4 = vmul.f32 0.5, %v3205_v10  ;;  %v3207_v29 = vpop.eup %3206  ;;  %v9295_v10 = vld [vmem:[#allocation27_spill] sm:$0xff] }
 0x482   :  { %v3209_v52 = vpop.eup %3208  ;;  %v1702_v58 = vmul.f32 0.5, %v3207_v29  ;;  %v9299_v29 = vld [vmem:[#allocation59_spill] sm:$0xff] }
 0x483   :  { %v1807_v51 = vadd.f32 0.5, %v1806_v4  ;;  %v9298_v4 = vld [vmem:[#allocation119_spill] sm:$0xff] }
 0x484   :  { %v1703_v23 = vadd.f32 0.5, %v1702_v58  ;;  %v9303_v58 = vld [vmem:[#allocation63_spill] sm:$0xff] }
 0x485   :  { %v6602_v19 = vmul.f32 %v3209_v52, %v1807_v51  ;;  %v9300_v51 = vld [vmem:[#allocation28_spill] sm:$0xff]  ;;  %v9301_v52 = vld [vmem:[#allocation61_spill] sm:$0xff] }
 0x487   :  { %3082 = vmatmul.msk.f32.vlgmr.msra.gmra.mxu0 %vm1818_vm12, %v6602_v19  ;;  %3083 = vmatmul.msk.f32.vlgmr.msrb.gmra.mxu1 %vm1818_vm12, %v6602_v19 }
 0x488   :  { %3084 = vmatmul.msk.f32.vlgmr.msrb.gmra.mxu2 %vm1818_vm12, %v6602_v19  ;;  %3085 = vmatmul.msk.f32.vlgmr.msra.gmra.mxu3 %vm1818_vm12, %v6602_v19 }
 0x489   :  { %1982 = vmatpush.msra.mxu0 %v6003_v50  ;;  %2026 = vmatpush.msrb.mxu1 %v6006_v57  ;;  %v3211_v50 = vpop.eup %3210 }
 0x48a   :  { %2046 = vmatpush.msrb.mxu2 %v6009_v16  ;;  %2066 = vmatpush.msra.mxu3 %v6012_v2  ;;  %v6627_v57 = vmul.f32 %v3211_v50, %v1703_v23  ;;  %v6629_v16 = vld [vmem:[#allocation7 + $0x198] sm:$0xff]  ;;  %v9304_v23 = vld [vmem:[#allocation29_spill] sm:$0xff] }
 0x48b   :  { %1983 = vmatpush.msra.mxu0 %v6015_v1  ;;  %2027 = vmatpush.msrb.mxu1 %v6018_v18  ;;  %v6640_v2 = vld [vmem:[#allocation7 + $0x178] sm:$0xff]  ;;  %v9305_v50 = vld [vmem:[#allocation65_spill] sm:$0xff] }
 0x48c   :  { %2047 = vmatpush.msrb.mxu2 %v6021_v41  ;;  %2067 = vmatpush.msra.mxu3 %v6024_v38  ;;  %9268 = vst [vmem:[#allocation170_spill] sm:$0xff] %v6627_v57  ;;  %v6646_v1 = vld [vmem:[#allocation7 + $0x158] sm:$0xff]  ;;  %v9269_v41 = vld [vmem:[#allocation13_spill] sm:$0xff] }
 0x48d   :  { %1984 = vmatpush.msra.mxu0 %v6621_v20  ;;  %2028 = vmatpush.msrb.mxu1 %v6028_v28  ;;  %v6652_v18 = vld [vmem:[#allocation7 + $0x138] sm:$0xff]  ;;  %v9270_v28 = vld [vmem:[#allocation18_spill] sm:$0xff] }
 0x48e   :  { %2048 = vmatpush.msrb.mxu2 %v6031_v40  ;;  %2068 = vmatpush.msra.mxu3 %v6034_v46  ;;  %v6658_v38 = vld [vmem:[#allocation7 + $0x118] sm:$0xff] }
 0x48f   :  { %1985 = vmatpush.msra.mxu0 %v6629_v16  ;;  %2029 = vmatpush.msrb.mxu1 %v6040_v26  ;;  %v9271_v40 = vld [vmem:[#allocation20_spill] sm:$0xff]  ;;  %v9272_v26 = vld [vmem:[#allocation14_spill] sm:$0xff] }
 0x490   :  { %2049 = vmatpush.msrb.mxu2 %v6043_v59  ;;  %2069 = vmatpush.msra.mxu3 %v6046_v17  ;;  %v6664_v46 = vld [vmem:[#allocation7 + $0xf8] sm:$0xff]  ;;  %v9273_v59 = vld [vmem:[#allocation21_spill] sm:$0xff] }
 0x491   :  { %3086 = vmatmul.msk.f32.vlgmr.msrb.gmra.mxu0 %vm1818_vm12, %v6602_v19  ;;  %1938 = vmatmul.f32.vlgmr.msra.gmra.mxu1 %v6627_v57  ;;  %v6670_v17 = vld [vmem:[#allocation7 + $0xd8] sm:$0xff] }
 0x492   :  { %1958 = vmatmul.f32.vlgmr.msra.gmra.mxu2 %v6627_v57  ;;  %1978 = vmatmul.f32.vlgmr.msrb.gmra.mxu3 %v6627_v57 }
 0x493   :  { %1986 = vmatpush.msra.mxu0 %v6640_v2  ;;  %2030 = vmatpush.msrb.mxu1 %v6055_v42  ;;  %v9274_v42 = vld [vmem:[#allocation23_spill] sm:$0xff] }
 0x494   :  { %2050 = vmatpush.msrb.mxu2 %v6058_v63  ;;  %2070 = vmatpush.msra.mxu3 %v6061_v22  ;;  %v9275_v63 = vld [vmem:[#allocation16_spill] sm:$0xff] }
 0x495   :  { %1987 = vmatpush.msra.mxu0 %v6646_v1  ;;  %2031 = vmatpush.msrb.mxu1 %v6065_v32  ;;  %v6676_v22 = vld [vmem:[#allocation7 + $0xb8] sm:$0xff]  ;;  %v9276_v32 = vld [vmem:[#allocation19_spill] sm:$0xff] }
 0x496   :  { %2051 = vmatpush.msrb.mxu2 %v6068_v37  ;;  %2071 = vmatpush.msra.mxu3 %v6071_v44  ;;  %v9277_v37 = vld [vmem:[#allocation37_spill] sm:$0xff]  ;;  %v6682_v44 = vld [vmem:[#allocation7 + $0x98] sm:$0xff] }
 0x497   :  { %1988 = vmatpush.msra.mxu0 %v6652_v18  ;;  %2032 = vmatpush.msrb.mxu1 %v6075_v9  ;;  %v9278_v9 = vld [vmem:[#allocation101_spill] sm:$0xff] }
 0x498   :  { %2052 = vmatpush.msrb.mxu2 %v6078_v30  ;;  %2072 = vmatpush.msra.mxu3 %v9269_v41  ;;  %v9279_v30 = vld [vmem:[#allocation39_spill] sm:$0xff]  ;;  %v9306_v41 = vld [vmem:[#allocation30_spill] sm:$0xff] }
 0x499   :  { %1989 = vmatpush.msra.mxu0 %v6658_v38  ;;  %2033 = vmatpush.msrb.mxu1 %v6085_v12  ;;  %v6688_v12 = vld [vmem:[#allocation7 + $0x78] sm:$0xff] }
 0x49a   :  { %2053 = vmatpush.msrb.mxu2 %v9270_v28  ;;  %2073 = vmatpush.msra.mxu3 %v9271_v40  ;;  %v9307_v28 = vld [vmem:[#allocation67_spill] sm:$0xff]  ;;  %v9308_v40 = vld [vmem:[#allocation128_spill] sm:$0xff] }
 0x49b   :  { %1990 = vmatpush.msra.mxu0 %v6664_v46  ;;  %2034 = vmatpush.msrb.mxu1 %v6095_v31  ;;  %v6694_v31 = vld [vmem:[#allocation7 + $0x58] sm:$0xff] }
 0x49c   :  { %2054 = vmatpush.msrb.mxu2 %v9272_v26  ;;  %2074 = vmatpush.msra.mxu3 %v9273_v59  ;;  %v9309_v26 = vld [vmem:[#allocation69_spill] sm:$0xff]  ;;  %v9310_v59 = vld [vmem:[#allocation31_spill] sm:$0xff] }
 0x49d   :  { %1991 = vmatpush.msra.mxu0 %v6670_v17  ;;  %2035 = vmatpush.msrb.mxu1 %v6105_v5  ;;  %v9281_v5 = vld [vmem:[#allocation41_spill] sm:$0xff] }
 0x49e   :  { %2055 = vmatpush.msrb.mxu2 %v9274_v42  ;;  %2075 = vmatpush.msra.mxu3 %v9275_v63  ;;  %v9311_v42 = vld [vmem:[#allocation71_spill] sm:$0xff]  ;;  %v9312_v63 = vld [vmem:[#allocation132_spill] sm:$0xff] }
 0x49f   :  { %1992 = vmatpush.msra.mxu0 %v6676_v22  ;;  %2036 = vmatpush.msrb.mxu1 %v6115_v56  ;;  %v9280_v56 = vld [vmem:[#allocation22_spill] sm:$0xff] }
 0x4a0   :  { %2056 = vmatpush.msrb.mxu2 %v9276_v32  ;;  %2076 = vmatpush.msra.mxu3 %v9277_v37  ;;  %v9313_v32 = vld [vmem:[#allocation73_spill] sm:$0xff] }
 0x4a1   :  { %1993 = vmatpush.msra.mxu0 %v6682_v44  ;;  %2037 = vmatpush.msrb.mxu1 %v6125_v62  ;;  %v9282_v62 = vld [vmem:[#allocation104_spill] sm:$0xff]  ;;  %v9314_v37 = vld [vmem:[#allocation137_spill] sm:$0xff] }
 0x4a2   :  { %2057 = vmatpush.msrb.mxu2 %v9278_v9  ;;  %2077 = vmatpush.msra.mxu3 %v9279_v30  ;;  %v9315_v9 = vld [vmem:[#allocation75_spill] sm:$0xff]  ;;  %v9316_v30 = vld [vmem:[#allocation32_spill] sm:$0xff] }
 0x4a3   :  { %1994 = vmatpush.msra.mxu0 %v6688_v12  ;;  %2038 = vmatpush.msrb.mxu1 %v6135_v60  ;;  %v9285_v60 = vld [vmem:[#allocation45_spill] sm:$0xff] }
 0x4a4   :  { %2058 = vmatpush.msrb.mxu2 %v9280_v56  ;;  %2078 = vmatpush.msra.mxu3 %v9281_v5  ;;  %v9317_v56 = vld [vmem:[#allocation77_spill] sm:$0xff] }
 0x4a5   :  { %1995 = vmatpush.msra.mxu0 %v6694_v31  ;;  %2039 = vmatpush.msrb.mxu1 %v6145_v53  ;;  %v9288_v53 = vld [vmem:[#allocation25_spill] sm:$0xff] }
 0x4a6   :  { %2059 = vmatpush.msrb.mxu2 %v9282_v62  ;;  %2079 = vmatpush.msra.mxu3 %v9283_v15  ;;  %v9318_v5 = vld [vmem:[#allocation141_spill] sm:$0xff]  ;;  %v9319_v62 = vld [vmem:[#allocation79_spill] sm:$0xff] }
 0x4a7   :  { %1996 = vmatpush.msra.mxu0 %v6700_v8  ;;  %2040 = vmatpush.msrb.mxu1 %v9284_v0  ;;  %v9320_v15 = vld [vmem:[#allocation33_spill] sm:$0xff]  ;;  %v9321_v0 = vld [vmem:[#allocation34_spill] sm:$0xff] }
 0x4a8   :  { %2060 = vmatpush.msrb.mxu2 %v9285_v60  ;;  %2080 = vmatpush.msra.mxu3 %v9286_v3  ;;  %v9322_v60 = vld [vmem:[#allocation145_spill] sm:$0xff] }
 0x4a9   :  { %1997 = vmatpush.msra.mxu0 %v6706_v47  ;;  %2041 = vmatpush.msrb.mxu1 %v9287_v36  ;;  %v9323_v3 = vld [vmem:[#allocation81_spill] sm:$0xff]  ;;  %v9324_v36 = vld [vmem:[#allocation83_spill] sm:$0xff] }
 0x4aa   :  { %2061 = vmatpush.msrb.mxu2 %v9288_v53  ;;  %2081 = vmatpush.msra.mxu3 %v9289_v13  ;;  %v9325_v53 = vld [vmem:[#allocation85_spill] sm:$0xff]  ;;  %v9326_v13 = vld [vmem:[#allocation150_spill] sm:$0xff] }
 0x4ab   :  { %1998 = vmatmul.f32.vlgmr.msra.gmra.mxu0 %v6627_v57  ;;  %2042 = vmatmul.f32.vlgmr.msrb.gmra.mxu1 %v6602_v19 }
 0x4ac   :  { %2062 = vmatmul.f32.vlgmr.msrb.gmra.mxu2 %v6602_v19  ;;  %2082 = vmatmul.f32.vlgmr.msra.gmra.mxu3 %v6602_v19 }
 0x4ad   :  { %2086 = vmatpush.msrb.mxu0 %v9290_v25  ;;  %2135 = vmatpush.msra.mxu1 %v9291_v48  ;;  %v9327_v25 = vld [vmem:[#allocation35_spill] sm:$0xff]  ;;  %v9328_v48 = vld [vmem:[#allocation36_spill] sm:$0xff] }
 0x4ae   :  { %2155 = vmatpush.msra.mxu2 %v9292_v6  ;;  %2175 = vmatpush.msrb.mxu3 %v9293_v43  ;;  %v9329_v6 = vld [vmem:[#allocation89_spill] sm:$0xff]  ;;  %v9330_v43 = vld [vmem:[#allocation155_spill] sm:$0xff] }
 0x4af   :  { %2087 = vmatpush.msrb.mxu0 %v9294_v24  ;;  %2136 = vmatpush.msra.mxu1 %v9295_v10  ;;  %v9331_v24 = vld [vmem:[#allocation87_spill] sm:$0xff] }
 0x4b0   :  { %2156 = vmatpush.msra.mxu2 %v9296_v21  ;;  %2176 = vmatpush.msrb.mxu3 %v9297_v35  ;;  %v9332_v10 = vld [vmem:[#allocation91_spill] sm:$0xff]  ;;  %v9333_v21 = vld [vmem:[#allocation93_spill] sm:$0xff]  ;;  %v9334_v35 = vld [vmem:[#allocation38_spill] sm:$0xff] }
 0x4b1   :  { %2088 = vmatpush.msrb.mxu0 %v9298_v4  ;;  %2137 = vmatpush.msra.mxu1 %v9299_v29  ;;  %v9335_v4 = vld [vmem:[#allocation161_spill] sm:$0xff]  ;;  %v9336_v29 = vld [vmem:[#allocation95_spill] sm:$0xff] }
 0x4b2   :  { %2157 = vmatpush.msra.mxu2 %v9300_v51  ;;  %2177 = vmatpush.msrb.mxu3 %v9301_v52  ;;  %v9337_v51 = vld [vmem:[#allocation97_spill] sm:$0xff]  ;;  %v9338_v52 = vld [vmem:[#allocation42_spill] sm:$0xff] }
 0x4b3   :  { %2089 = vmatpush.msrb.mxu0 %v9302_v39  ;;  %2138 = vmatpush.msra.mxu1 %v9303_v58  ;;  %v9339_v39 = vld [vmem:[#allocation166_spill] sm:$0xff]  ;;  %v9340_v58 = vld [vmem:[#allocation40_spill] sm:$0xff] }
 0x4b4   :  { %2158 = vmatpush.msra.mxu2 %v9304_v23  ;;  %2178 = vmatpush.msrb.mxu3 %v9305_v50  ;;  %v9341_v23 = vld [vmem:[#allocation46_spill] sm:$0xff] }
 0x4b5   :  { %2090 = vmatpush.msrb.mxu0 %v9306_v41  ;;  %2139 = vmatpush.msra.mxu1 %v9307_v28  ;;  %v9342_v50 = vld [vmem:[#allocation50_spill] sm:$0xff]  ;;  %v9343_v41 = vld [vmem:[#allocation103_spill] sm:$0xff] }
 0x4b6   :  { %2159 = vmatpush.msra.mxu2 %v9308_v40  ;;  %2179 = vmatpush.msrb.mxu3 %v9309_v26  ;;  %v9344_v28 = vld [vmem:[#allocation54_spill] sm:$0xff]  ;;  %v9345_v40 = vld [vmem:[#allocation99_spill] sm:$0xff] }
 0x4b7   :  { %2091 = vmatpush.msrb.mxu0 %v9310_v59  ;;  %2140 = vmatpush.msra.mxu1 %v9311_v42  ;;  %v9346_v26 = vld [vmem:[#allocation106_spill] sm:$0xff]  ;;  %v9347_v59 = vld [vmem:[#allocation48_spill] sm:$0xff]  ;;  %v9348_v42 = vld [vmem:[#allocation109_spill] sm:$0xff] }
 0x4b8   :  { %2160 = vmatpush.msra.mxu2 %v9312_v63  ;;  %2180 = vmatpush.msrb.mxu3 %v9313_v32  ;;  %v9349_v63 = vld [vmem:[#allocation44_spill] sm:$0xff]  ;;  %v9350_v32 = vld [vmem:[#allocation62_spill] sm:$0xff] }
 0x4b9   :  { %2092 = vmatpush.msrb.mxu0 %v9314_v37  ;;  %2141 = vmatpush.msra.mxu1 %v9315_v9  ;;  %v9351_v37 = vld [vmem:[#allocation113_spill] sm:$0xff]  ;;  %v9352_v9 = vld [vmem:[#allocation58_spill] sm:$0xff] }
 0x4ba   :  { %2161 = vmatpush.msra.mxu2 %v9316_v30  ;;  %2181 = vmatpush.msrb.mxu3 %v9317_v56  ;;  %v9353_v30 = vld [vmem:[#allocation66_spill] sm:$0xff]  ;;  %v9354_v56 = vld [vmem:[#allocation117_spill] sm:$0xff] }
 0x4bb   :  { %2093 = vmatpush.msrb.mxu0 %v9318_v5  ;;  %2142 = vmatpush.msra.mxu1 %v9319_v62  ;;  %v9355_v5 = vld [vmem:[#allocation52_spill] sm:$0xff] }
 0x4bc   :  { %2162 = vmatpush.msra.mxu2 %v9320_v15  ;;  %2182 = vmatpush.msrb.mxu3 %v9321_v0  ;;  %v9356_v62 = vld [vmem:[#allocation60_spill] sm:$0xff]  ;;  %v9357_v15 = vld [vmem:[#allocation121_spill] sm:$0xff]  ;;  %v6785_v0 = vld [vmem:[#allocation7 + $0x1e8] sm:$0xff] }
 0x4bd   :  { %2094 = vmatpush.msrb.mxu0 %v9322_v60  ;;  %2143 = vmatpush.msra.mxu1 %v9323_v3  ;;  %v9358_v60 = vld [vmem:[#allocation56_spill] sm:$0xff]  ;;  %v9359_v3 = vld [vmem:[#allocation74_spill] sm:$0xff] }
 0x4be   :  { %2163 = vmatpush.msra.mxu2 %v9324_v36  ;;  %2183 = vmatpush.msrb.mxu3 %v9325_v53  ;;  %v6791_v36 = vld [vmem:[#allocation7 + $0x1c8] sm:$0xff]  ;;  %v9361_v53 = vld [vmem:[#allocation68_spill] sm:$0xff] }
 0x4bf   :  { %2095 = vmatpush.msrb.mxu0 %v9326_v13  ;;  %2144 = vmatpush.msra.mxu1 %v9327_v25  ;;  %v9362_v13 = vld [vmem:[#allocation64_spill] sm:$0xff]  ;;  %v9363_v25 = vld [vmem:[#allocation130_spill] sm:$0xff] }
 0x4c0   :  { %2164 = vmatpush.msra.mxu2 %v9328_v48  ;;  %2184 = vmatpush.msrb.mxu3 %v9329_v6  ;;  %v6797_v48 = vld [vmem:[#allocation7 + $0x1a8] sm:$0xff]  ;;  %v9364_v6 = vld [vmem:[#allocation72_spill] sm:$0xff] }
 0x4c1   :  { %2096 = vmatpush.msrb.mxu0 %v9330_v43  ;;  %2145 = vmatpush.msra.mxu1 %v9331_v24  ;;  %v9365_v43 = vld [vmem:[#allocation125_spill] sm:$0xff]  ;;  %v9366_v24 = vld [vmem:[#allocation134_spill] sm:$0xff] }
 0x4c2   :  { %2165 = vmatpush.msra.mxu2 %v9332_v10  ;;  %2185 = vmatpush.msrb.mxu3 %v9333_v21  ;;  %v6803_v10 = vld [vmem:[#allocation7 + $0x188] sm:$0xff]  ;;  %v9367_v21 = vld [vmem:[#allocation76_spill] sm:$0xff] }
 0x4c3   :  { %2097 = vmatpush.msrb.mxu0 %v9334_v35  ;;  %2146 = vmatpush.msra.mxu1 %v9335_v4  ;;  %v9368_v35 = vld [vmem:[#allocation78_spill] sm:$0xff]  ;;  %v9369_v4 = vld [vmem:[#allocation139_spill] sm:$0xff] }
 0x4c4   :  { %2166 = vmatpush.msra.mxu2 %v9336_v29  ;;  %2186 = vmatpush.msrb.mxu3 %v9337_v51  ;;  %v6809_v29 = vld [vmem:[#allocation7 + $0x168] sm:$0xff]  ;;  %v9370_v51 = vld [vmem:[#allocation80_spill] sm:$0xff] }
 0x4c5   :  { %2098 = vmatpush.msrb.mxu0 %v9338_v52  ;;  %2147 = vmatpush.msra.mxu1 %v9339_v39  ;;  %v9371_v52 = vld [vmem:[#allocation82_spill] sm:$0xff]  ;;  %v9372_v39 = vld [vmem:[#allocation143_spill] sm:$0xff] }
 0x4c6   :  { %2167 = vmatpush.msra.mxu2 %v9340_v58  ;;  %2187 = vmatpush.msrb.mxu3 %v9341_v23  ;;  %v6815_v58 = vld [vmem:[#allocation7 + $0x148] sm:$0xff]  ;;  %v9373_v23 = vld [vmem:[#allocation84_spill] sm:$0xff] }
 0x4c7   :  { %2099 = vmatpush.msrb.mxu0 %v9342_v50  ;;  %2148 = vmatpush.msra.mxu1 %v9343_v41  ;;  %v9374_v50 = vld [vmem:[#allocation86_spill] sm:$0xff]  ;;  %v9375_v41 = vld [vmem:[#allocation147_spill] sm:$0xff] }
 0x4c8   :  { %2168 = vmatpush.msra.mxu2 %v9344_v28  ;;  %2188 = vmatpush.msrb.mxu3 %v9345_v40  ;;  %v6821_v28 = vld [vmem:[#allocation7 + $0x128] sm:$0xff]  ;;  %v9376_v40 = vld [vmem:[#allocation88_spill] sm:$0xff] }
 0x4c9   :  { %2100 = vmatpush.msrb.mxu0 %v9346_v26  ;;  %2149 = vmatpush.msra.mxu1 %v9347_v59  ;;  %v9377_v26 = vld [vmem:[#allocation90_spill] sm:$0xff] }
 0x4ca   :  { %2169 = vmatpush.msra.mxu2 %v9348_v42  ;;  %2189 = vmatpush.msrb.mxu3 %v9349_v63  ;;  %v9378_v59 = vld [vmem:[#allocation102_spill] sm:$0xff]  ;;  %v9379_v63 = vld [vmem:[#allocation152_spill] sm:$0xff] }
 0x4cb   :  { %2101 = vmatpush.msrb.mxu0 %v9350_v32  ;;  %2150 = vmatpush.msra.mxu1 %v9351_v37  ;;  %v6827_v42 = vld [vmem:[#allocation7 + $0x108] sm:$0xff]  ;;  %v9381_v37 = vld [vmem:[#allocation105_spill] sm:$0xff] }
 0x4cc   :  { %2102 = vmatmul.f32.vlgmr.msrb.gmra.mxu0 %v6602_v19  ;;  %2170 = vmatpush.msra.mxu2 %v9352_v9  ;;  %v9360_v19 = vld [vmem:[#allocation70_spill] sm:$0xff] }
 0x4cd   :  { %2195 = vmatpush.msra.mxu0 %v9353_v30  ;;  %2190 = vmatpush.msrb.mxu3 %v9354_v56  ;;  %v9380_v32 = vld [vmem:[#allocation94_spill] sm:$0xff]  ;;  %v9382_v30 = vld [vmem:[#allocation157_spill] sm:$0xff] }
 0x4ce   :  { %2215 = vmatpush.msrb.mxu1 %v9355_v5  ;;  %2237 = vmatpush.msrb.mxu2 %v9356_v62  ;;  %v6833_v9 = vld [vmem:[#allocation7 + $0xe8] sm:$0xff]  ;;  %v9384_v5 = vld [vmem:[#allocation108_spill] sm:$0xff] }
 0x4cf   :  { %2196 = vmatpush.msra.mxu0 %v9357_v15  ;;  %2257 = vmatpush.msra.mxu3 %v6785_v0  ;;  %v9383_v56 = vld [vmem:[#allocation98_spill] sm:$0xff]  ;;  %v9385_v15 = vld [vmem:[#allocation163_spill] sm:$0xff] }
 0x4d0   :  { %2216 = vmatpush.msrb.mxu1 %v9358_v60  ;;  %2238 = vmatpush.msrb.mxu2 %v9359_v3  ;;  %v6839_v62 = vld [vmem:[#allocation7 + $0xc8] sm:$0xff]  ;;  %v9386_v60 = vld [vmem:[#allocation92_spill] sm:$0xff] }
 0x4d1   :  { %2197 = vmatpush.msra.mxu0 %v9360_v19  ;;  %2258 = vmatpush.msra.mxu3 %v6791_v36  ;;  %v9387_v3 = vld [vmem:[#allocation112_spill] sm:$0xff]  ;;  %v6845_v19 = vld [vmem:[#allocation7 + $0xa8] sm:$0xff] }
 0x4d2   :  { %2217 = vmatpush.msrb.mxu1 %v9361_v53  ;;  %2239 = vmatpush.msrb.mxu2 %v9362_v13  ;;  %v9388_v53 = vld [vmem:[#allocation168_spill] sm:$0xff] }
 0x4d3   :  { %2198 = vmatpush.msra.mxu0 %v9363_v25  ;;  %2259 = vmatpush.msra.mxu3 %v6797_v48  ;;  %v9389_v13 = vld [vmem:[#allocation96_spill] sm:$0xff] }
 0x4d4   :  { %2218 = vmatpush.msrb.mxu1 %v9364_v6  ;;  %2240 = vmatpush.msrb.mxu2 %v9365_v43  ;;  %v9390_v25 = vld [vmem:[#allocation120_spill] sm:$0xff]  ;;  %v6851_v6 = vld [vmem:[#allocation7 + $0x88] sm:$0xff] }
 0x4d5   :  { %2199 = vmatpush.msra.mxu0 %v9366_v24  ;;  %2260 = vmatpush.msra.mxu3 %v6803_v10  ;;  %v9391_v43 = vld [vmem:[#allocation124_spill] sm:$0xff] }
 0x4d6   :  { %2219 = vmatpush.msrb.mxu1 %v9367_v21  ;;  %2241 = vmatpush.msrb.mxu2 %v9368_v35  ;;  %v9392_v24 = vld [vmem:[#allocation100_spill] sm:$0xff]  ;;  %v9393_v21 = vld [vmem:[#allocation133_spill] sm:$0xff]  ;;  %v6857_v35 = vld [vmem:[#allocation7 + $0x68] sm:$0xff] }
 0x4d7   :  { %2200 = vmatpush.msra.mxu0 %v9369_v4  ;;  %2261 = vmatpush.msra.mxu3 %v6809_v29  ;;  %v9394_v4 = vld [vmem:[#allocation142_spill] sm:$0xff] }
 0x4d8   :  { %2220 = vmatpush.msrb.mxu1 %v9370_v51  ;;  %2242 = vmatpush.msrb.mxu2 %v9371_v52  ;;  %v9395_v51 = vld [vmem:[#allocation116_spill] sm:$0xff]  ;;  %v9396_v52 = vld [vmem:[#allocation146_spill] sm:$0xff] }
 0x4d9   :  { %2201 = vmatpush.msra.mxu0 %v9372_v39  ;;  %2262 = vmatpush.msra.mxu3 %v6815_v58  ;;  %v6863_v39 = vld [vmem:[#allocation7 + $0x48] sm:$0xff] }
 0x4da   :  { %2221 = vmatpush.msrb.mxu1 %v9373_v23  ;;  %2243 = vmatpush.msrb.mxu2 %v9374_v50  ;;  %v9397_v23 = vld [vmem:[#allocation156_spill] sm:$0xff]  ;;  %v9398_v50 = vld [vmem:[#allocation129_spill] sm:$0xff] }
 0x4db   :  { %2202 = vmatpush.msra.mxu0 %v9375_v41  ;;  %2263 = vmatpush.msra.mxu3 %v6821_v28  ;;  %v9399_v41 = vld [vmem:[#allocation138_spill] sm:$0xff] }
 0x4dc   :  { %2222 = vmatpush.msrb.mxu1 %v9376_v40  ;;  %2244 = vmatpush.msrb.mxu2 %v9377_v26  ;;  %v6869_v40 = vld [vmem:[#allocation7 + $0x28] sm:$0xff] }
 0x4dd   :  { %2203 = vmatpush.msra.mxu0 %v9378_v59  ;;  %2264 = vmatpush.msra.mxu3 %v6827_v42  ;;  %v9400_v26 = vld [vmem:[#allocation162_spill] sm:$0xff] }
 0x4de   :  { %2223 = vmatpush.msrb.mxu1 %v9379_v63  ;;  %2245 = vmatpush.msrb.mxu2 %v9380_v32  ;;  %v9401_v59 = vld [vmem:[#allocation154_spill] sm:$0xff]  ;;  %v9402_v63 = vld [vmem:[#allocation151_spill] sm:$0xff] }
 0x4df   :  { %2204 = vmatpush.msra.mxu0 %v9381_v37  ;;  %2265 = vmatpush.msra.mxu3 %v6833_v9  ;;  %v6875_v32 = vld [vmem:[#allocation7 + $0x8] sm:$0xff]  ;;  %v9404_v37 = vld [vmem:[#allocation167_spill] sm:$0xff] }
 0x4e0   :  { %2224 = vmatpush.msrb.mxu1 %v9382_v30  ;;  %2246 = vmatpush.msrb.mxu2 %v9383_v56  ;;  %9403 = vst [vmem:[#allocation13_spill] sm:$0xff] %v6875_v32  ;;  %v9405_v30 = vld [vmem:[#allocation158_spill] sm:$0xff]  ;;  %v9406_v56 = vld [vmem:[#allocation165_spill] sm:$0xff] }
 0x4e1   :  { %2205 = vmatpush.msra.mxu0 %v9384_v5  ;;  %2266 = vmatpush.msra.mxu3 %v6839_v62  ;;  %v9407_v5 = vld [vmem:[#allocation110_spill] sm:$0xff] }
 0x4e2   :  { %2225 = vmatpush.msrb.mxu1 %v9385_v15  ;;  %2247 = vmatpush.msrb.mxu2 %v9386_v60  ;;  %v9408_v15 = vld [vmem:[#allocation114_spill] sm:$0xff] }
 0x4e3   :  { %2206 = vmatpush.msra.mxu0 %v9387_v3  ;;  %2267 = vmatpush.msra.mxu3 %v6845_v19  ;;  %v9409_v60 = vld [vmem:[#allocation118_spill] sm:$0xff] }
 0x4e4   :  { %2226 = vmatpush.msrb.mxu1 %v9388_v53  ;;  %2248 = vmatpush.msrb.mxu2 %v9389_v13  ;;  %v9410_v3 = vld [vmem:[#allocation122_spill] sm:$0xff]  ;;  %v9412_v13 = vld [vmem:[#allocation131_spill] sm:$0xff] }
 0x4e5   :  { %2207 = vmatpush.msra.mxu0 %v9390_v25  ;;  %2268 = vmatpush.msra.mxu3 %v6851_v6  ;;  %v9411_v53 = vld [vmem:[#allocation126_spill] sm:$0xff]  ;;  %v9413_v25 = vld [vmem:[#allocation135_spill] sm:$0xff] }
 0x4e6   :  { %2227 = vmatpush.msrb.mxu1 %v9391_v43  ;;  %2249 = vmatpush.msrb.mxu2 %v9392_v24  ;;  %v9414_v43 = vld [vmem:[#allocation140_spill] sm:$0xff] }
 0x4e7   :  { %2208 = vmatpush.msra.mxu0 %v9393_v21  ;;  %2269 = vmatpush.msra.mxu3 %v6857_v35  ;;  %v9415_v21 = vld [vmem:[#allocation144_spill] sm:$0xff] }
 0x4e8   :  { %2228 = vmatpush.msrb.mxu1 %v9394_v4  ;;  %2250 = vmatpush.msrb.mxu2 %v9395_v51  ;;  %v9416_v4 = vld [vmem:[#allocation15_spill] sm:$0xff] }
 0x4e9   :  { %2209 = vmatpush.msra.mxu0 %v9396_v52  ;;  %2270 = vmatpush.msra.mxu3 %v6863_v39  ;;  %v9417_v52 = vld [vmem:[#allocation148_spill] sm:$0xff] }
 0x4ea   :  { %2229 = vmatpush.msrb.mxu1 %v9397_v23  ;;  %2251 = vmatpush.msrb.mxu2 %v9398_v50  ;;  %v9418_v23 = vld [vmem:[#allocation153_spill] sm:$0xff]  ;;  %v9419_v50 = vld [vmem:[#allocation164_spill] sm:$0xff] }
 0x4eb   :  { %2210 = vmatpush.msra.mxu0 %v9399_v41  ;;  %2271 = vmatpush.msra.mxu3 %v6869_v40 }
 0x4ec   :  { %2230 = vmatpush.msrb.mxu1 %v9401_v59  ;;  %2252 = vmatpush.msrb.mxu2 %v9402_v63 }
 0x4ed   :  { %2277 = vmatpush.msrb.mxu0 %v9400_v26  ;;  %2272 = vmatpush.msra.mxu3 %v6875_v32 }
 0x4ef   :  { %2278 = vmatpush.msrb.mxu0 %v9404_v37  ;;  %v346_v37 = vpop.permute.xlu1 %345 }
 0x4f1   :  { %2279 = vmatpush.msrb.mxu0 %v9405_v30 }
 0x4f3   :  { %2280 = vmatpush.msrb.mxu0 %v9406_v56  ;;  %v9420_v56 = vld [vmem:[#allocation149_spill] sm:$0xff] }
 0x4f5   :  { %2281 = vmatpush.msrb.mxu0 %v9407_v5  ;;  %v388_v5 = vmul.f32 %v9420_v56, %v346_v37 }
 0x4f7   :  { %2282 = vmatpush.msrb.mxu0 %v9408_v15  ;;  %v9421_v15 = vld [vmem:[#allocation127_spill] sm:$0xff] }
 0x4f9   :  { %2283 = vmatpush.msrb.mxu0 %v9409_v60  ;;  %v387_v60 = vmul.f32 %v9421_v15, %v346_v37 }
 0x4fb   :  { %2284 = vmatpush.msrb.mxu0 %v9410_v3  ;;  %v430_v3 = vadd.f32 %v9112_v7, %v388_v5 }
 0x4fd   :  { %2285 = vmatpush.msrb.mxu0 %v9411_v53 }
 0x4ff   :  { %2286 = vmatpush.msrb.mxu0 %v9412_v13 }
 0x501   :  { %2287 = vmatpush.msrb.mxu0 %v9413_v25  ;;  %v9422_v25 = vld [vmem:[#allocation136_spill] sm:$0xff] }
 0x503   :  { %2288 = vmatpush.msrb.mxu0 %v9414_v43  ;;  %v429_v43 = vadd.f32 %v9422_v25, %v387_v60 }
 0x504   :  { %v1837_v24 = vpop.f32.mrf.mxu0  ;;  %v1857_v26 = vpop.f32.mrf.mxu1 }
 0x505   :  { %2289 = vmatpush.msrb.mxu0 %v9415_v21  ;;  %v1838_v51 = vadd.f32 %v1837_v24, %v9416_v4  ;;  %v389_v4 = vmul.f32 %v8791_v55, %v346_v37  ;;  %v1858_v15 = vadd.f32 %v1857_v26, %v5033_v49 }
 0x507   :  { %2290 = vmatpush.msrb.mxu0 %v9417_v52  ;;  %3087 = vst [vmem:[%s7861_s10 + $0x20] sm:$0xff] %v1838_v51  ;;  %v431_v32 = vadd.f32 %v8794_v14, %v389_v4 }
 0x509   :  { %2291 = vmatpush.msrb.mxu0 %v9418_v23 }
 0x50b   :  { %2292 = vmatpush.msrb.mxu0 %v9419_v50  ;;  %v1877_v41 = vpop.f32.mrf.mxu2  ;;  %v1897_v30 = vpop.f32.mrf.mxu3 }
 0x50c   :  { %v1878_v50 = vadd.f32 %v1877_v41, %v5031_v45  ;;  %v1898_v26 = vadd.f32 %v1897_v30, %v5043_v27 }
 0x50e   :  { %v1939_v63 = vpop.f32.mrf.mxu1  ;;  %v1917_v57 = vpop.f32.mrf.mxu0 }
 0x50f   :  { %v2002_v7 = vadd.f32 %v1939_v63, %v1858_v15  ;;  %v1918_v63 = vadd.f32 %v1917_v57, %v5045_v33 }
 0x515   :  { %v1959_v59 = vpop.f32.mrf.mxu2  ;;  %v1979_v51 = vpop.f32.mrf.mxu3 }
 0x516   :  { %v2003_v56 = vadd.f32 %v1959_v59, %v1878_v50 }
 0x518   :  { %v2010_v60 = vmul.f32 0.5, %v2003_v56 }
 0x528   :  { %v2043_v13 = vpop.f32.mrf.mxu1 }
 0x529   :  { %v2106_v21 = vadd.f32 %v2043_v13, %v429_v43  ;;  %v2006_v43 = vmul.f32 0.5, %v2002_v7 }
 0x52b   :  { %v2110_v23 = vmul.f32 0.5, %v2106_v21 }
 0x52f   :  { %v2063_v53 = vpop.f32.mrf.mxu2  ;;  %v2083_v5 = vpop.f32.mrf.mxu3 }
 0x530   :  { %v2107_v24 = vadd.f32 %v2063_v53, %v430_v3  ;;  %v2108_v53 = vadd.f32 %v2083_v5, %v431_v32 }
 0x532   :  { %v2114_v52 = vmul.f32 0.5, %v2107_v24  ;;  %v1999_v24 = vpop.f32.mrf.mxu0 }
 0x533   :  { %v2005_v7 = vadd.f32 %v1999_v24, %v1918_v63 }
 0x534   :  { %3212 = vtanh.f32 %v2114_v52  ;;  %v390_v52 = vmul.f32 %v8792_v54, %v346_v37 }
 0x535   :  { %3214 = vtanh.f32 %v2110_v23  ;;  %v2004_v23 = vadd.f32 %v1979_v51, %v1898_v26 }
 0x536   :  { %3216 = vtanh.f32 %v2010_v60  ;;  %v432_v56 = vadd.f32 %v4729_v61, %v390_v52 }
 0x537   :  { %3218 = vtanh.f32 %v2108_v53 }
 0x538   :  { %3220 = vtanh.f32 %v2006_v43  ;;  %v2015_v43 = vmul.f32 0.5, %v2005_v7  ;;  %v6930_v7 = vld [vmem:[#allocation3 + $0x1e0] sm:$0xff] }
 0x539   :  { %3222 = vtanh.f32 %v2004_v23 }
 0x53a   :  { %v3213_v3 = vpop.eup %3212 }
 0x53b   :  { %v3215_v13 = vpop.eup %3214  ;;  %v2116_v41 = vmul.f32 0.5, %v3213_v3 }
 0x53c   :  { %v2112_v21 = vmul.f32 0.5, %v3215_v13  ;;  %v3217_v15 = vpop.eup %3216 }
 0x53d   :  { %v2117_v59 = vadd.f32 0.5, %v2116_v41  ;;  %v3219_v32 = vpop.eup %3218  ;;  %v2012_v53 = vmul.f32 0.5, %v3217_v15 }
 0x53e   :  { %v2113_v4 = vadd.f32 0.5, %v2112_v21  ;;  %v3221_v3 = vpop.eup %3220 }
 0x53f   :  { %v2123_v5 = vmul.f32 %v2117_v59, %v6596_v34  ;;  %v2008_v30 = vmul.f32 0.5, %v3221_v3  ;;  %v2013_v57 = vadd.f32 0.5, %v2012_v53  ;;  %v3223_v51 = vpop.eup %3222  ;;  %v6939_v3 = vld [vmem:[#allocation7 + $0x1d8] sm:$0xff]  ;;  %v6942_v53 = vld [vmem:[#allocation3 + $0x1c0] sm:$0xff] }
 0x540   :  { %v2124_v37 = vmul.f32 %v3219_v32, %v2113_v4 }
 0x541   :  { %v2009_v21 = vadd.f32 0.5, %v2008_v30  ;;  %v2019_v34 = vmul.f32 %v2013_v57, %v6600_v11  ;;  %v6927_v11 = vld [vmem:[#allocation7 + $0x1f8] sm:$0xff]  ;;  %v6955_v57 = vld [vmem:[#allocation3 + $0x1a8] sm:$0xff] }
 0x542   :  { %v6910_v41 = vadd.f32 %v2124_v37, %v2123_v5  ;;  %v6936_v5 = vld [vmem:[#allocation3 + $0x1f0] sm:$0xff]  ;;  %v6945_v37 = vld [vmem:[#allocation3 + $0x1c8] sm:$0xff] }
 0x543   :  { %v2020_v59 = vmul.f32 %v3223_v51, %v2009_v21  ;;  %v6958_v21 = vld [vmem:[#allocation3 + $0x1b0] sm:$0xff] }
 0x545   :  { %v6914_v4 = vadd.f32 %v2020_v59, %v2019_v34  ;;  %v6970_v34 = vld [vmem:[#allocation3 + $0x190] sm:$0xff] }
 0x546   :  { %v6985_v59 = vld [vmem:[#allocation3 + $0x170] sm:$0xff] }
 0x549   :  { %v2103_v50 = vpop.f32.mrf.mxu0 }
 0x54a   :  { %v2109_v60 = vadd.f32 %v2103_v50, %v432_v56  ;;  %v2132_v56 = vpop.permute.xlu2 %2131  ;;  %v6933_v50 = vld [vmem:[#allocation3 + $0x1e8] sm:$0xff] }
 0x54b   :  { %vm2133_vm13 = vcmp.eq.s32.totalorder %v2132_v56, 1  ;;  %v7002_v56 = vld [vmem:[#allocation3 + $0x128] sm:$0xff] }
 0x54c   :  { %v2119_v13 = vmul.f32 0.5, %v2109_v60 }
 0x54e   :  { %3224 = vtanh.f32 %v2119_v13  ;;  %v6948_v13 = vld [vmem:[#allocation3 + $0x1d0] sm:$0xff] }
 0x54f   :  { %3226 = vtanh.f32 %v2015_v43  ;;  %v6952_v43 = vld [vmem:[#allocation3 + $0x1a0] sm:$0xff] }
 0x550   :  { %3228 = vtanh.f32 %v6910_v41 }
 0x551   :  { %3230 = vtanh.f32 %v6914_v4 }
 0x554   :  { %v3225_v24 = vpop.eup %3224 }
 0x555   :  { %v2121_v52 = vmul.f32 0.5, %v3225_v24  ;;  %v3227_v26 = vpop.eup %3226  ;;  %v6964_v24 = vld [vmem:[#allocation3 + $0x180] sm:$0xff] }
 0x556   :  { %v3229_v15 = vpop.eup %3228  ;;  %v2017_v23 = vmul.f32 0.5, %v3227_v26  ;;  %v6989_v26 = vld [vmem:[#allocation3 + $0x140] sm:$0xff] }
 0x557   :  { %v2122_v63 = vadd.f32 0.5, %v2121_v52  ;;  %v3231_v30 = vpop.eup %3230  ;;  %v6982_v52 = vld [vmem:[#allocation3 + $0x168] sm:$0xff] }
 0x558   :  { %v2018_v60 = vadd.f32 0.5, %v2017_v23  ;;  %v7009_v23 = vld [vmem:[#allocation3 + $0x100] sm:$0xff] }
 0x559   :  { %v6916_v32 = vmul.f32 %v3229_v15, %v2122_v63  ;;  %v6992_v63 = vld [vmem:[#allocation3 + $0x148] sm:$0xff]  ;;  %v6999_v15 = vld [vmem:[#allocation3 + $0x120] sm:$0xff] }
 0x55a   :  { %v6961_v51 = vmul.f32 %v3231_v30, %v2018_v60  ;;  %v7012_v60 = vld [vmem:[#allocation3 + $0x108] sm:$0xff]  ;;  %v7019_v30 = vld [vmem:[#allocation3 + $0xe0] sm:$0xff] }
 0x55b   :  { %3088 = vmatmul.msk.f32.vlgmr.msra.gmra.mxu1 %vm2133_vm13, %v6916_v32  ;;  %3089 = vmatmul.msk.f32.vlgmr.msra.gmra.mxu2 %vm2133_vm13, %v6916_v32  ;;  %9425 = vst [vmem:[#allocation14_spill] sm:$0xff] %v7012_v60 }
 0x55c   :  { %3090 = vmatmul.msk.f32.vlgmr.msrb.gmra.mxu3 %vm2133_vm13, %v6916_v32  ;;  %3091 = vmatmul.msk.f32.vlgmr.msra.gmra.mxu0 %vm2133_vm13, %v6916_v32  ;;  %9423 = vst [vmem:[#allocation18_spill] sm:$0xff] %v6961_v51 }
 0x55d   :  { %2297 = vmatpush.msra.mxu1 %v6927_v11  ;;  %2341 = vmatpush.msra.mxu2 %v6930_v7 }
 0x55e   :  { %2361 = vmatpush.msrb.mxu3 %v6933_v50  ;;  %2381 = vmatpush.msra.mxu0 %v6936_v5 }
 0x55f   :  { %2298 = vmatpush.msra.mxu1 %v6939_v3  ;;  %2342 = vmatpush.msra.mxu2 %v6942_v53 }
 0x560   :  { %2362 = vmatpush.msrb.mxu3 %v6945_v37  ;;  %2382 = vmatpush.msra.mxu0 %v6948_v13 }
 0x561   :  { %2299 = vmatpush.msra.mxu1 %v6621_v20  ;;  %2343 = vmatpush.msra.mxu2 %v6952_v43  ;;  %v6967_v20 = vld [vmem:[#allocation3 + $0x188] sm:$0xff] }
 0x562   :  { %2363 = vmatpush.msrb.mxu3 %v6955_v57  ;;  %2383 = vmatpush.msra.mxu0 %v6958_v21 }
 0x563   :  { %2300 = vmatpush.msra.mxu1 %v6629_v16  ;;  %2344 = vmatpush.msra.mxu2 %v6964_v24  ;;  %v6979_v16 = vld [vmem:[#allocation3 + $0x160] sm:$0xff] }
 0x564   :  { %2364 = vmatpush.msrb.mxu3 %v6967_v20  ;;  %2384 = vmatpush.msra.mxu0 %v6970_v34 }
 0x565   :  { %3092 = vmatmul.msk.f32.vlgmr.msrb.gmra.mxu1 %vm2133_vm13, %v6916_v32  ;;  %2253 = vmatmul.f32.vlgmr.msrb.gmra.mxu2 %v6961_v51 }
 0x566   :  { %2273 = vmatmul.f32.vlgmr.msra.gmra.mxu3 %v6961_v51  ;;  %2293 = vmatmul.f32.vlgmr.msrb.gmra.mxu0 %v6961_v51 }
 0x567   :  { %2301 = vmatpush.msra.mxu1 %v6640_v2  ;;  %2345 = vmatpush.msra.mxu2 %v6979_v16  ;;  %v6995_v2 = vld [vmem:[#allocation3 + $0x150] sm:$0xff] }
 0x568   :  { %2365 = vmatpush.msrb.mxu3 %v6982_v52  ;;  %2385 = vmatpush.msra.mxu0 %v6985_v59 }
 0x569   :  { %2302 = vmatpush.msra.mxu1 %v6646_v1  ;;  %2346 = vmatpush.msra.mxu2 %v6989_v26  ;;  %v7005_v1 = vld [vmem:[#allocation3 + $0x130] sm:$0xff] }
 0x56a   :  { %2366 = vmatpush.msrb.mxu3 %v6992_v63  ;;  %2386 = vmatpush.msra.mxu0 %v6995_v2  ;;  %9424 = vst [vmem:[#allocation20_spill] sm:$0xff] %v7005_v1 }
 0x56b   :  { %2303 = vmatpush.msra.mxu1 %v6652_v18  ;;  %2347 = vmatpush.msra.mxu2 %v6999_v15  ;;  %v7015_v18 = vld [vmem:[#allocation3 + $0x110] sm:$0xff] }
 0x56c   :  { %2367 = vmatpush.msrb.mxu3 %v7002_v56  ;;  %2387 = vmatpush.msra.mxu0 %v7005_v1  ;;  %9426 = vst [vmem:[#allocation21_spill] sm:$0xff] %v7015_v18  ;;  %v7022_v1 = vld [vmem:[#allocation3 + $0xe8] sm:$0xff] }
 0x56d   :  { %2304 = vmatpush.msra.mxu1 %v6658_v38  ;;  %2348 = vmatpush.msra.mxu2 %v7009_v23  ;;  %9427 = vst [vmem:[#allocation23_spill] sm:$0xff] %v7022_v1  ;;  %v7025_v38 = vld [vmem:[#allocation3 + $0xf0] sm:$0xff] }
 0x56e   :  { %2368 = vmatpush.msrb.mxu3 %v7012_v60  ;;  %2388 = vmatpush.msra.mxu0 %v7015_v18  ;;  %9428 = vst [vmem:[#allocation16_spill] sm:$0xff] %v7025_v38  ;;  %v7029_v60 = vld [vmem:[#allocation3 + $0xc0] sm:$0xff]  ;;  %v7032_v18 = vld [vmem:[#allocation3 + $0xc8] sm:$0xff] }
 0x56f   :  { %2305 = vmatpush.msra.mxu1 %v6664_v46  ;;  %2349 = vmatpush.msra.mxu2 %v7019_v30  ;;  %9429 = vst [vmem:[#allocation19_spill] sm:$0xff] %v7032_v18  ;;  %v7035_v46 = vld [vmem:[#allocation3 + $0xd0] sm:$0xff] }
 0x570   :  { %2369 = vmatpush.msrb.mxu3 %v7022_v1  ;;  %2389 = vmatpush.msra.mxu0 %v7025_v38  ;;  %9430 = vst [vmem:[#allocation37_spill] sm:$0xff] %v7035_v46  ;;  %v7039_v1 = vld [vmem:[#allocation3 + $0xa0] sm:$0xff]  ;;  %v7042_v38 = vld [vmem:[#allocation3 + $0xa8] sm:$0xff] }
 0x571   :  { %2306 = vmatpush.msra.mxu1 %v6670_v17  ;;  %2350 = vmatpush.msra.mxu2 %v7029_v60  ;;  %9431 = vst [vmem:[#allocation101_spill] sm:$0xff] %v7042_v38  ;;  %v7045_v17 = vld [vmem:[#allocation3 + $0xb0] sm:$0xff] }
 0x572   :  { %2370 = vmatpush.msrb.mxu3 %v7032_v18  ;;  %2390 = vmatpush.msra.mxu0 %v7035_v46  ;;  %9432 = vst [vmem:[#allocation39_spill] sm:$0xff] %v7045_v17  ;;  %v7049_v18 = vld [vmem:[#allocation3 + $0x80] sm:$0xff]  ;;  %v7052_v46 = vld [vmem:[#allocation3 + $0x88] sm:$0xff] }
 0x573   :  { %2307 = vmatpush.msra.mxu1 %v6676_v22  ;;  %2351 = vmatpush.msra.mxu2 %v7039_v1  ;;  %9433 = vst [vmem:[#allocation22_spill] sm:$0xff] %v7052_v46  ;;  %v7055_v22 = vld [vmem:[#allocation3 + $0x90] sm:$0xff] }
 0x574   :  { %2371 = vmatpush.msrb.mxu3 %v7042_v38  ;;  %2391 = vmatpush.msra.mxu0 %v7045_v17  ;;  %9434 = vst [vmem:[#allocation41_spill] sm:$0xff] %v7055_v22  ;;  %v7059_v38 = vld [vmem:[#allocation3 + $0x60] sm:$0xff]  ;;  %v7062_v17 = vld [vmem:[#allocation3 + $0x68] sm:$0xff] }
 0x575   :  { %2308 = vmatpush.msra.mxu1 %v6682_v44  ;;  %2352 = vmatpush.msra.mxu2 %v7049_v18  ;;  %9435 = vst [vmem:[#allocation104_spill] sm:$0xff] %v7062_v17  ;;  %v7065_v44 = vld [vmem:[#allocation3 + $0x70] sm:$0xff] }
 0x576   :  { %2372 = vmatpush.msrb.mxu3 %v7052_v46  ;;  %2392 = vmatpush.msra.mxu0 %v7055_v22  ;;  %9436 = vst [vmem:[#allocation43_spill] sm:$0xff] %v7065_v44  ;;  %v7069_v46 = vld [vmem:[#allocation3 + $0x40] sm:$0xff]  ;;  %v7072_v22 = vld [vmem:[#allocation3 + $0x48] sm:$0xff] }
 0x577   :  { %2309 = vmatpush.msra.mxu1 %v6688_v12  ;;  %2353 = vmatpush.msra.mxu2 %v7059_v38  ;;  %9437 = vst [vmem:[#allocation24_spill] sm:$0xff] %v7072_v22  ;;  %v7075_v12 = vld [vmem:[#allocation3 + $0x50] sm:$0xff] }
 0x578   :  { %2373 = vmatpush.msrb.mxu3 %v7062_v17  ;;  %2393 = vmatpush.msra.mxu0 %v7065_v44  ;;  %9438 = vst [vmem:[#allocation45_spill] sm:$0xff] %v7075_v12  ;;  %v7079_v17 = vld [vmem:[#allocation3 + $0x20] sm:$0xff]  ;;  %v7082_v44 = vld [vmem:[#allocation3 + $0x28] sm:$0xff] }
 0x579   :  { %2310 = vmatpush.msra.mxu1 %v6694_v31  ;;  %2354 = vmatpush.msra.mxu2 %v7069_v46  ;;  %9439 = vst [vmem:[#allocation107_spill] sm:$0xff] %v7079_v17  ;;  %v7085_v31 = vld [vmem:[#allocation3 + $0x30] sm:$0xff] }
 0x57a   :  { %2374 = vmatpush.msrb.mxu3 %v7072_v22  ;;  %2394 = vmatpush.msra.mxu0 %v7075_v12  ;;  %9440 = vst [vmem:[#allocation47_spill] sm:$0xff] %v7082_v44  ;;  %v7089_v22 = vld [vmem:[#allocation3] sm:$0xff]  ;;  %v7092_v12 = vld [vmem:[#allocation3 + $0x8] sm:$0xff] }
 0x57b   :  { %2311 = vmatpush.msra.mxu1 %v6700_v8  ;;  %2355 = vmatpush.msra.mxu2 %v7079_v17  ;;  %9441 = vst [vmem:[#allocation25_spill] sm:$0xff] %v7085_v31  ;;  %v7095_v8 = vld [vmem:[#allocation3 + $0x10] sm:$0xff] }
 0x57c   :  { %2375 = vmatpush.msrb.mxu3 %v7082_v44  ;;  %2395 = vmatpush.msra.mxu0 %v7085_v31  ;;  %9442 = vst [vmem:[#allocation49_spill] sm:$0xff] %v7089_v22  ;;  %v7117_v31 = vld [vmem:[#allocation5 + $0x230] sm:$0xff] }
 0x57d   :  { %2312 = vmatpush.msra.mxu1 %v6706_v47  ;;  %2356 = vmatpush.msra.mxu2 %v7089_v22  ;;  %9443 = vst [vmem:[#allocation111_spill] sm:$0xff] %v7092_v12  ;;  %v7102_v47 = vld [vmem:[#allocation3 + $0x1f8] sm:$0xff] }
 0x57e   :  { %2376 = vmatpush.msrb.mxu3 %v7092_v12  ;;  %9444 = vst [vmem:[#allocation26_spill] sm:$0xff] %v7095_v8  ;;  %2396 = vmatpush.msra.mxu0 %v7095_v8  ;;  %v7105_v22 = vld [vmem:[#allocation5 + $0x258] sm:$0xff]  ;;  %v7108_v12 = vld [vmem:[#allocation5 + $0x260] sm:$0xff]  ;;  %v7111_v8 = vld [vmem:[#allocation5 + $0x268] sm:$0xff] }
 0x57f   :  { %2313 = vmatmul.f32.vlgmr.msra.gmra.mxu1 %v6961_v51  ;;  %2357 = vmatmul.f32.vlgmr.msra.gmra.mxu2 %v6916_v32  ;;  %9445 = vst [vmem:[#allocation51_spill] sm:$0xff] %v7102_v47  ;;  %v7114_v51 = vld [vmem:[#allocation3 + $0x1d8] sm:$0xff] }
 0x580   :  { %2377 = vmatmul.f32.vlgmr.msrb.gmra.mxu3 %v6916_v32  ;;  %2397 = vmatmul.f32.vlgmr.msra.gmra.mxu0 %v6916_v32  ;;  %9446 = vst [vmem:[#allocation53_spill] sm:$0xff] %v7105_v22 }
 0x581   :  { %2401 = vmatpush.msrb.mxu1 %v7102_v47  ;;  %2450 = vmatpush.msrb.mxu2 %v7105_v22  ;;  %9447 = vst [vmem:[#allocation115_spill] sm:$0xff] %v7108_v12  ;;  %v7120_v47 = vld [vmem:[#allocation5 + $0x238] sm:$0xff]  ;;  %v7123_v22 = vld [vmem:[#allocation5 + $0x240] sm:$0xff] }
 0x582   :  { %2470 = vmatpush.msra.mxu3 %v7108_v12  ;;  %9448 = vst [vmem:[#allocation27_spill] sm:$0xff] %v7111_v8  ;;  %2490 = vmatpush.msrb.mxu0 %v7111_v8  ;;  %v7126_v12 = vld [vmem:[#allocation3 + $0x1b8] sm:$0xff]  ;;  %v7129_v8 = vld [vmem:[#allocation5 + $0x208] sm:$0xff] }
 0x583   :  { %9449 = vst [vmem:[#allocation55_spill] sm:$0xff] %v7114_v51  ;;  %2402 = vmatpush.msrb.mxu1 %v7114_v51  ;;  %2451 = vmatpush.msrb.mxu2 %v7117_v31  ;;  %v7132_v51 = vld [vmem:[#allocation5 + $0x210] sm:$0xff] }
 0x584   :  { %9450 = vst [vmem:[#allocation57_spill] sm:$0xff] %v7117_v31  ;;  %2471 = vmatpush.msra.mxu3 %v7120_v47  ;;  %2491 = vmatpush.msrb.mxu0 %v7123_v22  ;;  %v7135_v31 = vld [vmem:[#allocation5 + $0x218] sm:$0xff] }
 0x585   :  { %9451 = vst [vmem:[#allocation119_spill] sm:$0xff] %v7120_v47  ;;  %2403 = vmatpush.msrb.mxu1 %v7126_v12  ;;  %2452 = vmatpush.msrb.mxu2 %v7129_v8  ;;  %v7138_v47 = vld [vmem:[#allocation3 + $0x198] sm:$0xff] }
 0x586   :  { %9452 = vst [vmem:[#allocation59_spill] sm:$0xff] %v7123_v22  ;;  %2472 = vmatpush.msra.mxu3 %v7132_v51  ;;  %2492 = vmatpush.msrb.mxu0 %v7135_v31  ;;  %v7141_v22 = vld [vmem:[#allocation5 + $0x1e0] sm:$0xff] }
 0x587   :  { %9453 = vst [vmem:[#allocation28_spill] sm:$0xff] %v7126_v12  ;;  %2404 = vmatpush.msrb.mxu1 %v7138_v47  ;;  %2453 = vmatpush.msrb.mxu2 %v7141_v22  ;;  %v7144_v12 = vld [vmem:[#allocation5 + $0x1e8] sm:$0xff] }
 0x588   :  { %9454 = vst [vmem:[#allocation61_spill] sm:$0xff] %v7129_v8  ;;  %2473 = vmatpush.msra.mxu3 %v7144_v12  ;;  %v7147_v8 = vld [vmem:[#allocation5 + $0x1f0] sm:$0xff] }
 0x589   :  { %9455 = vst [vmem:[#allocation123_spill] sm:$0xff] %v7132_v51  ;;  %2493 = vmatpush.msrb.mxu0 %v7147_v8  ;;  %v7150_v51 = vld [vmem:[#allocation3 + $0x178] sm:$0xff] }
 0x58a   :  { %9456 = vst [vmem:[#allocation63_spill] sm:$0xff] %v7135_v31  ;;  %2405 = vmatpush.msrb.mxu1 %v7150_v51  ;;  %v7153_v31 = vld [vmem:[#allocation5 + $0x1b8] sm:$0xff] }
 0x58b   :  { %9457 = vst [vmem:[#allocation29_spill] sm:$0xff] %v7138_v47  ;;  %2454 = vmatpush.msrb.mxu2 %v7153_v31  ;;  %v7156_v47 = vld [vmem:[#allocation5 + $0x1c0] sm:$0xff] }
 0x58c   :  { %9458 = vst [vmem:[#allocation65_spill] sm:$0xff] %v7141_v22  ;;  %2474 = vmatpush.msra.mxu3 %v7156_v47  ;;  %v7159_v22 = vld [vmem:[#allocation5 + $0x1c8] sm:$0xff] }
 0x58d   :  { %9459 = vst [vmem:[#allocation30_spill] sm:$0xff] %v7144_v12  ;;  %2494 = vmatpush.msrb.mxu0 %v7159_v22  ;;  %v7162_v12 = vld [vmem:[#allocation3 + $0x158] sm:$0xff] }
 0x58e   :  { %9460 = vst [vmem:[#allocation67_spill] sm:$0xff] %v7147_v8  ;;  %2406 = vmatpush.msrb.mxu1 %v7162_v12  ;;  %v7165_v8 = vld [vmem:[#allocation5 + $0x190] sm:$0xff] }
 0x58f   :  { %9461 = vst [vmem:[#allocation128_spill] sm:$0xff] %v7150_v51  ;;  %2455 = vmatpush.msrb.mxu2 %v7165_v8  ;;  %v7168_v51 = vld [vmem:[#allocation5 + $0x198] sm:$0xff] }
 0x590   :  { %9462 = vst [vmem:[#allocation69_spill] sm:$0xff] %v7153_v31  ;;  %2475 = vmatpush.msra.mxu3 %v7168_v51  ;;  %v7171_v31 = vld [vmem:[#allocation5 + $0x1a0] sm:$0xff] }
 0x591   :  { %9463 = vst [vmem:[#allocation31_spill] sm:$0xff] %v7156_v47  ;;  %2495 = vmatpush.msrb.mxu0 %v7171_v31  ;;  %v7174_v47 = vld [vmem:[#allocation3 + $0x138] sm:$0xff] }
 0x592   :  { %9464 = vst [vmem:[#allocation71_spill] sm:$0xff] %v7159_v22  ;;  %2407 = vmatpush.msrb.mxu1 %v7174_v47  ;;  %v7177_v22 = vld [vmem:[#allocation5 + $0x168] sm:$0xff] }
 0x593   :  { %9465 = vst [vmem:[#allocation132_spill] sm:$0xff] %v7162_v12  ;;  %2456 = vmatpush.msrb.mxu2 %v7177_v22  ;;  %v7180_v12 = vld [vmem:[#allocation5 + $0x170] sm:$0xff] }
 0x594   :  { %9466 = vst [vmem:[#allocation73_spill] sm:$0xff] %v7165_v8  ;;  %2476 = vmatpush.msra.mxu3 %v7180_v12  ;;  %v7183_v8 = vld [vmem:[#allocation5 + $0x178] sm:$0xff] }
 0x595   :  { %9467 = vst [vmem:[#allocation137_spill] sm:$0xff] %v7168_v51  ;;  %2496 = vmatpush.msrb.mxu0 %v7183_v8  ;;  %v7186_v51 = vld [vmem:[#allocation3 + $0x118] sm:$0xff] }
 0x596   :  { %9468 = vst [vmem:[#allocation75_spill] sm:$0xff] %v7171_v31  ;;  %2408 = vmatpush.msrb.mxu1 %v7186_v51  ;;  %v7189_v31 = vld [vmem:[#allocation5 + $0x140] sm:$0xff] }
 0x597   :  { %9469 = vst [vmem:[#allocation32_spill] sm:$0xff] %v7174_v47  ;;  %2457 = vmatpush.msrb.mxu2 %v7189_v31  ;;  %v7192_v47 = vld [vmem:[#allocation5 + $0x148] sm:$0xff] }
 0x598   :  { %9470 = vst [vmem:[#allocation77_spill] sm:$0xff] %v7177_v22  ;;  %2477 = vmatpush.msra.mxu3 %v7192_v47  ;;  %v7195_v22 = vld [vmem:[#allocation5 + $0x150] sm:$0xff] }
 0x599   :  { %9471 = vst [vmem:[#allocation141_spill] sm:$0xff] %v7180_v12  ;;  %2497 = vmatpush.msrb.mxu0 %v7195_v22  ;;  %v7198_v12 = vld [vmem:[#allocation3 + $0xf8] sm:$0xff] }
 0x59a   :  { %9472 = vst [vmem:[#allocation79_spill] sm:$0xff] %v7183_v8  ;;  %2409 = vmatpush.msrb.mxu1 %v7198_v12  ;;  %v7201_v8 = vld [vmem:[#allocation5 + $0x118] sm:$0xff] }
 0x59b   :  { %9473 = vst [vmem:[#allocation33_spill] sm:$0xff] %v7186_v51  ;;  %2458 = vmatpush.msrb.mxu2 %v7201_v8  ;;  %v7204_v51 = vld [vmem:[#allocation5 + $0x120] sm:$0xff] }
 0x59c   :  { %9474 = vst [vmem:[#allocation34_spill] sm:$0xff] %v7189_v31  ;;  %2478 = vmatpush.msra.mxu3 %v7204_v51  ;;  %v7207_v31 = vld [vmem:[#allocation5 + $0x128] sm:$0xff] }
 0x59d   :  { %9475 = vst [vmem:[#allocation145_spill] sm:$0xff] %v7192_v47  ;;  %2498 = vmatpush.msrb.mxu0 %v7207_v31  ;;  %v7210_v47 = vld [vmem:[#allocation3 + $0xd8] sm:$0xff] }
 0x59e   :  { %9476 = vst [vmem:[#allocation81_spill] sm:$0xff] %v7195_v22  ;;  %2410 = vmatpush.msrb.mxu1 %v7210_v47  ;;  %v7213_v22 = vld [vmem:[#allocation5 + $0xf0] sm:$0xff] }
 0x59f   :  { %9477 = vst [vmem:[#allocation83_spill] sm:$0xff] %v7198_v12  ;;  %2459 = vmatpush.msrb.mxu2 %v7213_v22  ;;  %v7216_v12 = vld [vmem:[#allocation5 + $0xf8] sm:$0xff] }
 0x5a0   :  { %9478 = vst [vmem:[#allocation85_spill] sm:$0xff] %v7201_v8  ;;  %2479 = vmatpush.msra.mxu3 %v7216_v12  ;;  %v7219_v8 = vld [vmem:[#allocation5 + $0x100] sm:$0xff] }
 0x5a1   :  { %9479 = vst [vmem:[#allocation150_spill] sm:$0xff] %v7204_v51  ;;  %2499 = vmatpush.msrb.mxu0 %v7219_v8  ;;  %v7222_v51 = vld [vmem:[#allocation3 + $0xb8] sm:$0xff] }
 0x5a2   :  { %9480 = vst [vmem:[#allocation35_spill] sm:$0xff] %v7207_v31  ;;  %2411 = vmatpush.msrb.mxu1 %v7222_v51  ;;  %v7225_v31 = vld [vmem:[#allocation5 + $0xc8] sm:$0xff] }
 0x5a3   :  { %9481 = vst [vmem:[#allocation36_spill] sm:$0xff] %v7210_v47  ;;  %2460 = vmatpush.msrb.mxu2 %v7225_v31  ;;  %v7228_v47 = vld [vmem:[#allocation5 + $0xd0] sm:$0xff] }
 0x5a4   :  { %9482 = vst [vmem:[#allocation89_spill] sm:$0xff] %v7213_v22  ;;  %2480 = vmatpush.msra.mxu3 %v7228_v47  ;;  %v7231_v22 = vld [vmem:[#allocation5 + $0xd8] sm:$0xff] }
 0x5a5   :  { %9483 = vst [vmem:[#allocation155_spill] sm:$0xff] %v7216_v12  ;;  %2500 = vmatpush.msrb.mxu0 %v7231_v22  ;;  %v7234_v12 = vld [vmem:[#allocation3 + $0x98] sm:$0xff] }
 0x5a6   :  { %9484 = vst [vmem:[#allocation87_spill] sm:$0xff] %v7219_v8  ;;  %2412 = vmatpush.msrb.mxu1 %v7234_v12  ;;  %v7237_v8 = vld [vmem:[#allocation5 + $0xa0] sm:$0xff] }
 0x5a7   :  { %9485 = vst [vmem:[#allocation91_spill] sm:$0xff] %v7222_v51  ;;  %2461 = vmatpush.msrb.mxu2 %v7237_v8  ;;  %v7240_v51 = vld [vmem:[#allocation5 + $0xa8] sm:$0xff] }
 0x5a8   :  { %9486 = vst [vmem:[#allocation93_spill] sm:$0xff] %v7225_v31  ;;  %2481 = vmatpush.msra.mxu3 %v7240_v51  ;;  %v7243_v31 = vld [vmem:[#allocation5 + $0xb0] sm:$0xff] }
 0x5a9   :  { %9487 = vst [vmem:[#allocation38_spill] sm:$0xff] %v7228_v47  ;;  %2501 = vmatpush.msrb.mxu0 %v7243_v31  ;;  %v7246_v47 = vld [vmem:[#allocation3 + $0x78] sm:$0xff] }
 0x5aa   :  { %9488 = vst [vmem:[#allocation161_spill] sm:$0xff] %v7231_v22  ;;  %2413 = vmatpush.msrb.mxu1 %v7246_v47  ;;  %v7249_v22 = vld [vmem:[#allocation5 + $0x78] sm:$0xff] }
 0x5ab   :  { %9489 = vst [vmem:[#allocation95_spill] sm:$0xff] %v7234_v12  ;;  %2462 = vmatpush.msrb.mxu2 %v7249_v22  ;;  %v7252_v12 = vld [vmem:[#allocation5 + $0x80] sm:$0xff] }
 0x5ac   :  { %9490 = vst [vmem:[#allocation97_spill] sm:$0xff] %v7237_v8  ;;  %2482 = vmatpush.msra.mxu3 %v7252_v12  ;;  %v7255_v8 = vld [vmem:[#allocation5 + $0x88] sm:$0xff] }
 0x5ad   :  { %9491 = vst [vmem:[#allocation42_spill] sm:$0xff] %v7240_v51  ;;  %2502 = vmatpush.msrb.mxu0 %v7255_v8  ;;  %v7258_v51 = vld [vmem:[#allocation3 + $0x58] sm:$0xff] }
 0x5ae   :  { %9492 = vst [vmem:[#allocation166_spill] sm:$0xff] %v7243_v31  ;;  %2414 = vmatpush.msrb.mxu1 %v7258_v51  ;;  %v7261_v31 = vld [vmem:[#allocation5 + $0x50] sm:$0xff] }
 0x5af   :  { %9493 = vst [vmem:[#allocation40_spill] sm:$0xff] %v7246_v47  ;;  %2463 = vmatpush.msrb.mxu2 %v7261_v31  ;;  %v7264_v47 = vld [vmem:[#allocation5 + $0x58] sm:$0xff] }
 0x5b0   :  { %9494 = vst [vmem:[#allocation46_spill] sm:$0xff] %v7249_v22  ;;  %2483 = vmatpush.msra.mxu3 %v7264_v47  ;;  %v7267_v22 = vld [vmem:[#allocation5 + $0x60] sm:$0xff] }
 0x5b1   :  { %9495 = vst [vmem:[#allocation50_spill] sm:$0xff] %v7252_v12  ;;  %2503 = vmatpush.msrb.mxu0 %v7267_v22  ;;  %v7270_v12 = vld [vmem:[#allocation3 + $0x38] sm:$0xff] }
 0x5b2   :  { %9496 = vst [vmem:[#allocation103_spill] sm:$0xff] %v7255_v8  ;;  %2415 = vmatpush.msrb.mxu1 %v7270_v12  ;;  %v7273_v8 = vld [vmem:[#allocation5 + $0x28] sm:$0xff] }
 0x5b3   :  { %9497 = vst [vmem:[#allocation54_spill] sm:$0xff] %v7258_v51  ;;  %2464 = vmatpush.msrb.mxu2 %v7273_v8  ;;  %v7276_v51 = vld [vmem:[#allocation5 + $0x30] sm:$0xff] }
 0x5b4   :  { %9498 = vst [vmem:[#allocation99_spill] sm:$0xff] %v7261_v31  ;;  %2484 = vmatpush.msra.mxu3 %v7276_v51  ;;  %v7279_v31 = vld [vmem:[#allocation5 + $0x38] sm:$0xff] }
 0x5b5   :  { %9499 = vst [vmem:[#allocation106_spill] sm:$0xff] %v7264_v47  ;;  %2504 = vmatpush.msrb.mxu0 %v7279_v31  ;;  %v7282_v47 = vld [vmem:[#allocation3 + $0x18] sm:$0xff] }
 0x5b6   :  { %9500 = vst [vmem:[#allocation48_spill] sm:$0xff] %v7267_v22  ;;  %2416 = vmatpush.msrb.mxu1 %v7282_v47  ;;  %v7285_v22 = vld [vmem:[#allocation5] sm:$0xff] }
 0x5b7   :  { %9501 = vst [vmem:[#allocation109_spill] sm:$0xff] %v7270_v12  ;;  %2465 = vmatpush.msrb.mxu2 %v7285_v22  ;;  %2417 = vmatmul.f32.vlgmr.msrb.gmra.mxu1 %v6916_v32  ;;  %v7289_v12 = vld [vmem:[#allocation5 + $0x8] sm:$0xff] }
 0x5b8   :  { %9502 = vst [vmem:[#allocation44_spill] sm:$0xff] %v7273_v8  ;;  %2485 = vmatpush.msra.mxu3 %v7289_v12  ;;  %v7292_v8 = vld [vmem:[#allocation5 + $0x270] sm:$0xff]  ;;  %v7304_v32 = vld [vmem:[#allocation5 + $0x248] sm:$0xff] }
 0x5b9   :  { %9503 = vst [vmem:[#allocation62_spill] sm:$0xff] %v7276_v51  ;;  %2510 = vmatpush.msra.mxu1 %v7292_v8  ;;  %v7295_v51 = vld [vmem:[#allocation5 + $0x10] sm:$0xff] }
 0x5ba   :  { %9504 = vst [vmem:[#allocation113_spill] sm:$0xff] %v7279_v31  ;;  %2505 = vmatpush.msrb.mxu0 %v7295_v51  ;;  %v7298_v31 = vld [vmem:[#allocation5 + $0x278] sm:$0xff] }
 0x5bb   :  { %9505 = vst [vmem:[#allocation58_spill] sm:$0xff] %v7282_v47  ;;  %2530 = vmatpush.msra.mxu2 %v7298_v31  ;;  %v7301_v47 = vld [vmem:[#allocation7 + $0x1e0] sm:$0xff]  ;;  %2511 = vmatpush.msra.mxu1 %v7304_v32 }
 0x5bc   :  { %9506 = vst [vmem:[#allocation66_spill] sm:$0xff] %v7285_v22  ;;  %2552 = vmatpush.msrb.mxu3 %v7301_v47  ;;  %2572 = vmatpush.msra.mxu0 %v6785_v0  ;;  %v7324_v0 = vld [vmem:[#allocation5 + $0x1f8] sm:$0xff] }
 0x5bd   :  { %9507 = vst [vmem:[#allocation117_spill] sm:$0xff] %v7289_v12  ;;  %v7308_v12 = vld [vmem:[#allocation5 + $0x250] sm:$0xff] }
 0x5be   :  { %9508 = vst [vmem:[#allocation52_spill] sm:$0xff] %v7292_v8  ;;  %2531 = vmatpush.msra.mxu2 %v7308_v12  ;;  %v7311_v8 = vld [vmem:[#allocation7 + $0x1c0] sm:$0xff]  ;;  %2573 = vmatpush.msra.mxu0 %v6791_v36  ;;  %v7334_v36 = vld [vmem:[#allocation5 + $0x1d0] sm:$0xff] }
 0x5bf   :  { %9509 = vst [vmem:[#allocation60_spill] sm:$0xff] %v7295_v51  ;;  %2553 = vmatpush.msrb.mxu3 %v7311_v8  ;;  %v7314_v51 = vld [vmem:[#allocation5 + $0x220] sm:$0xff] }
 0x5c0   :  { %9510 = vst [vmem:[#allocation121_spill] sm:$0xff] %v7298_v31  ;;  %2512 = vmatpush.msra.mxu1 %v7314_v51  ;;  %2574 = vmatpush.msra.mxu0 %v6797_v48  ;;  %v7344_v48 = vld [vmem:[#allocation5 + $0x1a8] sm:$0xff] }
 0x5c1   :  { %9511 = vst [vmem:[#allocation56_spill] sm:$0xff] %v7301_v47  ;;  %v7318_v47 = vld [vmem:[#allocation5 + $0x228] sm:$0xff] }
 0x5c2   :  { %9512 = vst [vmem:[#allocation74_spill] sm:$0xff] %v7304_v32  ;;  %2532 = vmatpush.msra.mxu2 %v7318_v47  ;;  %v7321_v32 = vld [vmem:[#allocation7 + $0x1a0] sm:$0xff]  ;;  %2513 = vmatpush.msra.mxu1 %v7324_v0 }
 0x5c3   :  { %9513 = vst [vmem:[#allocation70_spill] sm:$0xff] %v7308_v12  ;;  %2554 = vmatpush.msrb.mxu3 %v7321_v32  ;;  %2575 = vmatpush.msra.mxu0 %v6803_v10  ;;  %v7354_v10 = vld [vmem:[#allocation5 + $0x180] sm:$0xff] }
 0x5c4   :  { %9514 = vst [vmem:[#allocation68_spill] sm:$0xff] %v7311_v8  ;;  %v7328_v8 = vld [vmem:[#allocation5 + $0x200] sm:$0xff]  ;;  %2514 = vmatpush.msra.mxu1 %v7334_v36 }
 0x5c5   :  { %9515 = vst [vmem:[#allocation64_spill] sm:$0xff] %v7314_v51  ;;  %2533 = vmatpush.msra.mxu2 %v7328_v8  ;;  %v7331_v51 = vld [vmem:[#allocation7 + $0x180] sm:$0xff]  ;;  %2576 = vmatpush.msra.mxu0 %v6809_v29  ;;  %v7364_v29 = vld [vmem:[#allocation5 + $0x158] sm:$0xff] }
 0x5c6   :  { %9516 = vst [vmem:[#allocation130_spill] sm:$0xff] %v7318_v47  ;;  %2555 = vmatpush.msrb.mxu3 %v7331_v51  ;;  %2515 = vmatpush.msra.mxu1 %v7344_v48 }
 0x5c7   :  { %9517 = vst [vmem:[#allocation72_spill] sm:$0xff] %v7321_v32  ;;  %v7338_v32 = vld [vmem:[#allocation5 + $0x1d8] sm:$0xff]  ;;  %2577 = vmatpush.msra.mxu0 %v6815_v58  ;;  %v7374_v58 = vld [vmem:[#allocation5 + $0x130] sm:$0xff] }
 0x5c8   :  { %9518 = vst [vmem:[#allocation125_spill] sm:$0xff] %v7324_v0  ;;  %2534 = vmatpush.msra.mxu2 %v7338_v32  ;;  %v7341_v0 = vld [vmem:[#allocation7 + $0x160] sm:$0xff]  ;;  %2516 = vmatpush.msra.mxu1 %v7354_v10 }
 0x5c9   :  { %9519 = vst [vmem:[#allocation134_spill] sm:$0xff] %v7328_v8  ;;  %2556 = vmatpush.msrb.mxu3 %v7341_v0  ;;  %2578 = vmatpush.msra.mxu0 %v6821_v28  ;;  %v7384_v28 = vld [vmem:[#allocation5 + $0x108] sm:$0xff] }
 0x5ca   :  { %9520 = vst [vmem:[#allocation76_spill] sm:$0xff] %v7331_v51  ;;  %v7348_v51 = vld [vmem:[#allocation5 + $0x1b0] sm:$0xff]  ;;  %2517 = vmatpush.msra.mxu1 %v7364_v29 }
 0x5cb   :  { %9521 = vst [vmem:[#allocation78_spill] sm:$0xff] %v7334_v36  ;;  %2535 = vmatpush.msra.mxu2 %v7348_v51  ;;  %v7351_v36 = vld [vmem:[#allocation7 + $0x140] sm:$0xff]  ;;  %2579 = vmatpush.msra.mxu0 %v6827_v42 }
 0x5cc   :  { %9522 = vst [vmem:[#allocation139_spill] sm:$0xff] %v7338_v32  ;;  %2557 = vmatpush.msrb.mxu3 %v7351_v36  ;;  %2518 = vmatpush.msra.mxu1 %v7374_v58  ;;  %v7394_v42 = vld [vmem:[#allocation5 + $0xe0] sm:$0xff] }
 0x5cd   :  { %9523 = vst [vmem:[#allocation80_spill] sm:$0xff] %v7341_v0  ;;  %v7358_v0 = vld [vmem:[#allocation5 + $0x188] sm:$0xff]  ;;  %2580 = vmatpush.msra.mxu0 %v6833_v9  ;;  %v7404_v9 = vld [vmem:[#allocation5 + $0xb8] sm:$0xff] }
 0x5ce   :  { %9524 = vst [vmem:[#allocation82_spill] sm:$0xff] %v7344_v48  ;;  %2536 = vmatpush.msra.mxu2 %v7358_v0  ;;  %v7361_v48 = vld [vmem:[#allocation7 + $0x120] sm:$0xff]  ;;  %2519 = vmatpush.msra.mxu1 %v7384_v28 }
 0x5cf   :  { %9525 = vst [vmem:[#allocation143_spill] sm:$0xff] %v7348_v51  ;;  %2558 = vmatpush.msrb.mxu3 %v7361_v48  ;;  %2581 = vmatpush.msra.mxu0 %v6839_v62  ;;  %v7414_v62 = vld [vmem:[#allocation5 + $0x90] sm:$0xff] }
 0x5d0   :  { %9526 = vst [vmem:[#allocation84_spill] sm:$0xff] %v7351_v36  ;;  %v7368_v36 = vld [vmem:[#allocation5 + $0x160] sm:$0xff]  ;;  %2520 = vmatpush.msra.mxu1 %v7394_v42 }
 0x5d1   :  { %9527 = vst [vmem:[#allocation86_spill] sm:$0xff] %v7354_v10  ;;  %2537 = vmatpush.msra.mxu2 %v7368_v36  ;;  %v7371_v10 = vld [vmem:[#allocation7 + $0x100] sm:$0xff]  ;;  %2582 = vmatpush.msra.mxu0 %v6845_v19  ;;  %v7424_v19 = vld [vmem:[#allocation5 + $0x68] sm:$0xff] }
 0x5d2   :  { %9528 = vst [vmem:[#allocation147_spill] sm:$0xff] %v7358_v0  ;;  %2559 = vmatpush.msrb.mxu3 %v7371_v10  ;;  %2521 = vmatpush.msra.mxu1 %v7404_v9  ;;  %v9577_v0 = vld [vmem:[#allocation160_spill] sm:$0xff] }
 0x5d3   :  { %9529 = vst [vmem:[#allocation88_spill] sm:$0xff] %v7361_v48  ;;  %v7378_v48 = vld [vmem:[#allocation5 + $0x138] sm:$0xff]  ;;  %2583 = vmatpush.msra.mxu0 %v6851_v6  ;;  %v7434_v6 = vld [vmem:[#allocation5 + $0x40] sm:$0xff] }
 0x5d4   :  { %9530 = vst [vmem:[#allocation90_spill] sm:$0xff] %v7364_v29  ;;  %2538 = vmatpush.msra.mxu2 %v7378_v48  ;;  %v7381_v29 = vld [vmem:[#allocation7 + $0xe0] sm:$0xff]  ;;  %2522 = vmatpush.msra.mxu1 %v7414_v62 }
 0x5d5   :  { %9531 = vst [vmem:[#allocation102_spill] sm:$0xff] %v7368_v36  ;;  %2560 = vmatpush.msrb.mxu3 %v7381_v29  ;;  %2584 = vmatpush.msra.mxu0 %v6857_v35  ;;  %v7444_v35 = vld [vmem:[#allocation5 + $0x18] sm:$0xff] }
 0x5d6   :  { %9532 = vst [vmem:[#allocation152_spill] sm:$0xff] %v7371_v10  ;;  %v7388_v10 = vld [vmem:[#allocation5 + $0x110] sm:$0xff]  ;;  %2523 = vmatpush.msra.mxu1 %v7424_v19 }
 0x5d7   :  { %9533 = vst [vmem:[#allocation94_spill] sm:$0xff] %v7374_v58  ;;  %2539 = vmatpush.msra.mxu2 %v7388_v10  ;;  %v7391_v58 = vld [vmem:[#allocation7 + $0xc0] sm:$0xff]  ;;  %2585 = vmatpush.msra.mxu0 %v6863_v39 }
 0x5d8   :  { %9534 = vst [vmem:[#allocation105_spill] sm:$0xff] %v7378_v48  ;;  %2561 = vmatpush.msrb.mxu3 %v7391_v58  ;;  %2524 = vmatpush.msra.mxu1 %v7434_v6  ;;  %v7454_v39 = vld [vmem:[#allocation7] sm:$0xff] }
 0x5d9   :  { %9535 = vst [vmem:[#allocation157_spill] sm:$0xff] %v7381_v29  ;;  %v7398_v29 = vld [vmem:[#allocation5 + $0xe8] sm:$0xff]  ;;  %2586 = vmatpush.msra.mxu0 %v6869_v40  ;;  %v7464_v40 = vld [vmem:[#allocation7 + $0x190] sm:$0xff] }
 0x5da   :  { %9536 = vst [vmem:[#allocation98_spill] sm:$0xff] %v7384_v28  ;;  %2540 = vmatpush.msra.mxu2 %v7398_v29  ;;  %v7401_v28 = vld [vmem:[#allocation7 + $0xa0] sm:$0xff]  ;;  %2525 = vmatpush.msra.mxu1 %v7444_v35 }
 0x5db   :  { %9537 = vst [vmem:[#allocation108_spill] sm:$0xff] %v7388_v10  ;;  %2562 = vmatpush.msrb.mxu3 %v7401_v28  ;;  %v9576_v10 = vld [vmem:[#allocation149_spill] sm:$0xff] }
 0x5dc   :  { %9538 = vst [vmem:[#allocation163_spill] sm:$0xff] %v7391_v58  ;;  %v7408_v58 = vld [vmem:[#allocation5 + $0xc0] sm:$0xff] }
 0x5dd   :  { %9539 = vst [vmem:[#allocation92_spill] sm:$0xff] %v7394_v42  ;;  %2541 = vmatpush.msra.mxu2 %v7408_v58  ;;  %v7411_v42 = vld [vmem:[#allocation7 + $0x80] sm:$0xff] }
 0x5de   :  { %9540 = vst [vmem:[#allocation112_spill] sm:$0xff] %v7398_v29  ;;  %2563 = vmatpush.msrb.mxu3 %v7411_v42  ;;  %v9575_v29 = vld [vmem:[#allocation127_spill] sm:$0xff] }
 0x5df   :  { %9541 = vst [vmem:[#allocation168_spill] sm:$0xff] %v7401_v28  ;;  %v7418_v28 = vld [vmem:[#allocation5 + $0x98] sm:$0xff] }
 0x5e0   :  { %9542 = vst [vmem:[#allocation96_spill] sm:$0xff] %v7404_v9  ;;  %2542 = vmatpush.msra.mxu2 %v7418_v28  ;;  %v7421_v9 = vld [vmem:[#allocation7 + $0x60] sm:$0xff] }
 0x5e1   :  { %9543 = vst [vmem:[#allocation120_spill] sm:$0xff] %v7408_v58  ;;  %2564 = vmatpush.msrb.mxu3 %v7421_v9  ;;  %v2212_v58 = vpop.f32.mrf.mxu0 }
 0x5e2   :  { %9544 = vst [vmem:[#allocation124_spill] sm:$0xff] %v7411_v42  ;;  %v7428_v42 = vld [vmem:[#allocation5 + $0x70] sm:$0xff] }
 0x5e3   :  { %9545 = vst [vmem:[#allocation100_spill] sm:$0xff] %v7414_v62  ;;  %2543 = vmatpush.msra.mxu2 %v7428_v42  ;;  %v7431_v62 = vld [vmem:[#allocation7 + $0x40] sm:$0xff] }
 0x5e4   :  { %9546 = vst [vmem:[#allocation133_spill] sm:$0xff] %v7418_v28  ;;  %2565 = vmatpush.msrb.mxu3 %v7431_v62 }
 0x5e5   :  { %9547 = vst [vmem:[#allocation142_spill] sm:$0xff] %v7421_v9  ;;  %v7438_v9 = vld [vmem:[#allocation5 + $0x48] sm:$0xff] }
 0x5e6   :  { %9548 = vst [vmem:[#allocation116_spill] sm:$0xff] %v7424_v19  ;;  %2544 = vmatpush.msra.mxu2 %v7438_v9  ;;  %v7441_v19 = vld [vmem:[#allocation7 + $0x20] sm:$0xff] }
 0x5e7   :  { %9549 = vst [vmem:[#allocation146_spill] sm:$0xff] %v7428_v42  ;;  %2566 = vmatpush.msrb.mxu3 %v7441_v19 }
 0x5e8   :  { %9550 = vst [vmem:[#allocation156_spill] sm:$0xff] %v7431_v62  ;;  %v7448_v62 = vld [vmem:[#allocation7 + $0x1f0] sm:$0xff] }
 0x5e9   :  { %9551 = vst [vmem:[#allocation129_spill] sm:$0xff] %v7434_v6  ;;  %2592 = vmatpush.msrb.mxu1 %v7448_v62  ;;  %v7451_v6 = vld [vmem:[#allocation5 + $0x20] sm:$0xff]  ;;  %2567 = vmatpush.msrb.mxu3 %v7454_v39  ;;  %v2294_v47 = vpop.f32.mrf.mxu0 }
 0x5ea   :  { %9552 = vst [vmem:[#allocation138_spill] sm:$0xff] %v7438_v9  ;;  %2545 = vmatpush.msra.mxu2 %v7451_v6  ;;  %v9558_v9 = vld [vmem:[#allocation13_spill] sm:$0xff] }
 0x5eb   :  { %9553 = vst [vmem:[#allocation162_spill] sm:$0xff] %v7441_v19  ;;  %2587 = vmatpush.msra.mxu0 %v9558_v9  ;;  %v7458_v19 = vld [vmem:[#allocation7 + $0x1d0] sm:$0xff] }
 0x5ec   :  { %9554 = vst [vmem:[#allocation154_spill] sm:$0xff] %v7444_v35  ;;  %2593 = vmatpush.msrb.mxu1 %v7458_v19  ;;  %v7461_v35 = vld [vmem:[#allocation7 + $0x1b0] sm:$0xff] }
 0x5ed   :  { %9555 = vst [vmem:[#allocation151_spill] sm:$0xff] %v7448_v62  ;;  %v7467_v62 = vld [vmem:[#allocation7 + $0x170] sm:$0xff] }
 0x5ee   :  { %9556 = vst [vmem:[#allocation167_spill] sm:$0xff] %v7451_v6  ;;  %2594 = vmatpush.msrb.mxu1 %v7461_v35  ;;  %v7470_v6 = vld [vmem:[#allocation7 + $0x150] sm:$0xff] }
 0x5ef   :  { %9557 = vst [vmem:[#allocation158_spill] sm:$0xff] %v7454_v39  ;;  %v7473_v9 = vld [vmem:[#allocation7 + $0x130] sm:$0xff] }
 0x5f0   :  { %9559 = vst [vmem:[#allocation165_spill] sm:$0xff] %v7458_v19  ;;  %2595 = vmatpush.msrb.mxu1 %v7464_v40  ;;  %v7476_v19 = vld [vmem:[#allocation7 + $0x110] sm:$0xff] }
 0x5f1   :  { %9560 = vst [vmem:[#allocation110_spill] sm:$0xff] %v7461_v35  ;;  %v7479_v35 = vld [vmem:[#allocation7 + $0xf0] sm:$0xff] }
 0x5f2   :  { %9561 = vst [vmem:[#allocation114_spill] sm:$0xff] %v7464_v40  ;;  %2596 = vmatpush.msrb.mxu1 %v7467_v62  ;;  %v7482_v40 = vld [vmem:[#allocation7 + $0xd0] sm:$0xff] }
 0x5f3   :  { %9562 = vst [vmem:[#allocation118_spill] sm:$0xff] %v7467_v62  ;;  %v7485_v62 = vld [vmem:[#allocation7 + $0xb0] sm:$0xff] }
 0x5f4   :  { %9563 = vst [vmem:[#allocation122_spill] sm:$0xff] %v7470_v6  ;;  %2597 = vmatpush.msrb.mxu1 %v7470_v6  ;;  %v7488_v6 = vld [vmem:[#allocation7 + $0x90] sm:$0xff] }
 0x5f5   :  { %9564 = vst [vmem:[#allocation126_spill] sm:$0xff] %v7473_v9  ;;  %v7491_v39 = vld [vmem:[#allocation7 + $0x70] sm:$0xff] }
 0x5f6   :  { %2598 = vmatpush.msrb.mxu1 %v7473_v9  ;;  %9565 = vst [vmem:[#allocation131_spill] sm:$0xff] %v7476_v19  ;;  %v2152_v9 = vpop.f32.mrf.mxu1 }
 0x5f7   :  { %9566 = vst [vmem:[#allocation135_spill] sm:$0xff] %v7479_v35 }
 0x5f8   :  { %2599 = vmatpush.msrb.mxu1 %v7476_v19  ;;  %9567 = vst [vmem:[#allocation140_spill] sm:$0xff] %v7482_v40  ;;  %v9571_v19 = vld [vmem:[#allocation15_spill] sm:$0xff] }
 0x5f9   :  { %9568 = vst [vmem:[#allocation144_spill] sm:$0xff] %v7485_v62  ;;  %v2153_v42 = vadd.f32 %v2152_v9, %v9571_v19  ;;  %v351_v19 = vpop.permute.xlu0 %350 }
 0x5fa   :  { %2600 = vmatpush.msrb.mxu1 %v7479_v35  ;;  %9569 = vst [vmem:[#allocation148_spill] sm:$0xff] %v7488_v6  ;;  %v7495_v35 = vld [vmem:[#allocation7 + $0x50] sm:$0xff]  ;;  %v392_v48 = vmul.f32 %v9576_v10, %v351_v19  ;;  %v393_v10 = vmul.f32 %v8791_v55, %v351_v19 }
 0x5fb   :  { %9570 = vst [vmem:[#allocation153_spill] sm:$0xff] %v7491_v39 }
 0x5fc   :  { %2601 = vmatpush.msrb.mxu1 %v7482_v40  ;;  %9572 = vst [vmem:[#allocation164_spill] sm:$0xff] %v7495_v35  ;;  %v2172_v40 = vpop.f32.mrf.mxu2  ;;  %v434_v51 = vadd.f32 %v9577_v0, %v392_v48  ;;  %v435_v48 = vadd.f32 %v8794_v14, %v393_v10 }
 0x5fd   :  { %3093 = vst [vmem:[%s7861_s10 + $0x28] sm:$0xff] %v2153_v42  ;;  %v2173_v31 = vadd.f32 %v2172_v40, %v5033_v49 }
 0x5fe   :  { %2602 = vmatpush.msrb.mxu1 %v7485_v62  ;;  %v7501_v62 = vld [vmem:[#allocation7 + $0x30] sm:$0xff]  ;;  %v2232_v44 = vpop.f32.mrf.mxu1 }
 0x5ff   :  { %9573 = vst [vmem:[#allocation13_spill] sm:$0xff] %v7501_v62 }
 0x600   :  { %2603 = vmatpush.msrb.mxu1 %v7488_v6  ;;  %v7504_v6 = vld [vmem:[#allocation7 + $0x10] sm:$0xff] }
 0x601   :  { %9574 = vst [vmem:[#allocation171_spill] sm:$0xff] %v7504_v6 }
 0x602   :  { %2604 = vmatpush.msrb.mxu1 %v7491_v39  ;;  %v2192_v39 = vpop.f32.mrf.mxu3 }
 0x603   :  { %v2193_v22 = vadd.f32 %v2192_v39, %v5031_v45 }
 0x604   :  { %2605 = vmatpush.msrb.mxu1 %v7495_v35  ;;  %v2254_v28 = vpop.f32.mrf.mxu2  ;;  %v391_v35 = vmul.f32 %v9575_v29, %v351_v19 }
 0x605   :  { %v2317_v29 = vadd.f32 %v2254_v28, %v2173_v31  ;;  %v394_v31 = vmul.f32 %v8792_v54, %v351_v19 }
 0x606   :  { %2606 = vmatpush.msrb.mxu1 %v7501_v62  ;;  %v433_v42 = vadd.f32 %v9422_v25, %v391_v35  ;;  %v2398_v25 = vpop.f32.mrf.mxu0 }
 0x607   :  { %v2321_v17 = vmul.f32 0.5, %v2317_v29  ;;  %v2233_v29 = vadd.f32 %v2232_v44, %v5045_v33 }
 0x608   :  { %2607 = vmatpush.msrb.mxu1 %v7504_v6 }
 0x60a   :  { %v2274_v9 = vpop.f32.mrf.mxu3 }
 0x60b   :  { %v2318_v35 = vadd.f32 %v2274_v9, %v2193_v22  ;;  %v2213_v22 = vadd.f32 %v2212_v58, %v5043_v27  ;;  %v436_v9 = vadd.f32 %v4729_v61, %v394_v31 }
 0x60c   :  { %v2358_v36 = vpop.f32.mrf.mxu2 }
 0x60d   :  { %v2421_v32 = vadd.f32 %v2358_v36, %v433_v42 }
 0x60f   :  { %v2425_v6 = vmul.f32 0.5, %v2421_v32  ;;  %v2423_v32 = vadd.f32 %v2398_v25, %v435_v48  ;;  %v2319_v25 = vadd.f32 %v2294_v47, %v2213_v22 }
 0x611   :  { %3232 = vtanh.f32 %v2425_v6 }
 0x612   :  { %v2378_v62 = vpop.f32.mrf.mxu3 }
 0x613   :  { %v2422_v8 = vadd.f32 %v2378_v62, %v434_v51  ;;  %v2325_v51 = vmul.f32 0.5, %v2318_v35 }
 0x615   :  { %v2429_v12 = vmul.f32 0.5, %v2422_v8  ;;  %v2314_v8 = vpop.f32.mrf.mxu1 }
 0x617   :  { %3234 = vtanh.f32 %v2429_v12  ;;  %v3233_v36 = vpop.eup %3232 }
 0x618   :  { %3236 = vtanh.f32 %v2321_v17  ;;  %v2427_v40 = vmul.f32 0.5, %v3233_v36  ;;  %v2320_v17 = vadd.f32 %v2314_v8, %v2233_v29 }
 0x619   :  { %3238 = vtanh.f32 %v2325_v51 }
 0x61a   :  { %3240 = vtanh.f32 %v2423_v32  ;;  %v2428_v28 = vadd.f32 0.5, %v2427_v40  ;;  %v2330_v40 = vmul.f32 0.5, %v2320_v17  ;;  %v9592_v17 = vld [vmem:[#allocation45_spill] sm:$0xff] }
 0x61b   :  { %3242 = vtanh.f32 %v2319_v25  ;;  %v7545_v25 = vld [vmem:[#allocation7 + $0x1b8] sm:$0xff] }
 0x61d   :  { %v3235_v62 = vpop.eup %3234 }
 0x61e   :  { %v2431_v39 = vmul.f32 0.5, %v3235_v62  ;;  %v3237_v12 = vpop.eup %3236 }
 0x61f   :  { %v3239_v10 = vpop.eup %3238  ;;  %v2323_v62 = vmul.f32 0.5, %v3237_v12  ;;  %v2447_v12 = vpop.permute.xlu1 %2446 }
 0x620   :  { %v2432_v6 = vadd.f32 0.5, %v2431_v39  ;;  %v3241_v42 = vpop.eup %3240  ;;  %v2327_v19 = vmul.f32 0.5, %v3239_v10  ;;  %vm2448_vm14 = vcmp.eq.s32.totalorder %v2447_v12, 1  ;;  %v9609_v12 = vld [vmem:[#allocation123_spill] sm:$0xff] }
 0x621   :  { %v2439_v48 = vmul.f32 %v3241_v42, %v2428_v28  ;;  %v2324_v44 = vadd.f32 0.5, %v2323_v62  ;;  %v3243_v47 = vpop.eup %3242  ;;  %v9596_v62 = vld [vmem:[#allocation49_spill] sm:$0xff] }
 0x622   :  { %v2438_v36 = vmul.f32 %v2432_v6, %v6910_v41  ;;  %v2328_v58 = vadd.f32 0.5, %v2327_v19  ;;  %v9598_v19 = vld [vmem:[#allocation26_spill] sm:$0xff] }
 0x623   :  { %v2335_v31 = vmul.f32 %v3243_v47, %v2324_v44  ;;  %v9601_v44 = vld [vmem:[#allocation115_spill] sm:$0xff] }
 0x624   :  { %v7520_v39 = vadd.f32 %v2439_v48, %v2438_v36  ;;  %v2334_v28 = vmul.f32 %v2328_v58, %v6914_v4  ;;  %v9593_v48 = vld [vmem:[#allocation107_spill] sm:$0xff]  ;;  %v9595_v36 = vld [vmem:[#allocation25_spill] sm:$0xff] }
 0x625   :  { %v9602_v58 = vld [vmem:[#allocation27_spill] sm:$0xff] }
 0x626   :  { %v7524_v10 = vadd.f32 %v2335_v31, %v2334_v28  ;;  %v9603_v47 = vld [vmem:[#allocation55_spill] sm:$0xff] }
 0x627   :  { %v9605_v31 = vld [vmem:[#allocation119_spill] sm:$0xff] }
 0x628   :  { %v9606_v28 = vld [vmem:[#allocation59_spill] sm:$0xff] }
 0x634   :  { %v2418_v35 = vpop.f32.mrf.mxu1 }
 0x635   :  { %v2424_v51 = vadd.f32 %v2418_v35, %v436_v9  ;;  %v7624_v35 = vld [vmem:[#allocation7 + $0x38] sm:$0xff] }
 0x637   :  { %v2434_v32 = vmul.f32 0.5, %v2424_v51  ;;  %v7630_v51 = vld [vmem:[#allocation7 + $0x18] sm:$0xff] }
 0x639   :  { %3244 = vtanh.f32 %v2434_v32  ;;  %v9599_v32 = vld [vmem:[#allocation51_spill] sm:$0xff] }
 0x63a   :  { %3246 = vtanh.f32 %v2330_v40  ;;  %v9600_v40 = vld [vmem:[#allocation53_spill] sm:$0xff] }
 0x63b   :  { %3248 = vtanh.f32 %v7520_v39 }
 0x63c   :  { %3250 = vtanh.f32 %v7524_v10 }
 0x63f   :  { %v3245_v8 = vpop.eup %3244 }
 0x640   :  { %v2436_v41 = vmul.f32 0.5, %v3245_v8  ;;  %v3247_v6 = vpop.eup %3246  ;;  %v9604_v8 = vld [vmem:[#allocation57_spill] sm:$0xff] }
 0x641   :  { %v3249_v29 = vpop.eup %3248  ;;  %v2332_v42 = vmul.f32 0.5, %v3247_v6  ;;  %v9608_v6 = vld [vmem:[#allocation61_spill] sm:$0xff] }
 0x642   :  { %v2437_v22 = vadd.f32 0.5, %v2436_v41  ;;  %v9607_v41 = vld [vmem:[#allocation28_spill] sm:$0xff] }
 0x643   :  { %v2333_v4 = vadd.f32 0.5, %v2332_v42  ;;  %v9612_v42 = vld [vmem:[#allocation65_spill] sm:$0xff] }
 0x644   :  { %v7526_v9 = vmul.f32 %v3249_v29, %v2437_v22  ;;  %v9610_v22 = vld [vmem:[#allocation63_spill] sm:$0xff]  ;;  %v9611_v29 = vld [vmem:[#allocation29_spill] sm:$0xff] }
 0x646   :  { %3094 = vmatmul.msk.f32.vlgmr.msrb.gmra.mxu2 %vm2448_vm14, %v7526_v9  ;;  %3095 = vmatmul.msk.f32.vlgmr.msra.gmra.mxu3 %vm2448_vm14, %v7526_v9 }
 0x647   :  { %3096 = vmatmul.msk.f32.vlgmr.msrb.gmra.mxu0 %vm2448_vm14, %v7526_v9  ;;  %3097 = vmatmul.msk.f32.vlgmr.msra.gmra.mxu1 %vm2448_vm14, %v7526_v9 }
 0x648   :  { %2612 = vmatpush.msrb.mxu2 %v6927_v11  ;;  %2656 = vmatpush.msra.mxu3 %v6930_v7  ;;  %v3251_v11 = vpop.eup %3250 }
 0x649   :  { %2676 = vmatpush.msrb.mxu0 %v6933_v50  ;;  %2696 = vmatpush.msra.mxu1 %v6936_v5  ;;  %v7551_v7 = vmul.f32 %v3251_v11, %v2333_v4  ;;  %v7553_v50 = vld [vmem:[#allocation7 + $0x198] sm:$0xff]  ;;  %v9613_v4 = vld [vmem:[#allocation30_spill] sm:$0xff]  ;;  %v9614_v11 = vld [vmem:[#allocation67_spill] sm:$0xff] }
 0x64a   :  { %2613 = vmatpush.msrb.mxu2 %v6939_v3  ;;  %2657 = vmatpush.msra.mxu3 %v6942_v53  ;;  %v7564_v5 = vld [vmem:[#allocation7 + $0x178] sm:$0xff] }
 0x64b   :  { %2677 = vmatpush.msrb.mxu0 %v6945_v37  ;;  %2697 = vmatpush.msra.mxu1 %v6948_v13  ;;  %v7570_v3 = vld [vmem:[#allocation7 + $0x158] sm:$0xff] }
 0x64c   :  { %2614 = vmatpush.msrb.mxu2 %v7545_v25  ;;  %2658 = vmatpush.msra.mxu3 %v6952_v43  ;;  %v7576_v53 = vld [vmem:[#allocation7 + $0x138] sm:$0xff]  ;;  %v9579_v43 = vld [vmem:[#allocation14_spill] sm:$0xff] }
 0x64d   :  { %2678 = vmatpush.msrb.mxu0 %v6955_v57  ;;  %2698 = vmatpush.msra.mxu1 %v6958_v21  ;;  %v9578_v37 = vld [vmem:[#allocation20_spill] sm:$0xff]  ;;  %v9580_v57 = vld [vmem:[#allocation21_spill] sm:$0xff] }
 0x64e   :  { %2615 = vmatpush.msrb.mxu2 %v7553_v50  ;;  %2659 = vmatpush.msra.mxu3 %v6964_v24  ;;  %v7582_v13 = vld [vmem:[#allocation7 + $0x118] sm:$0xff]  ;;  %v9581_v24 = vld [vmem:[#allocation23_spill] sm:$0xff] }
 0x64f   :  { %2679 = vmatpush.msrb.mxu0 %v6967_v20  ;;  %2699 = vmatpush.msra.mxu1 %v6970_v34  ;;  %v7588_v21 = vld [vmem:[#allocation7 + $0xf8] sm:$0xff] }
 0x650   :  { %3098 = vmatmul.msk.f32.vlgmr.msra.gmra.mxu2 %vm2448_vm14, %v7526_v9  ;;  %2568 = vmatmul.f32.vlgmr.msrb.gmra.mxu3 %v7551_v7  ;;  %v9582_v20 = vld [vmem:[#allocation16_spill] sm:$0xff] }
 0x651   :  { %2588 = vmatmul.f32.vlgmr.msra.gmra.mxu0 %v7551_v7  ;;  %2608 = vmatmul.f32.vlgmr.msrb.gmra.mxu1 %v7551_v7  ;;  %v7594_v34 = vld [vmem:[#allocation7 + $0xd8] sm:$0xff] }
 0x652   :  { %2616 = vmatpush.msrb.mxu2 %v7564_v5  ;;  %2660 = vmatpush.msra.mxu3 %v6979_v16  ;;  %v9583_v16 = vld [vmem:[#allocation19_spill] sm:$0xff] }
 0x653   :  { %2680 = vmatpush.msrb.mxu0 %v6982_v52  ;;  %2700 = vmatpush.msra.mxu1 %v6985_v59  ;;  %v9584_v52 = vld [vmem:[#allocation37_spill] sm:$0xff]  ;;  %v7600_v59 = vld [vmem:[#allocation7 + $0xb8] sm:$0xff] }
 0x654   :  { %2617 = vmatpush.msrb.mxu2 %v7570_v3  ;;  %2661 = vmatpush.msra.mxu3 %v6989_v26  ;;  %v9585_v26 = vld [vmem:[#allocation101_spill] sm:$0xff] }
 0x655   :  { %2681 = vmatpush.msrb.mxu0 %v6992_v63  ;;  %2701 = vmatpush.msra.mxu1 %v6995_v2  ;;  %v9586_v63 = vld [vmem:[#allocation39_spill] sm:$0xff]  ;;  %v7606_v2 = vld [vmem:[#allocation7 + $0x98] sm:$0xff] }
 0x656   :  { %2618 = vmatpush.msrb.mxu2 %v7576_v53  ;;  %2662 = vmatpush.msra.mxu3 %v6999_v15  ;;  %v9587_v15 = vld [vmem:[#allocation22_spill] sm:$0xff] }
 0x657   :  { %2682 = vmatpush.msrb.mxu0 %v7002_v56  ;;  %2702 = vmatpush.msra.mxu1 %v9578_v37  ;;  %v9588_v56 = vld [vmem:[#allocation41_spill] sm:$0xff]  ;;  %v9615_v37 = vld [vmem:[#allocation128_spill] sm:$0xff] }
 0x658   :  { %2619 = vmatpush.msrb.mxu2 %v7582_v13  ;;  %2663 = vmatpush.msra.mxu3 %v7009_v23  ;;  %v7612_v23 = vld [vmem:[#allocation7 + $0x78] sm:$0xff] }
 0x659   :  { %2683 = vmatpush.msrb.mxu0 %v9579_v43  ;;  %2703 = vmatpush.msra.mxu1 %v9580_v57  ;;  %v9616_v43 = vld [vmem:[#allocation69_spill] sm:$0xff]  ;;  %v9617_v57 = vld [vmem:[#allocation31_spill] sm:$0xff] }
 0x65a   :  { %2620 = vmatpush.msrb.mxu2 %v7588_v21  ;;  %2664 = vmatpush.msra.mxu3 %v7019_v30  ;;  %v7618_v30 = vld [vmem:[#allocation7 + $0x58] sm:$0xff] }
 0x65b   :  { %2684 = vmatpush.msrb.mxu0 %v9581_v24  ;;  %2704 = vmatpush.msra.mxu1 %v9582_v20  ;;  %v9618_v24 = vld [vmem:[#allocation71_spill] sm:$0xff]  ;;  %v9619_v20 = vld [vmem:[#allocation132_spill] sm:$0xff] }
 0x65c   :  { %2621 = vmatpush.msrb.mxu2 %v7594_v34  ;;  %2665 = vmatpush.msra.mxu3 %v7029_v60  ;;  %v9590_v60 = vld [vmem:[#allocation43_spill] sm:$0xff] }
 0x65d   :  { %2685 = vmatpush.msrb.mxu0 %v9583_v16  ;;  %2705 = vmatpush.msra.mxu1 %v9584_v52  ;;  %v9620_v16 = vld [vmem:[#allocation73_spill] sm:$0xff] }
 0x65e   :  { %2622 = vmatpush.msrb.mxu2 %v7600_v59  ;;  %2666 = vmatpush.msra.mxu3 %v7039_v1  ;;  %v9589_v1 = vld [vmem:[#allocation104_spill] sm:$0xff]  ;;  %v9621_v52 = vld [vmem:[#allocation137_spill] sm:$0xff] }
 0x65f   :  { %2686 = vmatpush.msrb.mxu0 %v9585_v26  ;;  %2706 = vmatpush.msra.mxu1 %v9586_v63  ;;  %v9622_v26 = vld [vmem:[#allocation75_spill] sm:$0xff]  ;;  %v9623_v63 = vld [vmem:[#allocation32_spill] sm:$0xff] }
 0x660   :  { %2623 = vmatpush.msrb.mxu2 %v7606_v2  ;;  %2667 = vmatpush.msra.mxu3 %v7049_v18  ;;  %v9591_v18 = vld [vmem:[#allocation24_spill] sm:$0xff] }
 0x661   :  { %2687 = vmatpush.msrb.mxu0 %v9587_v15  ;;  %2707 = vmatpush.msra.mxu1 %v9588_v56  ;;  %v9624_v15 = vld [vmem:[#allocation77_spill] sm:$0xff] }
 0x662   :  { %2624 = vmatpush.msrb.mxu2 %v7612_v23  ;;  %2668 = vmatpush.msra.mxu3 %v7059_v38  ;;  %v9594_v38 = vld [vmem:[#allocation47_spill] sm:$0xff]  ;;  %v9625_v56 = vld [vmem:[#allocation141_spill] sm:$0xff] }
 0x663   :  { %2688 = vmatpush.msrb.mxu0 %v9589_v1  ;;  %2708 = vmatpush.msra.mxu1 %v9590_v60  ;;  %v9626_v1 = vld [vmem:[#allocation79_spill] sm:$0xff]  ;;  %v9627_v60 = vld [vmem:[#allocation33_spill] sm:$0xff] }
 0x664   :  { %2625 = vmatpush.msrb.mxu2 %v7618_v30  ;;  %2669 = vmatpush.msra.mxu3 %v7069_v46  ;;  %v9597_v46 = vld [vmem:[#allocation111_spill] sm:$0xff] }
 0x665   :  { %2689 = vmatpush.msrb.mxu0 %v9591_v18  ;;  %2709 = vmatpush.msra.mxu1 %v9592_v17  ;;  %v9628_v18 = vld [vmem:[#allocation34_spill] sm:$0xff]  ;;  %v9629_v17 = vld [vmem:[#allocation145_spill] sm:$0xff] }
 0x666   :  { %2626 = vmatpush.msrb.mxu2 %v7624_v35  ;;  %2670 = vmatpush.msra.mxu3 %v9593_v48  ;;  %v9630_v48 = vld [vmem:[#allocation81_spill] sm:$0xff] }
 0x667   :  { %2690 = vmatpush.msrb.mxu0 %v9594_v38  ;;  %2710 = vmatpush.msra.mxu1 %v9595_v36  ;;  %v9631_v38 = vld [vmem:[#allocation83_spill] sm:$0xff]  ;;  %v9632_v36 = vld [vmem:[#allocation85_spill] sm:$0xff] }
 0x668   :  { %2627 = vmatpush.msrb.mxu2 %v7630_v51  ;;  %2671 = vmatpush.msra.mxu3 %v9596_v62  ;;  %v9633_v62 = vld [vmem:[#allocation150_spill] sm:$0xff] }
 0x669   :  { %2691 = vmatpush.msrb.mxu0 %v9597_v46  ;;  %2711 = vmatpush.msra.mxu1 %v9598_v19  ;;  %v9634_v46 = vld [vmem:[#allocation35_spill] sm:$0xff]  ;;  %v9635_v19 = vld [vmem:[#allocation36_spill] sm:$0xff] }
 0x66a   :  { %2628 = vmatmul.f32.vlgmr.msrb.gmra.mxu2 %v7551_v7  ;;  %2672 = vmatmul.f32.vlgmr.msra.gmra.mxu3 %v7526_v9 }
 0x66b   :  { %2692 = vmatmul.f32.vlgmr.msrb.gmra.mxu0 %v7526_v9  ;;  %2712 = vmatmul.f32.vlgmr.msra.gmra.mxu1 %v7526_v9 }
 0x66c   :  { %2716 = vmatpush.msra.mxu2 %v9599_v32  ;;  %2765 = vmatpush.msrb.mxu3 %v9600_v40  ;;  %v9636_v32 = vld [vmem:[#allocation89_spill] sm:$0xff]  ;;  %v9637_v40 = vld [vmem:[#allocation155_spill] sm:$0xff] }
 0x66d   :  { %2785 = vmatpush.msra.mxu0 %v9601_v44  ;;  %2805 = vmatpush.msrb.mxu1 %v9602_v58  ;;  %v9638_v44 = vld [vmem:[#allocation87_spill] sm:$0xff] }
 0x66e   :  { %2717 = vmatpush.msra.mxu2 %v9603_v47  ;;  %2766 = vmatpush.msrb.mxu3 %v9604_v8  ;;  %v9639_v58 = vld [vmem:[#allocation91_spill] sm:$0xff]  ;;  %v9640_v47 = vld [vmem:[#allocation93_spill] sm:$0xff]  ;;  %v9641_v8 = vld [vmem:[#allocation38_spill] sm:$0xff] }
 0x66f   :  { %2786 = vmatpush.msra.mxu0 %v9605_v31  ;;  %2806 = vmatpush.msrb.mxu1 %v9606_v28  ;;  %v9642_v31 = vld [vmem:[#allocation161_spill] sm:$0xff]  ;;  %v9643_v28 = vld [vmem:[#allocation95_spill] sm:$0xff] }
 0x670   :  { %2718 = vmatpush.msra.mxu2 %v9607_v41  ;;  %2767 = vmatpush.msrb.mxu3 %v9608_v6  ;;  %v9644_v41 = vld [vmem:[#allocation97_spill] sm:$0xff]  ;;  %v9645_v6 = vld [vmem:[#allocation42_spill] sm:$0xff] }
 0x671   :  { %2787 = vmatpush.msra.mxu0 %v9609_v12  ;;  %2807 = vmatpush.msrb.mxu1 %v9610_v22  ;;  %v9646_v12 = vld [vmem:[#allocation166_spill] sm:$0xff]  ;;  %v9647_v22 = vld [vmem:[#allocation40_spill] sm:$0xff] }
 0x672   :  { %2719 = vmatpush.msra.mxu2 %v9611_v29  ;;  %2768 = vmatpush.msrb.mxu3 %v9612_v42  ;;  %v9648_v29 = vld [vmem:[#allocation46_spill] sm:$0xff] }
 0x673   :  { %2788 = vmatpush.msra.mxu0 %v9613_v4  ;;  %2808 = vmatpush.msrb.mxu1 %v9614_v11  ;;  %v9649_v42 = vld [vmem:[#allocation50_spill] sm:$0xff]  ;;  %v9650_v4 = vld [vmem:[#allocation103_spill] sm:$0xff] }
 0x674   :  { %2720 = vmatpush.msra.mxu2 %v9615_v37  ;;  %2769 = vmatpush.msrb.mxu3 %v9616_v43  ;;  %v9651_v11 = vld [vmem:[#allocation54_spill] sm:$0xff]  ;;  %v9652_v37 = vld [vmem:[#allocation99_spill] sm:$0xff] }
 0x675   :  { %2789 = vmatpush.msra.mxu0 %v9617_v57  ;;  %2809 = vmatpush.msrb.mxu1 %v9618_v24  ;;  %v9653_v43 = vld [vmem:[#allocation106_spill] sm:$0xff]  ;;  %v9654_v57 = vld [vmem:[#allocation48_spill] sm:$0xff]  ;;  %v9655_v24 = vld [vmem:[#allocation109_spill] sm:$0xff] }
 0x676   :  { %2721 = vmatpush.msra.mxu2 %v9619_v20  ;;  %2770 = vmatpush.msrb.mxu3 %v9620_v16  ;;  %v9656_v20 = vld [vmem:[#allocation44_spill] sm:$0xff]  ;;  %v9657_v16 = vld [vmem:[#allocation62_spill] sm:$0xff] }
 0x677   :  { %2790 = vmatpush.msra.mxu0 %v9621_v52  ;;  %2810 = vmatpush.msrb.mxu1 %v9622_v26  ;;  %v9658_v52 = vld [vmem:[#allocation113_spill] sm:$0xff]  ;;  %v9659_v26 = vld [vmem:[#allocation58_spill] sm:$0xff] }
 0x678   :  { %2722 = vmatpush.msra.mxu2 %v9623_v63  ;;  %2771 = vmatpush.msrb.mxu3 %v9624_v15  ;;  %v9660_v63 = vld [vmem:[#allocation66_spill] sm:$0xff]  ;;  %v9661_v15 = vld [vmem:[#allocation117_spill] sm:$0xff] }
 0x679   :  { %2791 = vmatpush.msra.mxu0 %v9625_v56  ;;  %2811 = vmatpush.msrb.mxu1 %v9626_v1  ;;  %v9662_v56 = vld [vmem:[#allocation52_spill] sm:$0xff]  ;;  %v9663_v1 = vld [vmem:[#allocation121_spill] sm:$0xff] }
 0x67a   :  { %2723 = vmatpush.msra.mxu2 %v9627_v60  ;;  %2772 = vmatpush.msrb.mxu3 %v9628_v18  ;;  %v9664_v60 = vld [vmem:[#allocation56_spill] sm:$0xff] }
 0x67b   :  { %2792 = vmatpush.msra.mxu0 %v9629_v17  ;;  %2812 = vmatpush.msrb.mxu1 %v9630_v48  ;;  %v9665_v18 = vld [vmem:[#allocation60_spill] sm:$0xff]  ;;  %v9666_v17 = vld [vmem:[#allocation74_spill] sm:$0xff] }
 0x67c   :  { %2724 = vmatpush.msra.mxu2 %v9631_v38  ;;  %2773 = vmatpush.msrb.mxu3 %v9632_v36  ;;  %v9667_v48 = vld [vmem:[#allocation70_spill] sm:$0xff]  ;;  %v9668_v38 = vld [vmem:[#allocation68_spill] sm:$0xff] }
 0x67d   :  { %2793 = vmatpush.msra.mxu0 %v9633_v62  ;;  %2813 = vmatpush.msrb.mxu1 %v9634_v46  ;;  %v3891_v36 = vld [vmem:[#allocation7 + $0x1e8] sm:$0xff]  ;;  %v9669_v62 = vld [vmem:[#allocation64_spill] sm:$0xff] }
 0x67e   :  { %2725 = vmatpush.msra.mxu2 %v9635_v19  ;;  %2774 = vmatpush.msrb.mxu3 %v9636_v32  ;;  %v9671_v46 = vld [vmem:[#allocation72_spill] sm:$0xff]  ;;  %v3892_v19 = vld [vmem:[#allocation7 + $0x1c8] sm:$0xff]  ;;  %v9672_v32 = vld [vmem:[#allocation125_spill] sm:$0xff] }
 0x67f   :  { %2794 = vmatpush.msra.mxu0 %v9637_v40  ;;  %2814 = vmatpush.msrb.mxu1 %v9638_v44  ;;  %v9673_v40 = vld [vmem:[#allocation134_spill] sm:$0xff]  ;;  %v9674_v44 = vld [vmem:[#allocation76_spill] sm:$0xff] }
 0x680   :  { %2726 = vmatpush.msra.mxu2 %v9639_v58  ;;  %2775 = vmatpush.msrb.mxu3 %v9640_v47  ;;  %v3893_v58 = vld [vmem:[#allocation7 + $0x1a8] sm:$0xff] }
 0x681   :  { %2795 = vmatpush.msra.mxu0 %v9641_v8  ;;  %2815 = vmatpush.msrb.mxu1 %v9642_v31  ;;  %v9675_v47 = vld [vmem:[#allocation78_spill] sm:$0xff]  ;;  %v9676_v8 = vld [vmem:[#allocation139_spill] sm:$0xff]  ;;  %v9677_v31 = vld [vmem:[#allocation80_spill] sm:$0xff] }
 0x682   :  { %2727 = vmatpush.msra.mxu2 %v9643_v28  ;;  %2776 = vmatpush.msrb.mxu3 %v9644_v41  ;;  %v3894_v28 = vld [vmem:[#allocation7 + $0x188] sm:$0xff] }
 0x683   :  { %2796 = vmatpush.msra.mxu0 %v9645_v6  ;;  %2816 = vmatpush.msrb.mxu1 %v9646_v12  ;;  %v9678_v41 = vld [vmem:[#allocation82_spill] sm:$0xff]  ;;  %v9679_v6 = vld [vmem:[#allocation143_spill] sm:$0xff]  ;;  %v9680_v12 = vld [vmem:[#allocation84_spill] sm:$0xff] }
 0x684   :  { %2728 = vmatpush.msra.mxu2 %v9647_v22  ;;  %2777 = vmatpush.msrb.mxu3 %v9648_v29  ;;  %v3895_v22 = vld [vmem:[#allocation7 + $0x168] sm:$0xff] }
 0x685   :  { %2797 = vmatpush.msra.mxu0 %v9649_v42  ;;  %2817 = vmatpush.msrb.mxu1 %v9650_v4  ;;  %v9681_v29 = vld [vmem:[#allocation86_spill] sm:$0xff]  ;;  %v9682_v42 = vld [vmem:[#allocation147_spill] sm:$0xff]  ;;  %v9683_v4 = vld [vmem:[#allocation88_spill] sm:$0xff] }
 0x686   :  { %2729 = vmatpush.msra.mxu2 %v9651_v11  ;;  %2778 = vmatpush.msrb.mxu3 %v9652_v37  ;;  %v3896_v11 = vld [vmem:[#allocation7 + $0x148] sm:$0xff] }
 0x687   :  { %2798 = vmatpush.msra.mxu0 %v9653_v43  ;;  %2818 = vmatpush.msrb.mxu1 %v9654_v57  ;;  %v9684_v37 = vld [vmem:[#allocation90_spill] sm:$0xff]  ;;  %v9686_v57 = vld [vmem:[#allocation152_spill] sm:$0xff] }
 0x688   :  { %2730 = vmatpush.msra.mxu2 %v9655_v24  ;;  %2779 = vmatpush.msrb.mxu3 %v9656_v20  ;;  %v9685_v43 = vld [vmem:[#allocation102_spill] sm:$0xff] }
 0x689   :  { %2799 = vmatpush.msra.mxu0 %v9657_v16  ;;  %2819 = vmatpush.msrb.mxu1 %v9658_v52  ;;  %v3897_v24 = vld [vmem:[#allocation7 + $0x128] sm:$0xff]  ;;  %v9688_v16 = vld [vmem:[#allocation105_spill] sm:$0xff] }
 0x68a   :  { %2731 = vmatpush.msra.mxu2 %v9659_v26  ;;  %2780 = vmatpush.msrb.mxu3 %v9660_v63  ;;  %v9687_v20 = vld [vmem:[#allocation94_spill] sm:$0xff]  ;;  %v9689_v52 = vld [vmem:[#allocation157_spill] sm:$0xff] }
 0x68b   :  { %2732 = vmatmul.f32.vlgmr.msra.gmra.mxu2 %v7526_v9  ;;  %2800 = vmatpush.msra.mxu0 %v9661_v15  ;;  %v9670_v9 = vld [vmem:[#allocation130_spill] sm:$0xff]  ;;  %v9691_v15 = vld [vmem:[#allocation108_spill] sm:$0xff] }
 0x68c   :  { %2825 = vmatpush.msrb.mxu2 %v9662_v56  ;;  %2845 = vmatpush.msra.mxu3 %v9663_v1  ;;  %v3898_v26 = vld [vmem:[#allocation7 + $0x108] sm:$0xff]  ;;  %v9692_v56 = vld [vmem:[#allocation163_spill] sm:$0xff] }
 0x68d   :  { %2867 = vmatpush.msrb.mxu0 %v9664_v60  ;;  %2820 = vmatpush.msrb.mxu1 %v9665_v18  ;;  %v9690_v63 = vld [vmem:[#allocation98_spill] sm:$0xff]  ;;  %v9693_v60 = vld [vmem:[#allocation92_spill] sm:$0xff] }
 0x68e   :  { %2826 = vmatpush.msrb.mxu2 %v9666_v17  ;;  %2846 = vmatpush.msra.mxu3 %v9667_v48  ;;  %v3899_v1 = vld [vmem:[#allocation7 + $0xe8] sm:$0xff]  ;;  %v9694_v18 = vld [vmem:[#allocation112_spill] sm:$0xff] }
 0x68f   :  { %2868 = vmatpush.msrb.mxu0 %v9668_v38  ;;  %2887 = vmatpush.msra.mxu1 %v3891_v36  ;;  %v9695_v17 = vld [vmem:[#allocation168_spill] sm:$0xff]  ;;  %v3900_v48 = vld [vmem:[#allocation7 + $0xc8] sm:$0xff] }
 0x690   :  { %2827 = vmatpush.msrb.mxu2 %v9669_v62  ;;  %2847 = vmatpush.msra.mxu3 %v9670_v9  ;;  %v9696_v38 = vld [vmem:[#allocation96_spill] sm:$0xff]  ;;  %v3901_v9 = vld [vmem:[#allocation7 + $0xa8] sm:$0xff] }
 0x691   :  { %2869 = vmatpush.msrb.mxu0 %v9671_v46  ;;  %2888 = vmatpush.msra.mxu1 %v3892_v19  ;;  %v9697_v36 = vld [vmem:[#allocation120_spill] sm:$0xff]  ;;  %v9700_v19 = vld [vmem:[#allocation133_spill] sm:$0xff] }
 0x692   :  { %2828 = vmatpush.msrb.mxu2 %v9672_v32  ;;  %2848 = vmatpush.msra.mxu3 %v9673_v40  ;;  %v9698_v62 = vld [vmem:[#allocation124_spill] sm:$0xff]  ;;  %v9701_v32 = vld [vmem:[#allocation142_spill] sm:$0xff] }
 0x693   :  { %2870 = vmatpush.msrb.mxu0 %v9674_v44  ;;  %2889 = vmatpush.msra.mxu1 %v3893_v58  ;;  %v9699_v46 = vld [vmem:[#allocation100_spill] sm:$0xff]  ;;  %v3902_v40 = vld [vmem:[#allocation7 + $0x88] sm:$0xff] }
 0x694   :  { %2829 = vmatpush.msrb.mxu2 %v9675_v47  ;;  %2849 = vmatpush.msra.mxu3 %v9676_v8  ;;  %v9702_v44 = vld [vmem:[#allocation116_spill] sm:$0xff]  ;;  %v9703_v58 = vld [vmem:[#allocation146_spill] sm:$0xff] }
 0x695   :  { %2871 = vmatpush.msrb.mxu0 %v9677_v31  ;;  %2890 = vmatpush.msra.mxu1 %v3894_v28  ;;  %v9704_v47 = vld [vmem:[#allocation156_spill] sm:$0xff]  ;;  %v3903_v8 = vld [vmem:[#allocation7 + $0x68] sm:$0xff]  ;;  %v9705_v31 = vld [vmem:[#allocation129_spill] sm:$0xff] }
 0x696   :  { %2830 = vmatpush.msrb.mxu2 %v9678_v41  ;;  %2850 = vmatpush.msra.mxu3 %v9679_v6  ;;  %v9706_v28 = vld [vmem:[#allocation138_spill] sm:$0xff] }
 0x697   :  { %2872 = vmatpush.msrb.mxu0 %v9680_v12  ;;  %2891 = vmatpush.msra.mxu1 %v3895_v22  ;;  %v9707_v41 = vld [vmem:[#allocation162_spill] sm:$0xff]  ;;  %v9709_v22 = vld [vmem:[#allocation167_spill] sm:$0xff] }
 0x698   :  { %2831 = vmatpush.msrb.mxu2 %v9681_v29  ;;  %2851 = vmatpush.msra.mxu3 %v9682_v42  ;;  %v3904_v6 = vld [vmem:[#allocation7 + $0x48] sm:$0xff]  ;;  %v9710_v29 = vld [vmem:[#allocation151_spill] sm:$0xff] }
 0x699   :  { %2873 = vmatpush.msrb.mxu0 %v9683_v4  ;;  %2892 = vmatpush.msra.mxu1 %v3896_v11  ;;  %v9708_v12 = vld [vmem:[#allocation154_spill] sm:$0xff]  ;;  %v9712_v11 = vld [vmem:[#allocation165_spill] sm:$0xff] }
 0x69a   :  { %2832 = vmatpush.msrb.mxu2 %v9684_v37  ;;  %2852 = vmatpush.msra.mxu3 %v9685_v43  ;;  %v9711_v42 = vld [vmem:[#allocation158_spill] sm:$0xff] }
 0x69b   :  { %2874 = vmatpush.msrb.mxu0 %v9686_v57  ;;  %2893 = vmatpush.msra.mxu1 %v3897_v24  ;;  %v3905_v4 = vld [vmem:[#allocation7 + $0x28] sm:$0xff] }
 0x69c   :  { %2833 = vmatpush.msrb.mxu2 %v9687_v20  ;;  %2853 = vmatpush.msra.mxu3 %v9688_v16  ;;  %v3906_v37 = vld [vmem:[#allocation7 + $0x8] sm:$0xff] }
 0x69d   :  { %2875 = vmatpush.msrb.mxu0 %v9689_v52  ;;  %2894 = vmatpush.msra.mxu1 %v3898_v26  ;;  %v9713_v43 = vld [vmem:[#allocation110_spill] sm:$0xff]  ;;  %v9718_v52 = vld [vmem:[#allocation131_spill] sm:$0xff] }
 0x69e   :  { %2834 = vmatpush.msrb.mxu2 %v9690_v63  ;;  %2854 = vmatpush.msra.mxu3 %v9691_v15  ;;  %v9714_v57 = vld [vmem:[#allocation114_spill] sm:$0xff]  ;;  %v9719_v26 = vld [vmem:[#allocation135_spill] sm:$0xff]  ;;  %v9720_v63 = vld [vmem:[#allocation140_spill] sm:$0xff] }
 0x69f   :  { %2876 = vmatpush.msrb.mxu0 %v9692_v56  ;;  %2895 = vmatpush.msra.mxu1 %v3899_v1  ;;  %v9715_v24 = vld [vmem:[#allocation118_spill] sm:$0xff]  ;;  %v9721_v15 = vld [vmem:[#allocation144_spill] sm:$0xff]  ;;  %v9723_v1 = vld [vmem:[#allocation153_spill] sm:$0xff] }
 0x6a0   :  { %2835 = vmatpush.msrb.mxu2 %v9693_v60  ;;  %2855 = vmatpush.msra.mxu3 %v9694_v18  ;;  %v9716_v20 = vld [vmem:[#allocation122_spill] sm:$0xff]  ;;  %v9722_v56 = vld [vmem:[#allocation148_spill] sm:$0xff]  ;;  %v9725_v18 = vld [vmem:[#allocation13_spill] sm:$0xff] }
 0x6a1   :  { %2877 = vmatpush.msrb.mxu0 %v9695_v17  ;;  %2896 = vmatpush.msra.mxu1 %v3900_v48  ;;  %v9717_v16 = vld [vmem:[#allocation126_spill] sm:$0xff]  ;;  %v9724_v60 = vld [vmem:[#allocation164_spill] sm:$0xff]  ;;  %v9726_v48 = vld [vmem:[#allocation171_spill] sm:$0xff] }
 0x6a2   :  { %2836 = vmatpush.msrb.mxu2 %v9696_v38  ;;  %2856 = vmatpush.msra.mxu3 %v9697_v36  ;;  %v9727_v38 = vld [vmem:[#allocation15_spill] sm:$0xff] }
 0x6a3   :  { %2878 = vmatpush.msrb.mxu0 %v9698_v62  ;;  %2897 = vmatpush.msra.mxu1 %v3901_v9 }
 0x6a4   :  { %2837 = vmatpush.msrb.mxu2 %v9699_v46  ;;  %2857 = vmatpush.msra.mxu3 %v9700_v19  ;;  %v356_v19 = vpop.permute.xlu2 %355 }
 0x6a5   :  { %2879 = vmatpush.msrb.mxu0 %v9701_v32  ;;  %2898 = vmatpush.msra.mxu1 %v3902_v40 }
 0x6a6   :  { %2838 = vmatpush.msrb.mxu2 %v9702_v44  ;;  %2858 = vmatpush.msra.mxu3 %v9703_v58  ;;  %v9728_v44 = vld [vmem:[#allocation127_spill] sm:$0xff] }
 0x6a7   :  { %2880 = vmatpush.msrb.mxu0 %v9704_v47  ;;  %2899 = vmatpush.msra.mxu1 %v3903_v8  ;;  %v395_v58 = vmul.f32 %v9728_v44, %v356_v19  ;;  %v9729_v47 = vld [vmem:[#allocation149_spill] sm:$0xff] }
 0x6a8   :  { %2839 = vmatpush.msrb.mxu2 %v9705_v31  ;;  %2859 = vmatpush.msra.mxu3 %v9706_v28  ;;  %v396_v8 = vmul.f32 %v9729_v47, %v356_v19  ;;  %v9730_v28 = vld [vmem:[#allocation136_spill] sm:$0xff] }
 0x6a9   :  { %2881 = vmatpush.msrb.mxu0 %v9707_v41  ;;  %2900 = vmatpush.msra.mxu1 %v3904_v6  ;;  %v437_v41 = vadd.f32 %v9730_v28, %v395_v58 }
 0x6aa   :  { %2840 = vmatpush.msrb.mxu2 %v9708_v12  ;;  %2860 = vmatpush.msra.mxu3 %v9709_v22  ;;  %v438_v12 = vadd.f32 %v9577_v0, %v396_v8 }
 0x6ab   :  { %2882 = vmatpush.msrb.mxu0 %v9711_v42  ;;  %2901 = vmatpush.msra.mxu1 %v3905_v4 }
 0x6ac   :  { %2907 = vmatpush.msra.mxu2 %v9710_v29 }
 0x6ad   :  { %2902 = vmatpush.msra.mxu1 %v3906_v37 }
 0x6ae   :  { %2908 = vmatpush.msra.mxu2 %v9712_v11 }
 0x6b0   :  { %2909 = vmatpush.msra.mxu2 %v9713_v43  ;;  %v397_v43 = vmul.f32 %v8791_v55, %v356_v19  ;;  %v398_v55 = vmul.f32 %v8792_v54, %v356_v19 }
 0x6b2   :  { %2910 = vmatpush.msra.mxu2 %v9714_v57 }
 0x6b4   :  { %2911 = vmatpush.msra.mxu2 %v9715_v24 }
 0x6b6   :  { %2912 = vmatpush.msra.mxu2 %v9716_v20 }
 0x6b8   :  { %2913 = vmatpush.msra.mxu2 %v9717_v16 }
 0x6ba   :  { %2914 = vmatpush.msra.mxu2 %v9718_v52 }
 0x6bc   :  { %2915 = vmatpush.msra.mxu2 %v9719_v26  ;;  %v439_v26 = vadd.f32 %v8794_v14, %v397_v43 }
 0x6be   :  { %2916 = vmatpush.msra.mxu2 %v9720_v63 }
 0x6c0   :  { %2917 = vmatpush.msra.mxu2 %v9721_v15 }
 0x6c2   :  { %2918 = vmatpush.msra.mxu2 %v9722_v56 }
 0x6c4   :  { %2919 = vmatpush.msra.mxu2 %v9723_v1  ;;  %v2507_v9 = vpop.f32.mrf.mxu0  ;;  %v2527_v40 = vpop.f32.mrf.mxu1 }
 0x6c5   :  { %v2508_v24 = vadd.f32 %v2507_v9, %v5031_v45 }
 0x6c6   :  { %2920 = vmatpush.msra.mxu2 %v9724_v60 }
 0x6c8   :  { %2921 = vmatpush.msra.mxu2 %v9725_v18 }
 0x6c9   :  { %v2467_v17 = vpop.f32.mrf.mxu2  ;;  %v2487_v62 = vpop.f32.mrf.mxu3 }
 0x6ca   :  { %2922 = vmatpush.msra.mxu2 %v9726_v48  ;;  %v2468_v36 = vadd.f32 %v2467_v17, %v9727_v38  ;;  %v2488_v37 = vadd.f32 %v2487_v62, %v5033_v49  ;;  %v2528_v48 = vadd.f32 %v2527_v40, %v5043_v27 }
 0x6cc   :  { %3099 = vst [vmem:[%s7861_s10 + $0x30] sm:$0xff] %v2468_v36 }
 0x6ce   :  { %v2589_v32 = vpop.f32.mrf.mxu0  ;;  %v2609_v42 = vpop.f32.mrf.mxu1 }
 0x6cf   :  { %v2633_v16 = vadd.f32 %v2589_v32, %v2508_v24  ;;  %v2634_v14 = vadd.f32 %v2609_v42, %v2528_v48  ;;  %v440_v32 = vadd.f32 %v4729_v61, %v398_v55  ;;  %v2990_v55 = vld [vmem:[#allocation8 + $0x58] sm:$0xff]  ;;  %v2988_v48 = vld [vmem:[#allocation8 + $0x48] sm:$0xff] }
 0x6d1   :  { %v2640_v56 = vmul.f32 0.5, %v2633_v16 }
 0x6d3   :  { %v2569_v46 = vpop.f32.mrf.mxu3  ;;  %v2547_v57 = vpop.f32.mrf.mxu2 }
 0x6d4   :  { %v2632_v20 = vadd.f32 %v2569_v46, %v2488_v37  ;;  %v2548_v62 = vadd.f32 %v2547_v57, %v5045_v33  ;;  %v2762_v57 = vpop.permute.xlu0 %2761 }
 0x6d5   :  { %vm2763_vm15 = vcmp.eq.s32.totalorder %v2762_v57, 1 }
 0x6d6   :  { %v2636_v0 = vmul.f32 0.5, %v2632_v20 }
 0x6e8   :  { %v2693_v6 = vpop.f32.mrf.mxu0  ;;  %v2713_v52 = vpop.f32.mrf.mxu1 }
 0x6e9   :  { %v2737_v29 = vadd.f32 %v2693_v6, %v438_v12  ;;  %v2738_v15 = vadd.f32 %v2713_v52, %v439_v26  ;;  %v2994_v26 = vld [vmem:[#allocation8 + $0x78] sm:$0xff] }
 0x6eb   :  { %v2744_v11 = vmul.f32 0.5, %v2737_v29 }
 0x6ed   :  { %v2673_v31 = vpop.f32.mrf.mxu3  ;;  %v2629_v60 = vpop.f32.mrf.mxu2 }
 0x6ee   :  { %v2736_v22 = vadd.f32 %v2673_v31, %v437_v41  ;;  %v2635_v58 = vadd.f32 %v2629_v60, %v2548_v62  ;;  %v2984_v62 = vld [vmem:[#allocation8 + $0x28] sm:$0xff] }
 0x6f0   :  { %v2740_v4 = vmul.f32 0.5, %v2736_v22  ;;  %v2645_v6 = vmul.f32 0.5, %v2635_v58 }
 0x6f2   :  { %3252 = vtanh.f32 %v2740_v4 }
 0x6f3   :  { %3254 = vtanh.f32 %v2744_v11 }
 0x6f4   :  { %3256 = vtanh.f32 %v2636_v0  ;;  %v3907_v0 = vld [vmem:[#allocation7 + $0x1f8] sm:$0xff] }
 0x6f5   :  { %3258 = vtanh.f32 %v2738_v15  ;;  %v2992_v15 = vld [vmem:[#allocation8 + $0x68] sm:$0xff] }
 0x6f6   :  { %3260 = vtanh.f32 %v2640_v56  ;;  %v3908_v56 = vld [vmem:[#allocation7 + $0x1d8] sm:$0xff] }
 0x6f7   :  { %3262 = vtanh.f32 %v2634_v14 }
 0x6f8   :  { %v3253_v63 = vpop.eup %3252 }
 0x6f9   :  { %v3255_v1 = vpop.eup %3254  ;;  %v2742_v18 = vmul.f32 0.5, %v3253_v63 }
 0x6fa   :  { %v2746_v17 = vmul.f32 0.5, %v3255_v1  ;;  %v3257_v9 = vpop.eup %3256  ;;  %v2991_v1 = vld [vmem:[#allocation8 + $0x60] sm:$0xff] }
 0x6fb   :  { %v2743_v36 = vadd.f32 0.5, %v2742_v18  ;;  %v3259_v44 = vpop.eup %3258  ;;  %v2638_v41 = vmul.f32 0.5, %v3257_v9  ;;  %v9735_v9 = vld [vmem:[#allocation18_spill] sm:$0xff] }
 0x6fc   :  { %v2747_v46 = vadd.f32 0.5, %v2746_v17  ;;  %v3261_v8 = vpop.eup %3260  ;;  %v2989_v17 = vld [vmem:[#allocation8 + $0x50] sm:$0xff] }
 0x6fd   :  { %v2754_v31 = vmul.f32 %v3259_v44, %v2743_v36  ;;  %v2642_v40 = vmul.f32 0.5, %v3261_v8  ;;  %v2639_v22 = vadd.f32 0.5, %v2638_v41  ;;  %v3263_v42 = vpop.eup %3262  ;;  %v2985_v36 = vld [vmem:[#allocation8 + $0x30] sm:$0xff] }
 0x6fe   :  { %v2753_v54 = vmul.f32 %v2747_v46, %v7520_v39 }
 0x6ff   :  { %v2643_v29 = vadd.f32 0.5, %v2642_v40  ;;  %v2650_v61 = vmul.f32 %v3263_v42, %v2639_v22 }
 0x700   :  { %v2755_v12 = vadd.f32 %v2754_v31, %v2753_v54 }
 0x701   :  { %v2649_v11 = vmul.f32 %v2643_v29, %v7524_v10  ;;  %v2993_v10 = vld [vmem:[#allocation8 + $0x70] sm:$0xff] }
 0x703   :  { %v7787_v24 = vadd.f32 %v2650_v61, %v2649_v11 }
 0x70e   :  { %v2733_v47 = vpop.f32.mrf.mxu2 }
 0x70f   :  { %v2739_v28 = vadd.f32 %v2733_v47, %v440_v32 }
 0x711   :  { %v2749_v19 = vmul.f32 0.5, %v2739_v28 }
 0x713   :  { %3264 = vtanh.f32 %v2749_v19 }
 0x714   :  { %3266 = vtanh.f32 %v2645_v6 }
 0x715   :  { %3268 = vtanh.f32 %v2755_v12 }
 0x716   :  { %3270 = vtanh.f32 %v7787_v24 }
 0x719   :  { %v3265_v4 = vpop.eup %3264 }
 0x71a   :  { %v2751_v37 = vmul.f32 0.5, %v3265_v4  ;;  %v3267_v43 = vpop.eup %3266 }
 0x71b   :  { %v3269_v20 = vpop.eup %3268  ;;  %v2647_v52 = vmul.f32 0.5, %v3267_v43 }
 0x71c   :  { %v2752_v39 = vadd.f32 0.5, %v2751_v37  ;;  %v3271_v60 = vpop.eup %3270 }
 0x71d   :  { %v2648_v63 = vadd.f32 0.5, %v2647_v52 }
 0x71e   :  { %v2757_v16 = vmul.f32 %v3269_v20, %v2752_v39 }
 0x71f   :  { %v2653_v18 = vmul.f32 %v3271_v60, %v2648_v63 }
 0x720   :  { %3100 = vmatmul.msk.f32.vlgmr.msrb.gmra.mxu3 %vm2763_vm15, %v2757_v16  ;;  %3101 = vmatmul.msk.f32.vlgmr.msra.gmra.mxu0 %vm2763_vm15, %v2757_v16 }
 0x721   :  { %3102 = vmatmul.msk.f32.vlgmr.msrb.gmra.mxu1 %vm2763_vm15, %v2757_v16  ;;  %3103 = vmatmul.msk.f32.vlgmr.msrb.gmra.mxu2 %vm2763_vm15, %v2757_v16 }
 0x722   :  { %2927 = vmatpush.msrb.mxu3 %v3907_v0  ;;  %2999 = vmatpush.msra.mxu0 %v2994_v26 }
 0x724   :  { %2928 = vmatpush.msrb.mxu3 %v3908_v56  ;;  %3000 = vmatpush.msra.mxu0 %v2993_v10 }
 0x726   :  { %2929 = vmatpush.msrb.mxu3 %v7545_v25  ;;  %3001 = vmatpush.msra.mxu0 %v2992_v15  ;;  %v2987_v25 = vld [vmem:[#allocation8 + $0x40] sm:$0xff] }
 0x728   :  { %2930 = vmatpush.msrb.mxu3 %v7553_v50  ;;  %3002 = vmatpush.msra.mxu0 %v2991_v1  ;;  %v2986_v50 = vld [vmem:[#allocation8 + $0x38] sm:$0xff] }
 0x729   :  { %3104 = vmatmul.msk.f32.vlgmr.msra.gmra.mxu3 %vm2763_vm15, %v2757_v16  ;;  %2883 = vmatmul.f32.vlgmr.msrb.gmra.mxu0 %v2653_v18 }
 0x72a   :  { %2903 = vmatmul.f32.vlgmr.msra.gmra.mxu1 %v2653_v18  ;;  %2923 = vmatmul.f32.vlgmr.msra.gmra.mxu2 %v2653_v18 }
 0x72b   :  { %2931 = vmatpush.msrb.mxu3 %v7564_v5  ;;  %3003 = vmatpush.msra.mxu0 %v2990_v55  ;;  %v2983_v5 = vld [vmem:[#allocation8 + $0x20] sm:$0xff] }
 0x72d   :  { %2932 = vmatpush.msrb.mxu3 %v7570_v3  ;;  %3004 = vmatpush.msra.mxu0 %v2989_v17  ;;  %v2982_v3 = vld [vmem:[#allocation8 + $0x18] sm:$0xff] }
 0x72f   :  { %2933 = vmatpush.msrb.mxu3 %v7576_v53  ;;  %3005 = vmatpush.msra.mxu0 %v2988_v48  ;;  %v2981_v53 = vld [vmem:[#allocation8 + $0x10] sm:$0xff] }
 0x731   :  { %2934 = vmatpush.msrb.mxu3 %v7582_v13  ;;  %3006 = vmatpush.msra.mxu0 %v2987_v25  ;;  %v2980_v13 = vld [vmem:[#allocation8 + $0x8] sm:$0xff] }
 0x733   :  { %2935 = vmatpush.msrb.mxu3 %v7588_v21  ;;  %3007 = vmatpush.msra.mxu0 %v2986_v50  ;;  %v2979_v21 = vld [vmem:[#allocation8] sm:$0xff] }
 0x735   :  { %2936 = vmatpush.msrb.mxu3 %v7594_v34  ;;  %3008 = vmatpush.msra.mxu0 %v2985_v36  ;;  %v9731_v34 = vld [vmem:[#allocation17_spill] sm:$0xff] }
 0x737   :  { %2937 = vmatpush.msrb.mxu3 %v7600_v59  ;;  %3009 = vmatpush.msra.mxu0 %v2984_v62  ;;  %v9732_v59 = vld [vmem:[#allocation159_spill] sm:$0xff] }
 0x739   :  { %2938 = vmatpush.msrb.mxu3 %v7606_v2  ;;  %3010 = vmatpush.msra.mxu0 %v2983_v5  ;;  %v9733_v2 = vld [vmem:[#allocation169_spill] sm:$0xff] }
 0x73b   :  { %2939 = vmatpush.msrb.mxu3 %v7612_v23  ;;  %3011 = vmatpush.msra.mxu0 %v2982_v3  ;;  %v9734_v23 = vld [vmem:[#allocation170_spill] sm:$0xff] }
 0x73d   :  { %2940 = vmatpush.msrb.mxu3 %v7618_v30  ;;  %3012 = vmatpush.msra.mxu0 %v2981_v53 }
 0x73f   :  { %2941 = vmatpush.msrb.mxu3 %v7624_v35  ;;  %3013 = vmatpush.msra.mxu0 %v2980_v13 }
 0x741   :  { %2942 = vmatpush.msrb.mxu3 %v7630_v51  ;;  %3014 = vmatpush.msra.mxu0 %v2979_v21 }
 0x742   :  { %2943 = vmatmul.f32.vlgmr.msrb.gmra.mxu3 %v2653_v18  ;;  %3015 = vmatmul.f32.vlgmr.msra.gmra.mxu0 %v9731_v34 }
 0x74a   :  { %3018 = vmatmul.f32.gmra.mxu0 %v9732_v59 }
 0x752   :  { %3021 = vmatmul.f32.gmra.mxu0 %v9733_v2 }
 0x75a   :  { %3024 = vmatmul.f32.gmra.mxu0 %v9734_v23 }
 0x762   :  { %3027 = vmatmul.f32.gmra.mxu0 %v9735_v9 }
 0x76a   :  { %3030 = vmatmul.f32.gmra.mxu0 %v7551_v7 }
 0x772   :  { %3033 = vmatmul.f32.gmra.mxu0 %v2653_v18 }
 0x79d   :  { %v2802_v30 = vpop.f32.mrf.mxu0 }
 0x79e   :  { %v2822_v35 = vpop.f32.mrf.mxu1  ;;  %v2803_v32 = vadd.f32 %v2802_v30, %v5033_v49  ;;  %v3121_v49 = vld [vmem:[%s7860_s9] ss:$0 sm:$0xff] }
 0x79f   :  { %v2823_v58 = vadd.f32 %v2822_v35, %v5031_v45 }
 0x7a3   :  { %v2782_v14 = vpop.f32.mrf.mxu3 }
 0x7a4   :  { %v2783_v51 = vadd.f32 %v2782_v14, %v9727_v38  ;;  %v2842_v47 = vpop.f32.mrf.mxu2 }
 0x7a5   :  { %v2843_v38 = vadd.f32 %v2842_v47, %v5043_v27 }
 0x7a6   :  { %3105 = vst [vmem:[%s7861_s10 + $0x38] sm:$0xff] %v2783_v51  ;;  %v2884_v46 = vpop.f32.mrf.mxu0 }
 0x7a7   :  { %v2904_v44 = vpop.f32.mrf.mxu1  ;;  %v2947_v8 = vadd.f32 %v2884_v46, %v2803_v32 }
 0x7a8   :  { %v2948_v31 = vadd.f32 %v2904_v44, %v2823_v58 }
 0x7a9   :  { %v2951_v7 = vmul.f32 0.5, %v2947_v8 }
 0x7aa   :  { %v2955_v28 = vmul.f32 0.5, %v2948_v31 }
 0x7ab   :  { %3272 = vtanh.f32 %v2951_v7 }
 0x7ac   :  { %3274 = vtanh.f32 %v2955_v28  ;;  %v2862_v6 = vpop.f32.mrf.mxu3 }
 0x7ad   :  { %v2924_v41 = vpop.f32.mrf.mxu2  ;;  %v2863_v4 = vadd.f32 %v2862_v6, %v5045_v33 }
 0x7ae   :  { %v2949_v54 = vadd.f32 %v2924_v41, %v2843_v38 }
 0x7b0   :  { %3276 = vtanh.f32 %v2949_v54 }
 0x7b1   :  { %v3273_v19 = vpop.eup %3272 }
 0x7b2   :  { %v3275_v40 = vpop.eup %3274  ;;  %v2953_v45 = vmul.f32 0.5, %v3273_v19 }
 0x7b3   :  { %v2957_v12 = vmul.f32 0.5, %v3275_v40 }
 0x7b4   :  { %v2954_v42 = vadd.f32 0.5, %v2953_v45 }
 0x7b5   :  { %v2958_v61 = vadd.f32 0.5, %v2957_v12 }
 0x7b6   :  { %v3277_v27 = vpop.eup %3276 }
 0x7b7   :  { %v2964_v37 = vmul.f32 %v2958_v61, %v7787_v24  ;;  %v2965_v43 = vmul.f32 %v3277_v27, %v2954_v42 }
 0x7b9   :  { %v2966_v52 = vadd.f32 %v2965_v43, %v2964_v37 }
 0x7bf   :  { %v3016_v22 = vpop.f32.mrf.mxu0 }
 0x7c0   :  { %v3017_v29 = vadd.f32 %v3121_v49, %v3016_v22 }
 0x7c2   :  { %3040 = vst [vmem:[%s7862_s11] sm:$0xff] %v3017_v29 }
 0x7c5   :  { %v2944_v11 = vpop.f32.mrf.mxu3 }
 0x7c6   :  { %v2950_v57 = vadd.f32 %v2944_v11, %v2863_v4 }
 0x7c7   :  { %v3019_v39 = vpop.f32.mrf.mxu0 }
 0x7c8   :  { %v2960_v20 = vmul.f32 0.5, %v2950_v57  ;;  %v3020_v16 = vadd.f32 %v3121_v49, %v3019_v39 }
 0x7ca   :  { %3278 = vtanh.f32 %v2960_v20  ;;  %3041 = vst [vmem:[%s7862_s11 + $0x8] sm:$0xff] %v3020_v16 }
 0x7cb   :  { %3280 = vtanh.f32 %v2966_v52 }
 0x7cf   :  { %v3022_v26 = vpop.f32.mrf.mxu0 }
 0x7d0   :  { %v3279_v10 = vpop.eup %3278  ;;  %v3023_v0 = vadd.f32 %v3121_v49, %v3022_v26 }
 0x7d1   :  { %v2962_v63 = vmul.f32 0.5, %v3279_v10  ;;  %v3281_v24 = vpop.eup %3280 }
 0x7d2   :  { %3042 = vst [vmem:[%s7862_s11 + $0x10] sm:$0xff] %v3023_v0 }
 0x7d3   :  { %v2963_v33 = vadd.f32 0.5, %v2962_v63 }
 0x7d5   :  { %v2968_v15 = vmul.f32 %v3281_v24, %v2963_v33 }
 0x7d7   :  { %v3025_v56 = vpop.f32.mrf.mxu0  ;;  %3036 = vmatmul.f32.gmra.mxu0 %v2968_v15 }
 0x7d8   :  { %v3026_v1 = vadd.f32 %v3121_v49, %v3025_v56 }
 0x7da   :  { %3043 = vst [vmem:[%s7862_s11 + $0x18] sm:$0xff] %v3026_v1 }
 0x7df   :  { %v3028_v60 = vpop.f32.mrf.mxu0 }
 0x7e0   :  { %v3029_v18 = vadd.f32 %v3121_v49, %v3028_v60 }
 0x7e2   :  { %3044 = vst [vmem:[%s7862_s11 + $0x20] sm:$0xff] %v3029_v18 }
 0x7e7   :  { %v3031_v55 = vpop.f32.mrf.mxu0 }
 0x7e8   :  { %v3032_v17 = vadd.f32 %v3121_v49, %v3031_v55 }
 0x7ea   :  { %3045 = vst [vmem:[%s7862_s11 + $0x28] sm:$0xff] %v3032_v17 }
 0x7ef   :  { %v3034_v48 = vpop.f32.mrf.mxu0 }
 0x7f0   :  { %v3035_v25 = vadd.f32 %v3121_v49, %v3034_v48 }
 0x7f2   :  { %3046 = vst [vmem:[%s7862_s11 + $0x30] sm:$0xff] %v3035_v25 }
 0x854   :  { %v3037_v50 = vpop.f32.mrf.mxu0 }
 0x855   :  { %v3038_v36 = vadd.f32 %v3121_v49, %v3037_v50 }
 0x857   :  { %3047 = vst [vmem:[%s7862_s11 + $0x38] sm:$0xff] %v3038_v36 }
 0x858   :  { %3056 = vsyncpa [#allocation4], 1 }
 0x859   :  { %3057 = vsyncpa [#allocation6], 1 }
 0x85a   :  { %3058 = vsyncpa [#allocation9], 1 }

</bundles_post_ra>
